<compile_context>
chip_gen: v6e
topology: v6e:2x2x1
jax: 0.10.0
libtpu: 0.0.40
codegen_flags: <defaults>
</compile_context>

<pallas_src>
import functools
import math

import jax
import jax.numpy as jnp
from jax.experimental import pallas as pl
from jax.experimental.pallas import tpu as pltpu

SQRT2 = math.sqrt(2.0)


def _round_up(x, m):
    return (x + m - 1) // m * m


# ---------------------------------------------------------------------------
# Pallas matmul kernel: y = [(act(x @ w + b)) (+ residual)] * out_scale
# ---------------------------------------------------------------------------

def _make_mm_kernel(act, out_scale, has_res):
    def kernel(*refs):
        if has_res:
            x_ref, w_ref, b_ref, r_ref, o_ref, acc_ref = refs
        else:
            x_ref, w_ref, b_ref, o_ref, acc_ref = refs
            r_ref = None

        @pl.when(pl.program_id(2) == 0)
        def _():
            acc_ref[...] = jnp.zeros_like(acc_ref)

        acc_ref[...] += jnp.dot(x_ref[...], w_ref[...],
                                preferred_element_type=jnp.float32)

        @pl.when(pl.program_id(2) == pl.num_programs(2) - 1)
        def _():
            y = acc_ref[...] + b_ref[...]
            if act:
                y = jnp.where(y >= 0.0, y, 0.2 * y) * SQRT2
            if r_ref is not None:
                y = y + r_ref[...]
            o_ref[...] = (y * out_scale).astype(o_ref.dtype)

    return kernel


def matmul_bias_act(x, w, b, *, act=False, out_scale=1.0, residual=None):
    """Tiled bf16 matmul with f32 accumulation and a fused epilogue."""
    M, K = x.shape
    _, N = w.shape
    # Adaptive tiles: MXU-filling tiles for big layers, clamped tiles for tiny
    # ones (e.g. the (B, 1) final linear) so we never over-pad.
    tm = min(256, _round_up(M, 16))     # bf16 sublane granularity
    tn = min(256, _round_up(N, 128))    # lane granularity
    tk = min(512, _round_up(K, 128))
    Mp, Kp, Np = _round_up(M, tm), _round_up(K, tk), _round_up(N, tn)

    # bf16 operands (native MXU dtype); bias / epilogue stay f32.
    xp = jnp.pad(x.astype(jnp.bfloat16), ((0, Mp - M), (0, Kp - K)))
    wp = jnp.pad(w.astype(jnp.bfloat16), ((0, Kp - K), (0, Np - N)))
    bp = jnp.pad(b.astype(jnp.float32).reshape(1, -1), ((0, 0), (0, Np - N)))

    inputs = [xp, wp, bp]
    in_specs = [
        pl.BlockSpec((tm, tk), lambda i, j, k: (i, k)),
        pl.BlockSpec((tk, tn), lambda i, j, k: (k, j)),
        pl.BlockSpec((1, tn), lambda i, j, k: (0, j)),
    ]
    has_res = residual is not None
    if has_res:
        rp = jnp.pad(residual.astype(jnp.float32), ((0, Mp - M), (0, Np - N)))
        inputs.append(rp)
        in_specs.append(pl.BlockSpec((tm, tn), lambda i, j, k: (i, j)))

    out = pl.pallas_call(
        _make_mm_kernel(act, out_scale, has_res),
        out_shape=jax.ShapeDtypeStruct((Mp, Np), jnp.float32),
        grid_spec=pltpu.PrefetchScalarGridSpec(
            num_scalar_prefetch=0,
            grid=(Mp // tm, Np // tn, Kp // tk),
            in_specs=in_specs,
            out_specs=pl.BlockSpec((tm, tn), lambda i, j, k: (i, j)),
            scratch_shapes=[pltpu.VMEM((tm, tn), jnp.float32)],
        ),
        compiler_params=pltpu.CompilerParams(
            dimension_semantics=("parallel", "parallel", "arbitrary"),
            vmem_limit_bytes=48 * 1024 * 1024),
    )(*inputs)
    return out[:M, :N]


# ---------------------------------------------------------------------------
# Separable depthwise blur (NHWC, channels on lanes), tiled over (B, C-blocks)
# ---------------------------------------------------------------------------

def _blur_kernel(x_ref, o_ref, *, taps, ho, wo):
    x = x_ref[...]                      # (1, Hp, Wp, cb)
    # vertical pass (along H — untiled dim, cheap offsets)
    v = taps[0] * x[:, 0:ho, :, :]
    for p in range(1, 4):
        v = v + taps[p] * x[:, p:p + ho, :, :]
    # horizontal pass (along W -> sublane shifts only; channels stay on lanes)
    out = taps[0] * v[:, :, 0:wo, :]
    for q in range(1, 4):
        out = out + taps[q] * v[:, :, q:q + wo, :]
    o_ref[...] = out


def blur(x, pad0, pad1):
    """upfirdn2d(x, outer([1,3,3,1])/64, up=1, down=1, pad=(pad0, pad1)); NHWC."""
    B, H, W, C = x.shape
    xp = jnp.pad(x, ((0, 0), (pad0, pad1), (pad0, pad1), (0, 0)))
    Hp, Wp = H + pad0 + pad1, W + pad0 + pad1
    Ho, Wo = Hp - 3, Wp - 3
    taps = (1.0 / 8.0, 3.0 / 8.0, 3.0 / 8.0, 1.0 / 8.0)   # separable 1/8*[1,3,3,1]
    cb = 128 if (C % 128 == 0) else C                      # lane-dense channel block

    out = pl.pallas_call(
        functools.partial(_blur_kernel, taps=taps, ho=Ho, wo=Wo),
        out_shape=jax.ShapeDtypeStruct((B, Ho, Wo, C), jnp.float32),
        grid=(B, C // cb),
        in_specs=[pl.BlockSpec((1, Hp, Wp, cb), lambda b, c: (b, 0, 0, c))],
        out_specs=pl.BlockSpec((1, Ho, Wo, cb), lambda b, c: (b, 0, 0, c)),
        compiler_params=pltpu.CompilerParams(
            dimension_semantics=("parallel", "parallel")),
    )(xp)
    return out


# ---------------------------------------------------------------------------
# Minibatch stddev (KB-scale -> plain JAX)
# ---------------------------------------------------------------------------

def minibatch_stddev(x, group_size=4):
    B, H, W, C = x.shape
    group = min(B, group_size)
    assert B % group == 0, "batch must be divisible by stddev group size"
    ngrp = B // group
    y = x.reshape(group, ngrp, H, W, C)
    var = jnp.var(y, axis=0)                               # biased variance
    std = jnp.sqrt(var + 1e-8)
    s = jnp.mean(std, axis=(1, 2, 3))                      # (ngrp,)
    smap = jnp.broadcast_to(s.reshape(1, ngrp, 1, 1, 1),
                            (group, ngrp, H, W, 1)).reshape(B, H, W, 1)
    return jnp.concatenate([x, smap], axis=-1)


# ---------------------------------------------------------------------------
# Layer wrappers (NHWC internal layout; plain-JAX glue around Pallas matmul)
# ---------------------------------------------------------------------------

def equal_conv2d(x, weight, bias, *, stride, padding, act,
                 flat_out=False, residual=None, out_scale=1.0):
    """EqualConv2d (+ optional FusedLeakyReLU / fused residual), NHWC im2col."""
    B, H, W, Cin = x.shape
    Cout, _, kh, kw = weight.shape
    scale = 1.0 / math.sqrt(Cin * kh * kw)

    if padding:
        x = jnp.pad(x, ((0, 0), (padding, padding), (padding, padding), (0, 0)))
    Hp, Wp = H + 2 * padding, W + 2 * padding
    Ho = (Hp - kh) // stride + 1
    Wo = (Wp - kw) // stride + 1

    if kh == 1 and kw == 1:
        patches = x[:, 0:stride * Ho:stride, 0:stride * Wo:stride, :]
    else:
        cols = [x[:, p:p + stride * Ho:stride, q:q + stride * Wo:stride, :]
                for p in range(kh) for q in range(kw)]
        patches = jnp.concatenate(cols, axis=-1)           # (B, Ho, Wo, kh*kw*Cin)
    patches = patches.reshape(B * Ho * Wo, kh * kw * Cin)

    # weight flattened in (kh, kw, cin) order to match the patch layout
    wmat = (weight.astype(jnp.float32) * scale).transpose(2, 3, 1, 0)
    wmat = wmat.reshape(kh * kw * Cin, Cout)

    y = matmul_bias_act(patches, wmat, bias, act=act,
                        residual=residual, out_scale=out_scale)
    if flat_out:
        return y, (Ho, Wo)
    return y.reshape(B, Ho, Wo, Cout)


def conv_layer(x, p, *, downsample, activate,
               flat_out=False, residual=None, out_scale=1.0):
    """ConvLayer: [Blur if downsample] -> EqualConv2d -> [FusedLeakyReLU]."""
    cout, _, k, _ = p["weight"].shape
    if downsample:
        pd = (4 - 2) + (k - 1)
        x = blur(x, (pd + 1) // 2, pd // 2)
        stride, padding = 2, 0
    else:
        stride, padding = 1, k // 2
    bias = p["bias"] if p["bias"] is not None else jnp.zeros((cout,), jnp.float32)
    return equal_conv2d(x, p["weight"], bias, stride=stride, padding=padding,
                        act=activate, flat_out=flat_out,
                        residual=residual, out_scale=out_scale)


def res_block(x, p):
    out = conv_layer(x, p["conv1"], downsample=False, activate=True)
    out2_flat, (Ho, Wo) = conv_layer(out, p["conv2"], downsample=True,
                                     activate=True, flat_out=True)
    # skip path with residual merge fused into the matmul epilogue:
    #   (skip + out2) / sqrt(2)
    skip_flat, _ = conv_layer(x, p["skip"], downsample=True, activate=False,
                              flat_out=True, residual=out2_flat,
                              out_scale=1.0 / SQRT2)
    B = x.shape[0]
    cout = skip_flat.shape[1]
    return skip_flat.reshape(B, Ho, Wo, cout)


def equal_linear(x, p, *, act):
    cin = p["weight"].shape[1]
    scale = 1.0 / math.sqrt(cin)        # lr_mul = 1
    w = (p["weight"].astype(jnp.float32) * scale).T
    return matmul_bias_act(x, w, p["bias"], act=act)


# ---------------------------------------------------------------------------
# Parameter init (deterministic; mirrors the module's __init__ shapes)
# ---------------------------------------------------------------------------

def init_conv_layer(key, cin, cout, k, bias=True):
    w = jax.random.normal(key, (cout, cin, k, k), jnp.float32)
    b = jnp.zeros((cout,), jnp.float32) if bias else None
    return {"weight": w, "bias": b}


def init_linear(key, cin, cout):
    return {"weight": jax.random.normal(key, (cout, cin), jnp.float32),
            "bias": jnp.zeros((cout,), jnp.float32)}


def init_discriminator(key, size, channels):
    log_size = int(math.log2(size))
    keys = iter(jax.random.split(key, 4 * log_size + 8))
    params = {"conv0": init_conv_layer(next(keys), 3, channels[size], 1)}
    resblocks = []
    in_ch = channels[size]
    for i in range(log_size, 2, -1):
        out_ch = channels[2 ** (i - 1)]
        resblocks.append({
            "conv1": init_conv_layer(next(keys), in_ch, in_ch, 3),
            "conv2": init_conv_layer(next(keys), in_ch, out_ch, 3),
            "skip": init_conv_layer(next(keys), in_ch, out_ch, 1, bias=False),
        })
        in_ch = out_ch
    params["resblocks"] = resblocks
    params["final_conv"] = init_conv_layer(next(keys), in_ch + 1, channels[4], 3)
    params["lin1"] = init_linear(next(keys), channels[4] * 4 * 4, channels[4])
    params["lin2"] = init_linear(next(keys), channels[4], 1)
    return params


def discriminator_forward(params, x_nchw):
    x = x_nchw.transpose(0, 2, 3, 1)                       # NCHW -> NHWC (internal)
    out = conv_layer(x, params["conv0"], downsample=False, activate=True)
    for rb in params["resblocks"]:
        out = res_block(out, rb)
    out = minibatch_stddev(out, group_size=4)              # stddev_group=4, feat=1
    out = conv_layer(out, params["final_conv"], downsample=False, activate=True)
    B, Hf, Wf, Cf = out.shape
    # flatten in PyTorch NCHW order so lin1 weight layout matches the reference
    out = out.transpose(0, 3, 1, 2).reshape(B, Cf * Hf * Wf)
    out = equal_linear(out, params["lin1"], act=True)      # fused_lrelu
    out = equal_linear(out, params["lin2"], act=False)
    return out


discriminator_forward_jit = jax.jit(discriminator_forward)


# ---------------------------------------------------------------------------

if __name__ == "__main__":
    key = jax.random.PRNGKey(0)
    kp, kx = jax.random.split(key)

    # Small, architecture-consistent config: size=16 -> two ResBlocks down to 4x4.
    # (Original channel table is 512-wide; shrunk here for a fast synthetic test.)
    size = 16
    channels = {4: 32, 8: 32, 16: 32}

    params = init_discriminator(kp, size, channels)
    x = jax.random.normal(kx, (4, 3, size, size), jnp.float32)   # NCHW, batch=4

    y = discriminator_forward_jit(params, x)
    y = jax.block_until_ready(y)

    assert y.shape == (4, 1), y.shape
    assert bool(jnp.all(jnp.isfinite(y)))
    print("KERNEL_OK")
</pallas_src>

<mosaic_0001>
module attributes {stable_mosaic.version = 11 : i64} {
  func.func @kernel(%arg0: i32, %arg1: i32, %arg2: i32, %arg3: memref<256x128xbf16, #tpu.memory_space<vmem>>, %arg4: memref<128x128xbf16, #tpu.memory_space<vmem>>, %arg5: memref<1x128xf32, #tpu.memory_space<vmem>>, %arg6: memref<256x128xf32, #tpu.memory_space<vmem>>, %arg7: memref<256x128xf32, #tpu.memory_space<vmem>>) attributes {dimension_semantics = [#tpu.dimension_semantics<parallel>, #tpu.dimension_semantics<parallel>, #tpu.dimension_semantics<arbitrary>], iteration_bounds = array<i64: 4, 1, 1>, scalar_prefetch = 0 : i64, scratch_operands = 1 : i64, tpu.core_type = #tpu.core_type<tc>, window_params = [{transform_indices = @transform_0, window_bounds = array<i64: 256, 128>}, {transform_indices = @transform_1, window_bounds = array<i64: 128, 128>}, {transform_indices = @transform_2, window_bounds = array<i64: 1, 128>}, {transform_indices = @transform_3, window_bounds = array<i64: 256, 128>}]} {
    %c0_i32 = arith.constant 0 : i32
    %0 = arith.cmpi eq, %arg2, %c0_i32 : i32
    %1 = arith.extui %0 : i1 to i32
    %c0_i32_0 = arith.constant 0 : i32
    %2 = arith.cmpi ne, %1, %c0_i32_0 : i32
    scf.if %2 {
      %cst_10 = arith.constant 0.000000e+00 : f32
      %12 = vector.broadcast %cst_10 : f32 to vector<256x128xf32>
      %c0_11 = arith.constant 0 : index
      %c0_12 = arith.constant 0 : index
      %13 = vector.load %arg7[%c0_11, %c0_12] : memref<256x128xf32, #tpu.memory_space<vmem>>, vector<256x128xf32>
      tpu.vector_store %arg7[%c0_11, %c0_12], %12 {strides = array<i32>} : memref<256x128xf32, #tpu.memory_space<vmem>>, vector<256x128xf32>,
    } else {
    }
    %c0 = arith.constant 0 : index
    %c0_1 = arith.constant 0 : index
    %3 = vector.load %arg7[%c0, %c0_1] : memref<256x128xf32, #tpu.memory_space<vmem>>, vector<256x128xf32>
    %c0_2 = arith.constant 0 : index
    %c0_3 = arith.constant 0 : index
    %4 = vector.load %arg3[%c0_2, %c0_3] : memref<256x128xbf16, #tpu.memory_space<vmem>>, vector<256x128xbf16>
    %c0_4 = arith.constant 0 : index
    %c0_5 = arith.constant 0 : index
    %5 = vector.load %arg4[%c0_4, %c0_5] : memref<128x128xbf16, #tpu.memory_space<vmem>>, vector<128x128xbf16>
    %cst = arith.constant dense<0.000000e+00> : vector<256x128xf32>
    %6 = tpu.matmul %4, %5, %cst {dimension_numbers = #tpu.dot_dimension_numbers<[1], [0], [0], [1], [0, 0, 1, 1], [], []>} : vector<256x128xbf16>, vector<128x128xbf16>, vector<256x128xf32> -> vector<256x128xf32>
    %7 = arith.addf %3, %6 : vector<256x128xf32>
    %c0_6 = arith.constant 0 : index
    %c0_7 = arith.constant 0 : index
    %8 = vector.load %arg7[%c0_6, %c0_7] : memref<256x128xf32, #tpu.memory_space<vmem>>, vector<256x128xf32>
    tpu.vector_store %arg7[%c0_6, %c0_7], %7 {strides = array<i32>} : memref<256x128xf32, #tpu.memory_space<vmem>>, vector<256x128xf32>,
    %c0_i32_8 = arith.constant 0 : i32
    %9 = arith.cmpi eq, %arg2, %c0_i32_8 : i32
    %10 = arith.extui %9 : i1 to i32
    %c0_i32_9 = arith.constant 0 : i32
    %11 = arith.cmpi ne, %10, %c0_i32_9 : i32
    scf.if %11 {
      %c0_10 = arith.constant 0 : index
      %c0_11 = arith.constant 0 : index
      %12 = vector.load %arg7[%c0_10, %c0_11] : memref<256x128xf32, #tpu.memory_space<vmem>>, vector<256x128xf32>
      %c0_12 = arith.constant 0 : index
      %c0_13 = arith.constant 0 : index
      %13 = vector.load %arg5[%c0_12, %c0_13] : memref<1x128xf32, #tpu.memory_space<vmem>>, vector<1x128xf32>
      %14 = vector.broadcast %13 : vector<1x128xf32> to vector<256x128xf32>
      %15 = arith.addf %12, %14 : vector<256x128xf32>
      %cst_14 = arith.constant 0.000000e+00 : f32
      %16 = vector.broadcast %cst_14 : f32 to vector<256x128xf32>
      %17 = arith.cmpf oge, %15, %16 : vector<256x128xf32>
      %cst_15 = arith.constant 2.000000e-01 : f32
      %18 = vector.broadcast %cst_15 : f32 to vector<256x128xf32>
      %19 = arith.mulf %18, %15 : vector<256x128xf32>
      %20 = arith.select %17, %15, %19 : vector<256x128xi1>, vector<256x128xf32>
      %cst_16 = arith.constant 1.41421354 : f32
      %21 = vector.broadcast %cst_16 : f32 to vector<256x128xf32>
      %22 = arith.mulf %20, %21 : vector<256x128xf32>
      %cst_17 = arith.constant 1.000000e+00 : f32
      %23 = vector.broadcast %cst_17 : f32 to vector<256x128xf32>
      %24 = arith.mulf %22, %23 : vector<256x128xf32>
      %c0_18 = arith.constant 0 : index
      %c0_19 = arith.constant 0 : index
      %25 = vector.load %arg6[%c0_18, %c0_19] : memref<256x128xf32, #tpu.memory_space<vmem>>, vector<256x128xf32>
      tpu.vector_store %arg6[%c0_18, %c0_19], %24 {strides = array<i32>} : memref<256x128xf32, #tpu.memory_space<vmem>>, vector<256x128xf32>,
    } else {
    }
    return
  }
  func.func @transform_0(%arg0: i32, %arg1: i32, %arg2: i32) -> (i32, i32) {
    %c0_i32 = arith.constant 0 : i32
    return %arg0, %arg2 : i32, i32
  }
  func.func @transform_1(%arg0: i32, %arg1: i32, %arg2: i32) -> (i32, i32) {
    %c0_i32 = arith.constant 0 : i32
    return %arg2, %arg1 : i32, i32
  }
  func.func @transform_2(%arg0: i32, %arg1: i32, %arg2: i32) -> (i32, i32) {
    %c0_i32 = arith.constant 0 : i32
    %c0_i32_0 = arith.constant 0 : i32
    return %c0_i32, %arg1 : i32, i32
  }
  func.func @transform_3(%arg0: i32, %arg1: i32, %arg2: i32) -> (i32, i32) {
    %c0_i32 = arith.constant 0 : i32
    return %arg0, %arg1 : i32, i32
  }
}

module attributes {stable_mosaic.version = 11 : i64} {
  func.func @_blur_kernel(%arg0: i32, %arg1: i32, %arg2: memref<1x18x18x32xf32, #tpu.memory_space<vmem>>, %arg3: memref<1x15x15x32xf32, #tpu.memory_space<vmem>>) attributes {dimension_semantics = [#tpu.dimension_semantics<parallel>, #tpu.dimension_semantics<parallel>], iteration_bounds = array<i64: 4, 1>, scalar_prefetch = 0 : i64, scratch_operands = 0 : i64, tpu.core_type = #tpu.core_type<tc>, window_params = [{transform_indices = @transform_0, window_bounds = array<i64: 1, 18, 18, 32>}, {transform_indices = @transform_1, window_bounds = array<i64: 1, 15, 15, 32>}]} {
    %c0 = arith.constant 0 : index
    %c0_0 = arith.constant 0 : index
    %c0_1 = arith.constant 0 : index
    %c0_2 = arith.constant 0 : index
    %0 = vector.load %arg2[%c0, %c0_0, %c0_1, %c0_2] : memref<1x18x18x32xf32, #tpu.memory_space<vmem>>, vector<1x18x18x32xf32>
    %1 = vector.extract_strided_slice %0 {offsets = [0, 0, 0, 0], sizes = [1, 15, 18, 32], strides = [1, 1, 1, 1]} : vector<1x18x18x32xf32> to vector<1x15x18x32xf32>
    %cst = arith.constant 1.250000e-01 : f32
    %2 = vector.broadcast %cst : f32 to vector<1x15x18x32xf32>
    %3 = arith.mulf %2, %1 : vector<1x15x18x32xf32>
    %4 = vector.extract_strided_slice %0 {offsets = [0, 1, 0, 0], sizes = [1, 15, 18, 32], strides = [1, 1, 1, 1]} : vector<1x18x18x32xf32> to vector<1x15x18x32xf32>
    %cst_3 = arith.constant 3.750000e-01 : f32
    %5 = vector.broadcast %cst_3 : f32 to vector<1x15x18x32xf32>
    %6 = arith.mulf %5, %4 : vector<1x15x18x32xf32>
    %7 = arith.addf %3, %6 : vector<1x15x18x32xf32>
    %8 = vector.extract_strided_slice %0 {offsets = [0, 2, 0, 0], sizes = [1, 15, 18, 32], strides = [1, 1, 1, 1]} : vector<1x18x18x32xf32> to vector<1x15x18x32xf32>
    %cst_4 = arith.constant 3.750000e-01 : f32
    %9 = vector.broadcast %cst_4 : f32 to vector<1x15x18x32xf32>
    %10 = arith.mulf %9, %8 : vector<1x15x18x32xf32>
    %11 = arith.addf %7, %10 : vector<1x15x18x32xf32>
    %12 = vector.extract_strided_slice %0 {offsets = [0, 3, 0, 0], sizes = [1, 15, 18, 32], strides = [1, 1, 1, 1]} : vector<1x18x18x32xf32> to vector<1x15x18x32xf32>
    %cst_5 = arith.constant 1.250000e-01 : f32
    %13 = vector.broadcast %cst_5 : f32 to vector<1x15x18x32xf32>
    %14 = arith.mulf %13, %12 : vector<1x15x18x32xf32>
    %15 = arith.addf %11, %14 : vector<1x15x18x32xf32>
    %16 = vector.extract_strided_slice %15 {offsets = [0, 0, 0, 0], sizes = [1, 15, 15, 32], strides = [1, 1, 1, 1]} : vector<1x15x18x32xf32> to vector<1x15x15x32xf32>
    %cst_6 = arith.constant 1.250000e-01 : f32
    %17 = vector.broadcast %cst_6 : f32 to vector<1x15x15x32xf32>
    %18 = arith.mulf %17, %16 : vector<1x15x15x32xf32>
    %19 = vector.extract_strided_slice %15 {offsets = [0, 0, 1, 0], sizes = [1, 15, 15, 32], strides = [1, 1, 1, 1]} : vector<1x15x18x32xf32> to vector<1x15x15x32xf32>
    %cst_7 = arith.constant 3.750000e-01 : f32
    %20 = vector.broadcast %cst_7 : f32 to vector<1x15x15x32xf32>
    %21 = arith.mulf %20, %19 : vector<1x15x15x32xf32>
    %22 = arith.addf %18, %21 : vector<1x15x15x32xf32>
    %23 = vector.extract_strided_slice %15 {offsets = [0, 0, 2, 0], sizes = [1, 15, 15, 32], strides = [1, 1, 1, 1]} : vector<1x15x18x32xf32> to vector<1x15x15x32xf32>
    %cst_8 = arith.constant 3.750000e-01 : f32
    %24 = vector.broadcast %cst_8 : f32 to vector<1x15x15x32xf32>
    %25 = arith.mulf %24, %23 : vector<1x15x15x32xf32>
    %26 = arith.addf %22, %25 : vector<1x15x15x32xf32>
    %27 = vector.extract_strided_slice %15 {offsets = [0, 0, 3, 0], sizes = [1, 15, 15, 32], strides = [1, 1, 1, 1]} : vector<1x15x18x32xf32> to vector<1x15x15x32xf32>
    %cst_9 = arith.constant 1.250000e-01 : f32
    %28 = vector.broadcast %cst_9 : f32 to vector<1x15x15x32xf32>
    %29 = arith.mulf %28, %27 : vector<1x15x15x32xf32>
    %30 = arith.addf %26, %29 : vector<1x15x15x32xf32>
    %c0_10 = arith.constant 0 : index
    %c0_11 = arith.constant 0 : index
    %c0_12 = arith.constant 0 : index
    %c0_13 = arith.constant 0 : index
    %31 = vector.load %arg3[%c0_10, %c0_11, %c0_12, %c0_13] : memref<1x15x15x32xf32, #tpu.memory_space<vmem>>, vector<1x15x15x32xf32>
    tpu.vector_store %arg3[%c0_10, %c0_11, %c0_12, %c0_13], %30 {strides = array<i32>} : memref<1x15x15x32xf32, #tpu.memory_space<vmem>>, vector<1x15x15x32xf32>,
    return
  }
  func.func @transform_0(%arg0: i32, %arg1: i32) -> (i32, i32, i32, i32) {
    %c0_i32 = arith.constant 0 : i32
    %c0_i32_0 = arith.constant 0 : i32
    %c0_i32_1 = arith.constant 0 : i32
    return %arg0, %c0_i32, %c0_i32_0, %arg1 : i32, i32, i32, i32
  }
  func.func @transform_1(%arg0: i32, %arg1: i32) -> (i32, i32, i32, i32) {
    %c0_i32 = arith.constant 0 : i32
    %c0_i32_0 = arith.constant 0 : i32
    %c0_i32_1 = arith.constant 0 : i32
    return %arg0, %c0_i32, %c0_i32_0, %arg1 : i32, i32, i32, i32
  }
}

module attributes {stable_mosaic.version = 11 : i64} {
  func.func @kernel(%arg0: i32, %arg1: i32, %arg2: i32, %arg3: memref<256x384xbf16, #tpu.memory_space<vmem>>, %arg4: memref<384x128xbf16, #tpu.memory_space<vmem>>, %arg5: memref<1x128xf32, #tpu.memory_space<vmem>>, %arg6: memref<256x128xf32, #tpu.memory_space<vmem>>, %arg7: memref<256x128xf32, #tpu.memory_space<vmem>>) attributes {dimension_semantics = [#tpu.dimension_semantics<parallel>, #tpu.dimension_semantics<parallel>, #tpu.dimension_semantics<arbitrary>], iteration_bounds = array<i64: 4, 1, 1>, scalar_prefetch = 0 : i64, scratch_operands = 1 : i64, tpu.core_type = #tpu.core_type<tc>, window_params = [{transform_indices = @transform_0, window_bounds = array<i64: 256, 384>}, {transform_indices = @transform_1, window_bounds = array<i64: 384, 128>}, {transform_indices = @transform_2, window_bounds = array<i64: 1, 128>}, {transform_indices = @transform_3, window_bounds = array<i64: 256, 128>}]} {
    %c0_i32 = arith.constant 0 : i32
    %0 = arith.cmpi eq, %arg2, %c0_i32 : i32
    %1 = arith.extui %0 : i1 to i32
    %c0_i32_0 = arith.constant 0 : i32
    %2 = arith.cmpi ne, %1, %c0_i32_0 : i32
    scf.if %2 {
      %cst_10 = arith.constant 0.000000e+00 : f32
      %12 = vector.broadcast %cst_10 : f32 to vector<256x128xf32>
      %c0_11 = arith.constant 0 : index
      %c0_12 = arith.constant 0 : index
      %13 = vector.load %arg7[%c0_11, %c0_12] : memref<256x128xf32, #tpu.memory_space<vmem>>, vector<256x128xf32>
      tpu.vector_store %arg7[%c0_11, %c0_12], %12 {strides = array<i32>} : memref<256x128xf32, #tpu.memory_space<vmem>>, vector<256x128xf32>,
    } else {
    }
    %c0 = arith.constant 0 : index
    %c0_1 = arith.constant 0 : index
    %3 = vector.load %arg7[%c0, %c0_1] : memref<256x128xf32, #tpu.memory_space<vmem>>, vector<256x128xf32>
    %c0_2 = arith.constant 0 : index
    %c0_3 = arith.constant 0 : index
    %4 = vector.load %arg3[%c0_2, %c0_3] : memref<256x384xbf16, #tpu.memory_space<vmem>>, vector<256x384xbf16>
    %c0_4 = arith.constant 0 : index
    %c0_5 = arith.constant 0 : index
    %5 = vector.load %arg4[%c0_4, %c0_5] : memref<384x128xbf16, #tpu.memory_space<vmem>>, vector<384x128xbf16>
    %cst = arith.constant dense<0.000000e+00> : vector<256x128xf32>
    %6 = tpu.matmul %4, %5, %cst {dimension_numbers = #tpu.dot_dimension_numbers<[1], [0], [0], [1], [0, 0, 1, 1], [], []>} : vector<256x384xbf16>, vector<384x128xbf16>, vector<256x128xf32> -> vector<256x128xf32>
    %7 = arith.addf %3, %6 : vector<256x128xf32>
    %c0_6 = arith.constant 0 : index
    %c0_7 = arith.constant 0 : index
    %8 = vector.load %arg7[%c0_6, %c0_7] : memref<256x128xf32, #tpu.memory_space<vmem>>, vector<256x128xf32>
    tpu.vector_store %arg7[%c0_6, %c0_7], %7 {strides = array<i32>} : memref<256x128xf32, #tpu.memory_space<vmem>>, vector<256x128xf32>,
    %c0_i32_8 = arith.constant 0 : i32
    %9 = arith.cmpi eq, %arg2, %c0_i32_8 : i32
    %10 = arith.extui %9 : i1 to i32
    %c0_i32_9 = arith.constant 0 : i32
    %11 = arith.cmpi ne, %10, %c0_i32_9 : i32
    scf.if %11 {
      %c0_10 = arith.constant 0 : index
      %c0_11 = arith.constant 0 : index
      %12 = vector.load %arg7[%c0_10, %c0_11] : memref<256x128xf32, #tpu.memory_space<vmem>>, vector<256x128xf32>
      %c0_12 = arith.constant 0 : index
      %c0_13 = arith.constant 0 : index
      %13 = vector.load %arg5[%c0_12, %c0_13] : memref<1x128xf32, #tpu.memory_space<vmem>>, vector<1x128xf32>
      %14 = vector.broadcast %13 : vector<1x128xf32> to vector<256x128xf32>
      %15 = arith.addf %12, %14 : vector<256x128xf32>
      %cst_14 = arith.constant 0.000000e+00 : f32
      %16 = vector.broadcast %cst_14 : f32 to vector<256x128xf32>
      %17 = arith.cmpf oge, %15, %16 : vector<256x128xf32>
      %cst_15 = arith.constant 2.000000e-01 : f32
      %18 = vector.broadcast %cst_15 : f32 to vector<256x128xf32>
      %19 = arith.mulf %18, %15 : vector<256x128xf32>
      %20 = arith.select %17, %15, %19 : vector<256x128xi1>, vector<256x128xf32>
      %cst_16 = arith.constant 1.41421354 : f32
      %21 = vector.broadcast %cst_16 : f32 to vector<256x128xf32>
      %22 = arith.mulf %20, %21 : vector<256x128xf32>
      %cst_17 = arith.constant 1.000000e+00 : f32
      %23 = vector.broadcast %cst_17 : f32 to vector<256x128xf32>
      %24 = arith.mulf %22, %23 : vector<256x128xf32>
      %c0_18 = arith.constant 0 : index
      %c0_19 = arith.constant 0 : index
      %25 = vector.load %arg6[%c0_18, %c0_19] : memref<256x128xf32, #tpu.memory_space<vmem>>, vector<256x128xf32>
      tpu.vector_store %arg6[%c0_18, %c0_19], %24 {strides = array<i32>} : memref<256x128xf32, #tpu.memory_space<vmem>>, vector<256x128xf32>,
    } else {
    }
    return
  }
  func.func @transform_0(%arg0: i32, %arg1: i32, %arg2: i32) -> (i32, i32) {
    %c0_i32 = arith.constant 0 : i32
    return %arg0, %arg2 : i32, i32
  }
  func.func @transform_1(%arg0: i32, %arg1: i32, %arg2: i32) -> (i32, i32) {
    %c0_i32 = arith.constant 0 : i32
    return %arg2, %arg1 : i32, i32
  }
  func.func @transform_2(%arg0: i32, %arg1: i32, %arg2: i32) -> (i32, i32) {
    %c0_i32 = arith.constant 0 : i32
    %c0_i32_0 = arith.constant 0 : i32
    return %c0_i32, %arg1 : i32, i32
  }
  func.func @transform_3(%arg0: i32, %arg1: i32, %arg2: i32) -> (i32, i32) {
    %c0_i32 = arith.constant 0 : i32
    return %arg0, %arg1 : i32, i32
  }
}

module attributes {stable_mosaic.version = 11 : i64} {
  func.func @_blur_kernel(%arg0: i32, %arg1: i32, %arg2: memref<1x20x20x32xf32, #tpu.memory_space<vmem>>, %arg3: memref<1x17x17x32xf32, #tpu.memory_space<vmem>>) attributes {dimension_semantics = [#tpu.dimension_semantics<parallel>, #tpu.dimension_semantics<parallel>], iteration_bounds = array<i64: 4, 1>, scalar_prefetch = 0 : i64, scratch_operands = 0 : i64, tpu.core_type = #tpu.core_type<tc>, window_params = [{transform_indices = @transform_0, window_bounds = array<i64: 1, 20, 20, 32>}, {transform_indices = @transform_1, window_bounds = array<i64: 1, 17, 17, 32>}]} {
    %c0 = arith.constant 0 : index
    %c0_0 = arith.constant 0 : index
    %c0_1 = arith.constant 0 : index
    %c0_2 = arith.constant 0 : index
    %0 = vector.load %arg2[%c0, %c0_0, %c0_1, %c0_2] : memref<1x20x20x32xf32, #tpu.memory_space<vmem>>, vector<1x20x20x32xf32>
    %1 = vector.extract_strided_slice %0 {offsets = [0, 0, 0, 0], sizes = [1, 17, 20, 32], strides = [1, 1, 1, 1]} : vector<1x20x20x32xf32> to vector<1x17x20x32xf32>
    %cst = arith.constant 1.250000e-01 : f32
    %2 = vector.broadcast %cst : f32 to vector<1x17x20x32xf32>
    %3 = arith.mulf %2, %1 : vector<1x17x20x32xf32>
    %4 = vector.extract_strided_slice %0 {offsets = [0, 1, 0, 0], sizes = [1, 17, 20, 32], strides = [1, 1, 1, 1]} : vector<1x20x20x32xf32> to vector<1x17x20x32xf32>
    %cst_3 = arith.constant 3.750000e-01 : f32
    %5 = vector.broadcast %cst_3 : f32 to vector<1x17x20x32xf32>
    %6 = arith.mulf %5, %4 : vector<1x17x20x32xf32>
    %7 = arith.addf %3, %6 : vector<1x17x20x32xf32>
    %8 = vector.extract_strided_slice %0 {offsets = [0, 2, 0, 0], sizes = [1, 17, 20, 32], strides = [1, 1, 1, 1]} : vector<1x20x20x32xf32> to vector<1x17x20x32xf32>
    %cst_4 = arith.constant 3.750000e-01 : f32
    %9 = vector.broadcast %cst_4 : f32 to vector<1x17x20x32xf32>
    %10 = arith.mulf %9, %8 : vector<1x17x20x32xf32>
    %11 = arith.addf %7, %10 : vector<1x17x20x32xf32>
    %12 = vector.extract_strided_slice %0 {offsets = [0, 3, 0, 0], sizes = [1, 17, 20, 32], strides = [1, 1, 1, 1]} : vector<1x20x20x32xf32> to vector<1x17x20x32xf32>
    %cst_5 = arith.constant 1.250000e-01 : f32
    %13 = vector.broadcast %cst_5 : f32 to vector<1x17x20x32xf32>
    %14 = arith.mulf %13, %12 : vector<1x17x20x32xf32>
    %15 = arith.addf %11, %14 : vector<1x17x20x32xf32>
    %16 = vector.extract_strided_slice %15 {offsets = [0, 0, 0, 0], sizes = [1, 17, 17, 32], strides = [1, 1, 1, 1]} : vector<1x17x20x32xf32> to vector<1x17x17x32xf32>
    %cst_6 = arith.constant 1.250000e-01 : f32
    %17 = vector.broadcast %cst_6 : f32 to vector<1x17x17x32xf32>
    %18 = arith.mulf %17, %16 : vector<1x17x17x32xf32>
    %19 = vector.extract_strided_slice %15 {offsets = [0, 0, 1, 0], sizes = [1, 17, 17, 32], strides = [1, 1, 1, 1]} : vector<1x17x20x32xf32> to vector<1x17x17x32xf32>
    %cst_7 = arith.constant 3.750000e-01 : f32
    %20 = vector.broadcast %cst_7 : f32 to vector<1x17x17x32xf32>
    %21 = arith.mulf %20, %19 : vector<1x17x17x32xf32>
    %22 = arith.addf %18, %21 : vector<1x17x17x32xf32>
    %23 = vector.extract_strided_slice %15 {offsets = [0, 0, 2, 0], sizes = [1, 17, 17, 32], strides = [1, 1, 1, 1]} : vector<1x17x20x32xf32> to vector<1x17x17x32xf32>
    %cst_8 = arith.constant 3.750000e-01 : f32
    %24 = vector.broadcast %cst_8 : f32 to vector<1x17x17x32xf32>
    %25 = arith.mulf %24, %23 : vector<1x17x17x32xf32>
    %26 = arith.addf %22, %25 : vector<1x17x17x32xf32>
    %27 = vector.extract_strided_slice %15 {offsets = [0, 0, 3, 0], sizes = [1, 17, 17, 32], strides = [1, 1, 1, 1]} : vector<1x17x20x32xf32> to vector<1x17x17x32xf32>
    %cst_9 = arith.constant 1.250000e-01 : f32
    %28 = vector.broadcast %cst_9 : f32 to vector<1x17x17x32xf32>
    %29 = arith.mulf %28, %27 : vector<1x17x17x32xf32>
    %30 = arith.addf %26, %29 : vector<1x17x17x32xf32>
    %c0_10 = arith.constant 0 : index
    %c0_11 = arith.constant 0 : index
    %c0_12 = arith.constant 0 : index
    %c0_13 = arith.constant 0 : index
    %31 = vector.load %arg3[%c0_10, %c0_11, %c0_12, %c0_13] : memref<1x17x17x32xf32, #tpu.memory_space<vmem>>, vector<1x17x17x32xf32>
    tpu.vector_store %arg3[%c0_10, %c0_11, %c0_12, %c0_13], %30 {strides = array<i32>} : memref<1x17x17x32xf32, #tpu.memory_space<vmem>>, vector<1x17x17x32xf32>,
    return
  }
  func.func @transform_0(%arg0: i32, %arg1: i32) -> (i32, i32, i32, i32) {
    %c0_i32 = arith.constant 0 : i32
    %c0_i32_0 = arith.constant 0 : i32
    %c0_i32_1 = arith.constant 0 : i32
    return %arg0, %c0_i32, %c0_i32_0, %arg1 : i32, i32, i32, i32
  }
  func.func @transform_1(%arg0: i32, %arg1: i32) -> (i32, i32, i32, i32) {
    %c0_i32 = arith.constant 0 : i32
    %c0_i32_0 = arith.constant 0 : i32
    %c0_i32_1 = arith.constant 0 : i32
    return %arg0, %c0_i32, %c0_i32_0, %arg1 : i32, i32, i32, i32
  }
}

module attributes {stable_mosaic.version = 11 : i64} {
  func.func @kernel(%arg0: i32, %arg1: i32, %arg2: i32, %arg3: memref<256x384xbf16, #tpu.memory_space<vmem>>, %arg4: memref<384x128xbf16, #tpu.memory_space<vmem>>, %arg5: memref<1x128xf32, #tpu.memory_space<vmem>>, %arg6: memref<256x128xf32, #tpu.memory_space<vmem>>, %arg7: memref<256x128xf32, #tpu.memory_space<vmem>>) attributes {dimension_semantics = [#tpu.dimension_semantics<parallel>, #tpu.dimension_semantics<parallel>, #tpu.dimension_semantics<arbitrary>], iteration_bounds = array<i64: 1, 1, 1>, scalar_prefetch = 0 : i64, scratch_operands = 1 : i64, tpu.core_type = #tpu.core_type<tc>, window_params = [{transform_indices = @transform_0, window_bounds = array<i64: 256, 384>}, {transform_indices = @transform_1, window_bounds = array<i64: 384, 128>}, {transform_indices = @transform_2, window_bounds = array<i64: 1, 128>}, {transform_indices = @transform_3, window_bounds = array<i64: 256, 128>}]} {
    %c0_i32 = arith.constant 0 : i32
    %0 = arith.cmpi eq, %arg2, %c0_i32 : i32
    %1 = arith.extui %0 : i1 to i32
    %c0_i32_0 = arith.constant 0 : i32
    %2 = arith.cmpi ne, %1, %c0_i32_0 : i32
    scf.if %2 {
      %cst_10 = arith.constant 0.000000e+00 : f32
      %12 = vector.broadcast %cst_10 : f32 to vector<256x128xf32>
      %c0_11 = arith.constant 0 : index
      %c0_12 = arith.constant 0 : index
      %13 = vector.load %arg7[%c0_11, %c0_12] : memref<256x128xf32, #tpu.memory_space<vmem>>, vector<256x128xf32>
      tpu.vector_store %arg7[%c0_11, %c0_12], %12 {strides = array<i32>} : memref<256x128xf32, #tpu.memory_space<vmem>>, vector<256x128xf32>,
    } else {
    }
    %c0 = arith.constant 0 : index
    %c0_1 = arith.constant 0 : index
    %3 = vector.load %arg7[%c0, %c0_1] : memref<256x128xf32, #tpu.memory_space<vmem>>, vector<256x128xf32>
    %c0_2 = arith.constant 0 : index
    %c0_3 = arith.constant 0 : index
    %4 = vector.load %arg3[%c0_2, %c0_3] : memref<256x384xbf16, #tpu.memory_space<vmem>>, vector<256x384xbf16>
    %c0_4 = arith.constant 0 : index
    %c0_5 = arith.constant 0 : index
    %5 = vector.load %arg4[%c0_4, %c0_5] : memref<384x128xbf16, #tpu.memory_space<vmem>>, vector<384x128xbf16>
    %cst = arith.constant dense<0.000000e+00> : vector<256x128xf32>
    %6 = tpu.matmul %4, %5, %cst {dimension_numbers = #tpu.dot_dimension_numbers<[1], [0], [0], [1], [0, 0, 1, 1], [], []>} : vector<256x384xbf16>, vector<384x128xbf16>, vector<256x128xf32> -> vector<256x128xf32>
    %7 = arith.addf %3, %6 : vector<256x128xf32>
    %c0_6 = arith.constant 0 : index
    %c0_7 = arith.constant 0 : index
    %8 = vector.load %arg7[%c0_6, %c0_7] : memref<256x128xf32, #tpu.memory_space<vmem>>, vector<256x128xf32>
    tpu.vector_store %arg7[%c0_6, %c0_7], %7 {strides = array<i32>} : memref<256x128xf32, #tpu.memory_space<vmem>>, vector<256x128xf32>,
    %c0_i32_8 = arith.constant 0 : i32
    %9 = arith.cmpi eq, %arg2, %c0_i32_8 : i32
    %10 = arith.extui %9 : i1 to i32
    %c0_i32_9 = arith.constant 0 : i32
    %11 = arith.cmpi ne, %10, %c0_i32_9 : i32
    scf.if %11 {
      %c0_10 = arith.constant 0 : index
      %c0_11 = arith.constant 0 : index
      %12 = vector.load %arg7[%c0_10, %c0_11] : memref<256x128xf32, #tpu.memory_space<vmem>>, vector<256x128xf32>
      %c0_12 = arith.constant 0 : index
      %c0_13 = arith.constant 0 : index
      %13 = vector.load %arg5[%c0_12, %c0_13] : memref<1x128xf32, #tpu.memory_space<vmem>>, vector<1x128xf32>
      %14 = vector.broadcast %13 : vector<1x128xf32> to vector<256x128xf32>
      %15 = arith.addf %12, %14 : vector<256x128xf32>
      %cst_14 = arith.constant 0.000000e+00 : f32
      %16 = vector.broadcast %cst_14 : f32 to vector<256x128xf32>
      %17 = arith.cmpf oge, %15, %16 : vector<256x128xf32>
      %cst_15 = arith.constant 2.000000e-01 : f32
      %18 = vector.broadcast %cst_15 : f32 to vector<256x128xf32>
      %19 = arith.mulf %18, %15 : vector<256x128xf32>
      %20 = arith.select %17, %15, %19 : vector<256x128xi1>, vector<256x128xf32>
      %cst_16 = arith.constant 1.41421354 : f32
      %21 = vector.broadcast %cst_16 : f32 to vector<256x128xf32>
      %22 = arith.mulf %20, %21 : vector<256x128xf32>
      %cst_17 = arith.constant 1.000000e+00 : f32
      %23 = vector.broadcast %cst_17 : f32 to vector<256x128xf32>
      %24 = arith.mulf %22, %23 : vector<256x128xf32>
      %c0_18 = arith.constant 0 : index
      %c0_19 = arith.constant 0 : index
      %25 = vector.load %arg6[%c0_18, %c0_19] : memref<256x128xf32, #tpu.memory_space<vmem>>, vector<256x128xf32>
      tpu.vector_store %arg6[%c0_18, %c0_19], %24 {strides = array<i32>} : memref<256x128xf32, #tpu.memory_space<vmem>>, vector<256x128xf32>,
    } else {
    }
    return
  }
  func.func @transform_0(%arg0: i32, %arg1: i32, %arg2: i32) -> (i32, i32) {
    %c0_i32 = arith.constant 0 : i32
    return %arg0, %arg2 : i32, i32
  }
  func.func @transform_1(%arg0: i32, %arg1: i32, %arg2: i32) -> (i32, i32) {
    %c0_i32 = arith.constant 0 : i32
    return %arg2, %arg1 : i32, i32
  }
  func.func @transform_2(%arg0: i32, %arg1: i32, %arg2: i32) -> (i32, i32) {
    %c0_i32 = arith.constant 0 : i32
    %c0_i32_0 = arith.constant 0 : i32
    return %c0_i32, %arg1 : i32, i32
  }
  func.func @transform_3(%arg0: i32, %arg1: i32, %arg2: i32) -> (i32, i32) {
    %c0_i32 = arith.constant 0 : i32
    return %arg0, %arg1 : i32, i32
  }
}

module attributes {stable_mosaic.version = 11 : i64} {
  func.func @kernel(%arg0: i32, %arg1: i32, %arg2: i32, %arg3: memref<256x128xbf16, #tpu.memory_space<vmem>>, %arg4: memref<128x128xbf16, #tpu.memory_space<vmem>>, %arg5: memref<1x128xf32, #tpu.memory_space<vmem>>, %arg6: memref<256x128xf32, #tpu.memory_space<vmem>>, %arg7: memref<256x128xf32, #tpu.memory_space<vmem>>, %arg8: memref<256x128xf32, #tpu.memory_space<vmem>>) attributes {dimension_semantics = [#tpu.dimension_semantics<parallel>, #tpu.dimension_semantics<parallel>, #tpu.dimension_semantics<arbitrary>], iteration_bounds = array<i64: 1, 1, 1>, scalar_prefetch = 0 : i64, scratch_operands = 1 : i64, tpu.core_type = #tpu.core_type<tc>, window_params = [{transform_indices = @transform_0, window_bounds = array<i64: 256, 128>}, {transform_indices = @transform_1, window_bounds = array<i64: 128, 128>}, {transform_indices = @transform_2, window_bounds = array<i64: 1, 128>}, {transform_indices = @transform_3, window_bounds = array<i64: 256, 128>}, {transform_indices = @transform_4, window_bounds = array<i64: 256, 128>}]} {
    %c0_i32 = arith.constant 0 : i32
    %0 = arith.cmpi eq, %arg2, %c0_i32 : i32
    %1 = arith.extui %0 : i1 to i32
    %c0_i32_0 = arith.constant 0 : i32
    %2 = arith.cmpi ne, %1, %c0_i32_0 : i32
    scf.if %2 {
      %cst_10 = arith.constant 0.000000e+00 : f32
      %12 = vector.broadcast %cst_10 : f32 to vector<256x128xf32>
      %c0_11 = arith.constant 0 : index
      %c0_12 = arith.constant 0 : index
      %13 = vector.load %arg8[%c0_11, %c0_12] : memref<256x128xf32, #tpu.memory_space<vmem>>, vector<256x128xf32>
      tpu.vector_store %arg8[%c0_11, %c0_12], %12 {strides = array<i32>} : memref<256x128xf32, #tpu.memory_space<vmem>>, vector<256x128xf32>,
    } else {
    }
    %c0 = arith.constant 0 : index
    %c0_1 = arith.constant 0 : index
    %3 = vector.load %arg8[%c0, %c0_1] : memref<256x128xf32, #tpu.memory_space<vmem>>, vector<256x128xf32>
    %c0_2 = arith.constant 0 : index
    %c0_3 = arith.constant 0 : index
    %4 = vector.load %arg3[%c0_2, %c0_3] : memref<256x128xbf16, #tpu.memory_space<vmem>>, vector<256x128xbf16>
    %c0_4 = arith.constant 0 : index
    %c0_5 = arith.constant 0 : index
    %5 = vector.load %arg4[%c0_4, %c0_5] : memref<128x128xbf16, #tpu.memory_space<vmem>>, vector<128x128xbf16>
    %cst = arith.constant dense<0.000000e+00> : vector<256x128xf32>
    %6 = tpu.matmul %4, %5, %cst {dimension_numbers = #tpu.dot_dimension_numbers<[1], [0], [0], [1], [0, 0, 1, 1], [], []>} : vector<256x128xbf16>, vector<128x128xbf16>, vector<256x128xf32> -> vector<256x128xf32>
    %7 = arith.addf %3, %6 : vector<256x128xf32>
    %c0_6 = arith.constant 0 : index
    %c0_7 = arith.constant 0 : index
    %8 = vector.load %arg8[%c0_6, %c0_7] : memref<256x128xf32, #tpu.memory_space<vmem>>, vector<256x128xf32>
    tpu.vector_store %arg8[%c0_6, %c0_7], %7 {strides = array<i32>} : memref<256x128xf32, #tpu.memory_space<vmem>>, vector<256x128xf32>,
    %c0_i32_8 = arith.constant 0 : i32
    %9 = arith.cmpi eq, %arg2, %c0_i32_8 : i32
    %10 = arith.extui %9 : i1 to i32
    %c0_i32_9 = arith.constant 0 : i32
    %11 = arith.cmpi ne, %10, %c0_i32_9 : i32
    scf.if %11 {
      %c0_10 = arith.constant 0 : index
      %c0_11 = arith.constant 0 : index
      %12 = vector.load %arg8[%c0_10, %c0_11] : memref<256x128xf32, #tpu.memory_space<vmem>>, vector<256x128xf32>
      %c0_12 = arith.constant 0 : index
      %c0_13 = arith.constant 0 : index
      %13 = vector.load %arg5[%c0_12, %c0_13] : memref<1x128xf32, #tpu.memory_space<vmem>>, vector<1x128xf32>
      %14 = vector.broadcast %13 : vector<1x128xf32> to vector<256x128xf32>
      %15 = arith.addf %12, %14 : vector<256x128xf32>
      %c0_14 = arith.constant 0 : index
      %c0_15 = arith.constant 0 : index
      %16 = vector.load %arg6[%c0_14, %c0_15] : memref<256x128xf32, #tpu.memory_space<vmem>>, vector<256x128xf32>
      %17 = arith.addf %15, %16 : vector<256x128xf32>
      %cst_16 = arith.constant 0.707106769 : f32
      %18 = vector.broadcast %cst_16 : f32 to vector<256x128xf32>
      %19 = arith.mulf %17, %18 : vector<256x128xf32>
      %c0_17 = arith.constant 0 : index
      %c0_18 = arith.constant 0 : index
      %20 = vector.load %arg7[%c0_17, %c0_18] : memref<256x128xf32, #tpu.memory_space<vmem>>, vector<256x128xf32>
      tpu.vector_store %arg7[%c0_17, %c0_18], %19 {strides = array<i32>} : memref<256x128xf32, #tpu.memory_space<vmem>>, vector<256x128xf32>,
    } else {
    }
    return
  }
  func.func @transform_0(%arg0: i32, %arg1: i32, %arg2: i32) -> (i32, i32) {
    %c0_i32 = arith.constant 0 : i32
    return %arg0, %arg2 : i32, i32
  }
  func.func @transform_1(%arg0: i32, %arg1: i32, %arg2: i32) -> (i32, i32) {
    %c0_i32 = arith.constant 0 : i32
    return %arg2, %arg1 : i32, i32
  }
  func.func @transform_2(%arg0: i32, %arg1: i32, %arg2: i32) -> (i32, i32) {
    %c0_i32 = arith.constant 0 : i32
    %c0_i32_0 = arith.constant 0 : i32
    return %c0_i32, %arg1 : i32, i32
  }
  func.func @transform_3(%arg0: i32, %arg1: i32, %arg2: i32) -> (i32, i32) {
    %c0_i32 = arith.constant 0 : i32
    return %arg0, %arg1 : i32, i32
  }
  func.func @transform_4(%arg0: i32, %arg1: i32, %arg2: i32) -> (i32, i32) {
    %c0_i32 = arith.constant 0 : i32
    return %arg0, %arg1 : i32, i32
  }
}

module attributes {stable_mosaic.version = 11 : i64} {
  func.func @_blur_kernel(%arg0: i32, %arg1: i32, %arg2: memref<1x10x10x32xf32, #tpu.memory_space<vmem>>, %arg3: memref<1x7x7x32xf32, #tpu.memory_space<vmem>>) attributes {dimension_semantics = [#tpu.dimension_semantics<parallel>, #tpu.dimension_semantics<parallel>], iteration_bounds = array<i64: 4, 1>, scalar_prefetch = 0 : i64, scratch_operands = 0 : i64, tpu.core_type = #tpu.core_type<tc>, window_params = [{transform_indices = @transform_0, window_bounds = array<i64: 1, 10, 10, 32>}, {transform_indices = @transform_1, window_bounds = array<i64: 1, 7, 7, 32>}]} {
    %c0 = arith.constant 0 : index
    %c0_0 = arith.constant 0 : index
    %c0_1 = arith.constant 0 : index
    %c0_2 = arith.constant 0 : index
    %0 = vector.load %arg2[%c0, %c0_0, %c0_1, %c0_2] : memref<1x10x10x32xf32, #tpu.memory_space<vmem>>, vector<1x10x10x32xf32>
    %1 = vector.extract_strided_slice %0 {offsets = [0, 0, 0, 0], sizes = [1, 7, 10, 32], strides = [1, 1, 1, 1]} : vector<1x10x10x32xf32> to vector<1x7x10x32xf32>
    %cst = arith.constant 1.250000e-01 : f32
    %2 = vector.broadcast %cst : f32 to vector<1x7x10x32xf32>
    %3 = arith.mulf %2, %1 : vector<1x7x10x32xf32>
    %4 = vector.extract_strided_slice %0 {offsets = [0, 1, 0, 0], sizes = [1, 7, 10, 32], strides = [1, 1, 1, 1]} : vector<1x10x10x32xf32> to vector<1x7x10x32xf32>
    %cst_3 = arith.constant 3.750000e-01 : f32
    %5 = vector.broadcast %cst_3 : f32 to vector<1x7x10x32xf32>
    %6 = arith.mulf %5, %4 : vector<1x7x10x32xf32>
    %7 = arith.addf %3, %6 : vector<1x7x10x32xf32>
    %8 = vector.extract_strided_slice %0 {offsets = [0, 2, 0, 0], sizes = [1, 7, 10, 32], strides = [1, 1, 1, 1]} : vector<1x10x10x32xf32> to vector<1x7x10x32xf32>
    %cst_4 = arith.constant 3.750000e-01 : f32
    %9 = vector.broadcast %cst_4 : f32 to vector<1x7x10x32xf32>
    %10 = arith.mulf %9, %8 : vector<1x7x10x32xf32>
    %11 = arith.addf %7, %10 : vector<1x7x10x32xf32>
    %12 = vector.extract_strided_slice %0 {offsets = [0, 3, 0, 0], sizes = [1, 7, 10, 32], strides = [1, 1, 1, 1]} : vector<1x10x10x32xf32> to vector<1x7x10x32xf32>
    %cst_5 = arith.constant 1.250000e-01 : f32
    %13 = vector.broadcast %cst_5 : f32 to vector<1x7x10x32xf32>
    %14 = arith.mulf %13, %12 : vector<1x7x10x32xf32>
    %15 = arith.addf %11, %14 : vector<1x7x10x32xf32>
    %16 = vector.extract_strided_slice %15 {offsets = [0, 0, 0, 0], sizes = [1, 7, 7, 32], strides = [1, 1, 1, 1]} : vector<1x7x10x32xf32> to vector<1x7x7x32xf32>
    %cst_6 = arith.constant 1.250000e-01 : f32
    %17 = vector.broadcast %cst_6 : f32 to vector<1x7x7x32xf32>
    %18 = arith.mulf %17, %16 : vector<1x7x7x32xf32>
    %19 = vector.extract_strided_slice %15 {offsets = [0, 0, 1, 0], sizes = [1, 7, 7, 32], strides = [1, 1, 1, 1]} : vector<1x7x10x32xf32> to vector<1x7x7x32xf32>
    %cst_7 = arith.constant 3.750000e-01 : f32
    %20 = vector.broadcast %cst_7 : f32 to vector<1x7x7x32xf32>
    %21 = arith.mulf %20, %19 : vector<1x7x7x32xf32>
    %22 = arith.addf %18, %21 : vector<1x7x7x32xf32>
    %23 = vector.extract_strided_slice %15 {offsets = [0, 0, 2, 0], sizes = [1, 7, 7, 32], strides = [1, 1, 1, 1]} : vector<1x7x10x32xf32> to vector<1x7x7x32xf32>
    %cst_8 = arith.constant 3.750000e-01 : f32
    %24 = vector.broadcast %cst_8 : f32 to vector<1x7x7x32xf32>
    %25 = arith.mulf %24, %23 : vector<1x7x7x32xf32>
    %26 = arith.addf %22, %25 : vector<1x7x7x32xf32>
    %27 = vector.extract_strided_slice %15 {offsets = [0, 0, 3, 0], sizes = [1, 7, 7, 32], strides = [1, 1, 1, 1]} : vector<1x7x10x32xf32> to vector<1x7x7x32xf32>
    %cst_9 = arith.constant 1.250000e-01 : f32
    %28 = vector.broadcast %cst_9 : f32 to vector<1x7x7x32xf32>
    %29 = arith.mulf %28, %27 : vector<1x7x7x32xf32>
    %30 = arith.addf %26, %29 : vector<1x7x7x32xf32>
    %c0_10 = arith.constant 0 : index
    %c0_11 = arith.constant 0 : index
    %c0_12 = arith.constant 0 : index
    %c0_13 = arith.constant 0 : index
    %31 = vector.load %arg3[%c0_10, %c0_11, %c0_12, %c0_13] : memref<1x7x7x32xf32, #tpu.memory_space<vmem>>, vector<1x7x7x32xf32>
    tpu.vector_store %arg3[%c0_10, %c0_11, %c0_12, %c0_13], %30 {strides = array<i32>} : memref<1x7x7x32xf32, #tpu.memory_space<vmem>>, vector<1x7x7x32xf32>,
    return
  }
  func.func @transform_0(%arg0: i32, %arg1: i32) -> (i32, i32, i32, i32) {
    %c0_i32 = arith.constant 0 : i32
    %c0_i32_0 = arith.constant 0 : i32
    %c0_i32_1 = arith.constant 0 : i32
    return %arg0, %c0_i32, %c0_i32_0, %arg1 : i32, i32, i32, i32
  }
  func.func @transform_1(%arg0: i32, %arg1: i32) -> (i32, i32, i32, i32) {
    %c0_i32 = arith.constant 0 : i32
    %c0_i32_0 = arith.constant 0 : i32
    %c0_i32_1 = arith.constant 0 : i32
    return %arg0, %c0_i32, %c0_i32_0, %arg1 : i32, i32, i32, i32
  }
}

module attributes {stable_mosaic.version = 11 : i64} {
  func.func @_blur_kernel(%arg0: i32, %arg1: i32, %arg2: memref<1x12x12x32xf32, #tpu.memory_space<vmem>>, %arg3: memref<1x9x9x32xf32, #tpu.memory_space<vmem>>) attributes {dimension_semantics = [#tpu.dimension_semantics<parallel>, #tpu.dimension_semantics<parallel>], iteration_bounds = array<i64: 4, 1>, scalar_prefetch = 0 : i64, scratch_operands = 0 : i64, tpu.core_type = #tpu.core_type<tc>, window_params = [{transform_indices = @transform_0, window_bounds = array<i64: 1, 12, 12, 32>}, {transform_indices = @transform_1, window_bounds = array<i64: 1, 9, 9, 32>}]} {
    %c0 = arith.constant 0 : index
    %c0_0 = arith.constant 0 : index
    %c0_1 = arith.constant 0 : index
    %c0_2 = arith.constant 0 : index
    %0 = vector.load %arg2[%c0, %c0_0, %c0_1, %c0_2] : memref<1x12x12x32xf32, #tpu.memory_space<vmem>>, vector<1x12x12x32xf32>
    %1 = vector.extract_strided_slice %0 {offsets = [0, 0, 0, 0], sizes = [1, 9, 12, 32], strides = [1, 1, 1, 1]} : vector<1x12x12x32xf32> to vector<1x9x12x32xf32>
    %cst = arith.constant 1.250000e-01 : f32
    %2 = vector.broadcast %cst : f32 to vector<1x9x12x32xf32>
    %3 = arith.mulf %2, %1 : vector<1x9x12x32xf32>
    %4 = vector.extract_strided_slice %0 {offsets = [0, 1, 0, 0], sizes = [1, 9, 12, 32], strides = [1, 1, 1, 1]} : vector<1x12x12x32xf32> to vector<1x9x12x32xf32>
    %cst_3 = arith.constant 3.750000e-01 : f32
    %5 = vector.broadcast %cst_3 : f32 to vector<1x9x12x32xf32>
    %6 = arith.mulf %5, %4 : vector<1x9x12x32xf32>
    %7 = arith.addf %3, %6 : vector<1x9x12x32xf32>
    %8 = vector.extract_strided_slice %0 {offsets = [0, 2, 0, 0], sizes = [1, 9, 12, 32], strides = [1, 1, 1, 1]} : vector<1x12x12x32xf32> to vector<1x9x12x32xf32>
    %cst_4 = arith.constant 3.750000e-01 : f32
    %9 = vector.broadcast %cst_4 : f32 to vector<1x9x12x32xf32>
    %10 = arith.mulf %9, %8 : vector<1x9x12x32xf32>
    %11 = arith.addf %7, %10 : vector<1x9x12x32xf32>
    %12 = vector.extract_strided_slice %0 {offsets = [0, 3, 0, 0], sizes = [1, 9, 12, 32], strides = [1, 1, 1, 1]} : vector<1x12x12x32xf32> to vector<1x9x12x32xf32>
    %cst_5 = arith.constant 1.250000e-01 : f32
    %13 = vector.broadcast %cst_5 : f32 to vector<1x9x12x32xf32>
    %14 = arith.mulf %13, %12 : vector<1x9x12x32xf32>
    %15 = arith.addf %11, %14 : vector<1x9x12x32xf32>
    %16 = vector.extract_strided_slice %15 {offsets = [0, 0, 0, 0], sizes = [1, 9, 9, 32], strides = [1, 1, 1, 1]} : vector<1x9x12x32xf32> to vector<1x9x9x32xf32>
    %cst_6 = arith.constant 1.250000e-01 : f32
    %17 = vector.broadcast %cst_6 : f32 to vector<1x9x9x32xf32>
    %18 = arith.mulf %17, %16 : vector<1x9x9x32xf32>
    %19 = vector.extract_strided_slice %15 {offsets = [0, 0, 1, 0], sizes = [1, 9, 9, 32], strides = [1, 1, 1, 1]} : vector<1x9x12x32xf32> to vector<1x9x9x32xf32>
    %cst_7 = arith.constant 3.750000e-01 : f32
    %20 = vector.broadcast %cst_7 : f32 to vector<1x9x9x32xf32>
    %21 = arith.mulf %20, %19 : vector<1x9x9x32xf32>
    %22 = arith.addf %18, %21 : vector<1x9x9x32xf32>
    %23 = vector.extract_strided_slice %15 {offsets = [0, 0, 2, 0], sizes = [1, 9, 9, 32], strides = [1, 1, 1, 1]} : vector<1x9x12x32xf32> to vector<1x9x9x32xf32>
    %cst_8 = arith.constant 3.750000e-01 : f32
    %24 = vector.broadcast %cst_8 : f32 to vector<1x9x9x32xf32>
    %25 = arith.mulf %24, %23 : vector<1x9x9x32xf32>
    %26 = arith.addf %22, %25 : vector<1x9x9x32xf32>
    %27 = vector.extract_strided_slice %15 {offsets = [0, 0, 3, 0], sizes = [1, 9, 9, 32], strides = [1, 1, 1, 1]} : vector<1x9x12x32xf32> to vector<1x9x9x32xf32>
    %cst_9 = arith.constant 1.250000e-01 : f32
    %28 = vector.broadcast %cst_9 : f32 to vector<1x9x9x32xf32>
    %29 = arith.mulf %28, %27 : vector<1x9x9x32xf32>
    %30 = arith.addf %26, %29 : vector<1x9x9x32xf32>
    %c0_10 = arith.constant 0 : index
    %c0_11 = arith.constant 0 : index
    %c0_12 = arith.constant 0 : index
    %c0_13 = arith.constant 0 : index
    %31 = vector.load %arg3[%c0_10, %c0_11, %c0_12, %c0_13] : memref<1x9x9x32xf32, #tpu.memory_space<vmem>>, vector<1x9x9x32xf32>
    tpu.vector_store %arg3[%c0_10, %c0_11, %c0_12, %c0_13], %30 {strides = array<i32>} : memref<1x9x9x32xf32, #tpu.memory_space<vmem>>, vector<1x9x9x32xf32>,
    return
  }
  func.func @transform_0(%arg0: i32, %arg1: i32) -> (i32, i32, i32, i32) {
    %c0_i32 = arith.constant 0 : i32
    %c0_i32_0 = arith.constant 0 : i32
    %c0_i32_1 = arith.constant 0 : i32
    return %arg0, %c0_i32, %c0_i32_0, %arg1 : i32, i32, i32, i32
  }
  func.func @transform_1(%arg0: i32, %arg1: i32) -> (i32, i32, i32, i32) {
    %c0_i32 = arith.constant 0 : i32
    %c0_i32_0 = arith.constant 0 : i32
    %c0_i32_1 = arith.constant 0 : i32
    return %arg0, %c0_i32, %c0_i32_0, %arg1 : i32, i32, i32, i32
  }
}

module attributes {stable_mosaic.version = 11 : i64} {
  func.func @kernel(%arg0: i32, %arg1: i32, %arg2: i32, %arg3: memref<64x384xbf16, #tpu.memory_space<vmem>>, %arg4: memref<384x128xbf16, #tpu.memory_space<vmem>>, %arg5: memref<1x128xf32, #tpu.memory_space<vmem>>, %arg6: memref<64x128xf32, #tpu.memory_space<vmem>>, %arg7: memref<64x128xf32, #tpu.memory_space<vmem>>) attributes {dimension_semantics = [#tpu.dimension_semantics<parallel>, #tpu.dimension_semantics<parallel>, #tpu.dimension_semantics<arbitrary>], iteration_bounds = array<i64: 1, 1, 1>, scalar_prefetch = 0 : i64, scratch_operands = 1 : i64, tpu.core_type = #tpu.core_type<tc>, window_params = [{transform_indices = @transform_0, window_bounds = array<i64: 64, 384>}, {transform_indices = @transform_1, window_bounds = array<i64: 384, 128>}, {transform_indices = @transform_2, window_bounds = array<i64: 1, 128>}, {transform_indices = @transform_3, window_bounds = array<i64: 64, 128>}]} {
    %c0_i32 = arith.constant 0 : i32
    %0 = arith.cmpi eq, %arg2, %c0_i32 : i32
    %1 = arith.extui %0 : i1 to i32
    %c0_i32_0 = arith.constant 0 : i32
    %2 = arith.cmpi ne, %1, %c0_i32_0 : i32
    scf.if %2 {
      %cst_10 = arith.constant 0.000000e+00 : f32
      %12 = vector.broadcast %cst_10 : f32 to vector<64x128xf32>
      %c0_11 = arith.constant 0 : index
      %c0_12 = arith.constant 0 : index
      %13 = vector.load %arg7[%c0_11, %c0_12] : memref<64x128xf32, #tpu.memory_space<vmem>>, vector<64x128xf32>
      tpu.vector_store %arg7[%c0_11, %c0_12], %12 {strides = array<i32>} : memref<64x128xf32, #tpu.memory_space<vmem>>, vector<64x128xf32>,
    } else {
    }
    %c0 = arith.constant 0 : index
    %c0_1 = arith.constant 0 : index
    %3 = vector.load %arg7[%c0, %c0_1] : memref<64x128xf32, #tpu.memory_space<vmem>>, vector<64x128xf32>
    %c0_2 = arith.constant 0 : index
    %c0_3 = arith.constant 0 : index
    %4 = vector.load %arg3[%c0_2, %c0_3] : memref<64x384xbf16, #tpu.memory_space<vmem>>, vector<64x384xbf16>
    %c0_4 = arith.constant 0 : index
    %c0_5 = arith.constant 0 : index
    %5 = vector.load %arg4[%c0_4, %c0_5] : memref<384x128xbf16, #tpu.memory_space<vmem>>, vector<384x128xbf16>
    %cst = arith.constant dense<0.000000e+00> : vector<64x128xf32>
    %6 = tpu.matmul %4, %5, %cst {dimension_numbers = #tpu.dot_dimension_numbers<[1], [0], [0], [1], [0, 0, 1, 1], [], []>} : vector<64x384xbf16>, vector<384x128xbf16>, vector<64x128xf32> -> vector<64x128xf32>
    %7 = arith.addf %3, %6 : vector<64x128xf32>
    %c0_6 = arith.constant 0 : index
    %c0_7 = arith.constant 0 : index
    %8 = vector.load %arg7[%c0_6, %c0_7] : memref<64x128xf32, #tpu.memory_space<vmem>>, vector<64x128xf32>
    tpu.vector_store %arg7[%c0_6, %c0_7], %7 {strides = array<i32>} : memref<64x128xf32, #tpu.memory_space<vmem>>, vector<64x128xf32>,
    %c0_i32_8 = arith.constant 0 : i32
    %9 = arith.cmpi eq, %arg2, %c0_i32_8 : i32
    %10 = arith.extui %9 : i1 to i32
    %c0_i32_9 = arith.constant 0 : i32
    %11 = arith.cmpi ne, %10, %c0_i32_9 : i32
    scf.if %11 {
      %c0_10 = arith.constant 0 : index
      %c0_11 = arith.constant 0 : index
      %12 = vector.load %arg7[%c0_10, %c0_11] : memref<64x128xf32, #tpu.memory_space<vmem>>, vector<64x128xf32>
      %c0_12 = arith.constant 0 : index
      %c0_13 = arith.constant 0 : index
      %13 = vector.load %arg5[%c0_12, %c0_13] : memref<1x128xf32, #tpu.memory_space<vmem>>, vector<1x128xf32>
      %14 = vector.broadcast %13 : vector<1x128xf32> to vector<64x128xf32>
      %15 = arith.addf %12, %14 : vector<64x128xf32>
      %cst_14 = arith.constant 0.000000e+00 : f32
      %16 = vector.broadcast %cst_14 : f32 to vector<64x128xf32>
      %17 = arith.cmpf oge, %15, %16 : vector<64x128xf32>
      %cst_15 = arith.constant 2.000000e-01 : f32
      %18 = vector.broadcast %cst_15 : f32 to vector<64x128xf32>
      %19 = arith.mulf %18, %15 : vector<64x128xf32>
      %20 = arith.select %17, %15, %19 : vector<64x128xi1>, vector<64x128xf32>
      %cst_16 = arith.constant 1.41421354 : f32
      %21 = vector.broadcast %cst_16 : f32 to vector<64x128xf32>
      %22 = arith.mulf %20, %21 : vector<64x128xf32>
      %cst_17 = arith.constant 1.000000e+00 : f32
      %23 = vector.broadcast %cst_17 : f32 to vector<64x128xf32>
      %24 = arith.mulf %22, %23 : vector<64x128xf32>
      %c0_18 = arith.constant 0 : index
      %c0_19 = arith.constant 0 : index
      %25 = vector.load %arg6[%c0_18, %c0_19] : memref<64x128xf32, #tpu.memory_space<vmem>>, vector<64x128xf32>
      tpu.vector_store %arg6[%c0_18, %c0_19], %24 {strides = array<i32>} : memref<64x128xf32, #tpu.memory_space<vmem>>, vector<64x128xf32>,
    } else {
    }
    return
  }
  func.func @transform_0(%arg0: i32, %arg1: i32, %arg2: i32) -> (i32, i32) {
    %c0_i32 = arith.constant 0 : i32
    return %arg0, %arg2 : i32, i32
  }
  func.func @transform_1(%arg0: i32, %arg1: i32, %arg2: i32) -> (i32, i32) {
    %c0_i32 = arith.constant 0 : i32
    return %arg2, %arg1 : i32, i32
  }
  func.func @transform_2(%arg0: i32, %arg1: i32, %arg2: i32) -> (i32, i32) {
    %c0_i32 = arith.constant 0 : i32
    %c0_i32_0 = arith.constant 0 : i32
    return %c0_i32, %arg1 : i32, i32
  }
  func.func @transform_3(%arg0: i32, %arg1: i32, %arg2: i32) -> (i32, i32) {
    %c0_i32 = arith.constant 0 : i32
    return %arg0, %arg1 : i32, i32
  }
}

module attributes {stable_mosaic.version = 11 : i64} {
  func.func @kernel(%arg0: i32, %arg1: i32, %arg2: i32, %arg3: memref<64x128xbf16, #tpu.memory_space<vmem>>, %arg4: memref<128x128xbf16, #tpu.memory_space<vmem>>, %arg5: memref<1x128xf32, #tpu.memory_space<vmem>>, %arg6: memref<64x128xf32, #tpu.memory_space<vmem>>, %arg7: memref<64x128xf32, #tpu.memory_space<vmem>>, %arg8: memref<64x128xf32, #tpu.memory_space<vmem>>) attributes {dimension_semantics = [#tpu.dimension_semantics<parallel>, #tpu.dimension_semantics<parallel>, #tpu.dimension_semantics<arbitrary>], iteration_bounds = array<i64: 1, 1, 1>, scalar_prefetch = 0 : i64, scratch_operands = 1 : i64, tpu.core_type = #tpu.core_type<tc>, window_params = [{transform_indices = @transform_0, window_bounds = array<i64: 64, 128>}, {transform_indices = @transform_1, window_bounds = array<i64: 128, 128>}, {transform_indices = @transform_2, window_bounds = array<i64: 1, 128>}, {transform_indices = @transform_3, window_bounds = array<i64: 64, 128>}, {transform_indices = @transform_4, window_bounds = array<i64: 64, 128>}]} {
    %c0_i32 = arith.constant 0 : i32
    %0 = arith.cmpi eq, %arg2, %c0_i32 : i32
    %1 = arith.extui %0 : i1 to i32
    %c0_i32_0 = arith.constant 0 : i32
    %2 = arith.cmpi ne, %1, %c0_i32_0 : i32
    scf.if %2 {
      %cst_10 = arith.constant 0.000000e+00 : f32
      %12 = vector.broadcast %cst_10 : f32 to vector<64x128xf32>
      %c0_11 = arith.constant 0 : index
      %c0_12 = arith.constant 0 : index
      %13 = vector.load %arg8[%c0_11, %c0_12] : memref<64x128xf32, #tpu.memory_space<vmem>>, vector<64x128xf32>
      tpu.vector_store %arg8[%c0_11, %c0_12], %12 {strides = array<i32>} : memref<64x128xf32, #tpu.memory_space<vmem>>, vector<64x128xf32>,
    } else {
    }
    %c0 = arith.constant 0 : index
    %c0_1 = arith.constant 0 : index
    %3 = vector.load %arg8[%c0, %c0_1] : memref<64x128xf32, #tpu.memory_space<vmem>>, vector<64x128xf32>
    %c0_2 = arith.constant 0 : index
    %c0_3 = arith.constant 0 : index
    %4 = vector.load %arg3[%c0_2, %c0_3] : memref<64x128xbf16, #tpu.memory_space<vmem>>, vector<64x128xbf16>
    %c0_4 = arith.constant 0 : index
    %c0_5 = arith.constant 0 : index
    %5 = vector.load %arg4[%c0_4, %c0_5] : memref<128x128xbf16, #tpu.memory_space<vmem>>, vector<128x128xbf16>
    %cst = arith.constant dense<0.000000e+00> : vector<64x128xf32>
    %6 = tpu.matmul %4, %5, %cst {dimension_numbers = #tpu.dot_dimension_numbers<[1], [0], [0], [1], [0, 0, 1, 1], [], []>} : vector<64x128xbf16>, vector<128x128xbf16>, vector<64x128xf32> -> vector<64x128xf32>
    %7 = arith.addf %3, %6 : vector<64x128xf32>
    %c0_6 = arith.constant 0 : index
    %c0_7 = arith.constant 0 : index
    %8 = vector.load %arg8[%c0_6, %c0_7] : memref<64x128xf32, #tpu.memory_space<vmem>>, vector<64x128xf32>
    tpu.vector_store %arg8[%c0_6, %c0_7], %7 {strides = array<i32>} : memref<64x128xf32, #tpu.memory_space<vmem>>, vector<64x128xf32>,
    %c0_i32_8 = arith.constant 0 : i32
    %9 = arith.cmpi eq, %arg2, %c0_i32_8 : i32
    %10 = arith.extui %9 : i1 to i32
    %c0_i32_9 = arith.constant 0 : i32
    %11 = arith.cmpi ne, %10, %c0_i32_9 : i32
    scf.if %11 {
      %c0_10 = arith.constant 0 : index
      %c0_11 = arith.constant 0 : index
      %12 = vector.load %arg8[%c0_10, %c0_11] : memref<64x128xf32, #tpu.memory_space<vmem>>, vector<64x128xf32>
      %c0_12 = arith.constant 0 : index
      %c0_13 = arith.constant 0 : index
      %13 = vector.load %arg5[%c0_12, %c0_13] : memref<1x128xf32, #tpu.memory_space<vmem>>, vector<1x128xf32>
      %14 = vector.broadcast %13 : vector<1x128xf32> to vector<64x128xf32>
      %15 = arith.addf %12, %14 : vector<64x128xf32>
      %c0_14 = arith.constant 0 : index
      %c0_15 = arith.constant 0 : index
      %16 = vector.load %arg6[%c0_14, %c0_15] : memref<64x128xf32, #tpu.memory_space<vmem>>, vector<64x128xf32>
      %17 = arith.addf %15, %16 : vector<64x128xf32>
      %cst_16 = arith.constant 0.707106769 : f32
      %18 = vector.broadcast %cst_16 : f32 to vector<64x128xf32>
      %19 = arith.mulf %17, %18 : vector<64x128xf32>
      %c0_17 = arith.constant 0 : index
      %c0_18 = arith.constant 0 : index
      %20 = vector.load %arg7[%c0_17, %c0_18] : memref<64x128xf32, #tpu.memory_space<vmem>>, vector<64x128xf32>
      tpu.vector_store %arg7[%c0_17, %c0_18], %19 {strides = array<i32>} : memref<64x128xf32, #tpu.memory_space<vmem>>, vector<64x128xf32>,
    } else {
    }
    return
  }
  func.func @transform_0(%arg0: i32, %arg1: i32, %arg2: i32) -> (i32, i32) {
    %c0_i32 = arith.constant 0 : i32
    return %arg0, %arg2 : i32, i32
  }
  func.func @transform_1(%arg0: i32, %arg1: i32, %arg2: i32) -> (i32, i32) {
    %c0_i32 = arith.constant 0 : i32
    return %arg2, %arg1 : i32, i32
  }
  func.func @transform_2(%arg0: i32, %arg1: i32, %arg2: i32) -> (i32, i32) {
    %c0_i32 = arith.constant 0 : i32
    %c0_i32_0 = arith.constant 0 : i32
    return %c0_i32, %arg1 : i32, i32
  }
  func.func @transform_3(%arg0: i32, %arg1: i32, %arg2: i32) -> (i32, i32) {
    %c0_i32 = arith.constant 0 : i32
    return %arg0, %arg1 : i32, i32
  }
  func.func @transform_4(%arg0: i32, %arg1: i32, %arg2: i32) -> (i32, i32) {
    %c0_i32 = arith.constant 0 : i32
    return %arg0, %arg1 : i32, i32
  }
}

module attributes {stable_mosaic.version = 11 : i64} {
  func.func @kernel(%arg0: i32, %arg1: i32, %arg2: i32, %arg3: memref<16x512xbf16, #tpu.memory_space<vmem>>, %arg4: memref<512x128xbf16, #tpu.memory_space<vmem>>, %arg5: memref<1x128xf32, #tpu.memory_space<vmem>>, %arg6: memref<16x128xf32, #tpu.memory_space<vmem>>, %arg7: memref<16x128xf32, #tpu.memory_space<vmem>>) attributes {dimension_semantics = [#tpu.dimension_semantics<parallel>, #tpu.dimension_semantics<parallel>, #tpu.dimension_semantics<arbitrary>], iteration_bounds = array<i64: 1, 1, 1>, scalar_prefetch = 0 : i64, scratch_operands = 1 : i64, tpu.core_type = #tpu.core_type<tc>, window_params = [{transform_indices = @transform_0, window_bounds = array<i64: 16, 512>}, {transform_indices = @transform_1, window_bounds = array<i64: 512, 128>}, {transform_indices = @transform_2, window_bounds = array<i64: 1, 128>}, {transform_indices = @transform_3, window_bounds = array<i64: 16, 128>}]} {
    %c0_i32 = arith.constant 0 : i32
    %0 = arith.cmpi eq, %arg2, %c0_i32 : i32
    %1 = arith.extui %0 : i1 to i32
    %c0_i32_0 = arith.constant 0 : i32
    %2 = arith.cmpi ne, %1, %c0_i32_0 : i32
    scf.if %2 {
      %cst_10 = arith.constant 0.000000e+00 : f32
      %12 = vector.broadcast %cst_10 : f32 to vector<16x128xf32>
      %c0_11 = arith.constant 0 : index
      %c0_12 = arith.constant 0 : index
      %13 = vector.load %arg7[%c0_11, %c0_12] : memref<16x128xf32, #tpu.memory_space<vmem>>, vector<16x128xf32>
      tpu.vector_store %arg7[%c0_11, %c0_12], %12 {strides = array<i32>} : memref<16x128xf32, #tpu.memory_space<vmem>>, vector<16x128xf32>,
    } else {
    }
    %c0 = arith.constant 0 : index
    %c0_1 = arith.constant 0 : index
    %3 = vector.load %arg7[%c0, %c0_1] : memref<16x128xf32, #tpu.memory_space<vmem>>, vector<16x128xf32>
    %c0_2 = arith.constant 0 : index
    %c0_3 = arith.constant 0 : index
    %4 = vector.load %arg3[%c0_2, %c0_3] : memref<16x512xbf16, #tpu.memory_space<vmem>>, vector<16x512xbf16>
    %c0_4 = arith.constant 0 : index
    %c0_5 = arith.constant 0 : index
    %5 = vector.load %arg4[%c0_4, %c0_5] : memref<512x128xbf16, #tpu.memory_space<vmem>>, vector<512x128xbf16>
    %cst = arith.constant dense<0.000000e+00> : vector<16x128xf32>
    %6 = tpu.matmul %4, %5, %cst {dimension_numbers = #tpu.dot_dimension_numbers<[1], [0], [0], [1], [0, 0, 1, 1], [], []>} : vector<16x512xbf16>, vector<512x128xbf16>, vector<16x128xf32> -> vector<16x128xf32>
    %7 = arith.addf %3, %6 : vector<16x128xf32>
    %c0_6 = arith.constant 0 : index
    %c0_7 = arith.constant 0 : index
    %8 = vector.load %arg7[%c0_6, %c0_7] : memref<16x128xf32, #tpu.memory_space<vmem>>, vector<16x128xf32>
    tpu.vector_store %arg7[%c0_6, %c0_7], %7 {strides = array<i32>} : memref<16x128xf32, #tpu.memory_space<vmem>>, vector<16x128xf32>,
    %c0_i32_8 = arith.constant 0 : i32
    %9 = arith.cmpi eq, %arg2, %c0_i32_8 : i32
    %10 = arith.extui %9 : i1 to i32
    %c0_i32_9 = arith.constant 0 : i32
    %11 = arith.cmpi ne, %10, %c0_i32_9 : i32
    scf.if %11 {
      %c0_10 = arith.constant 0 : index
      %c0_11 = arith.constant 0 : index
      %12 = vector.load %arg7[%c0_10, %c0_11] : memref<16x128xf32, #tpu.memory_space<vmem>>, vector<16x128xf32>
      %c0_12 = arith.constant 0 : index
      %c0_13 = arith.constant 0 : index
      %13 = vector.load %arg5[%c0_12, %c0_13] : memref<1x128xf32, #tpu.memory_space<vmem>>, vector<1x128xf32>
      %14 = vector.broadcast %13 : vector<1x128xf32> to vector<16x128xf32>
      %15 = arith.addf %12, %14 : vector<16x128xf32>
      %cst_14 = arith.constant 0.000000e+00 : f32
      %16 = vector.broadcast %cst_14 : f32 to vector<16x128xf32>
      %17 = arith.cmpf oge, %15, %16 : vector<16x128xf32>
      %cst_15 = arith.constant 2.000000e-01 : f32
      %18 = vector.broadcast %cst_15 : f32 to vector<16x128xf32>
      %19 = arith.mulf %18, %15 : vector<16x128xf32>
      %20 = arith.select %17, %15, %19 : vector<16x128xi1>, vector<16x128xf32>
      %cst_16 = arith.constant 1.41421354 : f32
      %21 = vector.broadcast %cst_16 : f32 to vector<16x128xf32>
      %22 = arith.mulf %20, %21 : vector<16x128xf32>
      %cst_17 = arith.constant 1.000000e+00 : f32
      %23 = vector.broadcast %cst_17 : f32 to vector<16x128xf32>
      %24 = arith.mulf %22, %23 : vector<16x128xf32>
      %c0_18 = arith.constant 0 : index
      %c0_19 = arith.constant 0 : index
      %25 = vector.load %arg6[%c0_18, %c0_19] : memref<16x128xf32, #tpu.memory_space<vmem>>, vector<16x128xf32>
      tpu.vector_store %arg6[%c0_18, %c0_19], %24 {strides = array<i32>} : memref<16x128xf32, #tpu.memory_space<vmem>>, vector<16x128xf32>,
    } else {
    }
    return
  }
  func.func @transform_0(%arg0: i32, %arg1: i32, %arg2: i32) -> (i32, i32) {
    %c0_i32 = arith.constant 0 : i32
    return %arg0, %arg2 : i32, i32
  }
  func.func @transform_1(%arg0: i32, %arg1: i32, %arg2: i32) -> (i32, i32) {
    %c0_i32 = arith.constant 0 : i32
    return %arg2, %arg1 : i32, i32
  }
  func.func @transform_2(%arg0: i32, %arg1: i32, %arg2: i32) -> (i32, i32) {
    %c0_i32 = arith.constant 0 : i32
    %c0_i32_0 = arith.constant 0 : i32
    return %c0_i32, %arg1 : i32, i32
  }
  func.func @transform_3(%arg0: i32, %arg1: i32, %arg2: i32) -> (i32, i32) {
    %c0_i32 = arith.constant 0 : i32
    return %arg0, %arg1 : i32, i32
  }
}

module attributes {stable_mosaic.version = 11 : i64} {
  func.func @kernel(%arg0: i32, %arg1: i32, %arg2: i32, %arg3: memref<16x128xbf16, #tpu.memory_space<vmem>>, %arg4: memref<128x128xbf16, #tpu.memory_space<vmem>>, %arg5: memref<1x128xf32, #tpu.memory_space<vmem>>, %arg6: memref<16x128xf32, #tpu.memory_space<vmem>>, %arg7: memref<16x128xf32, #tpu.memory_space<vmem>>) attributes {dimension_semantics = [#tpu.dimension_semantics<parallel>, #tpu.dimension_semantics<parallel>, #tpu.dimension_semantics<arbitrary>], iteration_bounds = array<i64: 1, 1, 1>, scalar_prefetch = 0 : i64, scratch_operands = 1 : i64, tpu.core_type = #tpu.core_type<tc>, window_params = [{transform_indices = @transform_0, window_bounds = array<i64: 16, 128>}, {transform_indices = @transform_1, window_bounds = array<i64: 128, 128>}, {transform_indices = @transform_2, window_bounds = array<i64: 1, 128>}, {transform_indices = @transform_3, window_bounds = array<i64: 16, 128>}]} {
    %c0_i32 = arith.constant 0 : i32
    %0 = arith.cmpi eq, %arg2, %c0_i32 : i32
    %1 = arith.extui %0 : i1 to i32
    %c0_i32_0 = arith.constant 0 : i32
    %2 = arith.cmpi ne, %1, %c0_i32_0 : i32
    scf.if %2 {
      %cst_10 = arith.constant 0.000000e+00 : f32
      %12 = vector.broadcast %cst_10 : f32 to vector<16x128xf32>
      %c0_11 = arith.constant 0 : index
      %c0_12 = arith.constant 0 : index
      %13 = vector.load %arg7[%c0_11, %c0_12] : memref<16x128xf32, #tpu.memory_space<vmem>>, vector<16x128xf32>
      tpu.vector_store %arg7[%c0_11, %c0_12], %12 {strides = array<i32>} : memref<16x128xf32, #tpu.memory_space<vmem>>, vector<16x128xf32>,
    } else {
    }
    %c0 = arith.constant 0 : index
    %c0_1 = arith.constant 0 : index
    %3 = vector.load %arg7[%c0, %c0_1] : memref<16x128xf32, #tpu.memory_space<vmem>>, vector<16x128xf32>
    %c0_2 = arith.constant 0 : index
    %c0_3 = arith.constant 0 : index
    %4 = vector.load %arg3[%c0_2, %c0_3] : memref<16x128xbf16, #tpu.memory_space<vmem>>, vector<16x128xbf16>
    %c0_4 = arith.constant 0 : index
    %c0_5 = arith.constant 0 : index
    %5 = vector.load %arg4[%c0_4, %c0_5] : memref<128x128xbf16, #tpu.memory_space<vmem>>, vector<128x128xbf16>
    %cst = arith.constant dense<0.000000e+00> : vector<16x128xf32>
    %6 = tpu.matmul %4, %5, %cst {dimension_numbers = #tpu.dot_dimension_numbers<[1], [0], [0], [1], [0, 0, 1, 1], [], []>} : vector<16x128xbf16>, vector<128x128xbf16>, vector<16x128xf32> -> vector<16x128xf32>
    %7 = arith.addf %3, %6 : vector<16x128xf32>
    %c0_6 = arith.constant 0 : index
    %c0_7 = arith.constant 0 : index
    %8 = vector.load %arg7[%c0_6, %c0_7] : memref<16x128xf32, #tpu.memory_space<vmem>>, vector<16x128xf32>
    tpu.vector_store %arg7[%c0_6, %c0_7], %7 {strides = array<i32>} : memref<16x128xf32, #tpu.memory_space<vmem>>, vector<16x128xf32>,
    %c0_i32_8 = arith.constant 0 : i32
    %9 = arith.cmpi eq, %arg2, %c0_i32_8 : i32
    %10 = arith.extui %9 : i1 to i32
    %c0_i32_9 = arith.constant 0 : i32
    %11 = arith.cmpi ne, %10, %c0_i32_9 : i32
    scf.if %11 {
      %c0_10 = arith.constant 0 : index
      %c0_11 = arith.constant 0 : index
      %12 = vector.load %arg7[%c0_10, %c0_11] : memref<16x128xf32, #tpu.memory_space<vmem>>, vector<16x128xf32>
      %c0_12 = arith.constant 0 : index
      %c0_13 = arith.constant 0 : index
      %13 = vector.load %arg5[%c0_12, %c0_13] : memref<1x128xf32, #tpu.memory_space<vmem>>, vector<1x128xf32>
      %14 = vector.broadcast %13 : vector<1x128xf32> to vector<16x128xf32>
      %15 = arith.addf %12, %14 : vector<16x128xf32>
      %cst_14 = arith.constant 1.000000e+00 : f32
      %16 = vector.broadcast %cst_14 : f32 to vector<16x128xf32>
      %17 = arith.mulf %15, %16 : vector<16x128xf32>
      %c0_15 = arith.constant 0 : index
      %c0_16 = arith.constant 0 : index
      %18 = vector.load %arg6[%c0_15, %c0_16] : memref<16x128xf32, #tpu.memory_space<vmem>>, vector<16x128xf32>
      tpu.vector_store %arg6[%c0_15, %c0_16], %17 {strides = array<i32>} : memref<16x128xf32, #tpu.memory_space<vmem>>, vector<16x128xf32>,
    } else {
    }
    return
  }
  func.func @transform_0(%arg0: i32, %arg1: i32, %arg2: i32) -> (i32, i32) {
    %c0_i32 = arith.constant 0 : i32
    return %arg0, %arg2 : i32, i32
  }
  func.func @transform_1(%arg0: i32, %arg1: i32, %arg2: i32) -> (i32, i32) {
    %c0_i32 = arith.constant 0 : i32
    return %arg2, %arg1 : i32, i32
  }
  func.func @transform_2(%arg0: i32, %arg1: i32, %arg2: i32) -> (i32, i32) {
    %c0_i32 = arith.constant 0 : i32
    %c0_i32_0 = arith.constant 0 : i32
    return %c0_i32, %arg1 : i32, i32
  }
  func.func @transform_3(%arg0: i32, %arg1: i32, %arg2: i32) -> (i32, i32) {
    %c0_i32 = arith.constant 0 : i32
    return %arg0, %arg1 : i32, i32
  }
}

</mosaic_0001>

<bundles_post_ra>
// kernel: discriminator_forward.14
= control target key start
LH: loop header
LB: loop body
LE: loop exit
PB: predicated region body
PF: predicated region fallthrough
CT: control target
= control target key end

     0   :  { %s1308_s12 = smov 0   ;;  %s1310_s13 = smov 0   ;;  %s1480_s0 = inlined_call_operand.vmem [shape: bf16[1024,128], index: 0, kind: input, shape index: {}]   ;;  %s1481_s1 = inlined_call_operand.vmem [shape: bf16[128,128], index: 1, kind: input, shape index: {}]   ;;  %s1482_s2 = inlined_call_operand.vmem [shape: f32[1,128], index: 2, kind: input, shape index: {}]   ;;  %s1483_s3 = inlined_call_operand.vmem [shape: f32[1024,128], index: 3, kind: output, shape index: {}]  }
   0x1   :  { %s1312_s14 = smov 0  }
   0x2 LB: > { %s32_s15 = sadd.s32 1, %s1282_s13  ;;  %p1096_p0 = scmp.ge.s32.totalorder %s1286_s14, 1  ;;  %s1286_s14 = sphi %s1312_s14, %s13_s14   ;;  %s1282_s13 = sphi %s1310_s13, %s1485_s13   ;;  %s1278_s12 = sphi %s1308_s12, %s1484_s12  }
   0x3   : > { %p34_p1 = scmp.ge.s32.totalorder %s32_s15, 4  ;;  %p188_p2 = scmp.lt.s32.totalorder %s1286_s14, 5 }
   0x5   : > { %s1487_s15 = smov (%p34_p1, %s32_s15), 0  ;;  %p189_p3 = pnand %p1096_p0, %p188_p2 }
   0x6   : > { %s1097_s18 = sshll.u32 (!%p189_p3), %s1278_s12, 5 }
   0x7   : > { %192 = sbr.rel (%p189_p3) target bundleno = 284 (0x11c), region = 32  ;;  %p230_p4 = scmp.lt.s32.totalorder (!%p189_p3), %s1097_s18, 127 }
   0xc   : > { %v1240_v0 = vld [vmem:[%s1481_s1 + $0x38] sm:$0xff]   ;;  %v1241_v1 = vld [vmem:[%s1481_s1 + $0x30] sm:$0xff]   ;;  %s1489_s18 = smov (!%p230_p4, %s1097_s18), 127  ;;  %v1242_v2 = vld [vmem:[%s1481_s1 + $0x28] sm:$0xff]  }
   0xd   : > { %1152 = vmatprep.subr.bf16.mxu0 %v1240_v0  ;;  %1200 = vmatprep.subr.bf16.mxu1 %v1240_v0  ;;  %s1098_s23 = sshll.u32 %s1489_s18, 2  ;;  %v1243_v3 = vld [vmem:[%s1481_s1 + $0x20] sm:$0xff]   ;;  %v1244_v6 = vld [vmem:[%s1481_s1 + $0x18] sm:$0xff]   ;;  %v1245_v7 = vld [vmem:[%s1481_s1 + $0x10] sm:$0xff]   ;;  %s1100_s12 = sshll.u32 %s1489_s18, 3 }
   0xe   : > { %1153 = vmatpush3.bf16.msra.mxu0 %v1240_v0  ;;  %1208 = vmatpush3.bf16.msra.mxu1 %v1240_v0  ;;  %s1341_s26 = scalar_lea.vmem %s1480_s0, %s1098_s23  ;;  %v1246_v8 = vld [vmem:[%s1481_s1 + $0x8] sm:$0xff]   ;;  %v1247_v9 = vld [vmem:[%s1481_s1] sm:$0xff]   ;;  %s1387_s19 = scalar_lea.vmem %s1483_s3, %s1100_s12 }
   0xf   : > { %1154 = vmatprep.subr.bf16.mxu0 %v1241_v1  ;;  %1201 = vmatprep.subr.bf16.mxu1 %v1241_v1  ;;  %v1248_v4 = vld [vmem:[%s1341_s26] sm:$0xff]   ;;  %v1250_v10 = vld [vmem:[%s1341_s26 + $0x8] sm:$0xff]   ;;  %v1252_v12 = vld [vmem:[%s1341_s26 + $0x10] sm:$0xff]  }
  0x10   : > { %v1249_v5 = vld [vmem:[%s1341_s26 + $0x40] sm:$0xff]   ;;  %1168 = vmatprep.mubr.bf16.mxu0 %v1248_v4  ;;  %v1251_v11 = vld [vmem:[%s1341_s26 + $0x48] sm:$0xff]   ;;  %v1253_v13 = vld [vmem:[%s1341_s26 + $0x50] sm:$0xff]  }
  0x11   : > { %1184 = vmatprep.mubr.bf16.mxu1 %v1249_v5  ;;  %v1254_v14 = vld [vmem:[%s1341_s26 + $0x18] sm:$0xff]   ;;  %v1256_v16 = vld [vmem:[%s1341_s26 + $0x20] sm:$0xff]   ;;  %v1258_v18 = vld [vmem:[%s1341_s26 + $0x28] sm:$0xff]  }
  0x12   : > { %1155 = vmatpush3.bf16.msra.mxu0 %v1241_v1  ;;  %1209 = vmatpush3.bf16.msra.mxu1 %v1241_v1  ;;  %v1255_v15 = vld [vmem:[%s1341_s26 + $0x58] sm:$0xff]   ;;  %v1257_v17 = vld [vmem:[%s1341_s26 + $0x60] sm:$0xff]   ;;  %v1259_v19 = vld [vmem:[%s1341_s26 + $0x68] sm:$0xff]  }
  0x13   : > { %1156 = vmatprep.subr.bf16.mxu0 %v1242_v2  ;;  %1202 = vmatprep.subr.bf16.mxu1 %v1242_v2  ;;  %v1260_v20 = vld [vmem:[%s1341_s26 + $0x30] sm:$0xff]   ;;  %v1262_v22 = vld [vmem:[%s1341_s26 + $0x38] sm:$0xff]   ;;  %v1377_v24 = vld [vmem:[%s1482_s2] ss:$0 sm:$0xff] }
  0x14   : > { %v1261_v21 = vld [vmem:[%s1341_s26 + $0x70] sm:$0xff]   ;;  %v1263_v23 = vld [vmem:[%s1341_s26 + $0x78] sm:$0xff]  }
  0x16   : > { %1157 = vmatpush3.bf16.msra.mxu0 %v1242_v2  ;;  %1210 = vmatpush3.bf16.msra.mxu1 %v1242_v2 }
  0x17   : > { %1158 = vmatprep.subr.bf16.mxu0 %v1243_v3  ;;  %1203 = vmatprep.subr.bf16.mxu1 %v1243_v3 }
  0x1a   : > { %1159 = vmatpush3.bf16.msra.mxu0 %v1243_v3  ;;  %1211 = vmatpush3.bf16.msra.mxu1 %v1243_v3 }
  0x1b   : > { %1160 = vmatprep.subr.bf16.mxu0 %v1244_v6  ;;  %1204 = vmatprep.subr.bf16.mxu1 %v1244_v6 }
  0x1e   : > { %1161 = vmatpush3.bf16.msra.mxu0 %v1244_v6  ;;  %1212 = vmatpush3.bf16.msra.mxu1 %v1244_v6 }
  0x1f   : > { %1162 = vmatprep.subr.bf16.mxu0 %v1245_v7  ;;  %1205 = vmatprep.subr.bf16.mxu1 %v1245_v7 }
  0x22   : > { %1163 = vmatpush3.bf16.msra.mxu0 %v1245_v7  ;;  %1213 = vmatpush3.bf16.msra.mxu1 %v1245_v7 }
  0x23   : > { %1164 = vmatprep.subr.bf16.mxu0 %v1246_v8  ;;  %1206 = vmatprep.subr.bf16.mxu1 %v1246_v8 }
  0x26   : > { %1165 = vmatpush3.bf16.msra.mxu0 %v1246_v8  ;;  %1214 = vmatpush3.bf16.msra.mxu1 %v1246_v8 }
  0x27   : > { %1166 = vmatprep.subr.bf16.mxu0 %v1247_v9  ;;  %1207 = vmatprep.subr.bf16.mxu1 %v1247_v9 }
  0x2a   : > { %1167 = vmatpush3.bf16.msra.mxu0 %v1247_v9  ;;  %1215 = vmatpush3.bf16.msra.mxu1 %v1247_v9 }
  0x2d   : > { %1169 = vmatmul.mubr.bf16.vlgmr.msra.gmra.mxu0 %v1250_v10  ;;  %1185 = vmatmul.mubr.bf16.vlgmr.msra.gmra.mxu1 %v1251_v11 }
  0x2e   : > { %1172 = vmatprep.mubr.bf16.mxu0 %v1252_v12  ;;  %1188 = vmatprep.mubr.bf16.mxu1 %v1253_v13 }
  0x35   : > { %1173 = vmatmul.mubr.bf16.gmra.mxu0 %v1254_v14  ;;  %1189 = vmatmul.mubr.bf16.gmra.mxu1 %v1255_v15 }
  0x36   : > { %1176 = vmatprep.mubr.bf16.mxu0 %v1256_v16  ;;  %1192 = vmatprep.mubr.bf16.mxu1 %v1257_v17 }
  0x3d   : > { %1177 = vmatmul.mubr.bf16.gmra.mxu0 %v1258_v18  ;;  %1193 = vmatmul.mubr.bf16.gmra.mxu1 %v1259_v19 }
  0x3e   : > { %1180 = vmatprep.mubr.bf16.mxu0 %v1260_v20  ;;  %1196 = vmatprep.mubr.bf16.mxu1 %v1261_v21 }
  0x45   : > { %1181 = vmatmul.mubr.bf16.gmra.mxu0 %v1262_v22  ;;  %1197 = vmatmul.mubr.bf16.gmra.mxu1 %v1263_v23 }
  0xed   : > { %v1170_v25 = vpop.f32.mrf.mxu0  ;;  %v1186_v26 = vpop.f32.mrf.mxu1 }
  0xee   : > { %v789_v27 = vadd.f32 %v1170_v25, %v1377_v24  ;;  %v805_v28 = vadd.f32 %v1186_v26, %v1377_v24 }
  0xef   : > { %v554_v29 = vpop.f32.mrf.mxu0  ;;  %v618_v30 = vpop.f32.mrf.mxu1 }
  0xf0   : > { %vm821_vm0 = vcmp.ge.f32.partialorder %v789_v27, 0.0  ;;  %v853_v31 = vmul.f32 0.2, %v789_v27  ;;  %vm837_vm1 = vcmp.ge.f32.partialorder %v805_v28, 0.0  ;;  %v869_v32 = vmul.f32 0.2, %v805_v28 }
  0xf1   : > { %v787_v33 = vadd.f32 %v1377_v24, %v554_v29  ;;  %v803_v34 = vadd.f32 %v1377_v24, %v618_v30  ;;  %v1171_v35 = vpop.f32.mrf.mxu0  ;;  %v1187_v36 = vpop.f32.mrf.mxu1 }
  0xf2   : > { %v885_v37 = vsel %vm821_vm0, %v789_v27, %v853_v31  ;;  %v901_v38 = vsel %vm837_vm1, %v805_v28, %v869_v32  ;;  %v790_v39 = vadd.f32 %v1171_v35, %v1377_v24  ;;  %v806_v40 = vadd.f32 %v1187_v36, %v1377_v24 }
  0xf3   : > { %v917_v41 = vmul.f32 1.4142135, %v885_v37  ;;  %v933_v42 = vmul.f32 1.4142135, %v901_v38  ;;  %vm819_vm2 = vcmp.ge.f32.partialorder %v787_v33, 0.0  ;;  %vm835_vm3 = vcmp.ge.f32.partialorder %v803_v34, 0.0  ;;  %v557_v43 = vpop.f32.mrf.mxu0  ;;  %v621_v44 = vpop.f32.mrf.mxu1 }
  0xf4   : > { %v851_v45 = vmul.f32 0.2, %v787_v33  ;;  %v867_v46 = vmul.f32 0.2, %v803_v34  ;;  %vm822_vm4 = vcmp.ge.f32.partialorder %v790_v39, 0.0  ;;  %vm838_vm5 = vcmp.ge.f32.partialorder %v806_v40, 0.0 }
  0xf5   : > { %949 = vst [vmem:[%s1387_s19 + $0x10] sm:$0xff] %v917_v41  ;;  %965 = vst [vmem:[%s1387_s19 + $0x90] sm:$0xff] %v933_v42  ;;  %v854_v47 = vmul.f32 0.2, %v790_v39  ;;  %v870_v48 = vmul.f32 0.2, %v806_v40  ;;  %v788_v49 = vadd.f32 %v1377_v24, %v557_v43  ;;  %v804_v50 = vadd.f32 %v1377_v24, %v621_v44  ;;  %v1174_v51 = vpop.f32.mrf.mxu0  ;;  %v1190_v52 = vpop.f32.mrf.mxu1 }
  0xf6   : > { %v883_v53 = vsel %vm819_vm2, %v787_v33, %v851_v45  ;;  %v899_v54 = vsel %vm835_vm3, %v803_v34, %v867_v46  ;;  %v793_v55 = vadd.f32 %v1174_v51, %v1377_v24  ;;  %v809_v56 = vadd.f32 %v1190_v52, %v1377_v24 }
  0xf7   : > { %v915_v57 = vmul.f32 1.4142135, %v883_v53  ;;  %v931_v58 = vmul.f32 1.4142135, %v899_v54  ;;  %v886_v59 = vsel %vm822_vm4, %v790_v39, %v854_v47  ;;  %v902_v60 = vsel %vm838_vm5, %v806_v40, %v870_v48  ;;  %v570_v61 = vpop.f32.mrf.mxu0  ;;  %v634_v62 = vpop.f32.mrf.mxu1 }
  0xf8   : > { %v918_v63 = vmul.f32 1.4142135, %v886_v59  ;;  %v934_v0 = vmul.f32 1.4142135, %v902_v60  ;;  %vm820_vm6 = vcmp.ge.f32.partialorder %v788_v49, 0.0  ;;  %vm836_vm7 = vcmp.ge.f32.partialorder %v804_v50, 0.0 }
  0xf9   : > { %947 = vst [vmem:[%s1387_s19] sm:$0xff] %v915_v57  ;;  %963 = vst [vmem:[%s1387_s19 + $0x80] sm:$0xff] %v931_v58  ;;  %v852_v1 = vmul.f32 0.2, %v788_v49  ;;  %v868_v2 = vmul.f32 0.2, %v804_v50  ;;  %vm825_vm8 = vcmp.ge.f32.partialorder %v793_v55, 0.0  ;;  %v1175_v3 = vpop.f32.mrf.mxu0  ;;  %v1191_v4 = vpop.f32.mrf.mxu1  ;;  %v791_v7 = vadd.f32 %v1377_v24, %v570_v61 }
  0xfa   : > { %vm841_vm9 = vcmp.ge.f32.partialorder %v809_v56, 0.0  ;;  %950 = vst [vmem:[%s1387_s19 + $0x18] sm:$0xff] %v918_v63  ;;  %966 = vst [vmem:[%s1387_s19 + $0x98] sm:$0xff] %v934_v0  ;;  %v857_v5 = vmul.f32 0.2, %v793_v55  ;;  %v807_v8 = vadd.f32 %v1377_v24, %v634_v62  ;;  %v794_v11 = vadd.f32 %v1175_v3, %v1377_v24 }
  0xfb   : > { %v873_v6 = vmul.f32 0.2, %v809_v56  ;;  %v884_v9 = vsel %vm820_vm6, %v788_v49, %v852_v1  ;;  %v900_v10 = vsel %vm836_vm7, %v804_v50, %v868_v2  ;;  %v810_v12 = vadd.f32 %v1191_v4, %v1377_v24  ;;  %v573_v13 = vpop.f32.mrf.mxu0  ;;  %v637_v14 = vpop.f32.mrf.mxu1 }
  0xfc   : > { %v916_v15 = vmul.f32 1.4142135, %v884_v9  ;;  %v932_v16 = vmul.f32 1.4142135, %v900_v10  ;;  %v889_v17 = vsel %vm825_vm8, %v793_v55, %v857_v5  ;;  %vm823_vm10 = vcmp.ge.f32.partialorder %v791_v7, 0.0 }
  0xfd   : > { %v905_v18 = vsel %vm841_vm9, %v809_v56, %v873_v6  ;;  %v921_v19 = vmul.f32 1.4142135, %v889_v17  ;;  %vm839_vm11 = vcmp.ge.f32.partialorder %v807_v8, 0.0  ;;  %v1178_v21 = vpop.f32.mrf.mxu0  ;;  %v1194_v22 = vpop.f32.mrf.mxu1  ;;  %v855_v23 = vmul.f32 0.2, %v791_v7 }
  0xfe   : > { %v937_v20 = vmul.f32 1.4142135, %v905_v18  ;;  %948 = vst [vmem:[%s1387_s19 + $0x8] sm:$0xff] %v916_v15  ;;  %964 = vst [vmem:[%s1387_s19 + $0x88] sm:$0xff] %v932_v16  ;;  %v871_v25 = vmul.f32 0.2, %v807_v8  ;;  %v792_v28 = vadd.f32 %v1377_v24, %v573_v13  ;;  %v808_v29 = vadd.f32 %v1377_v24, %v637_v14 }
  0xff   : > { %vm826_vm12 = vcmp.ge.f32.partialorder %v794_v11, 0.0  ;;  %vm842_vm13 = vcmp.ge.f32.partialorder %v810_v12, 0.0  ;;  %953 = vst [vmem:[%s1387_s19 + $0x30] sm:$0xff] %v921_v19  ;;  %v858_v26 = vmul.f32 0.2, %v794_v11  ;;  %v586_v30 = vpop.f32.mrf.mxu0  ;;  %v650_v31 = vpop.f32.mrf.mxu1  ;;  %v887_v32 = vsel %vm823_vm10, %v791_v7, %v855_v23 }
 0x100   : > { %969 = vst [vmem:[%s1387_s19 + $0xb0] sm:$0xff] %v937_v20  ;;  %v874_v27 = vmul.f32 0.2, %v810_v12  ;;  %v903_v33 = vsel %vm839_vm11, %v807_v8, %v871_v25  ;;  %v797_v34 = vadd.f32 %v1178_v21, %v1377_v24  ;;  %v813_v35 = vadd.f32 %v1194_v22, %v1377_v24 }
 0x101   : > { %v919_v36 = vmul.f32 1.4142135, %v887_v32  ;;  %v935_v37 = vmul.f32 1.4142135, %v903_v33  ;;  %v890_v38 = vsel %vm826_vm12, %v794_v11, %v858_v26  ;;  %v1179_v40 = vpop.f32.mrf.mxu0  ;;  %v1195_v41 = vpop.f32.mrf.mxu1  ;;  %vm824_vm14 = vcmp.ge.f32.partialorder %v792_v28, 0.0 }
 0x102   : > { %v906_v39 = vsel %vm842_vm13, %v810_v12, %v874_v27  ;;  %v922_v42 = vmul.f32 1.4142135, %v890_v38  ;;  %vm840_vm15 = vcmp.ge.f32.partialorder %v808_v29, 0.0  ;;  %v856_v44 = vmul.f32 0.2, %v792_v28 }
 0x103   : > { %v938_v43 = vmul.f32 1.4142135, %v906_v39  ;;  %951 = vst [vmem:[%s1387_s19 + $0x20] sm:$0xff] %v919_v36  ;;  %967 = vst [vmem:[%s1387_s19 + $0xa0] sm:$0xff] %v935_v37  ;;  %v872_v45 = vmul.f32 0.2, %v808_v29  ;;  %v589_v46 = vpop.f32.mrf.mxu0  ;;  %v653_v47 = vpop.f32.mrf.mxu1  ;;  %v795_v50 = vadd.f32 %v1377_v24, %v586_v30  ;;  %v811_v51 = vadd.f32 %v1377_v24, %v650_v31 }
 0x104   : > { %vm829_vm0 = vcmp.ge.f32.partialorder %v797_v34, 0.0  ;;  %vm845_vm1 = vcmp.ge.f32.partialorder %v813_v35, 0.0  ;;  %954 = vst [vmem:[%s1387_s19 + $0x38] sm:$0xff] %v922_v42  ;;  %v861_v48 = vmul.f32 0.2, %v797_v34  ;;  %v888_v52 = vsel %vm824_vm14, %v792_v28, %v856_v44 }
 0x105   : > { %970 = vst [vmem:[%s1387_s19 + $0xb8] sm:$0xff] %v938_v43  ;;  %v877_v49 = vmul.f32 0.2, %v813_v35  ;;  %v904_v53 = vsel %vm840_vm15, %v808_v29, %v872_v45  ;;  %v798_v54 = vadd.f32 %v1179_v40, %v1377_v24  ;;  %v814_v55 = vadd.f32 %v1195_v41, %v1377_v24  ;;  %v1182_v56 = vpop.f32.mrf.mxu0  ;;  %v1198_v57 = vpop.f32.mrf.mxu1 }
 0x106   : > { %v920_v58 = vmul.f32 1.4142135, %v888_v52  ;;  %v936_v59 = vmul.f32 1.4142135, %v904_v53  ;;  %v893_v60 = vsel %vm829_vm0, %v797_v34, %v861_v48  ;;  %vm827_vm2 = vcmp.ge.f32.partialorder %v795_v50, 0.0 }
 0x107   : > { %v909_v61 = vsel %vm845_vm1, %v813_v35, %v877_v49  ;;  %v925_v62 = vmul.f32 1.4142135, %v893_v60  ;;  %vm843_vm3 = vcmp.ge.f32.partialorder %v811_v51, 0.0  ;;  %v859_v0 = vmul.f32 0.2, %v795_v50  ;;  %v602_v2 = vpop.f32.mrf.mxu0  ;;  %v666_v3 = vpop.f32.mrf.mxu1 }
 0x108   : > { %v941_v63 = vmul.f32 1.4142135, %v909_v61  ;;  %952 = vst [vmem:[%s1387_s19 + $0x28] sm:$0xff] %v920_v58  ;;  %968 = vst [vmem:[%s1387_s19 + $0xa8] sm:$0xff] %v936_v59  ;;  %v875_v1 = vmul.f32 0.2, %v811_v51  ;;  %v796_v6 = vadd.f32 %v1377_v24, %v589_v46  ;;  %v812_v7 = vadd.f32 %v1377_v24, %v653_v47 }
 0x109   : > { %vm830_vm4 = vcmp.ge.f32.partialorder %v798_v54, 0.0  ;;  %vm846_vm5 = vcmp.ge.f32.partialorder %v814_v55, 0.0  ;;  %957 = vst [vmem:[%s1387_s19 + $0x50] sm:$0xff] %v925_v62  ;;  %v862_v4 = vmul.f32 0.2, %v798_v54  ;;  %v891_v8 = vsel %vm827_vm2, %v795_v50, %v859_v0  ;;  %v1183_v18 = vpop.f32.mrf.mxu0  ;;  %v1199_v19 = vpop.f32.mrf.mxu1 }
 0x10a   : > { %973 = vst [vmem:[%s1387_s19 + $0xd0] sm:$0xff] %v941_v63  ;;  %v878_v5 = vmul.f32 0.2, %v814_v55  ;;  %v907_v9 = vsel %vm843_vm3, %v811_v51, %v875_v1  ;;  %v801_v10 = vadd.f32 %v1182_v56, %v1377_v24  ;;  %v817_v11 = vadd.f32 %v1198_v57, %v1377_v24 }
 0x10b   : > { %v923_v12 = vmul.f32 1.4142135, %v891_v8  ;;  %v939_v13 = vmul.f32 1.4142135, %v907_v9  ;;  %v894_v14 = vsel %vm830_vm4, %v798_v54, %v862_v4  ;;  %vm828_vm6 = vcmp.ge.f32.partialorder %v796_v6, 0.0  ;;  %v605_v35 = vpop.f32.mrf.mxu0  ;;  %v669_v36 = vpop.f32.mrf.mxu1 }
 0x10c   : > { %v910_v15 = vsel %vm846_vm5, %v814_v55, %v878_v5  ;;  %v926_v16 = vmul.f32 1.4142135, %v894_v14  ;;  %vm844_vm7 = vcmp.ge.f32.partialorder %v812_v7, 0.0  ;;  %v860_v20 = vmul.f32 0.2, %v796_v6 }
 0x10d   : > { %v942_v17 = vmul.f32 1.4142135, %v910_v15  ;;  %955 = vst [vmem:[%s1387_s19 + $0x40] sm:$0xff] %v923_v12  ;;  %971 = vst [vmem:[%s1387_s19 + $0xc0] sm:$0xff] %v939_v13  ;;  %v876_v21 = vmul.f32 0.2, %v812_v7  ;;  %v799_v25 = vadd.f32 %v1377_v24, %v602_v2  ;;  %v815_v26 = vadd.f32 %v1377_v24, %v666_v3 }
 0x10e   : > { %vm833_vm8 = vcmp.ge.f32.partialorder %v801_v10, 0.0  ;;  %vm849_vm9 = vcmp.ge.f32.partialorder %v817_v11, 0.0  ;;  %958 = vst [vmem:[%s1387_s19 + $0x58] sm:$0xff] %v926_v16  ;;  %v865_v22 = vmul.f32 0.2, %v801_v10  ;;  %v892_v27 = vsel %vm828_vm6, %v796_v6, %v860_v20 }
 0x10f   : > { %974 = vst [vmem:[%s1387_s19 + $0xd8] sm:$0xff] %v942_v17  ;;  %v881_v23 = vmul.f32 0.2, %v817_v11  ;;  %v908_v28 = vsel %vm844_vm7, %v812_v7, %v876_v21  ;;  %v802_v29 = vadd.f32 %v1183_v18, %v1377_v24  ;;  %v818_v30 = vadd.f32 %v1199_v19, %v1377_v24 }
 0x110   : > { %v924_v31 = vmul.f32 1.4142135, %v892_v27  ;;  %v940_v32 = vmul.f32 1.4142135, %v908_v28  ;;  %v897_v33 = vsel %vm833_vm8, %v801_v10, %v865_v22  ;;  %vm831_vm10 = vcmp.ge.f32.partialorder %v799_v25, 0.0 }
 0x111   : > { %v913_v34 = vsel %vm849_vm9, %v817_v11, %v881_v23  ;;  %v929_v37 = vmul.f32 1.4142135, %v897_v33  ;;  %vm847_vm11 = vcmp.ge.f32.partialorder %v815_v26, 0.0  ;;  %v863_v39 = vmul.f32 0.2, %v799_v25 }
 0x112   : > { %v945_v38 = vmul.f32 1.4142135, %v913_v34  ;;  %956 = vst [vmem:[%s1387_s19 + $0x48] sm:$0xff] %v924_v31  ;;  %972 = vst [vmem:[%s1387_s19 + $0xc8] sm:$0xff] %v940_v32  ;;  %v879_v40 = vmul.f32 0.2, %v815_v26  ;;  %v800_v43 = vadd.f32 %v1377_v24, %v605_v35  ;;  %v816_v44 = vadd.f32 %v1377_v24, %v669_v36 }
 0x113   : > { %vm834_vm12 = vcmp.ge.f32.partialorder %v802_v29, 0.0  ;;  %vm850_vm13 = vcmp.ge.f32.partialorder %v818_v30, 0.0  ;;  %961 = vst [vmem:[%s1387_s19 + $0x70] sm:$0xff] %v929_v37  ;;  %v866_v41 = vmul.f32 0.2, %v802_v29  ;;  %v895_v45 = vsel %vm831_vm10, %v799_v25, %v863_v39 }
 0x114   : > { %977 = vst [vmem:[%s1387_s19 + $0xf0] sm:$0xff] %v945_v38  ;;  %v882_v42 = vmul.f32 0.2, %v818_v30  ;;  %v911_v46 = vsel %vm847_vm11, %v815_v26, %v879_v40  ;;  %v927_v47 = vmul.f32 1.4142135, %v895_v45  ;;  %vm832_vm14 = vcmp.ge.f32.partialorder %v800_v43, 0.0 }
 0x115   : > { %v943_v48 = vmul.f32 1.4142135, %v911_v46  ;;  %v898_v49 = vsel %vm834_vm12, %v802_v29, %v866_v41  ;;  %vm848_vm15 = vcmp.ge.f32.partialorder %v816_v44, 0.0  ;;  %v864_v53 = vmul.f32 0.2, %v800_v43 }
 0x116   : > { %v914_v50 = vsel %vm850_vm13, %v818_v30, %v882_v42  ;;  %v930_v51 = vmul.f32 1.4142135, %v898_v49  ;;  %959 = vst [vmem:[%s1387_s19 + $0x60] sm:$0xff] %v927_v47  ;;  %v880_v54 = vmul.f32 0.2, %v816_v44 }
 0x117   : > { %v946_v52 = vmul.f32 1.4142135, %v914_v50  ;;  %975 = vst [vmem:[%s1387_s19 + $0xe0] sm:$0xff] %v943_v48  ;;  %v896_v24 = vsel %vm832_vm14, %v800_v43, %v864_v53 }
 0x118   : > { %962 = vst [vmem:[%s1387_s19 + $0x78] sm:$0xff] %v930_v51  ;;  %v912_v55 = vsel %vm848_vm15, %v816_v44, %v880_v54  ;;  %v928_v56 = vmul.f32 1.4142135, %v896_v24 }
 0x119   : > { %978 = vst [vmem:[%s1387_s19 + $0xf8] sm:$0xff] %v946_v52  ;;  %v944_v57 = vmul.f32 1.4142135, %v912_v55 }
 0x11a   : > { %960 = vst [vmem:[%s1387_s19 + $0x68] sm:$0xff] %v928_v56 }
 0x11b   : > { %976 = vst [vmem:[%s1387_s19 + $0xe8] sm:$0xff] %v944_v57 }
 0x11c PF: > { %s13_s14 = sadd.s32 1, %s1286_s14   ;;  %s1484_s12 = smov %s1282_s13 }
 0x11d   : > { %p10_p5 = scmp.ge.s32.totalorder %s13_s14, 6   ;;  %s1485_s13 = smov %s1487_s15 }
 0x11f   :  { %12 = sbr.rel (!%p10_p5) target bundleno = 2 (0x2), region = 76 }

// kernel: discriminator_forward.18
= control target key start
LH: loop header
LB: loop body
LE: loop exit
PB: predicated region body
PF: predicated region fallthrough
CT: control target
= control target key end

     0   :  { %s1181_s6 = smov 0   ;;  %s1183_s7 = smov 0   ;;  %s1699_s0 = inlined_call_operand.vmem [shape: f32[4,18,18,32], index: 0, kind: input, shape index: {}]   ;;  %s1700_s1 = inlined_call_operand.vmem [shape: f32[4,15,15,32], index: 1, kind: output, shape index: {}]  }
   0x1   :  { %s1185_s8 = smov 0  }
   0x2 LB: > { %s23_s9 = sadd.s32 1, %s1165_s7  ;;  %p1116_p0 = scmp.ge.s32.totalorder %s1169_s8, 1  ;;  %s1169_s8 = sphi %s1185_s8, %s11_s8   ;;  %s1165_s7 = sphi %s1183_s7, %s1702_s7   ;;  %s1161_s6 = sphi %s1181_s6, %s1701_s6  }
   0x3   : > { %p25_p1 = scmp.ge.s32.totalorder %s23_s9, 4  ;;  %p106_p2 = scmp.lt.s32.totalorder %s1169_s8, 5 }
   0x5   : > { %s1704_s9 = smov (%p25_p1, %s23_s9), 0  ;;  %p107_p3 = pnand %p1116_p0, %p106_p2 }
   0x6   : > { %p132_p4 = scmp.lt.s32.totalorder (!%p107_p3), %s1161_s6, 3 }
   0x7   : > { %110 = sbr.rel (%p107_p3) target bundleno = 179 (0xb3), region = 24 }
   0xc   : > { %s1706_s6 = smov (!%p132_p4, %s1161_s6), 3  ;;  %vm529_vm0 = vcmask 1046528   ;;  %vm665_vm1 = vcmask 1045504   ;;  %vm861_vm2 = vcmask 1044480   ;;  %vm997_vm3 = vcmask 261120  }
   0xd   : > { %s1121_s10 = smul.u32 432, %s1706_s6  ;;  %vm999_vm4 = vcmask 260096  }
   0xe   : > { %s1122_s14 = smul.u32 240, %s1706_s6 }
   0xf   : > { %s1205_s13 = scalar_lea.vmem %s1699_s0, %s1121_s10 }
  0x10   : > { %v148_v0 = vld [vmem:[%s1205_s13] sm:$0xff]  ;;  %v149_v1 = vld [vmem:[%s1205_s13 + $0x8] sm:$0xff]  ;;  %v151_v2 = vld [vmem:[%s1205_s13 + $0x18] sm:$0xff]  ;;  %s1272_s17 = scalar_lea.vmem %s1700_s1, %s1122_s14 }
  0x11   : > { %v152_v3 = vld [vmem:[%s1205_s13 + $0x20] sm:$0xff]  ;;  %v1212_v4 = vld [vmem:[%s1205_s13 + $0x30] sm:$0xff]  ;;  %v1215_v5 = vld [vmem:[%s1205_s13 + $0x38] sm:$0xff]  ;;  %v202_v6 = vmul.f32 0.125, %v148_v0  ;;  %v203_v7 = vmul.f32 0.125, %v149_v1  ;;  %v247_v8 = vmul.f32 0.375, %v151_v2 }
  0x12   : > { %v157_v9 = vld [vmem:[%s1205_s13 + $0x48] sm:$0xff]  ;;  %v158_v10 = vld [vmem:[%s1205_s13 + $0x50] sm:$0xff]  ;;  %v248_v11 = vmul.f32 0.375, %v152_v3  ;;  %v250_v12 = vmul.f32 0.375, %v1212_v4  ;;  %v251_v13 = vmul.f32 0.375, %v1215_v5  ;;  %v1222_v14 = vld [vmem:[%s1205_s13 + $0x60] sm:$0xff] }
  0x13   : > { %v1224_v15 = vmul.f32 0.125, %v157_v9  ;;  %v1226_v16 = vmul.f32 0.125, %v158_v10  ;;  %v292_v17 = vadd.f32 %v247_v8, %v202_v6  ;;  %v150_v18 = vld [vmem:[%s1205_s13 + $0x10] sm:$0x3]  ;;  %v153_v19 = vld [vmem:[%s1205_s13 + $0x28] sm:$0x3] }
  0x14   : > { %v293_v20 = vadd.f32 %v248_v11, %v203_v7  ;;  %v1231_v21 = vld [vmem:[%s1205_s13 + $0x40] sm:$0x3]  ;;  %v159_v22 = vld [vmem:[%s1205_s13 + $0x58] sm:$0x3]  ;;  %v204_v23 = vmul.f32 0.125, %v150_v18  ;;  %v249_v24 = vmul.f32 0.375, %v153_v19 }
  0x15   : > { %v340_v25 = vadd.f32 %v292_v17, %v250_v12  ;;  %v1234_v26 = vmul.f32 0.125, %v159_v22  ;;  %v252_v27 = vmul.f32 0.375, %v1231_v21  ;;  %v1238_v28 = vld [vmem:[%s1205_s13 + $0x68] sm:$0xff]  ;;  %v205_v29 = vmul.f32 0.125, %v151_v2  ;;  %v1244_v34 = vld [vmem:[%s1205_s13 + $0x70] sm:$0x3] }
  0x16   : > { %v341_v30 = vadd.f32 %v293_v20, %v251_v13  ;;  %v294_v31 = vadd.f32 %v249_v24, %v204_v23  ;;  %v206_v32 = vmul.f32 0.125, %v152_v3  ;;  %v1241_v33 = vmul.f32 0.125, %v1222_v14 }
  0x17   : > { %v394_v35 = vadd.f32 %v340_v25, %v1224_v15  ;;  %v1248_v36 = vmul.f32 0.125, %v1238_v28  ;;  %v1250_v37 = vmul.f32 0.375, %v157_v9  ;;  %v1252_v38 = vmul.f32 0.375, %v158_v10 }
  0x18   : > { %v395_v39 = vadd.f32 %v341_v30, %v1226_v16  ;;  %v342_v40 = vadd.f32 %v294_v31, %v252_v27  ;;  %v295_v41 = vadd.f32 %v250_v12, %v205_v29  ;;  %v296_v42 = vadd.f32 %v251_v13, %v206_v32  ;;  %v163_v31 = vld [vmem:[%s1205_s13 + $0x78] sm:$0xff]  ;;  %v164_v32 = vld [vmem:[%s1205_s13 + $0x80] sm:$0xff] }
  0x19   : > { %v439_v43 = vmul.f32 0.125, %v394_v35  ;;  %v469_v44 = vmul.f32 0.375, %v394_v35  ;;  %v207_v45 = vmul.f32 0.125, %v153_v19  ;;  %v1256_v46 = vmul.f32 0.125, %v1244_v34 }
  0x1a   : > { %v440_v47 = vmul.f32 0.125, %v395_v39  ;;  %v470_v48 = vmul.f32 0.375, %v395_v39  ;;  %v396_v49 = vadd.f32 %v342_v40, %v1234_v26  ;;  %v343_v50 = vadd.f32 %v295_v41, %v1250_v37 }
  0x1b   : > { %v530_v51 = vrot.slane %v469_v44, 1  ;;  %v666_v52 = vrot.slane %v469_v44, 2  ;;  %v862_v53 = vrot.slane %v439_v43, 3  ;;  %v344_v54 = vadd.f32 %v296_v42, %v1252_v38 }
  0x1c   : > { %v531_v55 = vrot.slane %v470_v48, 1  ;;  %v667_v56 = vrot.slane %v470_v48, 2  ;;  %v863_v57 = vrot.slane %v440_v47, 3  ;;  %v635_v58 = vmul.f32 0.375, %v396_v49 }
  0x1d   : > { %v801_v59 = vmul.f32 0.125, %v396_v49  ;;  %v397_v60 = vadd.f32 %v343_v50, %v1241_v33  ;;  %v398_v61 = vadd.f32 %v344_v54, %v1248_v36  ;;  %v255_v62 = vmul.f32 0.375, %v159_v22 }
  0x1e   : > { %v532_v63 = vsel %vm529_vm0, %v530_v51, %v531_v55  ;;  %v668_v0 = vsel %vm665_vm1, %v666_v52, %v667_v56  ;;  %v864_v1 = vsel %vm861_vm2, %v862_v53, %v863_v57  ;;  %v606_v2 = vadd.f32 %v531_v55, %v440_v47  ;;  %v165_v47 = vld [vmem:[%s1205_s13 + $0x88] sm:$0x3]  ;;  %v1294_v55 = vld [vmem:[%s1205_s13 + $0x90] sm:$0xff] }
  0x1f   : > { %v605_v3 = vadd.f32 %v532_v63, %v439_v43  ;;  %v669_v6 = vrot.slane %v635_v58, 2  ;;  %v865_v7 = vrot.slane %v801_v59, 3  ;;  %v441_v8 = vmul.f32 0.125, %v397_v60  ;;  %v1302_v59 = vld [vmem:[%s1205_s13 + $0x98] sm:$0xff] }
  0x20   : > { %v442_v9 = vmul.f32 0.125, %v398_v61  ;;  %v471_v10 = vmul.f32 0.375, %v397_v60  ;;  %v472_v11 = vmul.f32 0.375, %v398_v61  ;;  %v297_v12 = vadd.f32 %v252_v27, %v207_v45 }
  0x21   : > { %v771_v13 = vadd.f32 %v668_v0, %v605_v3  ;;  %v670_v17 = vsel %vm665_vm1, %v667_v56, %v669_v6  ;;  %v866_v18 = vsel %vm861_vm2, %v863_v57, %v865_v7  ;;  %v867_v19 = vrot.slane %v441_v8, 3 }
  0x22   : > { %v772_v20 = vadd.f32 %v670_v17, %v606_v2  ;;  %v533_v22 = vrot.slane %v471_v10, 1  ;;  %v534_v23 = vrot.slane %v472_v11, 1  ;;  %v671_v24 = vrot.slane %v471_v10, 2 }
  0x23   : > { %v967_v25 = vadd.f32 %v864_v1, %v771_v13  ;;  %v672_v27 = vrot.slane %v472_v11, 2  ;;  %v868_v29 = vrot.slane %v442_v9, 3  ;;  %v345_v30 = vadd.f32 %v297_v12, %v255_v62 }
  0x24   : > { %v968_v35 = vadd.f32 %v866_v18, %v772_v20  ;;  %v535_v39 = vsel %vm529_vm0, %v533_v22, %v534_v23  ;;  %v608_v40 = vadd.f32 %v534_v23, %v442_v9  ;;  %v208_v41 = vmul.f32 0.125, %v1212_v4 }
  0x25   : > { %998 = vst.msk [vmem:[%s1272_s17] sm:$0xff] %vm997_vm3, %v967_v25  ;;  %v607_v42 = vadd.f32 %v535_v39, %v441_v8  ;;  %v673_v43 = vsel %vm665_vm1, %v671_v24, %v672_v27  ;;  %v869_v44 = vsel %vm861_vm2, %v867_v19, %v868_v29  ;;  %v399_v45 = vadd.f32 %v345_v30, %v1256_v46 }
  0x26   : > { %1000 = vst.msk [vmem:[%s1272_s17 + $0x8] sm:$0x7f] %vm999_vm4, %v968_v35  ;;  %v209_v48 = vmul.f32 0.125, %v1215_v5  ;;  %v1287_v49 = vmul.f32 0.125, %v163_v31  ;;  %v1289_v50 = vmul.f32 0.125, %v164_v32  ;;  %v256_v4 = vmul.f32 0.375, %v1222_v14 }
  0x27   : > { %v773_v51 = vadd.f32 %v673_v43, %v607_v42  ;;  %v636_v52 = vmul.f32 0.375, %v399_v45  ;;  %v802_v53 = vmul.f32 0.125, %v399_v45  ;;  %v257_v54 = vmul.f32 0.375, %v1238_v28 }
  0x28   : > { %v298_v56 = vadd.f32 %v1250_v37, %v208_v41  ;;  %v299_v57 = vadd.f32 %v1252_v38, %v209_v48  ;;  %v210_v5 = vmul.f32 0.125, %v1231_v21  ;;  %v1299_v58 = vmul.f32 0.125, %v165_v47  ;;  %v1309_v37 = vld [vmem:[%s1205_s13 + $0xa0] sm:$0x3] }
  0x29   : > { %v969_v14 = vadd.f32 %v869_v44, %v773_v51  ;;  %v674_v60 = vrot.slane %v636_v52, 2  ;;  %v870_v61 = vrot.slane %v802_v53, 3  ;;  %v258_v63 = vmul.f32 0.375, %v1244_v34 }
  0x2a   : > { %v346_v0 = vadd.f32 %v298_v56, %v256_v4  ;;  %v347_v28 = vadd.f32 %v299_v57, %v257_v54  ;;  %v300_v1 = vadd.f32 %v255_v62, %v210_v5  ;;  %v1306_v2 = vmul.f32 0.125, %v1294_v55 }
  0x2b   : > { %1001 = vst.msk [vmem:[%s1272_s17 + $0x10] sm:$0xff] %vm997_vm3, %v969_v14  ;;  %v675_v21 = vsel %vm665_vm1, %v672_v27, %v674_v60  ;;  %v871_v38 = vsel %vm861_vm2, %v868_v29, %v870_v61  ;;  %v1316_v3 = vmul.f32 0.125, %v1302_v59  ;;  %v1318_v6 = vmul.f32 0.375, %v163_v31  ;;  %v169_v61 = vld [vmem:[%s1205_s13 + $0xa8] sm:$0xff] }
  0x2c   : > { %v774_v34 = vadd.f32 %v675_v21, %v608_v40  ;;  %v400_v62 = vadd.f32 %v346_v0, %v1287_v49  ;;  %v401_v7 = vadd.f32 %v347_v28, %v1289_v50  ;;  %v348_v8 = vadd.f32 %v300_v1, %v258_v63 }
  0x2d   : > { %v1322_v9 = vmul.f32 0.375, %v164_v32  ;;  %v301_v10 = vadd.f32 %v256_v4, %v1224_v15  ;;  %v302_v11 = vadd.f32 %v257_v54, %v1226_v16  ;;  %v1327_v12 = vmul.f32 0.125, %v1309_v37 }
  0x2e   : > { %v970_v13 = vadd.f32 %v871_v38, %v774_v34  ;;  %v443_v17 = vmul.f32 0.125, %v400_v62  ;;  %v444_v18 = vmul.f32 0.125, %v401_v7  ;;  %v473_v19 = vmul.f32 0.375, %v400_v62  ;;  %v170_v38 = vld [vmem:[%s1205_s13 + $0xb0] sm:$0xff] }
  0x2f   : > { %v474_v20 = vmul.f32 0.375, %v401_v7  ;;  %v402_v22 = vadd.f32 %v348_v8, %v1299_v58  ;;  %v349_v23 = vadd.f32 %v301_v10, %v1318_v6  ;;  %v350_v24 = vadd.f32 %v302_v11, %v1322_v9 }
  0x30   : > { %1002 = vst.msk [vmem:[%s1272_s17 + $0x18] sm:$0x7f] %vm999_vm4, %v970_v13  ;;  %v536_v25 = vrot.slane %v473_v19, 1  ;;  %v676_v15 = vrot.slane %v473_v19, 2  ;;  %v872_v27 = vrot.slane %v443_v17, 3  ;;  %v873_v16 = vrot.slane %v444_v18, 3 }
  0x31   : > { %v537_v29 = vrot.slane %v474_v20, 1  ;;  %v677_v30 = vrot.slane %v474_v20, 2  ;;  %v637_v31 = vmul.f32 0.375, %v402_v22  ;;  %v803_v32 = vmul.f32 0.125, %v402_v22  ;;  %v1349_v13 = vld [vmem:[%s1205_s13 + $0xb8] sm:$0x3] }
  0x32   : > { %v874_v35 = vsel %vm861_vm2, %v872_v27, %v873_v16  ;;  %v403_v39 = vadd.f32 %v349_v23, %v1306_v2  ;;  %v404_v40 = vadd.f32 %v350_v24, %v1316_v3  ;;  %v261_v41 = vmul.f32 0.375, %v165_v47 }
  0x33   : > { %v538_v42 = vsel %vm529_vm0, %v536_v25, %v537_v29  ;;  %v678_v43 = vsel %vm665_vm1, %v676_v15, %v677_v30  ;;  %v610_v44 = vadd.f32 %v537_v29, %v444_v18  ;;  %v679_v45 = vrot.slane %v637_v31, 2  ;;  %v1366_v15 = vld [vmem:[%s1205_s13 + $0xc0] sm:$0xff]  ;;  %v1372_v31 = vld [vmem:[%s1205_s13 + $0xc8] sm:$0xff] }
  0x34   : > { %v609_v48 = vadd.f32 %v538_v42, %v443_v17  ;;  %v875_v4 = vrot.slane %v803_v32, 3  ;;  %v445_v51 = vmul.f32 0.125, %v403_v39  ;;  %v446_v52 = vmul.f32 0.125, %v404_v40 }
  0x35   : > { %v680_v53 = vsel %vm665_vm1, %v677_v30, %v679_v45  ;;  %v475_v54 = vmul.f32 0.375, %v403_v39  ;;  %v476_v56 = vmul.f32 0.375, %v404_v40  ;;  %v303_v57 = vadd.f32 %v258_v63, %v1234_v26 }
  0x36   : > { %v775_v5 = vadd.f32 %v678_v43, %v609_v48  ;;  %v776_v47 = vadd.f32 %v680_v53, %v610_v44  ;;  %v876_v14 = vsel %vm861_vm2, %v873_v16, %v875_v4  ;;  %v877_v60 = vrot.slane %v445_v51, 3 }
  0x37   : > { %v539_v0 = vrot.slane %v475_v54, 1  ;;  %v540_v28 = vrot.slane %v476_v56, 1  ;;  %v681_v1 = vrot.slane %v475_v54, 2  ;;  %v682_v21 = vrot.slane %v476_v56, 2 }
  0x38   : > { %v971_v34 = vadd.f32 %v874_v35, %v775_v5  ;;  %v972_v62 = vadd.f32 %v876_v14, %v776_v47  ;;  %v878_v7 = vrot.slane %v446_v52, 3  ;;  %v351_v8 = vadd.f32 %v303_v57, %v261_v41  ;;  %v1396_v57 = vld [vmem:[%s1205_s13 + $0xd0] sm:$0x3] }
  0x39   : > { %v541_v26 = vsel %vm529_vm0, %v539_v0, %v540_v28  ;;  %v683_v63 = vsel %vm665_vm1, %v681_v1, %v682_v21  ;;  %v612_v10 = vadd.f32 %v540_v28, %v446_v52  ;;  %v1346_v11 = vmul.f32 0.125, %v169_v61 }
  0x3a   : > { %1003 = vst.msk [vmem:[%s1272_s17 + $0x20] sm:$0xff] %vm997_vm3, %v971_v34  ;;  %v611_v17 = vadd.f32 %v541_v26, %v445_v51  ;;  %v879_v18 = vsel %vm861_vm2, %v877_v60, %v878_v7  ;;  %v405_v19 = vadd.f32 %v351_v8, %v1327_v12  ;;  %v1357_v20 = vmul.f32 0.125, %v170_v38  ;;  %v1406_v34 = vld [vmem:[%s1205_s13 + $0xd8] sm:$0xff] }
  0x3b   : > { %1004 = vst.msk [vmem:[%s1272_s17 + $0x28] sm:$0x7f] %vm999_vm4, %v972_v62  ;;  %v262_v22 = vmul.f32 0.375, %v1294_v55  ;;  %v263_v23 = vmul.f32 0.375, %v1302_v59  ;;  %v304_v24 = vadd.f32 %v1318_v6, %v1241_v33  ;;  %v305_v25 = vadd.f32 %v1322_v9, %v1248_v36 }
  0x3c   : > { %v777_v27 = vadd.f32 %v683_v63, %v611_v17  ;;  %v638_v16 = vmul.f32 0.375, %v405_v19  ;;  %v804_v29 = vmul.f32 0.125, %v405_v19  ;;  %v1369_v30 = vmul.f32 0.125, %v1349_v13 }
  0x3d   : > { %v352_v55 = vadd.f32 %v304_v24, %v262_v22  ;;  %v353_v32 = vadd.f32 %v305_v25, %v263_v23  ;;  %v264_v59 = vmul.f32 0.375, %v1309_v37  ;;  %v306_v33 = vadd.f32 %v261_v41, %v1256_v46  ;;  %v176_v24 = vld [vmem:[%s1205_s13 + $0xe0] sm:$0xff] }
  0x3e   : > { %v973_v6 = vadd.f32 %v879_v18, %v777_v27  ;;  %v684_v35 = vrot.slane %v638_v16, 2  ;;  %v880_v36 = vrot.slane %v804_v29, 3  ;;  %v1377_v9 = vmul.f32 0.125, %v1366_v15 }
  0x3f   : > { %v406_v39 = vadd.f32 %v352_v55, %v1346_v11  ;;  %v407_v40 = vadd.f32 %v353_v32, %v1357_v20  ;;  %v354_v42 = vadd.f32 %v306_v33, %v264_v59  ;;  %v1382_v43 = vmul.f32 0.125, %v1372_v31 }
  0x40   : > { %1005 = vst.msk [vmem:[%s1272_s17 + $0x30] sm:$0xff] %vm997_vm3, %v973_v6  ;;  %v685_v37 = vsel %vm665_vm1, %v682_v21, %v684_v35  ;;  %v881_v46 = vsel %vm861_vm2, %v878_v7, %v880_v36  ;;  %v1388_v41 = vmul.f32 0.375, %v169_v61  ;;  %v1390_v44 = vmul.f32 0.375, %v170_v38 }
  0x41   : > { %v778_v45 = vadd.f32 %v685_v37, %v612_v10  ;;  %v447_v48 = vmul.f32 0.125, %v406_v39  ;;  %v448_v4 = vmul.f32 0.125, %v407_v40  ;;  %v477_v51 = vmul.f32 0.375, %v406_v39 }
  0x42   : > { %v478_v52 = vmul.f32 0.375, %v407_v40  ;;  %v408_v53 = vadd.f32 %v354_v42, %v1369_v30  ;;  %v307_v54 = vadd.f32 %v262_v22, %v1287_v49  ;;  %v308_v56 = vadd.f32 %v263_v23, %v1289_v50 }
  0x43   : > { %v974_v5 = vadd.f32 %v881_v46, %v778_v45  ;;  %v542_v47 = vrot.slane %v477_v51, 1  ;;  %v686_v14 = vrot.slane %v477_v51, 2  ;;  %v882_v60 = vrot.slane %v447_v48, 3  ;;  %v1428_v51 = vld [vmem:[%s1205_s13 + $0xe8] sm:$0x3] }
  0x44   : > { %v543_v61 = vrot.slane %v478_v52, 1  ;;  %v687_v0 = vrot.slane %v478_v52, 2  ;;  %v883_v28 = vrot.slane %v448_v4, 3  ;;  %v639_v1 = vmul.f32 0.375, %v408_v53 }
  0x45   : > { %1006 = vst.msk [vmem:[%s1272_s17 + $0x38] sm:$0x7f] %vm999_vm4, %v974_v5  ;;  %v805_v21 = vmul.f32 0.125, %v408_v53  ;;  %v355_v38 = vadd.f32 %v307_v54, %v1388_v41  ;;  %v356_v49 = vadd.f32 %v308_v56, %v1390_v44  ;;  %v1403_v50 = vmul.f32 0.125, %v1396_v57 }
  0x46   : > { %v544_v62 = vsel %vm529_vm0, %v542_v47, %v543_v61  ;;  %v688_v7 = vsel %vm665_vm1, %v686_v14, %v687_v0  ;;  %v884_v8 = vsel %vm861_vm2, %v882_v60, %v883_v28  ;;  %v614_v26 = vadd.f32 %v543_v61, %v448_v4 }
  0x47   : > { %v613_v63 = vadd.f32 %v544_v62, %v447_v48  ;;  %v689_v10 = vrot.slane %v639_v1, 2  ;;  %v885_v17 = vrot.slane %v805_v21, 3  ;;  %v409_v18 = vadd.f32 %v355_v38, %v1377_v9 }
  0x48   : > { %v410_v19 = vadd.f32 %v356_v49, %v1382_v43  ;;  %v267_v22 = vmul.f32 0.375, %v1349_v13  ;;  %v309_v23 = vadd.f32 %v264_v59, %v1299_v58  ;;  %v1417_v25 = vmul.f32 0.125, %v1406_v34 }
  0x49   : > { %v779_v27 = vadd.f32 %v688_v7, %v613_v63  ;;  %v690_v16 = vsel %vm665_vm1, %v687_v0, %v689_v10  ;;  %v886_v29 = vsel %vm861_vm2, %v883_v28, %v885_v17  ;;  %v449_v55 = vmul.f32 0.125, %v409_v18 }
  0x4a   : > { %v780_v32 = vadd.f32 %v690_v16, %v614_v26  ;;  %v450_v33 = vmul.f32 0.125, %v410_v19  ;;  %v479_v6 = vmul.f32 0.375, %v409_v18  ;;  %v480_v35 = vmul.f32 0.375, %v410_v19 }
  0x4b   : > { %v975_v13 = vadd.f32 %v884_v8, %v779_v27  ;;  %v887_v36 = vrot.slane %v449_v55, 3  ;;  %v357_v58 = vadd.f32 %v309_v23, %v267_v22  ;;  %v1421_v59 = vmul.f32 0.125, %v176_v24 }
  0x4c   : > { %v976_v39 = vadd.f32 %v886_v29, %v780_v32  ;;  %v545_v40 = vrot.slane %v479_v6, 1  ;;  %v546_v42 = vrot.slane %v480_v35, 1  ;;  %v691_v37 = vrot.slane %v479_v6, 2  ;;  %v1466_v32 = vld [vmem:[%s1205_s13 + $0x100] sm:$0x3] }
  0x4d   : > { %1007 = vst.msk [vmem:[%s1272_s17 + $0x40] sm:$0xff] %vm997_vm3, %v975_v13  ;;  %v692_v46 = vrot.slane %v480_v35, 2  ;;  %v888_v45 = vrot.slane %v450_v33, 3  ;;  %v411_v48 = vadd.f32 %v357_v58, %v1403_v50  ;;  %v268_v4 = vmul.f32 0.375, %v1366_v15  ;;  %v1439_v15 = vld [vmem:[%s1205_s13 + $0xf0] sm:$0xff] }
  0x4e   : > { %1008 = vst.msk [vmem:[%s1272_s17 + $0x48] sm:$0x7f] %vm999_vm4, %v976_v39  ;;  %v547_v52 = vsel %vm529_vm0, %v545_v40, %v546_v42  ;;  %v616_v53 = vadd.f32 %v546_v42, %v450_v33  ;;  %v269_v54 = vmul.f32 0.375, %v1372_v31  ;;  %v310_v56 = vadd.f32 %v1388_v41, %v1306_v2  ;;  %v1447_v31 = vld [vmem:[%s1205_s13 + $0xf8] sm:$0xff] }
  0x4f   : > { %v615_v5 = vadd.f32 %v547_v52, %v449_v55  ;;  %v693_v47 = vsel %vm665_vm1, %v691_v37, %v692_v46  ;;  %v889_v14 = vsel %vm861_vm2, %v887_v36, %v888_v45  ;;  %v640_v60 = vmul.f32 0.375, %v411_v48 }
  0x50   : > { %v806_v61 = vmul.f32 0.125, %v411_v48  ;;  %v311_v0 = vadd.f32 %v1390_v44, %v1316_v3  ;;  %v358_v28 = vadd.f32 %v310_v56, %v268_v4  ;;  %v1444_v1 = vmul.f32 0.125, %v1428_v51  ;;  %v1482_v56 = vld [vmem:[%s1205_s13 + $0x110] sm:$0xff] }
  0x51   : > { %v781_v21 = vadd.f32 %v693_v47, %v615_v5  ;;  %v694_v2 = vrot.slane %v640_v60, 2  ;;  %v270_v41 = vmul.f32 0.375, %v1396_v57  ;;  %v312_v38 = vadd.f32 %v267_v22, %v1327_v12 }
  0x52   : > { %v890_v49 = vrot.slane %v806_v61, 3  ;;  %v359_v62 = vadd.f32 %v311_v0, %v269_v54  ;;  %v412_v7 = vadd.f32 %v358_v28, %v1417_v25  ;;  %v1453_v8 = vmul.f32 0.125, %v1439_v15 }
  0x53   : > { %v977_v3 = vadd.f32 %v889_v14, %v781_v21  ;;  %v695_v44 = vsel %vm665_vm1, %v692_v46, %v694_v2  ;;  %v360_v26 = vadd.f32 %v312_v38, %v270_v41  ;;  %v1457_v63 = vmul.f32 0.125, %v1447_v31 }
  0x54   : > { %v782_v10 = vadd.f32 %v695_v44, %v616_v53  ;;  %v891_v57 = vsel %vm861_vm2, %v888_v45, %v890_v49  ;;  %v413_v12 = vadd.f32 %v359_v62, %v1421_v59  ;;  %v451_v17 = vmul.f32 0.125, %v412_v7  ;;  %v1479_v53 = vld [vmem:[%s1205_s13 + $0x108] sm:$0xff] }
  0x55   : > { %1009 = vst.msk [vmem:[%s1272_s17 + $0x50] sm:$0xff] %vm997_vm3, %v977_v3  ;;  %v481_v18 = vmul.f32 0.375, %v412_v7  ;;  %v414_v19 = vadd.f32 %v360_v26, %v1444_v1  ;;  %v271_v22 = vmul.f32 0.375, %v1406_v34  ;;  %v272_v23 = vmul.f32 0.375, %v176_v24 }
  0x56   : > { %v978_v27 = vadd.f32 %v891_v57, %v782_v10  ;;  %v452_v16 = vmul.f32 0.125, %v413_v12  ;;  %v482_v29 = vmul.f32 0.375, %v413_v12  ;;  %v892_v55 = vrot.slane %v451_v17, 3  ;;  %v1507_v57 = vld [vmem:[%s1205_s13 + $0x118] sm:$0x3] }
  0x57   : > { %v548_v33 = vrot.slane %v481_v18, 1  ;;  %v696_v6 = vrot.slane %v481_v18, 2  ;;  %v641_v35 = vmul.f32 0.375, %v414_v19  ;;  %v807_v13 = vmul.f32 0.125, %v414_v19 }
  0x58   : > { %1010 = vst.msk [vmem:[%s1272_s17 + $0x58] sm:$0x7f] %vm999_vm4, %v978_v27  ;;  %v549_v36 = vrot.slane %v482_v29, 1  ;;  %v697_v58 = vrot.slane %v482_v29, 2  ;;  %v893_v39 = vrot.slane %v452_v16, 3  ;;  %v313_v34 = vadd.f32 %v268_v4, %v1346_v11 }
  0x59   : > { %v699_v24 = vrot.slane %v641_v35, 2  ;;  %v895_v40 = vrot.slane %v807_v13, 3  ;;  %v314_v42 = vadd.f32 %v269_v54, %v1357_v20  ;;  %v1473_v37 = vmul.f32 0.125, %v1466_v32 }
  0x5a   : > { %v550_v46 = vsel %vm529_vm0, %v548_v33, %v549_v36  ;;  %v698_v45 = vsel %vm665_vm1, %v696_v6, %v697_v58  ;;  %v894_v48 = vsel %vm861_vm2, %v892_v55, %v893_v39  ;;  %v618_v52 = vadd.f32 %v549_v36, %v452_v16 }
  0x5b   : > { %v617_v5 = vadd.f32 %v550_v46, %v451_v17  ;;  %v700_v11 = vsel %vm665_vm1, %v697_v58, %v699_v24  ;;  %v896_v4 = vsel %vm861_vm2, %v893_v39, %v895_v40  ;;  %v361_v20 = vadd.f32 %v313_v34, %v271_v22 }
  0x5c   : > { %v784_v54 = vadd.f32 %v700_v11, %v618_v52  ;;  %v362_v47 = vadd.f32 %v314_v42, %v272_v23  ;;  %v273_v14 = vmul.f32 0.375, %v1428_v51  ;;  %v315_v60 = vadd.f32 %v270_v41, %v1369_v30  ;;  %v185_v42 = vld [vmem:[%s1205_s13 + $0x128] sm:$0xff] }
  0x5d   : > { %v783_v61 = vadd.f32 %v698_v45, %v617_v5  ;;  %v415_v0 = vadd.f32 %v361_v20, %v1453_v8  ;;  %v1490_v28 = vmul.f32 0.125, %v1479_v53  ;;  %v1493_v21 = vmul.f32 0.125, %v1482_v56 }
  0x5e   : > { %v980_v2 = vadd.f32 %v896_v4, %v784_v54  ;;  %v416_v38 = vadd.f32 %v362_v47, %v1457_v63  ;;  %v363_v49 = vadd.f32 %v315_v60, %v273_v14  ;;  %v1497_v62 = vmul.f32 0.375, %v1439_v15 }
  0x5f   : > { %v979_v51 = vadd.f32 %v894_v48, %v783_v61  ;;  %v453_v30 = vmul.f32 0.125, %v415_v0  ;;  %v483_v41 = vmul.f32 0.375, %v415_v0  ;;  %v1500_v7 = vmul.f32 0.375, %v1447_v31 }
  0x60   : > { %1012 = vst.msk [vmem:[%s1272_s17 + $0x68] sm:$0x7f] %vm999_vm4, %v980_v2  ;;  %v454_v3 = vmul.f32 0.125, %v416_v38  ;;  %v484_v44 = vmul.f32 0.375, %v416_v38  ;;  %v417_v26 = vadd.f32 %v363_v49, %v1473_v37  ;;  %v316_v10 = vadd.f32 %v271_v22, %v1377_v9  ;;  %v1518_v22 = vld [vmem:[%s1205_s13 + $0x120] sm:$0xff] }
  0x61   : > { %1011 = vst.msk [vmem:[%s1272_s17 + $0x60] sm:$0xff] %vm997_vm3, %v979_v51  ;;  %v551_v15 = vrot.slane %v483_v41, 1  ;;  %v701_v12 = vrot.slane %v483_v41, 2  ;;  %v897_v17 = vrot.slane %v453_v30, 3  ;;  %v317_v18 = vadd.f32 %v272_v23, %v1382_v43  ;;  %v1540_v41 = vld [vmem:[%s1205_s13 + $0x130] sm:$0x3] }
  0x62   : > { %v552_v31 = vrot.slane %v484_v44, 1  ;;  %v702_v19 = vrot.slane %v484_v44, 2  ;;  %v898_v27 = vrot.slane %v454_v3, 3  ;;  %v642_v16 = vmul.f32 0.375, %v417_v26 }
  0x63   : > { %v808_v29 = vmul.f32 0.125, %v417_v26  ;;  %v364_v55 = vadd.f32 %v316_v10, %v1497_v62  ;;  %v365_v33 = vadd.f32 %v317_v18, %v1500_v7  ;;  %v1515_v9 = vmul.f32 0.125, %v1507_v57 }
  0x64   : > { %v553_v6 = vsel %vm529_vm0, %v551_v15, %v552_v31  ;;  %v703_v35 = vsel %vm665_vm1, %v701_v12, %v702_v19  ;;  %v899_v43 = vsel %vm861_vm2, %v897_v17, %v898_v27  ;;  %v620_v23 = vadd.f32 %v552_v31, %v454_v3 }
  0x65   : > { %v619_v13 = vadd.f32 %v553_v6, %v453_v30  ;;  %v704_v36 = vrot.slane %v642_v16, 2  ;;  %v900_v58 = vrot.slane %v808_v29, 3  ;;  %v418_v39 = vadd.f32 %v364_v55, %v1490_v28 }
  0x66   : > { %v419_v34 = vadd.f32 %v365_v33, %v1493_v21  ;;  %v276_v24 = vmul.f32 0.375, %v1466_v32  ;;  %v318_v40 = vadd.f32 %v273_v14, %v1403_v50  ;;  %v1529_v46 = vmul.f32 0.125, %v1518_v22 }
  0x67   : > { %v785_v45 = vadd.f32 %v703_v35, %v619_v13  ;;  %v705_v48 = vsel %vm665_vm1, %v702_v19, %v704_v36  ;;  %v901_v52 = vsel %vm861_vm2, %v898_v27, %v900_v58  ;;  %v455_v5 = vmul.f32 0.125, %v418_v39 }
  0x68   : > { %v786_v11 = vadd.f32 %v705_v48, %v620_v23  ;;  %v456_v4 = vmul.f32 0.125, %v419_v34  ;;  %v485_v20 = vmul.f32 0.375, %v418_v39  ;;  %v486_v54 = vmul.f32 0.375, %v419_v34 }
  0x69   : > { %v981_v32 = vadd.f32 %v899_v43, %v785_v45  ;;  %v902_v47 = vrot.slane %v455_v5, 3  ;;  %v366_v50 = vadd.f32 %v318_v40, %v276_v24  ;;  %v1533_v14 = vmul.f32 0.125, %v185_v42 }
  0x6a   : > { %v982_v60 = vadd.f32 %v901_v52, %v786_v11  ;;  %v554_v61 = vrot.slane %v485_v20, 1  ;;  %v555_v0 = vrot.slane %v486_v54, 1  ;;  %v706_v2 = vrot.slane %v485_v20, 2  ;;  %v1578_v11 = vld [vmem:[%s1205_s13 + $0x148] sm:$0x3] }
  0x6b   : > { %1013 = vst.msk [vmem:[%s1272_s17 + $0x70] sm:$0xff] %vm997_vm3, %v981_v32  ;;  %v707_v38 = vrot.slane %v486_v54, 2  ;;  %v903_v49 = vrot.slane %v456_v4, 3  ;;  %v420_v51 = vadd.f32 %v366_v50, %v1515_v9  ;;  %v277_v30 = vmul.f32 0.375, %v1479_v53  ;;  %v1551_v53 = vld [vmem:[%s1205_s13 + $0x138] sm:$0xff] }
  0x6c   : > { %1014 = vst.msk [vmem:[%s1272_s17 + $0x78] sm:$0x7f] %vm999_vm4, %v982_v60  ;;  %v556_v3 = vsel %vm529_vm0, %v554_v61, %v555_v0  ;;  %v622_v44 = vadd.f32 %v555_v0, %v456_v4  ;;  %v278_v26 = vmul.f32 0.375, %v1482_v56  ;;  %v319_v10 = vadd.f32 %v1497_v62, %v1417_v25  ;;  %v1559_v56 = vld [vmem:[%s1205_s13 + $0x140] sm:$0xff] }
  0x6d   : > { %v621_v15 = vadd.f32 %v556_v3, %v455_v5  ;;  %v708_v12 = vsel %vm665_vm1, %v706_v2, %v707_v38  ;;  %v904_v17 = vsel %vm861_vm2, %v902_v47, %v903_v49  ;;  %v643_v18 = vmul.f32 0.375, %v420_v51 }
  0x6e   : > { %v809_v31 = vmul.f32 0.125, %v420_v51  ;;  %v320_v19 = vadd.f32 %v1500_v7, %v1421_v59  ;;  %v367_v27 = vadd.f32 %v319_v10, %v277_v30  ;;  %v1556_v16 = vmul.f32 0.125, %v1540_v41  ;;  %v1592_v10 = vld [vmem:[%s1205_s13 + $0x158] sm:$0xff] }
  0x6f   : > { %v787_v29 = vadd.f32 %v708_v12, %v621_v15  ;;  %v709_v25 = vrot.slane %v643_v18, 2  ;;  %v279_v62 = vmul.f32 0.375, %v1507_v57  ;;  %v321_v55 = vadd.f32 %v276_v24, %v1444_v1 }
  0x70   : > { %v905_v33 = vrot.slane %v809_v31, 3  ;;  %v368_v6 = vadd.f32 %v320_v19, %v278_v26  ;;  %v421_v35 = vadd.f32 %v367_v27, %v1529_v46  ;;  %v1565_v43 = vmul.f32 0.125, %v1551_v53 }
  0x71   : > { %v983_v59 = vadd.f32 %v904_v17, %v787_v29  ;;  %v710_v7 = vsel %vm665_vm1, %v707_v38, %v709_v25  ;;  %v369_v23 = vadd.f32 %v321_v55, %v279_v62  ;;  %v1569_v13 = vmul.f32 0.125, %v1559_v56 }
  0x72   : > { %v788_v36 = vadd.f32 %v710_v7, %v622_v44  ;;  %v906_v57 = vsel %vm861_vm2, %v903_v49, %v905_v33  ;;  %v422_v1 = vadd.f32 %v368_v6, %v1533_v14  ;;  %v457_v58 = vmul.f32 0.125, %v421_v35  ;;  %v190_v44 = vld [vmem:[%s1205_s13 + $0x150] sm:$0xff] }
  0x73   : > { %1015 = vst.msk [vmem:[%s1272_s17 + $0x80] sm:$0xff] %vm997_vm3, %v983_v59  ;;  %v487_v39 = vmul.f32 0.375, %v421_v35  ;;  %v423_v34 = vadd.f32 %v369_v23, %v1556_v16  ;;  %v280_v24 = vmul.f32 0.375, %v1518_v22  ;;  %v281_v40 = vmul.f32 0.375, %v185_v42 }
  0x74   : > { %v984_v45 = vadd.f32 %v906_v57, %v788_v36  ;;  %v458_v48 = vmul.f32 0.125, %v422_v1  ;;  %v488_v52 = vmul.f32 0.375, %v422_v1  ;;  %v907_v5 = vrot.slane %v457_v58, 3  ;;  %v1612_v57 = vld [vmem:[%s1205_s13 + $0x160] sm:$0x3] }
  0x75   : > { %v557_v4 = vrot.slane %v487_v39, 1  ;;  %v711_v20 = vrot.slane %v487_v39, 2  ;;  %v644_v54 = vmul.f32 0.375, %v423_v34  ;;  %v810_v32 = vmul.f32 0.125, %v423_v34 }
  0x76   : > { %1016 = vst.msk [vmem:[%s1272_s17 + $0x88] sm:$0x7f] %vm999_vm4, %v984_v45  ;;  %v558_v47 = vrot.slane %v488_v52, 1  ;;  %v712_v50 = vrot.slane %v488_v52, 2  ;;  %v908_v60 = vrot.slane %v458_v48, 3  ;;  %v322_v22 = vadd.f32 %v277_v30, %v1453_v8 }
  0x77   : > { %v714_v42 = vrot.slane %v644_v54, 2  ;;  %v910_v61 = vrot.slane %v810_v32, 3  ;;  %v323_v0 = vadd.f32 %v278_v26, %v1457_v63  ;;  %v1585_v2 = vmul.f32 0.125, %v1578_v11 }
  0x78   : > { %v559_v38 = vsel %vm529_vm0, %v557_v4, %v558_v47  ;;  %v713_v49 = vsel %vm665_vm1, %v711_v20, %v712_v50  ;;  %v909_v51 = vsel %vm861_vm2, %v907_v5, %v908_v60  ;;  %v624_v3 = vadd.f32 %v558_v47, %v458_v48 }
  0x79   : > { %v623_v15 = vadd.f32 %v559_v38, %v457_v58  ;;  %v715_v8 = vsel %vm665_vm1, %v712_v50, %v714_v42  ;;  %v911_v30 = vsel %vm861_vm2, %v908_v60, %v910_v61  ;;  %v370_v12 = vadd.f32 %v322_v22, %v280_v24 }
  0x7a   : > { %v790_v63 = vadd.f32 %v715_v8, %v624_v3  ;;  %v371_v26 = vadd.f32 %v323_v0, %v281_v40  ;;  %v282_v17 = vmul.f32 0.375, %v1540_v41  ;;  %v324_v18 = vadd.f32 %v279_v62, %v1473_v37 }
  0x7b   : > { %v789_v31 = vadd.f32 %v713_v49, %v623_v15  ;;  %v424_v19 = vadd.f32 %v370_v12, %v1565_v43  ;;  %v1599_v27 = vmul.f32 0.125, %v190_v44  ;;  %v1602_v29 = vmul.f32 0.125, %v1592_v10 }
  0x7c   : > { %v986_v25 = vadd.f32 %v911_v30, %v790_v63  ;;  %v425_v55 = vadd.f32 %v371_v26, %v1569_v13  ;;  %v372_v33 = vadd.f32 %v324_v18, %v282_v17  ;;  %v283_v6 = vmul.f32 0.375, %v1551_v53 }
  0x7d   : > { %v985_v35 = vadd.f32 %v909_v51, %v789_v31  ;;  %v459_v41 = vmul.f32 0.125, %v424_v19  ;;  %v489_v59 = vmul.f32 0.375, %v424_v19  ;;  %v284_v37 = vmul.f32 0.375, %v1559_v56 }
  0x7e   : > { %1018 = vst.msk [vmem:[%s1272_s17 + $0x98] sm:$0x7f] %vm999_vm4, %v986_v25  ;;  %v460_v62 = vmul.f32 0.125, %v425_v55  ;;  %v490_v7 = vmul.f32 0.375, %v425_v55  ;;  %v426_v23 = vadd.f32 %v372_v33, %v1585_v2  ;;  %v325_v36 = vadd.f32 %v280_v24, %v1490_v28  ;;  %v193_v55 = vld [vmem:[%s1205_s13 + $0x168] sm:$0xff] }
  0x7f   : > { %1017 = vst.msk [vmem:[%s1272_s17 + $0x90] sm:$0xff] %vm997_vm3, %v985_v35  ;;  %v560_v1 = vrot.slane %v489_v59, 1  ;;  %v716_v58 = vrot.slane %v489_v59, 2  ;;  %v912_v53 = vrot.slane %v459_v41, 3  ;;  %v326_v39 = vadd.f32 %v281_v40, %v1493_v21 }
  0x80   : > { %v561_v34 = vrot.slane %v490_v7, 1  ;;  %v717_v45 = vrot.slane %v490_v7, 2  ;;  %v913_v56 = vrot.slane %v460_v62, 3  ;;  %v645_v48 = vmul.f32 0.375, %v426_v23 }
  0x81   : > { %v811_v52 = vmul.f32 0.125, %v426_v23  ;;  %v373_v5 = vadd.f32 %v325_v36, %v283_v6  ;;  %v374_v4 = vadd.f32 %v326_v39, %v284_v37  ;;  %v1618_v20 = vmul.f32 0.125, %v1612_v57 }
  0x82   : > { %v562_v28 = vsel %vm529_vm0, %v560_v1, %v561_v34  ;;  %v718_v24 = vsel %vm665_vm1, %v716_v58, %v717_v45  ;;  %v914_v54 = vsel %vm861_vm2, %v912_v53, %v913_v56  ;;  %v626_v32 = vadd.f32 %v561_v34, %v460_v62  ;;  %v194_v1 = vld [vmem:[%s1205_s13 + $0x170] sm:$0xff] }
  0x83   : > { %v625_v47 = vadd.f32 %v562_v28, %v459_v41  ;;  %v719_v50 = vrot.slane %v645_v48, 2  ;;  %v915_v21 = vrot.slane %v811_v52, 3  ;;  %v427_v40 = vadd.f32 %v373_v5, %v1599_v27 }
  0x84   : > { %v428_v60 = vadd.f32 %v374_v4, %v1602_v29  ;;  %v285_v22 = vmul.f32 0.375, %v1578_v11  ;;  %v327_v42 = vadd.f32 %v282_v17, %v1515_v9  ;;  %v286_v61 = vmul.f32 0.375, %v190_v44 }
  0x85   : > { %v791_v0 = vadd.f32 %v718_v24, %v625_v47  ;;  %v720_v38 = vsel %vm665_vm1, %v717_v45, %v719_v50  ;;  %v916_v49 = vsel %vm861_vm2, %v913_v56, %v915_v21  ;;  %v461_v51 = vmul.f32 0.125, %v427_v40  ;;  %v195_v45 = vld [vmem:[%s1205_s13 + $0x178] sm:$0x3] }
  0x86   : > { %v792_v3 = vadd.f32 %v720_v38, %v626_v32  ;;  %v462_v15 = vmul.f32 0.125, %v428_v60  ;;  %v491_v8 = vmul.f32 0.375, %v427_v40  ;;  %v492_v30 = vmul.f32 0.375, %v428_v60 }
  0x87   : > { %v987_v12 = vadd.f32 %v914_v54, %v791_v0  ;;  %v917_v63 = vrot.slane %v461_v51, 3  ;;  %v375_v26 = vadd.f32 %v327_v42, %v285_v22  ;;  %v287_v11 = vmul.f32 0.375, %v1592_v10 }
  0x88   : > { %v988_v9 = vadd.f32 %v916_v49, %v792_v3  ;;  %v563_v44 = vrot.slane %v491_v8, 1  ;;  %v564_v17 = vrot.slane %v492_v30, 1  ;;  %v721_v18 = vrot.slane %v491_v8, 2 }
  0x89   : > { %1019 = vst.msk [vmem:[%s1272_s17 + $0xa0] sm:$0xff] %vm997_vm3, %v987_v12  ;;  %v722_v31 = vrot.slane %v492_v30, 2  ;;  %v918_v19 = vrot.slane %v462_v15, 3  ;;  %v429_v25 = vadd.f32 %v375_v26, %v1618_v20  ;;  %v328_v33 = vadd.f32 %v283_v6, %v1529_v46 }
  0x8a   : > { %1020 = vst.msk [vmem:[%s1272_s17 + $0xa8] sm:$0x7f] %vm999_vm4, %v988_v9  ;;  %v565_v35 = vsel %vm529_vm0, %v563_v44, %v564_v17  ;;  %v628_v10 = vadd.f32 %v564_v17, %v462_v15  ;;  %v329_v41 = vadd.f32 %v284_v37, %v1533_v14  ;;  %v385_v59 = vmul.f32 0.125, %v193_v55 }
  0x8b   : > { %v627_v62 = vadd.f32 %v565_v35, %v461_v51  ;;  %v723_v7 = vsel %vm665_vm1, %v721_v18, %v722_v31  ;;  %v919_v23 = vsel %vm861_vm2, %v917_v63, %v918_v19  ;;  %v646_v36 = vmul.f32 0.375, %v429_v25  ;;  %v198_v35 = vld [vmem:[%s1205_s13 + $0x190] sm:$0x3] }
  0x8c   : > { %v812_v58 = vmul.f32 0.125, %v429_v25  ;;  %v376_v53 = vadd.f32 %v328_v33, %v286_v61  ;;  %v377_v39 = vadd.f32 %v329_v41, %v287_v11  ;;  %v386_v46 = vmul.f32 0.125, %v194_v1 }
  0x8d   : > { %v793_v6 = vadd.f32 %v723_v7, %v627_v62  ;;  %v724_v34 = vrot.slane %v646_v36, 2  ;;  %v288_v56 = vmul.f32 0.375, %v1612_v57  ;;  %v330_v14 = vadd.f32 %v285_v22, %v1556_v16 }
  0x8e   : > { %v920_v37 = vrot.slane %v812_v58, 3  ;;  %v430_v48 = vadd.f32 %v385_v59, %v376_v53  ;;  %v431_v52 = vadd.f32 %v386_v46, %v377_v39  ;;  %v387_v5 = vmul.f32 0.125, %v195_v45 }
  0x8f   : > { %v989_v4 = vadd.f32 %v919_v23, %v793_v6  ;;  %v725_v28 = vsel %vm665_vm1, %v722_v31, %v724_v34  ;;  %v378_v24 = vadd.f32 %v330_v14, %v288_v56  ;;  %v289_v54 = vmul.f32 0.375, %v193_v55  ;;  %v196_v31 = vld [vmem:[%s1205_s13 + $0x180] sm:$0xff] }
  0x90   : > { %v794_v32 = vadd.f32 %v725_v28, %v628_v10  ;;  %v921_v47 = vsel %vm861_vm2, %v918_v19, %v920_v37  ;;  %v463_v50 = vmul.f32 0.125, %v430_v48  ;;  %v464_v21 = vmul.f32 0.125, %v431_v52  ;;  %v197_v19 = vld [vmem:[%s1205_s13 + $0x188] sm:$0xff]  ;;  %v199_v37 = vld [vmem:[%s1205_s13 + $0x198] sm:$0xff] }
  0x91   : > { %1021 = vst.msk [vmem:[%s1272_s17 + $0xb0] sm:$0xff] %vm997_vm3, %v989_v4  ;;  %v493_v57 = vmul.f32 0.375, %v430_v48  ;;  %v494_v40 = vmul.f32 0.375, %v431_v52  ;;  %v432_v16 = vadd.f32 %v387_v5, %v378_v24  ;;  %v290_v60 = vmul.f32 0.375, %v194_v1  ;;  %v200_v48 = vld [vmem:[%s1205_s13 + $0x1a0] sm:$0xff] }
  0x92   : > { %v990_v22 = vadd.f32 %v921_v47, %v794_v32  ;;  %v922_v42 = vrot.slane %v463_v50, 3  ;;  %v923_v0 = vrot.slane %v464_v21, 3  ;;  %v331_v38 = vadd.f32 %v286_v61, %v1565_v43 }
  0x93   : > { %v566_v49 = vrot.slane %v493_v57, 1  ;;  %v567_v51 = vrot.slane %v494_v40, 1  ;;  %v726_v3 = vrot.slane %v493_v57, 2  ;;  %v727_v15 = vrot.slane %v494_v40, 2 }
  0x94   : > { %1022 = vst.msk [vmem:[%s1272_s17 + $0xb8] sm:$0x7f] %vm999_vm4, %v990_v22  ;;  %v924_v8 = vsel %vm861_vm2, %v922_v42, %v923_v0  ;;  %v647_v30 = vmul.f32 0.375, %v432_v16  ;;  %v813_v12 = vmul.f32 0.125, %v432_v16  ;;  %v332_v63 = vadd.f32 %v287_v11, %v1569_v13  ;;  %v201_v16 = vld [vmem:[%s1205_s13 + $0x1a8] sm:$0x3] }
  0x95   : > { %v568_v26 = vsel %vm529_vm0, %v566_v49, %v567_v51  ;;  %v728_v9 = vsel %vm665_vm1, %v726_v3, %v727_v15  ;;  %v630_v43 = vadd.f32 %v567_v51, %v464_v21  ;;  %v379_v61 = vadd.f32 %v331_v38, %v289_v54 }
  0x96   : > { %v629_v44 = vadd.f32 %v568_v26, %v463_v50  ;;  %v729_v17 = vrot.slane %v647_v30, 2  ;;  %v925_v18 = vrot.slane %v813_v12, 3  ;;  %v380_v25 = vadd.f32 %v332_v63, %v290_v60 }
  0x97   : > { %v388_v55 = vmul.f32 0.125, %v196_v31  ;;  %v389_v33 = vmul.f32 0.125, %v197_v19  ;;  %v291_v10 = vmul.f32 0.375, %v195_v45  ;;  %v333_v41 = vadd.f32 %v288_v56, %v1585_v2 }
  0x98   : > { %v795_v59 = vadd.f32 %v728_v9, %v629_v44  ;;  %v730_v13 = vsel %vm665_vm1, %v727_v15, %v729_v17  ;;  %v926_v11 = vsel %vm861_vm2, %v923_v0, %v925_v18  ;;  %v390_v62 = vmul.f32 0.125, %v198_v35 }
  0x99   : > { %v796_v7 = vadd.f32 %v730_v13, %v630_v43  ;;  %v433_v23 = vadd.f32 %v388_v55, %v379_v61  ;;  %v434_v36 = vadd.f32 %v389_v33, %v380_v25  ;;  %v381_v1 = vadd.f32 %v333_v41, %v291_v10 }
  0x9a   : > { %v991_v58 = vadd.f32 %v924_v8, %v795_v59  ;;  %v334_v53 = vadd.f32 %v289_v54, %v1599_v27  ;;  %v335_v39 = vadd.f32 %v290_v60, %v1602_v29  ;;  %v337_v2 = vmul.f32 0.375, %v196_v31 }
  0x9b   : > { %v992_v46 = vadd.f32 %v926_v11, %v796_v7  ;;  %v465_v6 = vmul.f32 0.125, %v433_v23  ;;  %v466_v34 = vmul.f32 0.125, %v434_v36  ;;  %v495_v45 = vmul.f32 0.375, %v433_v23 }
  0x9c   : > { %1023 = vst.msk [vmem:[%s1272_s17 + $0xc0] sm:$0xff] %vm997_vm3, %v991_v58  ;;  %v496_v56 = vmul.f32 0.375, %v434_v36  ;;  %v435_v14 = vadd.f32 %v390_v62, %v381_v1  ;;  %v338_v52 = vmul.f32 0.375, %v197_v19  ;;  %v382_v5 = vadd.f32 %v337_v2, %v334_v53 }
  0x9d   : > { %1024 = vst.msk [vmem:[%s1272_s17 + $0xc8] sm:$0x7f] %vm999_vm4, %v992_v46  ;;  %v569_v4 = vrot.slane %v495_v45, 1  ;;  %v731_v27 = vrot.slane %v495_v45, 2  ;;  %v927_v28 = vrot.slane %v465_v6, 3  ;;  %v928_v29 = vrot.slane %v466_v34, 3 }
  0x9e   : > { %v570_v24 = vrot.slane %v496_v56, 1  ;;  %v732_v54 = vrot.slane %v496_v56, 2  ;;  %v648_v32 = vmul.f32 0.375, %v435_v14  ;;  %v814_v47 = vmul.f32 0.125, %v435_v14 }
  0x9f   : > { %v929_v50 = vsel %vm861_vm2, %v927_v28, %v928_v29  ;;  %v383_v21 = vadd.f32 %v338_v52, %v335_v39  ;;  %v391_v57 = vmul.f32 0.125, %v199_v37  ;;  %v392_v40 = vmul.f32 0.125, %v200_v48 }
  0xa0   : > { %v571_v60 = vsel %vm529_vm0, %v569_v4, %v570_v24  ;;  %v733_v22 = vsel %vm665_vm1, %v731_v27, %v732_v54  ;;  %v632_v42 = vadd.f32 %v570_v24, %v466_v34  ;;  %v734_v0 = vrot.slane %v648_v32, 2 }
  0xa1   : > { %v631_v38 = vadd.f32 %v571_v60, %v465_v6  ;;  %v930_v49 = vrot.slane %v814_v47, 3  ;;  %v436_v51 = vadd.f32 %v391_v57, %v382_v5  ;;  %v437_v3 = vadd.f32 %v392_v40, %v383_v21 }
  0xa2   : > { %v735_v15 = vsel %vm665_vm1, %v732_v54, %v734_v0  ;;  %v336_v8 = vadd.f32 %v291_v10, %v1618_v20  ;;  %v339_v30 = vmul.f32 0.375, %v198_v35  ;;  %v393_v12 = vmul.f32 0.125, %v201_v16 }
  0xa3   : > { %v797_v63 = vadd.f32 %v733_v22, %v631_v38  ;;  %v798_v26 = vadd.f32 %v735_v15, %v632_v42  ;;  %v931_v9 = vsel %vm861_vm2, %v928_v29, %v930_v49  ;;  %v467_v43 = vmul.f32 0.125, %v436_v51 }
  0xa4   : > { %v468_v61 = vmul.f32 0.125, %v437_v3  ;;  %v497_v44 = vmul.f32 0.375, %v436_v51  ;;  %v498_v17 = vmul.f32 0.375, %v437_v3  ;;  %v384_v18 = vadd.f32 %v339_v30, %v336_v8 }
  0xa5   : > { %v993_v31 = vadd.f32 %v929_v50, %v797_v63  ;;  %v994_v19 = vadd.f32 %v931_v9, %v798_v26  ;;  %v932_v25 = vrot.slane %v467_v43, 3 }
  0xa6   : > { %v572_v55 = vrot.slane %v497_v44, 1  ;;  %v573_v33 = vrot.slane %v498_v17, 1  ;;  %v736_v41 = vrot.slane %v497_v44, 2  ;;  %v737_v20 = vrot.slane %v498_v17, 2 }
  0xa7   : > { %1025 = vst.msk [vmem:[%s1272_s17 + $0xd0] sm:$0xff] %vm997_vm3, %v993_v31  ;;  %v933_v35 = vrot.slane %v468_v61, 3  ;;  %v438_v10 = vadd.f32 %v393_v12, %v384_v18 }
  0xa8   : > { %1026 = vst.msk [vmem:[%s1272_s17 + $0xd8] sm:$0x7f] %vm999_vm4, %v994_v19  ;;  %v574_v59 = vsel %vm529_vm0, %v572_v55, %v573_v33  ;;  %v738_v13 = vsel %vm665_vm1, %v736_v41, %v737_v20  ;;  %v634_v36 = vadd.f32 %v573_v33, %v468_v61 }
  0xa9   : > { %v633_v11 = vadd.f32 %v574_v59, %v467_v43  ;;  %v649_v62 = vmul.f32 0.375, %v438_v10  ;;  %v815_v7 = vmul.f32 0.125, %v438_v10  ;;  %v934_v23 = vsel %vm861_vm2, %v932_v25, %v933_v35 }
  0xab   : > { %v799_v1 = vadd.f32 %v738_v13, %v633_v11  ;;  %v739_v58 = vrot.slane %v649_v62, 2  ;;  %v935_v53 = vrot.slane %v815_v7, 3 }
  0xad   : > { %v995_v39 = vadd.f32 %v934_v23, %v799_v1  ;;  %v740_v2 = vsel %vm665_vm1, %v737_v20, %v739_v58  ;;  %v936_v46 = vsel %vm861_vm2, %v933_v35, %v935_v53 }
  0xae   : > { %v800_v6 = vadd.f32 %v740_v2, %v634_v36 }
  0xaf   : > { %1027 = vst.msk [vmem:[%s1272_s17 + $0xe0] sm:$0xff] %vm997_vm3, %v995_v39 }
  0xb0   : > { %v996_v34 = vadd.f32 %v936_v46, %v800_v6 }
  0xb2   : > { %1028 = vst.msk [vmem:[%s1272_s17 + $0xe8] sm:$0x7f] %vm999_vm4, %v996_v34 }
  0xb3 PF: > { %s11_s8 = sadd.s32 1, %s1169_s8   ;;  %s1701_s6 = smov %s1165_s7 }
  0xb4   : > { %p8_p5 = scmp.ge.s32.totalorder %s11_s8, 6   ;;  %s1702_s7 = smov %s1704_s9 }
  0xb6   :  { %10 = sbr.rel (!%p8_p5) target bundleno = 2 (0x2), region = 54 }

// kernel: discriminator_forward.15
= control target key start
LH: loop header
LB: loop body
LE: loop exit
PB: predicated region body
PF: predicated region fallthrough
CT: control target
= control target key end

     0   :  { %s2025_s12 = smov 0   ;;  %s2027_s13 = smov 0   ;;  %s2309_s0 = inlined_call_operand.vmem [shape: bf16[1024,384], index: 0, kind: input, shape index: {}]   ;;  %s2310_s1 = inlined_call_operand.vmem [shape: bf16[384,128], index: 1, kind: input, shape index: {}]   ;;  %s2311_s2 = inlined_call_operand.vmem [shape: f32[1,128], index: 2, kind: input, shape index: {}]   ;;  %s2312_s3 = inlined_call_operand.vmem [shape: f32[1024,128], index: 3, kind: output, shape index: {}]  }
   0x1   :  { %s2029_s14 = smov 0  }
   0x2 LB: > { %s32_s15 = sadd.s32 1, %s1999_s13  ;;  %p1588_p0 = scmp.ge.s32.totalorder %s2003_s14, 1  ;;  %s2003_s14 = sphi %s2029_s14, %s13_s14   ;;  %s1999_s13 = sphi %s2027_s13, %s2314_s13   ;;  %s1995_s12 = sphi %s2025_s12, %s2313_s12  }
   0x3   : > { %p34_p1 = scmp.ge.s32.totalorder %s32_s15, 4  ;;  %p191_p2 = scmp.lt.s32.totalorder %s2003_s14, 5 }
   0x5   : > { %s2316_s15 = smov (%p34_p1, %s32_s15), 0  ;;  %p192_p3 = pnand %p1588_p0, %p191_p2 }
   0x6   : > { %s1589_s18 = sshll.u32 (!%p192_p3), %s1995_s12, 5 }
   0x7   : > { %195 = sbr.rel (%p192_p3) target bundleno = 347 (0x15b), region = 32  ;;  %p236_p4 = scmp.lt.s32.totalorder (!%p192_p3), %s1589_s18, 127 }
   0xc   : > { %v1893_v0 = vld [vmem:[%s2310_s1 + $0x78] sm:$0xff]   ;;  %v1895_v2 = vld [vmem:[%s2310_s1 + $0x70] sm:$0xff]   ;;  %v1897_v4 = vld [vmem:[%s2310_s1 + $0x68] sm:$0xff]   ;;  %s2318_s18 = smov (!%p236_p4, %s1589_s18), 127 }
   0xd   : > { %v1894_v1 = vld [vmem:[%s2310_s1 + $0x38] sm:$0xff]   ;;  %1668 = vmatprep.subr.bf16.mxu0 %v1893_v0  ;;  %1852 = vmatprep.subr.bf16.mxu1 %v1893_v0  ;;  %v1896_v3 = vld [vmem:[%s2310_s1 + $0x30] sm:$0xff]   ;;  %v1898_v5 = vld [vmem:[%s2310_s1 + $0x28] sm:$0xff]   ;;  %s1868_s4 = smul.u32 12, %s2318_s18  ;;  %s1592_s25 = sshll.u32 %s2318_s18, 3 }
   0xe   : > { %1669 = vmatpush3.bf16.msra.mxu0 %v1894_v1  ;;  %1860 = vmatpush3.bf16.msra.mxu1 %v1894_v1  ;;  %v1899_v6 = vld [vmem:[%s2310_s1 + $0x60] sm:$0xff]   ;;  %v1901_v8 = vld [vmem:[%s2310_s1 + $0x58] sm:$0xff]   ;;  %v1903_v10 = vld [vmem:[%s2310_s1 + $0x50] sm:$0xff]   ;;  %s2214_s28 = scalar_lea.vmem %s2312_s3, %s1592_s25 }
   0xf   : > { %1670 = vmatprep.subr.bf16.mxu0 %v1895_v2  ;;  %1853 = vmatprep.subr.bf16.mxu1 %v1895_v2  ;;  %v1900_v7 = vld [vmem:[%s2310_s1 + $0x20] sm:$0xff]   ;;  %s2076_s11 = scalar_lea.vmem %s2309_s0, %s1868_s4  ;;  %v1902_v9 = vld [vmem:[%s2310_s1 + $0x18] sm:$0xff]   ;;  %v1904_v13 = vld [vmem:[%s2310_s1 + $0x10] sm:$0xff]  }
  0x10   : > { %v1911_v11 = vld [vmem:[%s2076_s11 + $0x4] ss:$12 sps:$4 sm:$0xff]   ;;  %v1905_v14 = vld [vmem:[%s2310_s1 + $0x48] sm:$0xff]   ;;  %v1915_v18 = vld [vmem:[%s2310_s1 + $0xb8] sm:$0xff]  }
  0x11   : > { %v1914_v12 = vld [vmem:[%s2076_s11 + $0x124] ss:$12 sps:$4 sm:$0xff]   ;;  %880 = vmatprep.mubr.bf16.mxu0 %v1911_v11  ;;  %v1906_v15 = vld [vmem:[%s2310_s1 + $0x8] sm:$0xff]   ;;  %v1925_v28 = vld [vmem:[%s2076_s11 + $0x34] ss:$12 sps:$4 sm:$0xff]  }
  0x12   : > { %1671 = vmatpush3.bf16.msra.mxu0 %v1896_v3  ;;  %1861 = vmatpush3.bf16.msra.mxu1 %v1896_v3  ;;  %v1907_v16 = vld [vmem:[%s2310_s1 + $0x40] sm:$0xff]   ;;  %v1917_v21 = vld [vmem:[%s2076_s11 + $0x1c] ss:$12 sps:$4 sm:$0xff]   ;;  %v1916_v22 = vld [vmem:[%s2310_s1 + $0xb0] sm:$0xff]  }
  0x13   : > { %1672 = vmatprep.subr.bf16.mxu0 %v1897_v4  ;;  %1854 = vmatprep.subr.bf16.mxu1 %v1897_v4  ;;  %v1908_v17 = vld [vmem:[%s2310_s1] sm:$0xff]   ;;  %v1919_v23 = vld [vmem:[%s2076_s11 + $0x13c] ss:$12 sps:$4 sm:$0xff]   ;;  %v1932_v33 = vld [vmem:[%s2310_s1 + $0x90] sm:$0xff]  }
  0x14   : > { %976 = vmatprep.mubr.bf16.mxu1 %v1914_v12  ;;  %v1909_v19 = vld [vmem:[%s2076_s11] ss:$12 sps:$4 sm:$0xff]   ;;  %v1921_v24 = vld [vmem:[%s2076_s11 + $0x18] ss:$12 sps:$4 sm:$0xff]   ;;  %v1929_v31 = vld [vmem:[%s2076_s11 + $0x30] ss:$12 sps:$4 sm:$0xff]  }
  0x15   : > { %v1912_v20 = vld [vmem:[%s2076_s11 + $0x120] ss:$12 sps:$4 sm:$0xff]   ;;  %v1922_v26 = vld [vmem:[%s2076_s11 + $0x138] ss:$12 sps:$4 sm:$0xff]   ;;  %v1930_v32 = vld [vmem:[%s2076_s11 + $0x150] ss:$12 sps:$4 sm:$0xff]  }
  0x16   : > { %1673 = vmatpush3.bf16.msra.mxu0 %v1898_v5  ;;  %1862 = vmatpush3.bf16.msra.mxu1 %v1898_v5  ;;  %v1923_v25 = vld [vmem:[%s2310_s1 + $0xa8] sm:$0xff]   ;;  %v1924_v27 = vld [vmem:[%s2310_s1 + $0xa0] sm:$0xff]   ;;  %v1931_v30 = vld [vmem:[%s2310_s1 + $0x98] sm:$0xff]  }
  0x17   : > { %1674 = vmatprep.subr.bf16.mxu0 %v1899_v6  ;;  %1855 = vmatprep.subr.bf16.mxu1 %v1899_v6  ;;  %v1927_v29 = vld [vmem:[%s2076_s11 + $0x154] ss:$12 sps:$4 sm:$0xff]   ;;  %v1933_v34 = vld [vmem:[%s2076_s11 + $0x4c] ss:$12 sps:$4 sm:$0xff]   ;;  %v1941_v39 = vld [vmem:[%s2076_s11 + $0x64] ss:$12 sps:$4 sm:$0xff]  }
  0x18   : > { %v1935_v35 = vld [vmem:[%s2076_s11 + $0x16c] ss:$12 sps:$4 sm:$0xff]   ;;  %v1937_v37 = vld [vmem:[%s2076_s11 + $0x48] ss:$12 sps:$4 sm:$0xff]   ;;  %v1940_v40 = vld [vmem:[%s2310_s1 + $0x80] sm:$0xff]  }
  0x19   : > { %v1939_v36 = vld [vmem:[%s2310_s1 + $0x88] sm:$0xff]   ;;  %v1948_v45 = vld [vmem:[%s2076_s11 + $0x38] ss:$12 sps:$4 sm:$0xff]   ;;  %v1950_v47 = vld [vmem:[%s2076_s11 + $0x50] ss:$12 sps:$4 sm:$0xff]  }
  0x1a   : > { %1675 = vmatpush3.bf16.msra.mxu0 %v1900_v7  ;;  %1863 = vmatpush3.bf16.msra.mxu1 %v1900_v7  ;;  %v1938_v38 = vld [vmem:[%s2076_s11 + $0x168] ss:$12 sps:$4 sm:$0xff]   ;;  %v1944_v42 = vld [vmem:[%s2076_s11 + $0x60] ss:$12 sps:$4 sm:$0xff]   ;;  %v1949_v46 = vld [vmem:[%s2076_s11 + $0x78] ss:$12 sps:$4 sm:$0xff]  }
  0x1b   : > { %1676 = vmatprep.subr.bf16.mxu0 %v1901_v8  ;;  %1856 = vmatprep.subr.bf16.mxu1 %v1901_v8  ;;  %v1943_v41 = vld [vmem:[%s2076_s11 + $0x8] ss:$12 sps:$4 sm:$0xff]   ;;  %v1945_v43 = vld [vmem:[%s2076_s11 + $0x20] ss:$12 sps:$4 sm:$0xff]   ;;  %v1954_v50 = vld [vmem:[%s2076_s11 + $0x90] ss:$12 sps:$4 sm:$0xff]  }
  0x1c   : > { %v1946_v44 = vld [vmem:[%s2076_s11 + $0x7c] ss:$12 sps:$4 sm:$0xff]   ;;  %v1951_v48 = vld [vmem:[%s2076_s11 + $0x94] ss:$12 sps:$4 sm:$0xff]   ;;  %v1956_v52 = vld [vmem:[%s2076_s11 + $0xac] ss:$12 sps:$4 sm:$0xff]  }
  0x1d   : > { %v1953_v49 = vld [vmem:[%s2076_s11 + $0x68] ss:$12 sps:$4 sm:$0xff]   ;;  %v1955_v51 = vld [vmem:[%s2076_s11 + $0x80] ss:$12 sps:$4 sm:$0xff]   ;;  %v1958_v53 = vld [vmem:[%s2076_s11 + $0x98] ss:$12 sps:$4 sm:$0xff]  }
  0x1e   : > { %1677 = vmatpush3.bf16.msra.mxu0 %v1902_v9  ;;  %1864 = vmatpush3.bf16.msra.mxu1 %v1902_v9  ;;  %v1959_v54 = vld [vmem:[%s2076_s11 + $0xa8] ss:$12 sps:$4 sm:$0xff]   ;;  %v1960_v55 = vld [vmem:[%s2076_s11 + $0xb0] ss:$12 sps:$4 sm:$0xff]   ;;  %v1964_v58 = vld [vmem:[%s2076_s11 + $0xc0] ss:$12 sps:$4 sm:$0xff]  }
  0x1f   : > { %1678 = vmatprep.subr.bf16.mxu0 %v1903_v10  ;;  %1857 = vmatprep.subr.bf16.mxu1 %v1903_v10  ;;  %v1961_v56 = vld [vmem:[%s2076_s11 + $0xc4] ss:$12 sps:$4 sm:$0xff]   ;;  %v1963_v57 = vld [vmem:[%s2076_s11 + $0xc8] ss:$12 sps:$4 sm:$0xff]   ;;  %v1965_v59 = vld [vmem:[%s2076_s11 + $0xe0] ss:$12 sps:$4 sm:$0xff]  }
  0x20   : > { %v1966_v60 = vld [vmem:[%s2076_s11 + $0xdc] ss:$12 sps:$4 sm:$0xff]   ;;  %v1968_v61 = vld [vmem:[%s2076_s11 + $0xf8] ss:$12 sps:$4 sm:$0xff]   ;;  %v1971_v0 = vld [vmem:[%s2076_s11 + $0xf4] ss:$12 sps:$4 sm:$0xff]  }
  0x21   : > { %v1969_v62 = vld [vmem:[%s2076_s11 + $0xd8] ss:$12 sps:$4 sm:$0xff]   ;;  %v1970_v63 = vld [vmem:[%s2076_s11 + $0x110] ss:$12 sps:$4 sm:$0xff]   ;;  %v1973_v1 = vld [vmem:[%s2076_s11 + $0x128] ss:$12 sps:$4 sm:$0xff]  }
  0x22   : > { %1679 = vmatpush3.bf16.msra.mxu0 %v1904_v13  ;;  %1865 = vmatpush3.bf16.msra.mxu1 %v1904_v13  ;;  %v1974_v2 = vld [vmem:[%s2076_s11 + $0xf0] ss:$12 sps:$4 sm:$0xff]   ;;  %v1975_v3 = vld [vmem:[%s2076_s11 + $0x140] ss:$12 sps:$4 sm:$0xff]   ;;  %v1978_v5 = vld [vmem:[%s2076_s11 + $0x158] ss:$12 sps:$4 sm:$0xff]  }
  0x23   : > { %1680 = vmatprep.subr.bf16.mxu0 %v1905_v14  ;;  %1858 = vmatprep.subr.bf16.mxu1 %v1905_v14  ;;  %v1976_v4 = vld [vmem:[%s2076_s11 + $0x10c] ss:$12 sps:$4 sm:$0xff]   ;;  %v1979_v6 = vld [vmem:[%s2076_s11 + $0x108] ss:$12 sps:$4 sm:$0xff]   ;;  %v1980_v7 = vld [vmem:[%s2076_s11 + $0x170] ss:$12 sps:$4 sm:$0xff]  }
  0x26   : > { %1681 = vmatpush3.bf16.msra.mxu0 %v1906_v15  ;;  %1866 = vmatpush3.bf16.msra.mxu1 %v1906_v15 }
  0x27   : > { %1682 = vmatprep.subr.bf16.mxu0 %v1907_v16  ;;  %1859 = vmatprep.subr.bf16.mxu1 %v1907_v16 }
  0x2a   : > { %1683 = vmatpush3.bf16.msra.mxu0 %v1908_v17  ;;  %1867 = vmatpush3.bf16.msra.mxu1 %v1908_v17 }
  0x2b   : > { %1804 = vmatprep.subr.bf16.mxu1 %v1915_v18 }
  0x2d   : > { %881 = vmatmul.mubr.bf16.vlgmr.msra.gmra.mxu0 %v1909_v19  ;;  %977 = vmatmul.mubr.bf16.vlgmr.msra.gmra.mxu1 %v1912_v20 }
  0x2e   : > { %1805 = vmatpush3.bf16.msra.mxu1 %v1915_v18  ;;  %888 = vmatprep.mubr.bf16.mxu0 %v1917_v21 }
  0x2f   : > { %1806 = vmatprep.subr.bf16.mxu1 %v1916_v22  ;;  %984 = vmatprep.mubr.bf16.mxu1 %v1919_v23 }
  0x32   : > { %1807 = vmatpush3.bf16.msra.mxu1 %v1916_v22 }
  0x33   : > { %1808 = vmatprep.subr.bf16.mxu1 %v1923_v25 }
  0x35   : > { %889 = vmatmul.mubr.bf16.gmra.mxu0 %v1921_v24  ;;  %985 = vmatmul.mubr.bf16.gmra.mxu1 %v1922_v26 }
  0x36   : > { %1809 = vmatpush3.bf16.msra.mxu1 %v1923_v25  ;;  %896 = vmatprep.mubr.bf16.mxu0 %v1925_v28 }
  0x37   : > { %1810 = vmatprep.subr.bf16.mxu1 %v1924_v27  ;;  %992 = vmatprep.mubr.bf16.mxu1 %v1927_v29 }
  0x3a   : > { %1811 = vmatpush3.bf16.msra.mxu1 %v1924_v27 }
  0x3b   : > { %1812 = vmatprep.subr.bf16.mxu1 %v1931_v30 }
  0x3d   : > { %897 = vmatmul.mubr.bf16.gmra.mxu0 %v1929_v31  ;;  %993 = vmatmul.mubr.bf16.gmra.mxu1 %v1930_v32 }
  0x3e   : > { %1813 = vmatpush3.bf16.msra.mxu1 %v1931_v30  ;;  %904 = vmatprep.mubr.bf16.mxu0 %v1933_v34 }
  0x3f   : > { %1814 = vmatprep.subr.bf16.mxu1 %v1932_v33  ;;  %1000 = vmatprep.mubr.bf16.mxu1 %v1935_v35 }
  0x42   : > { %1815 = vmatpush3.bf16.msra.mxu1 %v1932_v33 }
  0x43   : > { %1816 = vmatprep.subr.bf16.mxu1 %v1939_v36 }
  0x45   : > { %905 = vmatmul.mubr.bf16.gmra.mxu0 %v1937_v37  ;;  %1001 = vmatmul.mubr.bf16.gmra.mxu1 %v1938_v38 }
  0x46   : > { %1817 = vmatpush3.bf16.msra.mxu1 %v1939_v36  ;;  %912 = vmatprep.mubr.bf16.mxu0 %v1941_v39 }
  0x47   : > { %1818 = vmatprep.subr.bf16.mxu1 %v1940_v40  ;;  %1820 = vmatprep.mubr.bf16.mxu1 %v1943_v41 }
  0x4a   : > { %1819 = vmatpush3.bf16.msra.mxu1 %v1940_v40 }
  0x4d   : > { %913 = vmatmul.mubr.bf16.gmra.mxu0 %v1944_v42  ;;  %1821 = vmatmul.mubr.bf16.vlgmr.msra.gmra.mxu1 %v1945_v43 }
  0x4e   : > { %920 = vmatprep.mubr.bf16.mxu0 %v1946_v44  ;;  %1824 = vmatprep.mubr.bf16.mxu1 %v1948_v45 }
  0x55   : > { %921 = vmatmul.mubr.bf16.gmra.mxu0 %v1949_v46  ;;  %1825 = vmatmul.mubr.bf16.gmra.mxu1 %v1950_v47 }
  0x56   : > { %928 = vmatprep.mubr.bf16.mxu0 %v1951_v48  ;;  %1828 = vmatprep.mubr.bf16.mxu1 %v1953_v49  ;;  %v2200_v49 = vld [vmem:[%s2311_s2] ss:$0 sm:$0xff] }
  0x5d   : > { %929 = vmatmul.mubr.bf16.gmra.mxu0 %v1954_v50  ;;  %1829 = vmatmul.mubr.bf16.gmra.mxu1 %v1955_v51 }
  0x5e   : > { %936 = vmatprep.mubr.bf16.mxu0 %v1956_v52  ;;  %1832 = vmatprep.mubr.bf16.mxu1 %v1958_v53 }
  0x65   : > { %937 = vmatmul.mubr.bf16.gmra.mxu0 %v1959_v54  ;;  %1833 = vmatmul.mubr.bf16.gmra.mxu1 %v1960_v55 }
  0x66   : > { %944 = vmatprep.mubr.bf16.mxu0 %v1961_v56  ;;  %1836 = vmatprep.mubr.bf16.mxu1 %v1963_v57 }
  0x6d   : > { %945 = vmatmul.mubr.bf16.gmra.mxu0 %v1964_v58  ;;  %1837 = vmatmul.mubr.bf16.gmra.mxu1 %v1965_v59 }
  0x6e   : > { %952 = vmatprep.mubr.bf16.mxu0 %v1966_v60  ;;  %1840 = vmatprep.mubr.bf16.mxu1 %v1968_v61 }
  0x75   : > { %953 = vmatmul.mubr.bf16.gmra.mxu0 %v1969_v62  ;;  %1841 = vmatmul.mubr.bf16.gmra.mxu1 %v1970_v63 }
  0x76   : > { %960 = vmatprep.mubr.bf16.mxu0 %v1971_v0  ;;  %1844 = vmatprep.mubr.bf16.mxu1 %v1973_v1 }
  0x7d   : > { %961 = vmatmul.mubr.bf16.gmra.mxu0 %v1974_v2  ;;  %1845 = vmatmul.mubr.bf16.gmra.mxu1 %v1975_v3 }
  0x7e   : > { %968 = vmatprep.mubr.bf16.mxu0 %v1976_v4  ;;  %1848 = vmatprep.mubr.bf16.mxu1 %v1978_v5 }
  0x85   : > { %969 = vmatmul.mubr.bf16.gmra.mxu0 %v1979_v6  ;;  %1849 = vmatmul.mubr.bf16.gmra.mxu1 %v1980_v7 }
  0xed   : > { %v1684_v8 = vpop.f32.mrf.mxu0  ;;  %v1756_v9 = vpop.f32.mrf.mxu1 }
  0xef   : > { %v1685_v10 = vpop.f32.mrf.mxu0  ;;  %v1757_v11 = vpop.f32.mrf.mxu1 }
  0xf0   : > { %v2171_v12 = vadd.f32 %v1757_v11, %v1756_v9  ;;  %v1686_v50 = vadd.f32 %v1685_v10, %v1684_v8 }
  0xf1   : > { %v1687_v13 = vpop.f32.mrf.mxu0  ;;  %v1759_v14 = vpop.f32.mrf.mxu1 }
  0xf3   : > { %v1688_v15 = vpop.f32.mrf.mxu0  ;;  %v1760_v16 = vpop.f32.mrf.mxu1 }
  0xf4   : > { %v2173_v17 = vadd.f32 %v1760_v16, %v1759_v14  ;;  %v1689_v62 = vadd.f32 %v1688_v15, %v1687_v13 }
  0xf5   : > { %v1690_v18 = vpop.f32.mrf.mxu0  ;;  %v1762_v19 = vpop.f32.mrf.mxu1 }
  0xf7   : > { %v1691_v20 = vpop.f32.mrf.mxu0  ;;  %v1763_v21 = vpop.f32.mrf.mxu1 }
  0xf8   : > { %v2175_v22 = vadd.f32 %v1763_v21, %v1762_v19  ;;  %v1692_v46 = vadd.f32 %v1691_v20, %v1690_v18 }
  0xf9   : > { %v1693_v23 = vpop.f32.mrf.mxu0  ;;  %v1765_v24 = vpop.f32.mrf.mxu1 }
  0xfb   : > { %v1694_v25 = vpop.f32.mrf.mxu0  ;;  %v1766_v26 = vpop.f32.mrf.mxu1 }
  0xfc   : > { %v2177_v27 = vadd.f32 %v1766_v26, %v1765_v24  ;;  %v1695_v54 = vadd.f32 %v1694_v25, %v1693_v23 }
  0xfd   : > { %v1696_v28 = vpop.f32.mrf.mxu0  ;;  %v1768_v29 = vpop.f32.mrf.mxu1 }
  0xff   : > { %v1697_v30 = vpop.f32.mrf.mxu0  ;;  %v1769_v31 = vpop.f32.mrf.mxu1 }
 0x100   : > { %v2179_v32 = vadd.f32 %v1769_v31, %v1768_v29  ;;  %v1698_v5 = vadd.f32 %v1697_v30, %v1696_v28 }
 0x101   : > { %v2181_v33 = vpop.f32.mrf.mxu0  ;;  %v1771_v34 = vpop.f32.mrf.mxu1 }
 0x103   : > { %v2183_v35 = vpop.f32.mrf.mxu0  ;;  %v1772_v36 = vpop.f32.mrf.mxu1 }
 0x104   : > { %v2185_v37 = vadd.f32 %v1772_v36, %v1771_v34  ;;  %v1701_v34 = vadd.f32 %v2183_v35, %v2181_v33 }
 0x105   : > { %v1702_v38 = vpop.f32.mrf.mxu0  ;;  %v2187_v39 = vpop.f32.mrf.mxu1 }
 0x107   : > { %v1703_v40 = vpop.f32.mrf.mxu0  ;;  %v2189_v41 = vpop.f32.mrf.mxu1 }
 0x108   : > { %v1704_v63 = vadd.f32 %v1703_v40, %v1702_v38 }
 0x109   : > { %v1705_v42 = vpop.f32.mrf.mxu0  ;;  %v2191_v43 = vpop.f32.mrf.mxu1 }
 0x10b   : > { %v1706_v44 = vpop.f32.mrf.mxu0  ;;  %v2193_v45 = vpop.f32.mrf.mxu1 }
 0x10c   : > { %v1707_v19 = vadd.f32 %v1706_v44, %v1705_v42 }
 0x10d   : > { %v2195_v47 = vpop.f32.mrf.mxu0  ;;  %v1822_v48 = vpop.f32.mrf.mxu1 }
 0x10e   : > { %v1052_v51 = vadd.f32 %v1822_v48, %v1692_v46 }
 0x10f   : > { %v2202_v52 = vpop.f32.mrf.mxu0  ;;  %v1043_v53 = vpop.f32.mrf.mxu1 }
 0x110   : > { %v1278_v55 = vadd.f32 %v2200_v49, %v1052_v51  ;;  %v1044_v56 = vadd.f32 %v1686_v50, %v1043_v53  ;;  %v1710_v33 = vadd.f32 %v2202_v52, %v2195_v47 }
 0x111   : > { %v2206_v57 = vpop.f32.mrf.mxu0  ;;  %v1823_v58 = vpop.f32.mrf.mxu1 }
 0x112   : > { %vm1310_vm0 = vcmp.ge.f32.partialorder %v1278_v55, 0.0  ;;  %v1342_v59 = vmul.f32 0.2, %v1278_v55  ;;  %v1276_v60 = vadd.f32 %v2200_v49, %v1044_v56  ;;  %v1055_v61 = vadd.f32 %v1823_v58, %v1695_v54 }
 0x113   : > { %v2209_v0 = vpop.f32.mrf.mxu0  ;;  %v1046_v1 = vpop.f32.mrf.mxu1 }
 0x114   : > { %v1374_v2 = vsel %vm1310_vm0, %v1278_v55, %v1342_v59  ;;  %vm1308_vm1 = vcmp.ge.f32.partialorder %v1276_v60, 0.0  ;;  %v1340_v3 = vmul.f32 0.2, %v1276_v60  ;;  %v1279_v4 = vadd.f32 %v2200_v49, %v1055_v61 }
 0x115   : > { %v1406_v6 = vmul.f32 1.4142135, %v1374_v2  ;;  %v1047_v7 = vadd.f32 %v1689_v62, %v1046_v1  ;;  %v1714_v8 = vpop.f32.mrf.mxu0  ;;  %v1826_v9 = vpop.f32.mrf.mxu1 }
 0x116   : > { %v1372_v10 = vsel %vm1308_vm1, %v1276_v60, %v1340_v3  ;;  %vm1311_vm2 = vcmp.ge.f32.partialorder %v1279_v4, 0.0  ;;  %v1343_v11 = vmul.f32 0.2, %v1279_v4  ;;  %v1068_v13 = vadd.f32 %v1826_v9, %v1704_v63 }
 0x117   : > { %1438 = vst [vmem:[%s2214_s28 + $0x10] sm:$0xff] %v1406_v6  ;;  %v1404_v14 = vmul.f32 1.4142135, %v1372_v10  ;;  %v1277_v15 = vadd.f32 %v2200_v49, %v1047_v7  ;;  %v1715_v16 = vpop.f32.mrf.mxu0  ;;  %v1059_v18 = vpop.f32.mrf.mxu1 }
 0x118   : > { %v1375_v20 = vsel %vm1311_vm2, %v1279_v4, %v1343_v11  ;;  %v1282_v21 = vadd.f32 %v2200_v49, %v1068_v13  ;;  %v1060_v23 = vadd.f32 %v1698_v5, %v1059_v18  ;;  %v1716_v38 = vadd.f32 %v1715_v16, %v1714_v8 }
 0x119   : > { %1436 = vst [vmem:[%s2214_s28] sm:$0xff] %v1404_v14  ;;  %v1407_v24 = vmul.f32 1.4142135, %v1375_v20  ;;  %vm1309_vm3 = vcmp.ge.f32.partialorder %v1277_v15, 0.0  ;;  %v1341_v25 = vmul.f32 0.2, %v1277_v15  ;;  %v1717_v26 = vpop.f32.mrf.mxu0  ;;  %v1827_v28 = vpop.f32.mrf.mxu1  ;;  %v1713_v8 = vadd.f32 %v2209_v0, %v2206_v57 }
 0x11a   : > { %vm1314_vm4 = vcmp.ge.f32.partialorder %v1282_v21, 0.0  ;;  %v1346_v29 = vmul.f32 0.2, %v1282_v21  ;;  %v1280_v30 = vadd.f32 %v2200_v49, %v1060_v23  ;;  %v1071_v31 = vadd.f32 %v1827_v28, %v1707_v19 }
 0x11b   : > { %1439 = vst [vmem:[%s2214_s28 + $0x18] sm:$0xff] %v1407_v24  ;;  %v1373_v36 = vsel %vm1309_vm3, %v1277_v15, %v1341_v25  ;;  %v1718_v40 = vpop.f32.mrf.mxu0  ;;  %v1062_v42 = vpop.f32.mrf.mxu1 }
 0x11c   : > { %v1405_v44 = vmul.f32 1.4142135, %v1373_v36  ;;  %v1378_v46 = vsel %vm1314_vm4, %v1282_v21, %v1346_v29  ;;  %vm1312_vm5 = vcmp.ge.f32.partialorder %v1280_v30, 0.0  ;;  %v1344_v48 = vmul.f32 0.2, %v1280_v30 }
 0x11d   : > { %v1410_v50 = vmul.f32 1.4142135, %v1378_v46  ;;  %v1283_v51 = vadd.f32 %v2200_v49, %v1071_v31  ;;  %v1063_v53 = vadd.f32 %v1701_v34, %v1062_v42  ;;  %v1720_v54 = vpop.f32.mrf.mxu0  ;;  %v1830_v55 = vpop.f32.mrf.mxu1  ;;  %v1719_v3 = vadd.f32 %v1718_v40, %v1717_v26 }
 0x11e   : > { %1437 = vst [vmem:[%s2214_s28 + $0x8] sm:$0xff] %v1405_v44  ;;  %v1376_v35 = vsel %vm1312_vm5, %v1280_v30, %v1344_v48  ;;  %v1084_v56 = vadd.f32 %v1830_v55, %v1716_v38 }
 0x11f   : > { %1442 = vst [vmem:[%s2214_s28 + $0x30] sm:$0xff] %v1410_v50  ;;  %v1408_v58 = vmul.f32 1.4142135, %v1376_v35  ;;  %vm1315_vm6 = vcmp.ge.f32.partialorder %v1283_v51, 0.0  ;;  %v1347_v59 = vmul.f32 0.2, %v1283_v51  ;;  %v1281_v60 = vadd.f32 %v2200_v49, %v1063_v53  ;;  %v1721_v61 = vpop.f32.mrf.mxu0  ;;  %v1075_v62 = vpop.f32.mrf.mxu1 }
 0x120   : > { %v1286_v63 = vadd.f32 %v2200_v49, %v1084_v56  ;;  %v1076_v1 = vadd.f32 %v1710_v33, %v1075_v62  ;;  %v1722_v24 = vadd.f32 %v1721_v61, %v1720_v54 }
 0x121   : > { %1440 = vst [vmem:[%s2214_s28 + $0x20] sm:$0xff] %v1408_v58  ;;  %v1379_v2 = vsel %vm1315_vm6, %v1283_v51, %v1347_v59  ;;  %vm1313_vm7 = vcmp.ge.f32.partialorder %v1281_v60, 0.0  ;;  %v1345_v47 = vmul.f32 0.2, %v1281_v60  ;;  %v1723_v52 = vpop.f32.mrf.mxu0  ;;  %v1831_v4 = vpop.f32.mrf.mxu1 }
 0x122   : > { %v1411_v5 = vmul.f32 1.4142135, %v1379_v2  ;;  %vm1318_vm8 = vcmp.ge.f32.partialorder %v1286_v63, 0.0  ;;  %v1350_v6 = vmul.f32 0.2, %v1286_v63  ;;  %v1284_v7 = vadd.f32 %v2200_v49, %v1076_v1 }
 0x123   : > { %v1377_v9 = vsel %vm1313_vm7, %v1281_v60, %v1345_v47  ;;  %v1087_v10 = vadd.f32 %v1831_v4, %v1719_v3  ;;  %v1724_v11 = vpop.f32.mrf.mxu0  ;;  %v1078_v13 = vpop.f32.mrf.mxu1 }
 0x124   : > { %1443 = vst [vmem:[%s2214_s28 + $0x38] sm:$0xff] %v1411_v5  ;;  %v1409_v14 = vmul.f32 1.4142135, %v1377_v9  ;;  %v1382_v15 = vsel %vm1318_vm8, %v1286_v63, %v1350_v6  ;;  %vm1316_vm9 = vcmp.ge.f32.partialorder %v1284_v7, 0.0  ;;  %v1348_v16 = vmul.f32 0.2, %v1284_v7 }
 0x125   : > { %v1414_v18 = vmul.f32 1.4142135, %v1382_v15  ;;  %v1287_v19 = vadd.f32 %v2200_v49, %v1087_v10  ;;  %v1079_v20 = vadd.f32 %v1713_v8, %v1078_v13  ;;  %v1726_v21 = vpop.f32.mrf.mxu0  ;;  %v1834_v23 = vpop.f32.mrf.mxu1  ;;  %v1725_v48 = vadd.f32 %v1724_v11, %v1723_v52 }
 0x126   : > { %1441 = vst [vmem:[%s2214_s28 + $0x28] sm:$0xff] %v1409_v14  ;;  %v1380_v57 = vsel %vm1316_vm9, %v1284_v7, %v1348_v16 }
 0x127   : > { %1446 = vst [vmem:[%s2214_s28 + $0x50] sm:$0xff] %v1414_v18  ;;  %v1412_v0 = vmul.f32 1.4142135, %v1380_v57  ;;  %vm1319_vm10 = vcmp.ge.f32.partialorder %v1287_v19, 0.0  ;;  %v1351_v25 = vmul.f32 0.2, %v1287_v19  ;;  %v1285_v26 = vadd.f32 %v2200_v49, %v1079_v20  ;;  %v1727_v28 = vpop.f32.mrf.mxu0  ;;  %v1091_v29 = vpop.f32.mrf.mxu1 }
 0x128   : > { %v1728_v30 = vadd.f32 %v1727_v28, %v1726_v21  ;;  %v1092_v31 = vadd.f32 %v1722_v24, %v1091_v29 }
 0x129   : > { %1444 = vst [vmem:[%s2214_s28 + $0x40] sm:$0xff] %v1412_v0  ;;  %v1383_v34 = vsel %vm1319_vm10, %v1287_v19, %v1351_v25  ;;  %vm1317_vm11 = vcmp.ge.f32.partialorder %v1285_v26, 0.0  ;;  %v1349_v36 = vmul.f32 0.2, %v1285_v26  ;;  %v1729_v38 = vpop.f32.mrf.mxu0  ;;  %v1835_v40 = vpop.f32.mrf.mxu1 }
 0x12a   : > { %v1415_v42 = vmul.f32 1.4142135, %v1383_v34  ;;  %v1100_v44 = vadd.f32 %v1834_v23, %v1728_v30  ;;  %v1288_v46 = vadd.f32 %v2200_v49, %v1092_v31 }
 0x12b   : > { %v1381_v50 = vsel %vm1317_vm11, %v1285_v26, %v1349_v36  ;;  %v1730_v51 = vpop.f32.mrf.mxu0  ;;  %v1094_v53 = vpop.f32.mrf.mxu1 }
 0x12c   : > { %1447 = vst [vmem:[%s2214_s28 + $0x58] sm:$0xff] %v1415_v42  ;;  %v1413_v54 = vmul.f32 1.4142135, %v1381_v50  ;;  %v1290_v55 = vadd.f32 %v2200_v49, %v1100_v44  ;;  %vm1320_vm12 = vcmp.ge.f32.partialorder %v1288_v46, 0.0  ;;  %v1352_v33 = vmul.f32 0.2, %v1288_v46 }
 0x12d   : > { %v1731_v35 = vadd.f32 %v1730_v51, %v1729_v38  ;;  %v1095_v56 = vadd.f32 %v1725_v48, %v1094_v53  ;;  %v1732_v58 = vpop.f32.mrf.mxu0  ;;  %v1838_v59 = vpop.f32.mrf.mxu1 }
 0x12e   : > { %1445 = vst [vmem:[%s2214_s28 + $0x48] sm:$0xff] %v1413_v54  ;;  %vm1322_vm13 = vcmp.ge.f32.partialorder %v1290_v55, 0.0  ;;  %v1354_v60 = vmul.f32 0.2, %v1290_v55  ;;  %v1384_v61 = vsel %vm1320_vm12, %v1288_v46, %v1352_v33 }
 0x12f   : > { %v1416_v62 = vmul.f32 1.4142135, %v1384_v61  ;;  %v1103_v63 = vadd.f32 %v1835_v40, %v1731_v35  ;;  %v1289_v1 = vadd.f32 %v2200_v49, %v1095_v56  ;;  %v1733_v2 = vpop.f32.mrf.mxu0  ;;  %v1107_v3 = vpop.f32.mrf.mxu1 }
 0x130   : > { %v1386_v47 = vsel %vm1322_vm13, %v1290_v55, %v1354_v60  ;;  %v1734_v52 = vadd.f32 %v1733_v2, %v1732_v58 }
 0x131   : > { %v1418_v4 = vmul.f32 1.4142135, %v1386_v47  ;;  %1448 = vst [vmem:[%s2214_s28 + $0x60] sm:$0xff] %v1416_v62  ;;  %v1291_v5 = vadd.f32 %v2200_v49, %v1103_v63  ;;  %vm1321_vm14 = vcmp.ge.f32.partialorder %v1289_v1, 0.0  ;;  %v1353_v6 = vmul.f32 0.2, %v1289_v1  ;;  %v1735_v7 = vpop.f32.mrf.mxu0  ;;  %v1839_v8 = vpop.f32.mrf.mxu1 }
 0x132   : > { %v1108_v9 = vadd.f32 %v1734_v52, %v1107_v3 }
 0x133   : > { %1450 = vst [vmem:[%s2214_s28 + $0x70] sm:$0xff] %v1418_v4  ;;  %vm1323_vm15 = vcmp.ge.f32.partialorder %v1291_v5, 0.0  ;;  %v1355_v10 = vmul.f32 0.2, %v1291_v5  ;;  %v1385_v11 = vsel %vm1321_vm14, %v1289_v1, %v1353_v6  ;;  %v1736_v13 = vpop.f32.mrf.mxu0  ;;  %v1110_v14 = vpop.f32.mrf.mxu1 }
 0x134   : > { %v1417_v15 = vmul.f32 1.4142135, %v1385_v11  ;;  %v1292_v16 = vadd.f32 %v2200_v49, %v1108_v9  ;;  %v1737_v18 = vadd.f32 %v1736_v13, %v1735_v7 }
 0x135   : > { %v1387_v19 = vsel %vm1323_vm15, %v1291_v5, %v1355_v10  ;;  %v1738_v20 = vpop.f32.mrf.mxu0  ;;  %v2251_v21 = vpop.f32.mrf.mxu1 }
 0x136   : > { %v1419_v23 = vmul.f32 1.4142135, %v1387_v19  ;;  %1449 = vst [vmem:[%s2214_s28 + $0x68] sm:$0xff] %v1417_v15  ;;  %vm1324_vm0 = vcmp.ge.f32.partialorder %v1292_v16, 0.0  ;;  %v1356_v24 = vmul.f32 0.2, %v1292_v16  ;;  %v1111_v57 = vadd.f32 %v1737_v18, %v1110_v14 }
 0x137   : > { %v1739_v0 = vpop.f32.mrf.mxu0  ;;  %v1123_v25 = vpop.f32.mrf.mxu1  ;;  %v1779_v19 = vadd.f32 %v2193_v45, %v2191_v43 }
 0x138   : > { %1451 = vst [vmem:[%s2214_s28 + $0x78] sm:$0xff] %v1419_v23  ;;  %v1388_v26 = vsel %vm1324_vm0, %v1292_v16, %v1356_v24  ;;  %v1293_v28 = vadd.f32 %v2200_v49, %v1111_v57  ;;  %v1740_v29 = vadd.f32 %v1739_v0, %v1738_v20 }
 0x139   : > { %v1420_v30 = vmul.f32 1.4142135, %v1388_v26  ;;  %v1741_v31 = vpop.f32.mrf.mxu0  ;;  %v2256_v34 = vpop.f32.mrf.mxu1 }
 0x13a   : > { %vm1325_vm1 = vcmp.ge.f32.partialorder %v1293_v28, 0.0  ;;  %v1357_v36 = vmul.f32 0.2, %v1293_v28  ;;  %v1116_v38 = vadd.f32 %v1838_v59, %v1740_v29 }
 0x13b   : > { %1452 = vst [vmem:[%s2214_s28 + $0x80] sm:$0xff] %v1420_v30  ;;  %v1742_v40 = vpop.f32.mrf.mxu0  ;;  %v1126_v42 = vpop.f32.mrf.mxu1 }
 0x13c   : > { %v1389_v44 = vsel %vm1325_vm1, %v1293_v28, %v1357_v36  ;;  %v1294_v46 = vadd.f32 %v2200_v49, %v1116_v38  ;;  %v1743_v48 = vadd.f32 %v1742_v40, %v1741_v31 }
 0x13d   : > { %v1421_v50 = vmul.f32 1.4142135, %v1389_v44  ;;  %v1744_v51 = vpop.f32.mrf.mxu0  ;;  %v1846_v53 = vpop.f32.mrf.mxu1 }
 0x13e   : > { %vm1326_vm2 = vcmp.ge.f32.partialorder %v1294_v46, 0.0  ;;  %v1358_v54 = vmul.f32 0.2, %v1294_v46  ;;  %v1119_v55 = vadd.f32 %v1839_v8, %v1743_v48  ;;  %v1148_v33 = vadd.f32 %v1846_v53, %v2175_v22 }
 0x13f   : > { %1453 = vst [vmem:[%s2214_s28 + $0x88] sm:$0xff] %v1421_v50  ;;  %v1745_v35 = vpop.f32.mrf.mxu0  ;;  %v1139_v56 = vpop.f32.mrf.mxu1  ;;  %v1776_v22 = vadd.f32 %v2189_v41, %v2187_v39 }
 0x140   : > { %v1390_v58 = vsel %vm1326_vm2, %v1294_v46, %v1358_v54  ;;  %v1295_v59 = vadd.f32 %v2200_v49, %v1119_v55  ;;  %v1302_v60 = vadd.f32 %v2200_v49, %v1148_v33  ;;  %v1746_v61 = vadd.f32 %v1745_v35, %v1744_v51 }
 0x141   : > { %v1422_v62 = vmul.f32 1.4142135, %v1390_v58  ;;  %v1140_v63 = vadd.f32 %v2171_v12, %v1139_v56  ;;  %v1747_v1 = vpop.f32.mrf.mxu0  ;;  %v1847_v2 = vpop.f32.mrf.mxu1 }
 0x142   : > { %vm1327_vm3 = vcmp.ge.f32.partialorder %v1295_v59, 0.0  ;;  %v1359_v3 = vmul.f32 0.2, %v1295_v59  ;;  %vm1334_vm4 = vcmp.ge.f32.partialorder %v1302_v60, 0.0  ;;  %v1366_v47 = vmul.f32 0.2, %v1302_v60 }
 0x143   : > { %1454 = vst [vmem:[%s2214_s28 + $0x90] sm:$0xff] %v1422_v62  ;;  %v1124_v52 = vadd.f32 %v1746_v61, %v1123_v25  ;;  %v1300_v4 = vadd.f32 %v2200_v49, %v1140_v63  ;;  %v1151_v5 = vadd.f32 %v1847_v2, %v2177_v27  ;;  %v1748_v6 = vpop.f32.mrf.mxu0  ;;  %v1142_v7 = vpop.f32.mrf.mxu1 }
 0x144   : > { %v1391_v8 = vsel %vm1327_vm3, %v1295_v59, %v1359_v3  ;;  %v1398_v12 = vsel %vm1334_vm4, %v1302_v60, %v1366_v47  ;;  %v1749_v9 = vadd.f32 %v1748_v6, %v1747_v1  ;;  %v1143_v10 = vadd.f32 %v2173_v17, %v1142_v7 }
 0x145   : > { %v1423_v11 = vmul.f32 1.4142135, %v1391_v8  ;;  %v1430_v13 = vmul.f32 1.4142135, %v1398_v12  ;;  %v1296_v14 = vadd.f32 %v2200_v49, %v1124_v52  ;;  %vm1332_vm5 = vcmp.ge.f32.partialorder %v1300_v4, 0.0  ;;  %v1750_v39 = vpop.f32.mrf.mxu0  ;;  %v1850_v41 = vpop.f32.mrf.mxu1 }
 0x146   : > { %v1364_v15 = vmul.f32 0.2, %v1300_v4  ;;  %v1303_v16 = vadd.f32 %v2200_v49, %v1151_v5  ;;  %v1127_v27 = vadd.f32 %v1749_v9, %v1126_v42  ;;  %v1301_v18 = vadd.f32 %v2200_v49, %v1143_v10 }
 0x147   : > { %1455 = vst [vmem:[%s2214_s28 + $0x98] sm:$0xff] %v1423_v11  ;;  %1462 = vst [vmem:[%s2214_s28 + $0xd0] sm:$0xff] %v1430_v13  ;;  %vm1328_vm6 = vcmp.ge.f32.partialorder %v1296_v14, 0.0  ;;  %v1360_v17 = vmul.f32 0.2, %v1296_v14  ;;  %v1164_v20 = vadd.f32 %v1850_v41, %v1776_v22  ;;  %v1751_v23 = vpop.f32.mrf.mxu0  ;;  %v1155_v24 = vpop.f32.mrf.mxu1 }
 0x148   : > { %v1396_v57 = vsel %vm1332_vm5, %v1300_v4, %v1364_v15  ;;  %vm1335_vm7 = vcmp.ge.f32.partialorder %v1303_v16, 0.0  ;;  %v1367_v0 = vmul.f32 0.2, %v1303_v16  ;;  %v1297_v25 = vadd.f32 %v2200_v49, %v1127_v27 }
 0x149   : > { %v1392_v26 = vsel %vm1328_vm6, %v1296_v14, %v1360_v17  ;;  %v1428_v28 = vmul.f32 1.4142135, %v1396_v57  ;;  %vm1333_vm8 = vcmp.ge.f32.partialorder %v1301_v18, 0.0  ;;  %v1365_v29 = vmul.f32 0.2, %v1301_v18  ;;  %v1753_v30 = vpop.f32.mrf.mxu0  ;;  %v1851_v43 = vpop.f32.mrf.mxu1 }
 0x14a   : > { %v1424_v45 = vmul.f32 1.4142135, %v1392_v26  ;;  %v1399_v31 = vsel %vm1335_vm7, %v1303_v16, %v1367_v0  ;;  %vm1329_vm9 = vcmp.ge.f32.partialorder %v1297_v25, 0.0  ;;  %v1361_v36 = vmul.f32 0.2, %v1297_v25 }
 0x14b   : > { %1460 = vst [vmem:[%s2214_s28 + $0xc0] sm:$0xff] %v1428_v28  ;;  %v1431_v38 = vmul.f32 1.4142135, %v1399_v31  ;;  %v1397_v40 = vsel %vm1333_vm8, %v1301_v18, %v1365_v29  ;;  %v1306_v42 = vadd.f32 %v2200_v49, %v1164_v20  ;;  %v1752_v44 = vadd.f32 %v1751_v23, %v1750_v39  ;;  %v1754_v46 = vpop.f32.mrf.mxu0  ;;  %v1158_v48 = vpop.f32.mrf.mxu1 }
 0x14c   : > { %1456 = vst [vmem:[%s2214_s28 + $0xa0] sm:$0xff] %v1424_v45  ;;  %v1393_v50 = vsel %vm1329_vm9, %v1297_v25, %v1361_v36  ;;  %v1429_v51 = vmul.f32 1.4142135, %v1397_v40  ;;  %v1156_v53 = vadd.f32 %v2179_v32, %v1155_v24  ;;  %v1167_v54 = vadd.f32 %v1851_v43, %v1779_v19 }
 0x14d   : > { %1463 = vst [vmem:[%s2214_s28 + $0xd8] sm:$0xff] %v1431_v38  ;;  %v1425_v55 = vmul.f32 1.4142135, %v1393_v50  ;;  %vm1338_vm10 = vcmp.ge.f32.partialorder %v1306_v42, 0.0  ;;  %v1370_v33 = vmul.f32 0.2, %v1306_v42  ;;  %v1132_v35 = vadd.f32 %v2251_v21, %v1752_v44 }
 0x14e   : > { %1461 = vst [vmem:[%s2214_s28 + $0xc8] sm:$0xff] %v1429_v51  ;;  %v1304_v56 = vadd.f32 %v2200_v49, %v1156_v53  ;;  %v1307_v58 = vadd.f32 %v2200_v49, %v1167_v54  ;;  %v1755_v59 = vadd.f32 %v1754_v46, %v1753_v30  ;;  %v1159_v60 = vadd.f32 %v2185_v37, %v1158_v48 }
 0x14f   : > { %1457 = vst [vmem:[%s2214_s28 + $0xa8] sm:$0xff] %v1425_v55  ;;  %v1402_v61 = vsel %vm1338_vm10, %v1306_v42, %v1370_v33  ;;  %v1298_v32 = vadd.f32 %v2200_v49, %v1132_v35 }
 0x150   : > { %v1434_v62 = vmul.f32 1.4142135, %v1402_v61  ;;  %vm1336_vm11 = vcmp.ge.f32.partialorder %v1304_v56, 0.0  ;;  %v1368_v63 = vmul.f32 0.2, %v1304_v56  ;;  %vm1339_vm12 = vcmp.ge.f32.partialorder %v1307_v58, 0.0 }
 0x151   : > { %vm1330_vm13 = vcmp.ge.f32.partialorder %v1298_v32, 0.0  ;;  %v1362_v21 = vmul.f32 0.2, %v1298_v32  ;;  %v1371_v1 = vmul.f32 0.2, %v1307_v58  ;;  %v1135_v2 = vadd.f32 %v2256_v34, %v1755_v59 }
 0x152   : > { %1466 = vst [vmem:[%s2214_s28 + $0xf0] sm:$0xff] %v1434_v62  ;;  %v1400_v3 = vsel %vm1336_vm11, %v1304_v56, %v1368_v63  ;;  %v1305_v37 = vadd.f32 %v2200_v49, %v1159_v60 }
 0x153   : > { %v1394_v47 = vsel %vm1330_vm13, %v1298_v32, %v1362_v21  ;;  %v1432_v22 = vmul.f32 1.4142135, %v1400_v3  ;;  %v1403_v52 = vsel %vm1339_vm12, %v1307_v58, %v1371_v1  ;;  %v1299_v4 = vadd.f32 %v2200_v49, %v1135_v2 }
 0x154   : > { %v1426_v5 = vmul.f32 1.4142135, %v1394_v47  ;;  %v1435_v6 = vmul.f32 1.4142135, %v1403_v52  ;;  %vm1337_vm14 = vcmp.ge.f32.partialorder %v1305_v37, 0.0 }
 0x155   : > { %1464 = vst [vmem:[%s2214_s28 + $0xe0] sm:$0xff] %v1432_v22  ;;  %vm1331_vm15 = vcmp.ge.f32.partialorder %v1299_v4, 0.0  ;;  %v1363_v7 = vmul.f32 0.2, %v1299_v4  ;;  %v1369_v8 = vmul.f32 0.2, %v1305_v37 }
 0x156   : > { %1458 = vst [vmem:[%s2214_s28 + $0xb0] sm:$0xff] %v1426_v5  ;;  %1467 = vst [vmem:[%s2214_s28 + $0xf8] sm:$0xff] %v1435_v6 }
 0x157   : > { %v1395_v34 = vsel %vm1331_vm15, %v1299_v4, %v1363_v7  ;;  %v1401_v12 = vsel %vm1337_vm14, %v1305_v37, %v1369_v8 }
 0x158   : > { %v1427_v9 = vmul.f32 1.4142135, %v1395_v34  ;;  %v1433_v10 = vmul.f32 1.4142135, %v1401_v12 }
 0x15a   : > { %1459 = vst [vmem:[%s2214_s28 + $0xb8] sm:$0xff] %v1427_v9  ;;  %1465 = vst [vmem:[%s2214_s28 + $0xe8] sm:$0xff] %v1433_v10 }
 0x15b PF: > { %s13_s14 = sadd.s32 1, %s2003_s14   ;;  %s2313_s12 = smov %s1999_s13 }
 0x15c   : > { %p10_p5 = scmp.ge.s32.totalorder %s13_s14, 6   ;;  %s2314_s13 = smov %s2316_s15 }
 0x15e   :  { %12 = sbr.rel (!%p10_p5) target bundleno = 2 (0x2), region = 76 }

// kernel: discriminator_forward.16
= control target key start
LH: loop header
LB: loop body
LE: loop exit
PB: predicated region body
PF: predicated region fallthrough
CT: control target
= control target key end

     0   :  { %s1448_s6 = smov 0   ;;  %s1450_s7 = smov 0   ;;  %s2145_s0 = inlined_call_operand.vmem [shape: f32[4,20,20,32], index: 0, kind: input, shape index: {}]   ;;  %s2146_s1 = inlined_call_operand.vmem [shape: f32[4,17,17,32], index: 1, kind: output, shape index: {}]  }
   0x1   :  { %s1452_s8 = smov 0  }
   0x2 LB: > { %s23_s9 = sadd.s32 1, %s1432_s7  ;;  %p1383_p0 = scmp.ge.s32.totalorder %s1436_s8, 1  ;;  %s1436_s8 = sphi %s1452_s8, %s11_s8   ;;  %s1432_s7 = sphi %s1450_s7, %s2148_s7   ;;  %s1428_s6 = sphi %s1448_s6, %s2147_s6  }
   0x3   : > { %p25_p1 = scmp.ge.s32.totalorder %s23_s9, 4  ;;  %p106_p2 = scmp.lt.s32.totalorder %s1436_s8, 5 }
   0x5   : > { %s2150_s9 = smov (%p25_p1, %s23_s9), 0  ;;  %p107_p3 = pnand %p1383_p0, %p106_p2 }
   0x6   : > { %p132_p4 = scmp.lt.s32.totalorder (!%p107_p3), %s1428_s6, 3 }
   0x7   : > { %110 = sbr.rel (%p107_p3) target bundleno = 221 (0xdd), region = 24 }
   0xc   : > { %s2152_s6 = smov (!%p132_p4, %s1428_s6), 3  ;;  %vm628_vm0 = vcmask 1046528   ;;  %vm816_vm1 = vcmask 1045504   ;;  %vm1055_vm2 = vcmask 1044480   ;;  %vm1243_vm3 = vcmask 261120  }
   0xd   : > { %s1388_s10 = smul.u32 480, %s2152_s6  ;;  %vm1246_vm4 = vcmask 253952  }
   0xe   : > { %s1389_s14 = smul.u32 408, %s2152_s6 }
   0xf   : > { %s1472_s13 = scalar_lea.vmem %s2145_s0, %s1388_s10 }
  0x10   : > { %v148_v0 = vld [vmem:[%s1472_s13] sm:$0xff]  ;;  %v149_v1 = vld [vmem:[%s1472_s13 + $0x8] sm:$0xff]  ;;  %v151_v2 = vld [vmem:[%s1472_s13 + $0x18] sm:$0xff]  ;;  %s1549_s17 = scalar_lea.vmem %s2146_s1, %s1389_s14 }
  0x11   : > { %v152_v3 = vld [vmem:[%s1472_s13 + $0x20] sm:$0xff]  ;;  %v1479_v4 = vld [vmem:[%s1472_s13 + $0x30] sm:$0xff]  ;;  %v1482_v5 = vld [vmem:[%s1472_s13 + $0x38] sm:$0xff]  ;;  %v208_v6 = vmul.f32 0.125, %v148_v0  ;;  %v209_v7 = vmul.f32 0.125, %v149_v1  ;;  %v259_v8 = vmul.f32 0.375, %v151_v2 }
  0x12   : > { %v157_v9 = vld [vmem:[%s1472_s13 + $0x48] sm:$0xff]  ;;  %v158_v10 = vld [vmem:[%s1472_s13 + $0x50] sm:$0xff]  ;;  %v260_v11 = vmul.f32 0.375, %v152_v3  ;;  %v262_v12 = vmul.f32 0.375, %v1479_v4  ;;  %v263_v13 = vmul.f32 0.375, %v1482_v5  ;;  %v1489_v14 = vld [vmem:[%s1472_s13 + $0x60] sm:$0xff] }
  0x13   : > { %v1491_v15 = vmul.f32 0.125, %v157_v9  ;;  %v1493_v16 = vmul.f32 0.125, %v158_v10  ;;  %v310_v17 = vadd.f32 %v259_v8, %v208_v6  ;;  %v150_v18 = vld [vmem:[%s1472_s13 + $0x10] sm:$0xf]  ;;  %v153_v19 = vld [vmem:[%s1472_s13 + $0x28] sm:$0xf] }
  0x14   : > { %v311_v20 = vadd.f32 %v260_v11, %v209_v7  ;;  %v1498_v21 = vld [vmem:[%s1472_s13 + $0x40] sm:$0xf]  ;;  %v159_v22 = vld [vmem:[%s1472_s13 + $0x58] sm:$0xf]  ;;  %v210_v23 = vmul.f32 0.125, %v150_v18  ;;  %v261_v24 = vmul.f32 0.375, %v153_v19 }
  0x15   : > { %v364_v25 = vadd.f32 %v310_v17, %v262_v12  ;;  %v1501_v26 = vmul.f32 0.125, %v159_v22  ;;  %v1504_v27 = vmul.f32 0.375, %v1498_v21  ;;  %v1507_v28 = vld [vmem:[%s1472_s13 + $0x68] sm:$0xff]  ;;  %v211_v29 = vmul.f32 0.125, %v151_v2  ;;  %v1513_v34 = vld [vmem:[%s1472_s13 + $0x70] sm:$0xf] }
  0x16   : > { %v365_v30 = vadd.f32 %v311_v20, %v263_v13  ;;  %v312_v31 = vadd.f32 %v261_v24, %v210_v23  ;;  %v212_v32 = vmul.f32 0.125, %v152_v3  ;;  %v1510_v33 = vmul.f32 0.125, %v1489_v14 }
  0x17   : > { %v424_v35 = vadd.f32 %v364_v25, %v1491_v15  ;;  %v1517_v36 = vmul.f32 0.125, %v1507_v28  ;;  %v1519_v37 = vmul.f32 0.375, %v157_v9  ;;  %v1521_v38 = vmul.f32 0.375, %v158_v10 }
  0x18   : > { %v425_v39 = vadd.f32 %v365_v30, %v1493_v16  ;;  %v366_v40 = vadd.f32 %v312_v31, %v1504_v27  ;;  %v313_v41 = vadd.f32 %v262_v12, %v211_v29  ;;  %v314_v42 = vadd.f32 %v263_v13, %v212_v32 }
  0x19   : > { %v475_v43 = vmul.f32 0.125, %v424_v35  ;;  %v526_v44 = vmul.f32 0.375, %v424_v35  ;;  %v213_v45 = vmul.f32 0.125, %v153_v19  ;;  %v1526_v46 = vmul.f32 0.125, %v1513_v34 }
  0x1a   : > { %v476_v47 = vmul.f32 0.125, %v425_v39  ;;  %v527_v48 = vmul.f32 0.375, %v425_v39  ;;  %v426_v49 = vadd.f32 %v366_v40, %v1501_v26  ;;  %v367_v50 = vadd.f32 %v313_v41, %v1519_v37  ;;  %v163_v41 = vld [vmem:[%s1472_s13 + $0x78] sm:$0xff] }
  0x1b   : > { %v629_v51 = vrot.slane %v526_v44, 1  ;;  %v817_v52 = vrot.slane %v526_v44, 2  ;;  %v1056_v53 = vrot.slane %v475_v43, 3  ;;  %v368_v54 = vadd.f32 %v314_v42, %v1521_v38  ;;  %v164_v42 = vld [vmem:[%s1472_s13 + $0x80] sm:$0xff] }
  0x1c   : > { %v630_v55 = vrot.slane %v527_v48, 1  ;;  %v818_v56 = vrot.slane %v527_v48, 2  ;;  %v1057_v57 = vrot.slane %v476_v47, 3  ;;  %v477_v58 = vmul.f32 0.125, %v426_v49 }
  0x1d   : > { %v528_v59 = vmul.f32 0.375, %v426_v49  ;;  %v427_v60 = vadd.f32 %v367_v50, %v1510_v33  ;;  %v428_v61 = vadd.f32 %v368_v54, %v1517_v36  ;;  %v1533_v62 = vmul.f32 0.375, %v159_v22 }
  0x1e   : > { %v631_v63 = vsel %vm628_vm0, %v629_v51, %v630_v55  ;;  %v819_v0 = vsel %vm816_vm1, %v817_v52, %v818_v56  ;;  %v1058_v1 = vsel %vm1055_vm2, %v1056_v53, %v1057_v57  ;;  %v1059_v2 = vrot.slane %v477_v58, 3 }
  0x1f   : > { %v765_v3 = vadd.f32 %v631_v63, %v475_v43  ;;  %v632_v6 = vrot.slane %v528_v59, 1  ;;  %v820_v7 = vrot.slane %v528_v59, 2  ;;  %v478_v8 = vmul.f32 0.125, %v427_v60  ;;  %v1585_v59 = vld [vmem:[%s1472_s13 + $0x98] sm:$0xff] }
  0x20   : > { %v1060_v9 = vsel %vm1055_vm2, %v1057_v57, %v1059_v2  ;;  %v1540_v10 = vmul.f32 0.125, %v428_v61  ;;  %v529_v11 = vmul.f32 0.375, %v427_v60  ;;  %v1542_v12 = vmul.f32 0.375, %v428_v61 }
  0x21   : > { %v953_v13 = vadd.f32 %v819_v0, %v765_v3  ;;  %v633_v17 = vsel %vm628_vm0, %v630_v55, %v632_v6  ;;  %v821_v18 = vsel %vm816_vm1, %v818_v56, %v820_v7  ;;  %v767_v19 = vadd.f32 %v632_v6, %v477_v58  ;;  %v1582_v58 = vld [vmem:[%s1472_s13 + $0x90] sm:$0xff] }
  0x22   : > { %v766_v20 = vadd.f32 %v633_v17, %v476_v47  ;;  %v634_v22 = vrot.slane %v529_v11, 1  ;;  %v635_v23 = vrot.slane %v1542_v12, 1  ;;  %v822_v24 = vrot.slane %v529_v11, 2 }
  0x23   : > { %v1192_v25 = vadd.f32 %v1058_v1, %v953_v13  ;;  %v955_v29 = vadd.f32 %v820_v7, %v767_v19  ;;  %v823_v30 = vrot.slane %v1542_v12, 2  ;;  %v1061_v31 = vrot.slane %v478_v8, 3 }
  0x24   : > { %v954_v32 = vadd.f32 %v821_v18, %v766_v20  ;;  %v636_v35 = vsel %vm628_vm0, %v634_v22, %v635_v23  ;;  %v1062_v39 = vrot.slane %v1540_v10, 3  ;;  %v315_v40 = vadd.f32 %v1504_v27, %v213_v45  ;;  %v1566_v45 = vld [vmem:[%s1472_s13 + $0x88] sm:$0xf] }
  0x25   : > { %1244 = vst.msk [vmem:[%s1549_s17] sm:$0xff] %vm1243_vm3, %v1192_v25  ;;  %v1194_v43 = vadd.f32 %v1059_v2, %v955_v29  ;;  %v768_v44 = vadd.f32 %v636_v35, %v478_v8  ;;  %v824_v47 = vsel %vm816_vm1, %v822_v24, %v823_v30  ;;  %v214_v48 = vmul.f32 0.125, %v1479_v4 }
  0x26   : > { %v1193_v49 = vadd.f32 %v1060_v9, %v954_v32  ;;  %v1063_v50 = vsel %vm1055_vm2, %v1061_v31, %v1062_v39  ;;  %v369_v51 = vadd.f32 %v315_v40, %v1533_v62  ;;  %v215_v27 = vmul.f32 0.125, %v1482_v5 }
  0x27   : > { %1247 = vst.msk [vmem:[%s1549_s17 + $0x10] sm:$0x1] %vm1246_vm4, %v1194_v43  ;;  %v956_v52 = vadd.f32 %v824_v47, %v768_v44  ;;  %v1570_v53 = vmul.f32 0.125, %v163_v41  ;;  %v1572_v54 = vmul.f32 0.125, %v164_v42  ;;  %v268_v4 = vmul.f32 0.375, %v1489_v14 }
  0x28   : > { %1245 = vst.msk [vmem:[%s1549_s17 + $0x8] sm:$0xff] %vm1243_vm3, %v1193_v49  ;;  %v429_v55 = vadd.f32 %v369_v51, %v1526_v46  ;;  %v269_v56 = vmul.f32 0.375, %v1507_v28  ;;  %v316_v5 = vadd.f32 %v1519_v37, %v214_v48  ;;  %v317_v57 = vadd.f32 %v1521_v38, %v215_v27  ;;  %v168_v49 = vld [vmem:[%s1472_s13 + $0xa0] sm:$0xf] }
  0x29   : > { %v1195_v60 = vadd.f32 %v1063_v50, %v956_v52  ;;  %v216_v61 = vmul.f32 0.125, %v1498_v21  ;;  %v1589_v14 = vmul.f32 0.125, %v1566_v45  ;;  %v1592_v63 = vmul.f32 0.375, %v1513_v34 }
  0x2a   : > { %v480_v0 = vmul.f32 0.125, %v429_v55  ;;  %v531_v1 = vmul.f32 0.375, %v429_v55  ;;  %v370_v28 = vadd.f32 %v316_v5, %v268_v4  ;;  %v371_v2 = vadd.f32 %v317_v57, %v269_v56 }
  0x2b   : > { %1248 = vst.msk [vmem:[%s1549_s17 + $0x18] sm:$0xff] %vm1243_vm3, %v1195_v60  ;;  %v318_v37 = vadd.f32 %v1533_v62, %v216_v61  ;;  %v1598_v38 = vmul.f32 0.125, %v1582_v58  ;;  %v1601_v3 = vmul.f32 0.125, %v1585_v59  ;;  %v1603_v21 = vmul.f32 0.375, %v163_v41 }
  0x2c   : > { %v637_v6 = vrot.slane %v531_v1, 1  ;;  %v825_v7 = vrot.slane %v531_v1, 2  ;;  %v1064_v34 = vrot.slane %v480_v0, 3  ;;  %v430_v8 = vadd.f32 %v370_v28, %v1570_v53 }
  0x2d   : > { %v431_v9 = vadd.f32 %v371_v2, %v1572_v54  ;;  %v372_v11 = vadd.f32 %v318_v37, %v1592_v63  ;;  %v1608_v12 = vmul.f32 0.375, %v164_v42  ;;  %v319_v62 = vadd.f32 %v268_v4, %v1491_v15 }
  0x2e   : > { %v638_v13 = vsel %vm628_vm0, %v635_v23, %v637_v6  ;;  %v826_v17 = vsel %vm816_vm1, %v823_v30, %v825_v7  ;;  %v1065_v18 = vsel %vm1055_vm2, %v1062_v39, %v1064_v34  ;;  %v770_v19 = vadd.f32 %v637_v6, %v480_v0 }
  0x2f   : > { %v769_v20 = vadd.f32 %v638_v13, %v1540_v10  ;;  %v481_v22 = vmul.f32 0.125, %v430_v8  ;;  %v482_v24 = vmul.f32 0.125, %v431_v9  ;;  %v532_v25 = vmul.f32 0.375, %v430_v8 }
  0x30   : > { %v958_v29 = vadd.f32 %v825_v7, %v770_v19  ;;  %v533_v31 = vmul.f32 0.375, %v431_v9  ;;  %v432_v32 = vadd.f32 %v372_v11, %v1589_v14  ;;  %v320_v15 = vadd.f32 %v269_v56, %v1493_v16  ;;  %v169_v19 = vld [vmem:[%s1472_s13 + $0xa8] sm:$0xff] }
  0x31   : > { %v957_v35 = vadd.f32 %v826_v17, %v769_v20  ;;  %v639_v23 = vrot.slane %v532_v25, 1  ;;  %v827_v40 = vrot.slane %v532_v25, 2  ;;  %v1066_v30 = vrot.slane %v481_v22, 3  ;;  %v170_v20 = vld [vmem:[%s1472_s13 + $0xb0] sm:$0xff] }
  0x32   : > { %v1197_v39 = vadd.f32 %v1064_v34, %v958_v29  ;;  %v640_v41 = vrot.slane %v533_v31, 1  ;;  %v828_v42 = vrot.slane %v533_v31, 2  ;;  %v1067_v10 = vrot.slane %v482_v24, 3 }
  0x33   : > { %v1196_v43 = vadd.f32 %v1065_v18, %v957_v35  ;;  %v483_v44 = vmul.f32 0.125, %v432_v32  ;;  %v534_v47 = vmul.f32 0.375, %v432_v32  ;;  %v373_v48 = vadd.f32 %v319_v62, %v1603_v21 }
  0x34   : > { %1250 = vst.msk [vmem:[%s1549_s17 + $0x28] sm:$0x1] %vm1246_vm4, %v1197_v39  ;;  %v641_v50 = vsel %vm628_vm0, %v639_v23, %v640_v41  ;;  %v829_v16 = vsel %vm816_vm1, %v827_v40, %v828_v42  ;;  %v1068_v51 = vsel %vm1055_vm2, %v1066_v30, %v1067_v10  ;;  %v374_v27 = vadd.f32 %v320_v15, %v1608_v12  ;;  %v1643_v15 = vld [vmem:[%s1472_s13 + $0xb8] sm:$0xf] }
  0x35   : > { %1249 = vst.msk [vmem:[%s1549_s17 + $0x20] sm:$0xff] %vm1243_vm3, %v1196_v43  ;;  %v771_v52 = vadd.f32 %v641_v50, %v481_v22  ;;  %v642_v4 = vrot.slane %v534_v47, 1  ;;  %v830_v55 = vrot.slane %v534_v47, 2  ;;  %v1069_v56 = vrot.slane %v483_v44, 3  ;;  %v1659_v43 = vld [vmem:[%s1472_s13 + $0xc0] sm:$0xff] }
  0x36   : > { %v433_v5 = vadd.f32 %v373_v48, %v1598_v38  ;;  %v434_v57 = vadd.f32 %v374_v27, %v1601_v3  ;;  %v1629_v60 = vmul.f32 0.125, %v168_v49  ;;  %v273_v61 = vmul.f32 0.375, %v1566_v45 }
  0x37   : > { %v959_v0 = vadd.f32 %v829_v16, %v771_v52  ;;  %v643_v1 = vsel %vm628_vm0, %v640_v41, %v642_v4  ;;  %v831_v28 = vsel %vm816_vm1, %v828_v42, %v830_v55  ;;  %v1070_v2 = vsel %vm1055_vm2, %v1067_v10, %v1069_v56 }
  0x38   : > { %v772_v37 = vadd.f32 %v643_v1, %v482_v24  ;;  %v773_v6 = vadd.f32 %v642_v4, %v483_v44  ;;  %v484_v7 = vmul.f32 0.125, %v433_v5  ;;  %v485_v34 = vmul.f32 0.125, %v434_v57  ;;  %v1662_v44 = vld [vmem:[%s1472_s13 + $0xc8] sm:$0xff] }
  0x39   : > { %v1198_v8 = vadd.f32 %v1068_v51, %v959_v0  ;;  %v535_v9 = vmul.f32 0.375, %v433_v5  ;;  %v536_v11 = vmul.f32 0.375, %v434_v57  ;;  %v321_v45 = vadd.f32 %v1592_v63, %v1501_v26 }
  0x3a   : > { %v960_v62 = vadd.f32 %v831_v28, %v772_v37  ;;  %v961_v13 = vadd.f32 %v830_v55, %v773_v6  ;;  %v1071_v17 = vrot.slane %v484_v7, 3  ;;  %v1072_v18 = vrot.slane %v485_v34, 3 }
  0x3b   : > { %1251 = vst.msk [vmem:[%s1549_s17 + $0x30] sm:$0xff] %vm1243_vm3, %v1198_v8  ;;  %v644_v22 = vrot.slane %v535_v9, 1  ;;  %v645_v24 = vrot.slane %v536_v11, 1  ;;  %v832_v25 = vrot.slane %v535_v9, 2  ;;  %v833_v29 = vrot.slane %v536_v11, 2 }
  0x3c   : > { %v1199_v31 = vadd.f32 %v1070_v2, %v960_v62  ;;  %v1200_v32 = vadd.f32 %v1069_v56, %v961_v13  ;;  %v1073_v26 = vsel %vm1055_vm2, %v1071_v17, %v1072_v18  ;;  %v375_v63 = vadd.f32 %v321_v45, %v273_v61 }
  0x3d   : > { %v646_v35 = vsel %vm628_vm0, %v644_v22, %v645_v24  ;;  %v834_v23 = vsel %vm816_vm1, %v832_v25, %v833_v29  ;;  %v1647_v40 = vmul.f32 0.125, %v169_v19  ;;  %v1649_v30 = vmul.f32 0.125, %v170_v20 }
  0x3e   : > { %1252 = vst.msk [vmem:[%s1549_s17 + $0x38] sm:$0xff] %vm1243_vm3, %v1199_v31  ;;  %v774_v39 = vadd.f32 %v646_v35, %v484_v7  ;;  %v435_v41 = vadd.f32 %v375_v63, %v1629_v60  ;;  %v274_v42 = vmul.f32 0.375, %v1582_v58  ;;  %v275_v10 = vmul.f32 0.375, %v1585_v59 }
  0x3f   : > { %1253 = vst.msk [vmem:[%s1549_s17 + $0x40] sm:$0x1] %vm1246_vm4, %v1200_v32  ;;  %v322_v47 = vadd.f32 %v1603_v21, %v1510_v33  ;;  %v323_v48 = vadd.f32 %v1608_v12, %v1517_v36  ;;  %v1669_v50 = vmul.f32 0.125, %v1643_v15  ;;  %v1671_v16 = vmul.f32 0.375, %v168_v49 }
  0x40   : > { %v962_v51 = vadd.f32 %v834_v23, %v774_v39  ;;  %v486_v58 = vmul.f32 0.125, %v435_v41  ;;  %v537_v27 = vmul.f32 0.375, %v435_v41  ;;  %v324_v59 = vadd.f32 %v273_v61, %v1526_v46 }
  0x41   : > { %v376_v52 = vadd.f32 %v322_v47, %v274_v42  ;;  %v377_v4 = vadd.f32 %v323_v48, %v275_v10  ;;  %v1675_v55 = vmul.f32 0.125, %v1659_v43  ;;  %v1678_v33 = vmul.f32 0.125, %v1662_v44 }
  0x42   : > { %v1201_v36 = vadd.f32 %v1073_v26, %v962_v51  ;;  %v647_v21 = vrot.slane %v537_v27, 1  ;;  %v835_v12 = vrot.slane %v537_v27, 2  ;;  %v1074_v56 = vrot.slane %v486_v58, 3  ;;  %v1695_v26 = vld [vmem:[%s1472_s13 + $0xd0] sm:$0xf]  ;;  %v1712_v27 = vld [vmem:[%s1472_s13 + $0xd8] sm:$0xff] }
  0x43   : > { %v436_v49 = vadd.f32 %v376_v52, %v1647_v40  ;;  %v437_v5 = vadd.f32 %v377_v4, %v1649_v30  ;;  %v378_v57 = vadd.f32 %v324_v59, %v1671_v16  ;;  %v1683_v0 = vmul.f32 0.375, %v169_v19  ;;  %v1715_v59 = vld [vmem:[%s1472_s13 + $0xe0] sm:$0xff] }
  0x44   : > { %1254 = vst.msk [vmem:[%s1549_s17 + $0x48] sm:$0xff] %vm1243_vm3, %v1201_v36  ;;  %v648_v46 = vsel %vm628_vm0, %v645_v24, %v647_v21  ;;  %v836_v61 = vsel %vm816_vm1, %v833_v29, %v835_v12  ;;  %v1075_v1 = vsel %vm1055_vm2, %v1072_v18, %v1074_v56  ;;  %v776_v28 = vadd.f32 %v647_v21, %v486_v58 }
  0x45   : > { %v775_v2 = vadd.f32 %v648_v46, %v485_v34  ;;  %v487_v37 = vmul.f32 0.125, %v436_v49  ;;  %v488_v6 = vmul.f32 0.125, %v437_v5  ;;  %v538_v7 = vmul.f32 0.375, %v436_v49 }
  0x46   : > { %v964_v8 = vadd.f32 %v835_v12, %v776_v28  ;;  %v539_v9 = vmul.f32 0.375, %v437_v5  ;;  %v438_v11 = vadd.f32 %v378_v57, %v1669_v50  ;;  %v1691_v45 = vmul.f32 0.375, %v170_v20 }
  0x47   : > { %v963_v62 = vadd.f32 %v836_v61, %v775_v2  ;;  %v649_v13 = vrot.slane %v538_v7, 1  ;;  %v837_v17 = vrot.slane %v538_v7, 2  ;;  %v1076_v19 = vrot.slane %v487_v37, 3 }
  0x48   : > { %v1203_v22 = vadd.f32 %v1074_v56, %v964_v8  ;;  %v650_v18 = vrot.slane %v539_v9, 1  ;;  %v838_v24 = vrot.slane %v539_v9, 2  ;;  %v1077_v34 = vrot.slane %v488_v6, 3 }
  0x49   : > { %v1202_v25 = vadd.f32 %v1075_v1, %v963_v62  ;;  %v489_v29 = vmul.f32 0.125, %v438_v11  ;;  %v540_v31 = vmul.f32 0.375, %v438_v11  ;;  %v325_v32 = vadd.f32 %v274_v42, %v1570_v53  ;;  %v1736_v11 = vld [vmem:[%s1472_s13 + $0xe8] sm:$0xf] }
  0x4a   : > { %1256 = vst.msk [vmem:[%s1549_s17 + $0x58] sm:$0x1] %vm1246_vm4, %v1203_v22  ;;  %v651_v20 = vsel %vm628_vm0, %v649_v13, %v650_v18  ;;  %v839_v63 = vsel %vm816_vm1, %v837_v17, %v838_v24  ;;  %v1078_v35 = vsel %vm1055_vm2, %v1076_v19, %v1077_v34  ;;  %v326_v23 = vadd.f32 %v275_v10, %v1572_v54 }
  0x4b   : > { %1255 = vst.msk [vmem:[%s1549_s17 + $0x50] sm:$0xff] %vm1243_vm3, %v1202_v25  ;;  %v777_v39 = vadd.f32 %v651_v20, %v487_v37  ;;  %v652_v41 = vrot.slane %v540_v31, 1  ;;  %v840_v47 = vrot.slane %v540_v31, 2  ;;  %v1079_v53 = vrot.slane %v489_v29, 3 }
  0x4c   : > { %v379_v42 = vadd.f32 %v325_v32, %v1683_v0  ;;  %v380_v48 = vadd.f32 %v326_v23, %v1691_v45  ;;  %v1708_v51 = vmul.f32 0.125, %v1695_v26  ;;  %v279_v58 = vmul.f32 0.375, %v1643_v15  ;;  %v1759_v23 = vld [vmem:[%s1472_s13 + $0xf8] sm:$0xff] }
  0x4d   : > { %v965_v54 = vadd.f32 %v839_v63, %v777_v39  ;;  %v653_v10 = vsel %vm628_vm0, %v650_v18, %v652_v41  ;;  %v841_v52 = vsel %vm816_vm1, %v838_v24, %v840_v47  ;;  %v1080_v4 = vsel %vm1055_vm2, %v1077_v34, %v1079_v53  ;;  %v1748_v34 = vld [vmem:[%s1472_s13 + $0xf0] sm:$0xff] }
  0x4e   : > { %v778_v36 = vadd.f32 %v653_v10, %v488_v6  ;;  %v779_v21 = vadd.f32 %v652_v41, %v489_v29  ;;  %v439_v12 = vadd.f32 %v379_v42, %v1675_v55  ;;  %v440_v56 = vadd.f32 %v380_v48, %v1678_v33 }
  0x4f   : > { %v1204_v49 = vadd.f32 %v1078_v35, %v965_v54  ;;  %v327_v15 = vadd.f32 %v1671_v16, %v1589_v14  ;;  %v1725_v5 = vmul.f32 0.125, %v1712_v27  ;;  %v1728_v57 = vmul.f32 0.125, %v1715_v59 }
  0x50   : > { %v966_v46 = vadd.f32 %v841_v52, %v778_v36  ;;  %v967_v61 = vadd.f32 %v840_v47, %v779_v21  ;;  %v490_v1 = vmul.f32 0.125, %v439_v12  ;;  %v491_v28 = vmul.f32 0.125, %v440_v56 }
  0x51   : > { %1257 = vst.msk [vmem:[%s1549_s17 + $0x60] sm:$0xff] %vm1243_vm3, %v1204_v49  ;;  %v541_v2 = vmul.f32 0.375, %v439_v12  ;;  %v542_v37 = vmul.f32 0.375, %v440_v56  ;;  %v381_v6 = vadd.f32 %v327_v15, %v279_v58  ;;  %v1733_v14 = vmul.f32 0.375, %v1659_v43 }
  0x52   : > { %v1205_v16 = vadd.f32 %v1080_v4, %v966_v46  ;;  %v1206_v7 = vadd.f32 %v1079_v53, %v967_v61  ;;  %v1081_v8 = vrot.slane %v490_v1, 3  ;;  %v1082_v9 = vrot.slane %v491_v28, 3 }
  0x53   : > { %v654_v62 = vrot.slane %v541_v2, 1  ;;  %v655_v13 = vrot.slane %v542_v37, 1  ;;  %v842_v17 = vrot.slane %v541_v2, 2  ;;  %v843_v19 = vrot.slane %v542_v37, 2 }
  0x54   : > { %1258 = vst.msk [vmem:[%s1549_s17 + $0x68] sm:$0xff] %vm1243_vm3, %v1205_v16  ;;  %v1083_v22 = vsel %vm1055_vm2, %v1081_v8, %v1082_v9  ;;  %v441_v43 = vadd.f32 %v381_v6, %v1708_v51  ;;  %v281_v18 = vmul.f32 0.375, %v1662_v44  ;;  %v328_v24 = vadd.f32 %v1683_v0, %v1598_v38 }
  0x55   : > { %1259 = vst.msk [vmem:[%s1549_s17 + $0x70] sm:$0x1] %vm1246_vm4, %v1206_v7  ;;  %v656_v25 = vsel %vm628_vm0, %v654_v62, %v655_v13  ;;  %v844_v29 = vsel %vm816_vm1, %v842_v17, %v843_v19  ;;  %v329_v31 = vadd.f32 %v1691_v45, %v1601_v3  ;;  %v1755_v32 = vmul.f32 0.125, %v1736_v11  ;;  %v1782_v17 = vld [vmem:[%s1472_s13 + $0x100] sm:$0xf] }
  0x56   : > { %v780_v20 = vadd.f32 %v656_v25, %v490_v1  ;;  %v492_v63 = vmul.f32 0.125, %v441_v43  ;;  %v543_v35 = vmul.f32 0.375, %v441_v43  ;;  %v382_v44 = vadd.f32 %v328_v24, %v1733_v14 }
  0x57   : > { %v383_v38 = vadd.f32 %v329_v31, %v281_v18  ;;  %v282_v0 = vmul.f32 0.375, %v1695_v26  ;;  %v330_v39 = vadd.f32 %v279_v58, %v1629_v60  ;;  %v1764_v41 = vmul.f32 0.125, %v1748_v34 }
  0x58   : > { %v968_v47 = vadd.f32 %v844_v29, %v780_v20  ;;  %v657_v3 = vrot.slane %v543_v35, 1  ;;  %v845_v45 = vrot.slane %v543_v35, 2  ;;  %v1084_v53 = vrot.slane %v492_v63, 3 }
  0x59   : > { %v442_v42 = vadd.f32 %v382_v44, %v1725_v5  ;;  %v443_v48 = vadd.f32 %v383_v38, %v1728_v57  ;;  %v384_v54 = vadd.f32 %v330_v39, %v282_v0  ;;  %v1769_v10 = vmul.f32 0.125, %v1759_v23 }
  0x5a   : > { %v1207_v52 = vadd.f32 %v1083_v22, %v968_v47  ;;  %v658_v26 = vsel %vm628_vm0, %v655_v13, %v657_v3  ;;  %v846_v60 = vsel %vm816_vm1, %v843_v19, %v845_v45  ;;  %v1085_v58 = vsel %vm1055_vm2, %v1082_v9, %v1084_v53 }
  0x5b   : > { %v781_v4 = vadd.f32 %v658_v26, %v491_v28  ;;  %v782_v36 = vadd.f32 %v657_v3, %v492_v63  ;;  %v493_v21 = vmul.f32 0.125, %v442_v42  ;;  %v494_v12 = vmul.f32 0.125, %v443_v48  ;;  %v1803_v3 = vld [vmem:[%s1472_s13 + $0x108] sm:$0xff] }
  0x5c   : > { %1260 = vst.msk [vmem:[%s1549_s17 + $0x78] sm:$0xff] %vm1243_vm3, %v1207_v52  ;;  %v544_v56 = vmul.f32 0.375, %v442_v42  ;;  %v545_v49 = vmul.f32 0.375, %v443_v48  ;;  %v444_v15 = vadd.f32 %v384_v54, %v1755_v32  ;;  %v1778_v46 = vmul.f32 0.375, %v1712_v27 }
  0x5d   : > { %v969_v61 = vadd.f32 %v846_v60, %v781_v4  ;;  %v970_v1 = vadd.f32 %v845_v45, %v782_v36  ;;  %v1086_v2 = vrot.slane %v493_v21, 3  ;;  %v1087_v37 = vrot.slane %v494_v12, 3 }
  0x5e   : > { %v659_v28 = vrot.slane %v544_v56, 1  ;;  %v660_v6 = vrot.slane %v545_v49, 1  ;;  %v847_v16 = vrot.slane %v544_v56, 2  ;;  %v848_v7 = vrot.slane %v545_v49, 2 }
  0x5f   : > { %v1208_v8 = vadd.f32 %v1085_v58, %v969_v61  ;;  %v1209_v9 = vadd.f32 %v1084_v53, %v970_v1  ;;  %v1088_v62 = vsel %vm1055_vm2, %v1086_v2, %v1087_v37  ;;  %v495_v13 = vmul.f32 0.125, %v444_v15 }
  0x60   : > { %v661_v27 = vsel %vm628_vm0, %v659_v28, %v660_v6  ;;  %v849_v19 = vsel %vm816_vm1, %v847_v16, %v848_v7  ;;  %v546_v22 = vmul.f32 0.375, %v444_v15  ;;  %v284_v43 = vmul.f32 0.375, %v1715_v59 }
  0x61   : > { %1261 = vst.msk [vmem:[%s1549_s17 + $0x80] sm:$0xff] %vm1243_vm3, %v1208_v8  ;;  %v783_v24 = vadd.f32 %v661_v27, %v493_v21  ;;  %v1089_v25 = vrot.slane %v495_v13, 3  ;;  %v331_v29 = vadd.f32 %v1733_v14, %v1647_v40  ;;  %v332_v31 = vadd.f32 %v281_v18, %v1649_v30  ;;  %v1806_v40 = vld [vmem:[%s1472_s13 + $0x110] sm:$0xff] }
  0x62   : > { %1262 = vst.msk [vmem:[%s1549_s17 + $0x88] sm:$0x1] %vm1246_vm4, %v1209_v9  ;;  %v662_v20 = vrot.slane %v546_v22, 1  ;;  %v850_v63 = vrot.slane %v546_v22, 2  ;;  %v1795_v35 = vmul.f32 0.125, %v1782_v17  ;;  %v1798_v44 = vmul.f32 0.375, %v1736_v11 }
  0x63   : > { %v971_v59 = vadd.f32 %v849_v19, %v783_v24  ;;  %v1090_v38 = vsel %vm1055_vm2, %v1087_v37, %v1089_v25  ;;  %v385_v39 = vadd.f32 %v331_v29, %v1778_v46  ;;  %v386_v47 = vadd.f32 %v332_v31, %v284_v43  ;;  %v183_v9 = vld [vmem:[%s1472_s13 + $0x118] sm:$0xf] }
  0x64   : > { %v663_v30 = vsel %vm628_vm0, %v660_v6, %v662_v20  ;;  %v851_v14 = vsel %vm816_vm1, %v848_v7, %v850_v63  ;;  %v785_v18 = vadd.f32 %v662_v20, %v495_v13  ;;  %v333_v45 = vadd.f32 %v282_v0, %v1669_v50 }
  0x65   : > { %v1210_v11 = vadd.f32 %v1088_v62, %v971_v59  ;;  %v784_v53 = vadd.f32 %v663_v30, %v494_v12  ;;  %v445_v42 = vadd.f32 %v385_v39, %v1764_v41  ;;  %v446_v48 = vadd.f32 %v386_v47, %v1769_v10 }
  0x66   : > { %v973_v54 = vadd.f32 %v850_v63, %v785_v18  ;;  %v387_v52 = vadd.f32 %v333_v45, %v1798_v44  ;;  %v1815_v26 = vmul.f32 0.125, %v1803_v3  ;;  %v1818_v60 = vmul.f32 0.125, %v1806_v40 }
  0x67   : > { %1263 = vst.msk [vmem:[%s1549_s17 + $0x90] sm:$0xff] %vm1243_vm3, %v1210_v11  ;;  %v972_v58 = vadd.f32 %v851_v14, %v784_v53  ;;  %v496_v50 = vmul.f32 0.125, %v445_v42  ;;  %v497_v0 = vmul.f32 0.125, %v446_v48  ;;  %v547_v4 = vmul.f32 0.375, %v445_v42 }
  0x68   : > { %v1212_v36 = vadd.f32 %v1089_v25, %v973_v54  ;;  %v548_v21 = vmul.f32 0.375, %v446_v48  ;;  %v447_v12 = vadd.f32 %v387_v52, %v1795_v35  ;;  %v1824_v56 = vmul.f32 0.375, %v1748_v34 }
  0x69   : > { %v1211_v49 = vadd.f32 %v1090_v38, %v972_v58  ;;  %v664_v15 = vrot.slane %v547_v4, 1  ;;  %v852_v61 = vrot.slane %v547_v4, 2  ;;  %v1091_v1 = vrot.slane %v496_v50, 3 }
  0x6a   : > { %1265 = vst.msk [vmem:[%s1549_s17 + $0xa0] sm:$0x1] %vm1246_vm4, %v1212_v36  ;;  %v665_v2 = vrot.slane %v548_v21, 1  ;;  %v853_v37 = vrot.slane %v548_v21, 2  ;;  %v1092_v28 = vrot.slane %v497_v0, 3  ;;  %v498_v6 = vmul.f32 0.125, %v447_v12 }
  0x6b   : > { %1264 = vst.msk [vmem:[%s1549_s17 + $0x98] sm:$0xff] %vm1243_vm3, %v1211_v49  ;;  %v549_v16 = vmul.f32 0.375, %v447_v12  ;;  %v287_v7 = vmul.f32 0.375, %v1759_v23  ;;  %v334_v34 = vadd.f32 %v1778_v46, %v1675_v55  ;;  %v335_v8 = vadd.f32 %v284_v43, %v1678_v33  ;;  %v1844_v46 = vld [vmem:[%s1472_s13 + $0x120] sm:$0xff]  ;;  %v1847_v43 = vld [vmem:[%s1472_s13 + $0x128] sm:$0xff] }
  0x6c   : > { %v666_v62 = vsel %vm628_vm0, %v664_v15, %v665_v2  ;;  %v854_v13 = vsel %vm816_vm1, %v852_v61, %v853_v37  ;;  %v1093_v27 = vsel %vm1055_vm2, %v1091_v1, %v1092_v28  ;;  %v1094_v19 = vrot.slane %v498_v6, 3 }
  0x6d   : > { %v786_v22 = vadd.f32 %v666_v62, %v496_v50  ;;  %v667_v24 = vrot.slane %v549_v16, 1  ;;  %v855_v25 = vrot.slane %v549_v16, 2  ;;  %v388_v23 = vadd.f32 %v334_v34, %v1824_v56 }
  0x6e   : > { %v1095_v29 = vsel %vm1055_vm2, %v1092_v28, %v1094_v19  ;;  %v389_v31 = vadd.f32 %v335_v8, %v287_v7  ;;  %v1840_v55 = vmul.f32 0.125, %v183_v9  ;;  %v288_v33 = vmul.f32 0.375, %v1782_v17  ;;  %v1882_v28 = vld [vmem:[%s1472_s13 + $0x138] sm:$0xff] }
  0x6f   : > { %v974_v20 = vadd.f32 %v854_v13, %v786_v22  ;;  %v668_v63 = vsel %vm628_vm0, %v665_v2, %v667_v24  ;;  %v856_v59 = vsel %vm816_vm1, %v853_v37, %v855_v25  ;;  %v788_v38 = vadd.f32 %v667_v24, %v498_v6 }
  0x70   : > { %v787_v39 = vadd.f32 %v668_v63, %v497_v0  ;;  %v448_v47 = vadd.f32 %v388_v23, %v1815_v26  ;;  %v449_v30 = vadd.f32 %v389_v31, %v1818_v60  ;;  %v336_v17 = vadd.f32 %v1798_v44, %v1708_v51  ;;  %v1867_v44 = vld [vmem:[%s1472_s13 + $0x130] sm:$0xf] }
  0x71   : > { %v1213_v14 = vadd.f32 %v1093_v27, %v974_v20  ;;  %v976_v18 = vadd.f32 %v855_v25, %v788_v38  ;;  %v1856_v45 = vmul.f32 0.125, %v1844_v46  ;;  %v1859_v11 = vmul.f32 0.125, %v1847_v43 }
  0x72   : > { %v975_v53 = vadd.f32 %v856_v59, %v787_v39  ;;  %v499_v42 = vmul.f32 0.125, %v448_v47  ;;  %v500_v48 = vmul.f32 0.125, %v449_v30  ;;  %v550_v54 = vmul.f32 0.375, %v448_v47 }
  0x73   : > { %1266 = vst.msk [vmem:[%s1549_s17 + $0xa8] sm:$0xff] %vm1243_vm3, %v1213_v14  ;;  %v1215_v52 = vadd.f32 %v1094_v19, %v976_v18  ;;  %v551_v58 = vmul.f32 0.375, %v449_v30  ;;  %v390_v50 = vadd.f32 %v336_v17, %v288_v33  ;;  %v1864_v51 = vmul.f32 0.375, %v1803_v3 }
  0x74   : > { %v1214_v0 = vadd.f32 %v1095_v29, %v975_v53  ;;  %v669_v4 = vrot.slane %v550_v54, 1  ;;  %v857_v36 = vrot.slane %v550_v54, 2  ;;  %v1096_v21 = vrot.slane %v499_v42, 3 }
  0x75   : > { %1268 = vst.msk [vmem:[%s1549_s17 + $0xb8] sm:$0x1] %vm1246_vm4, %v1215_v52  ;;  %v670_v12 = vrot.slane %v551_v58, 1  ;;  %v858_v49 = vrot.slane %v551_v58, 2  ;;  %v1097_v15 = vrot.slane %v500_v48, 3  ;;  %v450_v61 = vadd.f32 %v390_v50, %v1840_v55 }
  0x76   : > { %1267 = vst.msk [vmem:[%s1549_s17 + $0xb0] sm:$0xff] %vm1243_vm3, %v1214_v0  ;;  %v290_v3 = vmul.f32 0.375, %v1806_v40  ;;  %v337_v1 = vadd.f32 %v1824_v56, %v1725_v5  ;;  %v338_v2 = vadd.f32 %v287_v7, %v1728_v57  ;;  %v1879_v37 = vmul.f32 0.125, %v1867_v44  ;;  %v1889_v5 = vld [vmem:[%s1472_s13 + $0x140] sm:$0xff] }
  0x77   : > { %v671_v6 = vsel %vm628_vm0, %v669_v4, %v670_v12  ;;  %v859_v16 = vsel %vm816_vm1, %v857_v36, %v858_v49  ;;  %v1098_v34 = vsel %vm1055_vm2, %v1096_v21, %v1097_v15  ;;  %v501_v8 = vmul.f32 0.125, %v450_v61 }
  0x78   : > { %v789_v62 = vadd.f32 %v671_v6, %v499_v42  ;;  %v552_v13 = vmul.f32 0.375, %v450_v61  ;;  %v391_v40 = vadd.f32 %v337_v1, %v1864_v51  ;;  %v392_v27 = vadd.f32 %v338_v2, %v290_v3 }
  0x79   : > { %v1099_v57 = vrot.slane %v501_v8, 3  ;;  %v291_v56 = vmul.f32 0.375, %v183_v9  ;;  %v339_v7 = vadd.f32 %v288_v33, %v1755_v32  ;;  %v1893_v19 = vmul.f32 0.125, %v1882_v28 }
  0x7a   : > { %v977_v22 = vadd.f32 %v859_v16, %v789_v62  ;;  %v672_v24 = vrot.slane %v552_v13, 1  ;;  %v860_v25 = vrot.slane %v552_v13, 2  ;;  %v451_v23 = vadd.f32 %v391_v40, %v1856_v45 }
  0x7b   : > { %v1100_v29 = vsel %vm1055_vm2, %v1097_v15, %v1099_v57  ;;  %v452_v31 = vadd.f32 %v392_v27, %v1859_v11  ;;  %v393_v20 = vadd.f32 %v339_v7, %v291_v56  ;;  %v1899_v63 = vmul.f32 0.125, %v1889_v5  ;;  %v1911_v15 = vld [vmem:[%s1472_s13 + $0x148] sm:$0xf]  ;;  %v1929_v27 = vld [vmem:[%s1472_s13 + $0x150] sm:$0xff] }
  0x7c   : > { %v1216_v9 = vadd.f32 %v1098_v34, %v977_v22  ;;  %v673_v32 = vsel %vm628_vm0, %v670_v12, %v672_v24  ;;  %v861_v33 = vsel %vm816_vm1, %v858_v49, %v860_v25  ;;  %v791_v59 = vadd.f32 %v672_v24, %v501_v8 }
  0x7d   : > { %v790_v38 = vadd.f32 %v673_v32, %v500_v48  ;;  %v502_v39 = vmul.f32 0.125, %v451_v23  ;;  %v503_v47 = vmul.f32 0.125, %v452_v31  ;;  %v553_v30 = vmul.f32 0.375, %v451_v23 }
  0x7e   : > { %1269 = vst.msk [vmem:[%s1549_s17 + $0xc0] sm:$0xff] %vm1243_vm3, %v1216_v9  ;;  %v979_v17 = vadd.f32 %v860_v25, %v791_v59  ;;  %v554_v14 = vmul.f32 0.375, %v452_v31  ;;  %v453_v18 = vadd.f32 %v393_v20, %v1879_v37  ;;  %v1907_v53 = vmul.f32 0.375, %v1844_v46 }
  0x7f   : > { %v978_v42 = vadd.f32 %v861_v33, %v790_v38  ;;  %v674_v54 = vrot.slane %v553_v30, 1  ;;  %v862_v52 = vrot.slane %v553_v30, 2  ;;  %v1101_v58 = vrot.slane %v502_v39, 3 }
  0x80   : > { %v1218_v48 = vadd.f32 %v1099_v57, %v979_v17  ;;  %v675_v50 = vrot.slane %v554_v14, 1  ;;  %v863_v0 = vrot.slane %v554_v14, 2  ;;  %v1102_v4 = vrot.slane %v503_v47, 3  ;;  %v1932_v57 = vld [vmem:[%s1472_s13 + $0x158] sm:$0xff]  ;;  %v1955_v14 = vld [vmem:[%s1472_s13 + $0x160] sm:$0xf] }
  0x81   : > { %v1217_v36 = vadd.f32 %v1100_v29, %v978_v42  ;;  %v504_v21 = vmul.f32 0.125, %v453_v18  ;;  %v555_v12 = vmul.f32 0.375, %v453_v18  ;;  %v293_v49 = vmul.f32 0.375, %v1847_v43 }
  0x82   : > { %1271 = vst.msk [vmem:[%s1549_s17 + $0xd0] sm:$0x1] %vm1246_vm4, %v1218_v48  ;;  %v676_v46 = vsel %vm628_vm0, %v674_v54, %v675_v50  ;;  %v864_v61 = vsel %vm816_vm1, %v862_v52, %v863_v0  ;;  %v1103_v1 = vsel %vm1055_vm2, %v1101_v58, %v1102_v4  ;;  %v340_v2 = vadd.f32 %v1864_v51, %v1764_v41 }
  0x83   : > { %1270 = vst.msk [vmem:[%s1549_s17 + $0xc8] sm:$0xff] %vm1243_vm3, %v1217_v36  ;;  %v792_v6 = vadd.f32 %v676_v46, %v502_v39  ;;  %v677_v16 = vrot.slane %v555_v12, 1  ;;  %v865_v43 = vrot.slane %v555_v12, 2  ;;  %v1104_v34 = vrot.slane %v504_v21, 3 }
  0x84   : > { %v341_v8 = vadd.f32 %v290_v3, %v1769_v10  ;;  %v394_v62 = vadd.f32 %v340_v2, %v1907_v53  ;;  %v1925_v13 = vmul.f32 0.125, %v1911_v15  ;;  %v294_v40 = vmul.f32 0.375, %v1867_v44 }
  0x85   : > { %v980_v41 = vadd.f32 %v864_v61, %v792_v6  ;;  %v678_v51 = vsel %vm628_vm0, %v675_v50, %v677_v16  ;;  %v866_v7 = vsel %vm816_vm1, %v863_v0, %v865_v43  ;;  %v1105_v22 = vsel %vm1055_vm2, %v1102_v4, %v1104_v34 }
  0x86   : > { %v793_v10 = vadd.f32 %v678_v51, %v503_v47  ;;  %v794_v3 = vadd.f32 %v677_v16, %v504_v21  ;;  %v395_v24 = vadd.f32 %v341_v8, %v293_v49  ;;  %v454_v25 = vadd.f32 %v394_v62, %v1893_v19 }
  0x87   : > { %v1219_v23 = vadd.f32 %v1103_v1, %v980_v41  ;;  %v342_v44 = vadd.f32 %v291_v56, %v1795_v35  ;;  %v1940_v29 = vmul.f32 0.125, %v1929_v27  ;;  %v1943_v31 = vmul.f32 0.125, %v1932_v57 }
  0x88   : > { %v981_v20 = vadd.f32 %v866_v7, %v793_v10  ;;  %v982_v9 = vadd.f32 %v865_v43, %v794_v3  ;;  %v455_v32 = vadd.f32 %v395_v24, %v1899_v63  ;;  %v505_v33 = vmul.f32 0.125, %v454_v25  ;;  %v1977_v43 = vld [vmem:[%s1472_s13 + $0x168] sm:$0xff] }
  0x89   : > { %1272 = vst.msk [vmem:[%s1549_s17 + $0xd8] sm:$0xff] %vm1243_vm3, %v1219_v23  ;;  %v556_v59 = vmul.f32 0.375, %v454_v25  ;;  %v396_v38 = vadd.f32 %v342_v44, %v294_v40  ;;  %v1949_v35 = vmul.f32 0.375, %v1882_v28  ;;  %v1952_v56 = vmul.f32 0.375, %v1889_v5 }
  0x8a   : > { %v1220_v39 = vadd.f32 %v1105_v22, %v981_v20  ;;  %v1221_v47 = vadd.f32 %v1104_v34, %v982_v9  ;;  %v506_v30 = vmul.f32 0.125, %v455_v32  ;;  %v557_v17 = vmul.f32 0.375, %v455_v32  ;;  %v194_v20 = vld [vmem:[%s1472_s13 + $0x170] sm:$0xff] }
  0x8b   : > { %v679_v18 = vrot.slane %v556_v59, 1  ;;  %v867_v42 = vrot.slane %v556_v59, 2  ;;  %v1106_v54 = vrot.slane %v505_v33, 3  ;;  %v456_v52 = vadd.f32 %v396_v38, %v1925_v13 }
  0x8c   : > { %1273 = vst.msk [vmem:[%s1549_s17 + $0xe0] sm:$0xff] %vm1243_vm3, %v1220_v39  ;;  %v680_v28 = vrot.slane %v557_v17, 1  ;;  %v868_v58 = vrot.slane %v557_v17, 2  ;;  %v1107_v48 = vrot.slane %v506_v30, 3  ;;  %v343_v5 = vadd.f32 %v1907_v53, %v1815_v26 }
  0x8d   : > { %1274 = vst.msk [vmem:[%s1549_s17 + $0xe8] sm:$0x1] %vm1246_vm4, %v1221_v47  ;;  %v507_v50 = vmul.f32 0.125, %v456_v52  ;;  %v558_v0 = vmul.f32 0.375, %v456_v52  ;;  %v344_v4 = vadd.f32 %v293_v49, %v1818_v60  ;;  %v1966_v36 = vmul.f32 0.125, %v1955_v14 }
  0x8e   : > { %v681_v21 = vsel %vm628_vm0, %v679_v18, %v680_v28  ;;  %v869_v12 = vsel %vm816_vm1, %v867_v42, %v868_v58  ;;  %v1108_v46 = vsel %vm1055_vm2, %v1106_v54, %v1107_v48  ;;  %v397_v61 = vadd.f32 %v343_v5, %v1949_v35  ;;  %v1993_v52 = vld [vmem:[%s1472_s13 + $0x178] sm:$0xf] }
  0x8f   : > { %v795_v1 = vadd.f32 %v681_v21, %v505_v33  ;;  %v682_v2 = vrot.slane %v558_v0, 1  ;;  %v870_v6 = vrot.slane %v558_v0, 2  ;;  %v1109_v26 = vrot.slane %v507_v50, 3 }
  0x90   : > { %v398_v53 = vadd.f32 %v344_v4, %v1952_v56  ;;  %v457_v16 = vadd.f32 %v397_v61, %v1940_v29  ;;  %v297_v60 = vmul.f32 0.375, %v1911_v15  ;;  %v345_v49 = vadd.f32 %v294_v40, %v1840_v55 }
  0x91   : > { %v983_v34 = vadd.f32 %v869_v12, %v795_v1  ;;  %v683_v8 = vsel %vm628_vm0, %v680_v28, %v682_v2  ;;  %v871_v62 = vsel %vm816_vm1, %v868_v58, %v870_v6  ;;  %v1110_v41 = vsel %vm1055_vm2, %v1107_v48, %v1109_v26 }
  0x92   : > { %v796_v51 = vadd.f32 %v683_v8, %v506_v30  ;;  %v797_v7 = vadd.f32 %v682_v2, %v507_v50  ;;  %v458_v22 = vadd.f32 %v398_v53, %v1943_v31  ;;  %v508_v10 = vmul.f32 0.125, %v457_v16 }
  0x93   : > { %v1222_v3 = vadd.f32 %v1108_v46, %v983_v34  ;;  %v559_v15 = vmul.f32 0.375, %v457_v16  ;;  %v399_v24 = vadd.f32 %v345_v49, %v297_v60  ;;  %v1984_v55 = vmul.f32 0.125, %v1977_v43 }
  0x94   : > { %v984_v40 = vadd.f32 %v871_v62, %v796_v51  ;;  %v985_v25 = vadd.f32 %v870_v6, %v797_v7  ;;  %v509_v23 = vmul.f32 0.125, %v458_v22  ;;  %v560_v44 = vmul.f32 0.375, %v458_v22 }
  0x95   : > { %1275 = vst.msk [vmem:[%s1549_s17 + $0xf0] sm:$0xff] %vm1243_vm3, %v1222_v3  ;;  %v684_v9 = vrot.slane %v559_v15, 1  ;;  %v872_v32 = vrot.slane %v559_v15, 2  ;;  %v1111_v33 = vrot.slane %v508_v10, 3  ;;  %v459_v59 = vadd.f32 %v399_v24, %v1966_v36 }
  0x96   : > { %v1223_v38 = vadd.f32 %v1110_v41, %v984_v40  ;;  %v1224_v39 = vadd.f32 %v1109_v26, %v985_v25  ;;  %v685_v47 = vrot.slane %v560_v44, 1  ;;  %v873_v30 = vrot.slane %v560_v44, 2  ;;  %v2014_v26 = vld [vmem:[%s1472_s13 + $0x180] sm:$0xff] }
  0x97   : > { %v1112_v17 = vrot.slane %v509_v23, 3  ;;  %v510_v18 = vmul.f32 0.125, %v459_v59  ;;  %v561_v42 = vmul.f32 0.375, %v459_v59  ;;  %v1990_v54 = vmul.f32 0.125, %v194_v20 }
  0x98   : > { %1276 = vst.msk [vmem:[%s1549_s17 + $0xf8] sm:$0xff] %vm1243_vm3, %v1223_v38  ;;  %v686_v28 = vsel %vm628_vm0, %v684_v9, %v685_v47  ;;  %v874_v58 = vsel %vm816_vm1, %v872_v32, %v873_v30  ;;  %v298_v48 = vmul.f32 0.375, %v1929_v27  ;;  %v299_v5 = vmul.f32 0.375, %v1932_v57  ;;  %v2038_v9 = vld [vmem:[%s1472_s13 + $0x190] sm:$0xf] }
  0x99   : > { %1277 = vst.msk [vmem:[%s1549_s17 + $0x100] sm:$0x1] %vm1246_vm4, %v1224_v39  ;;  %v798_v50 = vadd.f32 %v686_v28, %v508_v10  ;;  %v1113_v0 = vsel %vm1055_vm2, %v1111_v33, %v1112_v17  ;;  %v687_v4 = vrot.slane %v561_v42, 1  ;;  %v875_v21 = vrot.slane %v561_v42, 2 }
  0x9a   : > { %v1114_v12 = vrot.slane %v510_v18, 3  ;;  %v346_v46 = vadd.f32 %v1949_v35, %v1856_v45  ;;  %v347_v61 = vadd.f32 %v1952_v56, %v1859_v11  ;;  %v2009_v1 = vmul.f32 0.125, %v1993_v52  ;;  %v2018_v35 = vld [vmem:[%s1472_s13 + $0x188] sm:$0xff] }
  0x9b   : > { %v986_v2 = vadd.f32 %v874_v58, %v798_v50  ;;  %v688_v27 = vsel %vm628_vm0, %v685_v47, %v687_v4  ;;  %v876_v57 = vsel %vm816_vm1, %v873_v30, %v875_v21  ;;  %v800_v6 = vadd.f32 %v687_v4, %v510_v18 }
  0x9c   : > { %v799_v53 = vadd.f32 %v688_v27, %v509_v23  ;;  %v1115_v16 = vsel %vm1055_vm2, %v1112_v17, %v1114_v12  ;;  %v400_v49 = vadd.f32 %v346_v46, %v298_v48  ;;  %v401_v45 = vadd.f32 %v347_v61, %v299_v5 }
  0x9d   : > { %v1225_v11 = vadd.f32 %v1113_v0, %v986_v2  ;;  %v988_v56 = vadd.f32 %v875_v21, %v800_v6  ;;  %v300_v34 = vmul.f32 0.375, %v1955_v14  ;;  %v348_v8 = vadd.f32 %v297_v60, %v1879_v37 }
  0x9e   : > { %v987_v62 = vadd.f32 %v876_v57, %v799_v53  ;;  %v460_v41 = vadd.f32 %v400_v49, %v1984_v55  ;;  %v461_v51 = vadd.f32 %v401_v45, %v1990_v54  ;;  %v2025_v7 = vmul.f32 0.125, %v2014_v26 }
  0x9f   : > { %1278 = vst.msk [vmem:[%s1549_s17 + $0x108] sm:$0xff] %vm1243_vm3, %v1225_v11  ;;  %v1227_v22 = vadd.f32 %v1114_v12, %v988_v56  ;;  %v402_v10 = vadd.f32 %v348_v8, %v300_v34  ;;  %v2030_v3 = vmul.f32 0.125, %v2018_v35  ;;  %v301_v14 = vmul.f32 0.375, %v1977_v43 }
  0xa0   : > { %v1226_v37 = vadd.f32 %v1115_v16, %v987_v62  ;;  %v511_v60 = vmul.f32 0.125, %v460_v41  ;;  %v512_v15 = vmul.f32 0.125, %v461_v51  ;;  %v562_v24 = vmul.f32 0.375, %v460_v41 }
  0xa1   : > { %1280 = vst.msk [vmem:[%s1549_s17 + $0x118] sm:$0x1] %vm1246_vm4, %v1227_v22  ;;  %v563_v40 = vmul.f32 0.375, %v461_v51  ;;  %v462_v25 = vadd.f32 %v402_v10, %v2009_v1  ;;  %v302_v23 = vmul.f32 0.375, %v194_v20  ;;  %v349_v44 = vadd.f32 %v298_v48, %v1893_v19 }
  0xa2   : > { %1279 = vst.msk [vmem:[%s1549_s17 + $0x110] sm:$0xff] %vm1243_vm3, %v1226_v37  ;;  %v689_v32 = vrot.slane %v562_v24, 1  ;;  %v877_v33 = vrot.slane %v562_v24, 2  ;;  %v1116_v59 = vrot.slane %v511_v60, 3  ;;  %v1117_v43 = vrot.slane %v512_v15, 3 }
  0xa3   : > { %v690_v38 = vrot.slane %v563_v40, 1  ;;  %v878_v39 = vrot.slane %v563_v40, 2  ;;  %v513_v47 = vmul.f32 0.125, %v462_v25  ;;  %v564_v30 = vmul.f32 0.375, %v462_v25 }
  0xa4   : > { %v1118_v17 = vsel %vm1055_vm2, %v1116_v59, %v1117_v43  ;;  %v350_v18 = vadd.f32 %v299_v5, %v1899_v63  ;;  %v403_v42 = vadd.f32 %v349_v44, %v301_v14  ;;  %v2045_v20 = vmul.f32 0.125, %v2038_v9 }
  0xa5   : > { %v691_v19 = vsel %vm628_vm0, %v689_v32, %v690_v38  ;;  %v879_v28 = vsel %vm816_vm1, %v877_v33, %v878_v39  ;;  %v692_v58 = vrot.slane %v564_v30, 1  ;;  %v880_v48 = vrot.slane %v564_v30, 2  ;;  %v199_v32 = vld [vmem:[%s1472_s13 + $0x198] sm:$0xff] }
  0xa6   : > { %v801_v50 = vadd.f32 %v691_v19, %v511_v60  ;;  %v1119_v0 = vrot.slane %v513_v47, 3  ;;  %v404_v4 = vadd.f32 %v350_v18, %v302_v23  ;;  %v463_v21 = vadd.f32 %v403_v42, %v2025_v7  ;;  %v201_v19 = vld [vmem:[%s1472_s13 + $0x1a8] sm:$0xf] }
  0xa7   : > { %v693_v12 = vsel %vm628_vm0, %v690_v38, %v692_v58  ;;  %v881_v46 = vsel %vm816_vm1, %v878_v39, %v880_v48  ;;  %v803_v63 = vadd.f32 %v692_v58, %v513_v47  ;;  %v303_v5 = vmul.f32 0.375, %v1993_v52 }
  0xa8   : > { %v989_v61 = vadd.f32 %v879_v28, %v801_v50  ;;  %v802_v2 = vadd.f32 %v693_v12, %v512_v15  ;;  %v1120_v27 = vsel %vm1055_vm2, %v1117_v43, %v1119_v0  ;;  %v464_v57 = vadd.f32 %v404_v4, %v2030_v3  ;;  %v200_v43 = vld [vmem:[%s1472_s13 + $0x1a0] sm:$0xff] }
  0xa9   : > { %v991_v6 = vadd.f32 %v880_v48, %v803_v63  ;;  %v514_v53 = vmul.f32 0.125, %v463_v21  ;;  %v565_v16 = vmul.f32 0.375, %v463_v21  ;;  %v351_v49 = vadd.f32 %v300_v34, %v1925_v13 }
  0xaa   : > { %v1228_v45 = vadd.f32 %v1118_v17, %v989_v61  ;;  %v990_v11 = vadd.f32 %v881_v46, %v802_v2  ;;  %v515_v56 = vmul.f32 0.125, %v464_v57  ;;  %v566_v8 = vmul.f32 0.375, %v464_v57 }
  0xab   : > { %v1230_v62 = vadd.f32 %v1119_v0, %v991_v6  ;;  %v694_v52 = vrot.slane %v565_v16, 1  ;;  %v882_v41 = vrot.slane %v565_v16, 2  ;;  %v1121_v51 = vrot.slane %v514_v53, 3 }
  0xac   : > { %1281 = vst.msk [vmem:[%s1549_s17 + $0x120] sm:$0xff] %vm1243_vm3, %v1228_v45  ;;  %v1229_v22 = vadd.f32 %v1120_v27, %v990_v11  ;;  %v695_v10 = vrot.slane %v566_v8, 1  ;;  %v883_v37 = vrot.slane %v566_v8, 2  ;;  %v1122_v60 = vrot.slane %v515_v56, 3 }
  0xad   : > { %1283 = vst.msk [vmem:[%s1549_s17 + $0x130] sm:$0x1] %vm1246_vm4, %v1230_v62  ;;  %v405_v13 = vadd.f32 %v351_v49, %v303_v5  ;;  %v304_v34 = vmul.f32 0.375, %v2014_v26  ;;  %v2062_v15 = vmul.f32 0.375, %v2018_v35  ;;  %v352_v24 = vadd.f32 %v301_v14, %v1940_v29 }
  0xae   : > { %1282 = vst.msk [vmem:[%s1549_s17 + $0x128] sm:$0xff] %vm1243_vm3, %v1229_v22  ;;  %v696_v40 = vsel %vm628_vm0, %v694_v52, %v695_v10  ;;  %v884_v25 = vsel %vm816_vm1, %v882_v41, %v883_v37  ;;  %v1123_v44 = vsel %vm1055_vm2, %v1121_v51, %v1122_v60  ;;  %v353_v33 = vadd.f32 %v302_v23, %v1943_v31 }
  0xaf   : > { %v804_v59 = vadd.f32 %v696_v40, %v514_v53  ;;  %v465_v26 = vadd.f32 %v405_v13, %v2045_v20  ;;  %v406_v35 = vadd.f32 %v352_v24, %v304_v34  ;;  %v415_v38 = vmul.f32 0.125, %v199_v32  ;;  %v202_v13 = vld [vmem:[%s1472_s13 + $0x1b0] sm:$0xff]  ;;  %v203_v24 = vld [vmem:[%s1472_s13 + $0x1b8] sm:$0xff] }
  0xb0   : > { %v407_v29 = vadd.f32 %v353_v33, %v2062_v15  ;;  %v416_v14 = vmul.f32 0.125, %v200_v43  ;;  %v306_v39 = vmul.f32 0.375, %v2038_v9  ;;  %v354_v47 = vadd.f32 %v303_v5, %v1966_v36 }
  0xb1   : > { %v992_v30 = vadd.f32 %v884_v25, %v804_v59  ;;  %v516_v17 = vmul.f32 0.125, %v465_v26  ;;  %v567_v18 = vmul.f32 0.375, %v465_v26  ;;  %v466_v42 = vadd.f32 %v415_v38, %v406_v35 }
  0xb2   : > { %v467_v31 = vadd.f32 %v416_v14, %v407_v29  ;;  %v408_v23 = vadd.f32 %v354_v47, %v306_v39  ;;  %v417_v28 = vmul.f32 0.125, %v201_v19  ;;  %v307_v58 = vmul.f32 0.375, %v199_v32 }
  0xb3   : > { %v1231_v48 = vadd.f32 %v1123_v44, %v992_v30  ;;  %v697_v50 = vrot.slane %v567_v18, 1  ;;  %v885_v0 = vrot.slane %v567_v18, 2  ;;  %v1124_v4 = vrot.slane %v516_v17, 3 }
  0xb4   : > { %v517_v21 = vmul.f32 0.125, %v466_v42  ;;  %v518_v12 = vmul.f32 0.125, %v467_v31  ;;  %v568_v46 = vmul.f32 0.375, %v466_v42  ;;  %v569_v9 = vmul.f32 0.375, %v467_v31  ;;  %v204_v42 = vld [vmem:[%s1472_s13 + $0x1c0] sm:$0xf] }
  0xb5   : > { %1284 = vst.msk [vmem:[%s1549_s17 + $0x138] sm:$0xff] %vm1243_vm3, %v1231_v48  ;;  %v698_v36 = vsel %vm628_vm0, %v695_v10, %v697_v50  ;;  %v886_v63 = vsel %vm816_vm1, %v883_v37, %v885_v0  ;;  %v1125_v5 = vsel %vm1055_vm2, %v1122_v60, %v1124_v4  ;;  %v806_v61 = vadd.f32 %v697_v50, %v516_v17 }
  0xb6   : > { %v805_v2 = vadd.f32 %v698_v36, %v515_v56  ;;  %v699_v27 = vrot.slane %v568_v46, 1  ;;  %v700_v57 = vrot.slane %v569_v9, 1  ;;  %v887_v6 = vrot.slane %v568_v46, 2  ;;  %v205_v46 = vld [vmem:[%s1472_s13 + $0x1c8] sm:$0xff] }
  0xb7   : > { %v994_v53 = vadd.f32 %v885_v0, %v806_v61  ;;  %v888_v16 = vrot.slane %v569_v9, 2  ;;  %v1126_v49 = vrot.slane %v517_v21, 3  ;;  %v1127_v45 = vrot.slane %v518_v12, 3 }
  0xb8   : > { %v993_v11 = vadd.f32 %v886_v63, %v805_v2  ;;  %v701_v8 = vsel %vm628_vm0, %v699_v27, %v700_v57  ;;  %v468_v62 = vadd.f32 %v417_v28, %v408_v23  ;;  %v308_v52 = vmul.f32 0.375, %v200_v43 }
  0xb9   : > { %v1233_v41 = vadd.f32 %v1124_v4, %v994_v53  ;;  %v807_v51 = vadd.f32 %v701_v8, %v517_v21  ;;  %v889_v56 = vsel %vm816_vm1, %v887_v6, %v888_v16  ;;  %v1128_v22 = vsel %vm1055_vm2, %v1126_v49, %v1127_v45 }
  0xba   : > { %v1232_v10 = vadd.f32 %v1125_v5, %v993_v11  ;;  %v519_v37 = vmul.f32 0.125, %v468_v62  ;;  %v570_v60 = vmul.f32 0.375, %v468_v62  ;;  %v355_v40 = vadd.f32 %v304_v34, %v1984_v55 }
  0xbb   : > { %1286 = vst.msk [vmem:[%s1549_s17 + $0x148] sm:$0x1] %vm1246_vm4, %v1233_v41  ;;  %v995_v25 = vadd.f32 %v889_v56, %v807_v51  ;;  %v356_v44 = vadd.f32 %v2062_v15, %v1990_v54  ;;  %v418_v32 = vmul.f32 0.125, %v202_v13  ;;  %v419_v33 = vmul.f32 0.125, %v203_v24 }
  0xbc   : > { %1285 = vst.msk [vmem:[%s1549_s17 + $0x140] sm:$0xff] %vm1243_vm3, %v1232_v10  ;;  %v702_v59 = vrot.slane %v570_v60, 1  ;;  %v890_v26 = vrot.slane %v570_v60, 2  ;;  %v1129_v43 = vrot.slane %v519_v37, 3  ;;  %v409_v35 = vadd.f32 %v355_v40, %v307_v58 }
  0xbd   : > { %v1234_v38 = vadd.f32 %v1128_v22, %v995_v25  ;;  %v410_v29 = vadd.f32 %v356_v44, %v308_v52  ;;  %v309_v14 = vmul.f32 0.375, %v201_v19  ;;  %v357_v55 = vadd.f32 %v306_v39, %v2009_v1 }
  0xbe   : > { %v703_v34 = vsel %vm628_vm0, %v700_v57, %v702_v59  ;;  %v891_v47 = vsel %vm816_vm1, %v888_v16, %v890_v26  ;;  %v1130_v54 = vsel %vm1055_vm2, %v1127_v45, %v1129_v43  ;;  %v809_v15 = vadd.f32 %v702_v59, %v519_v37  ;;  %v206_v57 = vld [vmem:[%s1472_s13 + $0x1d0] sm:$0xff]  ;;  %v207_v37 = vld [vmem:[%s1472_s13 + $0x1d8] sm:$0xf] }
  0xbf   : > { %1287 = vst.msk [vmem:[%s1549_s17 + $0x150] sm:$0xff] %vm1243_vm3, %v1234_v38  ;;  %v808_v30 = vadd.f32 %v703_v34, %v518_v12  ;;  %v469_v17 = vadd.f32 %v418_v32, %v409_v35  ;;  %v470_v18 = vadd.f32 %v419_v33, %v410_v29  ;;  %v411_v31 = vadd.f32 %v357_v55, %v309_v14 }
  0xc0   : > { %v997_v23 = vadd.f32 %v890_v26, %v809_v15  ;;  %v420_v28 = vmul.f32 0.125, %v204_v42  ;;  %v358_v1 = vadd.f32 %v307_v58, %v2025_v7  ;;  %v359_v39 = vadd.f32 %v308_v52, %v2030_v3 }
  0xc1   : > { %v996_v19 = vadd.f32 %v891_v47, %v808_v30  ;;  %v520_v48 = vmul.f32 0.125, %v469_v17  ;;  %v521_v50 = vmul.f32 0.125, %v470_v18  ;;  %v571_v0 = vmul.f32 0.375, %v469_v17 }
  0xc2   : > { %v1236_v4 = vadd.f32 %v1129_v43, %v997_v23  ;;  %v572_v21 = vmul.f32 0.375, %v470_v18  ;;  %v471_v12 = vadd.f32 %v420_v28, %v411_v31  ;;  %v361_v9 = vmul.f32 0.375, %v202_v13 }
  0xc3   : > { %v1235_v36 = vadd.f32 %v1130_v54, %v996_v19  ;;  %v704_v63 = vrot.slane %v571_v0, 1  ;;  %v892_v5 = vrot.slane %v571_v0, 2  ;;  %v1131_v61 = vrot.slane %v520_v48, 3 }
  0xc4   : > { %1289 = vst.msk [vmem:[%s1549_s17 + $0x160] sm:$0x1] %vm1246_vm4, %v1236_v4  ;;  %v705_v7 = vrot.slane %v572_v21, 1  ;;  %v893_v58 = vrot.slane %v572_v21, 2  ;;  %v1132_v3 = vrot.slane %v521_v50, 3  ;;  %v522_v2 = vmul.f32 0.125, %v471_v12 }
  0xc5   : > { %1288 = vst.msk [vmem:[%s1549_s17 + $0x158] sm:$0xff] %vm1243_vm3, %v1235_v36  ;;  %v573_v27 = vmul.f32 0.375, %v471_v12  ;;  %v362_v6 = vmul.f32 0.375, %v203_v24  ;;  %v412_v53 = vadd.f32 %v361_v9, %v358_v1  ;;  %v421_v16 = vmul.f32 0.125, %v205_v46 }
  0xc6   : > { %v706_v49 = vsel %vm628_vm0, %v704_v63, %v705_v7  ;;  %v894_v45 = vsel %vm816_vm1, %v892_v5, %v893_v58  ;;  %v1133_v11 = vsel %vm1055_vm2, %v1131_v61, %v1132_v3  ;;  %v1134_v8 = vrot.slane %v522_v2, 3 }
  0xc7   : > { %v810_v62 = vadd.f32 %v706_v49, %v520_v48  ;;  %v707_v52 = vrot.slane %v573_v27, 1  ;;  %v895_v41 = vrot.slane %v573_v27, 2  ;;  %v413_v51 = vadd.f32 %v362_v6, %v359_v39 }
  0xc8   : > { %v1135_v56 = vsel %vm1055_vm2, %v1132_v3, %v1134_v8  ;;  %v422_v22 = vmul.f32 0.125, %v206_v57  ;;  %v472_v10 = vadd.f32 %v421_v16, %v412_v53  ;;  %v360_v60 = vadd.f32 %v309_v14, %v2045_v20 }
  0xc9   : > { %v998_v13 = vadd.f32 %v894_v45, %v810_v62  ;;  %v708_v24 = vsel %vm628_vm0, %v705_v7, %v707_v52  ;;  %v896_v40 = vsel %vm816_vm1, %v893_v58, %v895_v41  ;;  %v812_v25 = vadd.f32 %v707_v52, %v522_v2 }
  0xca   : > { %v811_v44 = vadd.f32 %v708_v24, %v521_v50  ;;  %v473_v32 = vadd.f32 %v422_v22, %v413_v51  ;;  %v523_v33 = vmul.f32 0.125, %v472_v10  ;;  %v574_v59 = vmul.f32 0.375, %v472_v10 }
  0xcb   : > { %v1237_v26 = vadd.f32 %v1133_v11, %v998_v13  ;;  %v1000_v43 = vadd.f32 %v895_v41, %v812_v25  ;;  %v363_v35 = vmul.f32 0.375, %v204_v42  ;;  %v423_v38 = vmul.f32 0.125, %v207_v37 }
  0xcc   : > { %v999_v29 = vadd.f32 %v896_v40, %v811_v44  ;;  %v524_v55 = vmul.f32 0.125, %v473_v32  ;;  %v575_v20 = vmul.f32 0.375, %v473_v32  ;;  %v709_v14 = vrot.slane %v574_v59, 1 }
  0xcd   : > { %1290 = vst.msk [vmem:[%s1549_s17 + $0x168] sm:$0xff] %vm1243_vm3, %v1237_v26  ;;  %v1239_v34 = vadd.f32 %v1134_v8, %v1000_v43  ;;  %v897_v47 = vrot.slane %v574_v59, 2  ;;  %v1136_v54 = vrot.slane %v523_v33, 3  ;;  %v414_v15 = vadd.f32 %v363_v35, %v360_v60 }
  0xce   : > { %v1238_v30 = vadd.f32 %v1135_v56, %v999_v29  ;;  %v710_v17 = vrot.slane %v575_v20, 1  ;;  %v898_v18 = vrot.slane %v575_v20, 2  ;;  %v1137_v31 = vrot.slane %v524_v55, 3 }
  0xcf   : > { %1292 = vst.msk [vmem:[%s1549_s17 + $0x178] sm:$0x1] %vm1246_vm4, %v1239_v34  ;;  %v474_v23 = vadd.f32 %v423_v38, %v414_v15 }
  0xd0   : > { %1291 = vst.msk [vmem:[%s1549_s17 + $0x170] sm:$0xff] %vm1243_vm3, %v1238_v30  ;;  %v711_v42 = vsel %vm628_vm0, %v709_v14, %v710_v17  ;;  %v899_v28 = vsel %vm816_vm1, %v897_v47, %v898_v18  ;;  %v1138_v48 = vsel %vm1055_vm2, %v1136_v54, %v1137_v31 }
  0xd1   : > { %v813_v1 = vadd.f32 %v711_v42, %v523_v33  ;;  %v525_v39 = vmul.f32 0.125, %v474_v23  ;;  %v576_v19 = vmul.f32 0.375, %v474_v23 }
  0xd3   : > { %v1001_v50 = vadd.f32 %v899_v28, %v813_v1  ;;  %v712_v0 = vrot.slane %v576_v19, 1  ;;  %v900_v4 = vrot.slane %v576_v19, 2  ;;  %v1139_v21 = vrot.slane %v525_v39, 3 }
  0xd5   : > { %v1240_v12 = vadd.f32 %v1138_v48, %v1001_v50  ;;  %v713_v46 = vsel %vm628_vm0, %v710_v17, %v712_v0  ;;  %v901_v9 = vsel %vm816_vm1, %v898_v18, %v900_v4  ;;  %v815_v63 = vadd.f32 %v712_v0, %v525_v39 }
  0xd6   : > { %v814_v36 = vadd.f32 %v713_v46, %v524_v55  ;;  %v1140_v5 = vsel %vm1055_vm2, %v1137_v31, %v1139_v21 }
  0xd7   : > { %1293 = vst.msk [vmem:[%s1549_s17 + $0x180] sm:$0xff] %vm1243_vm3, %v1240_v12  ;;  %v1003_v7 = vadd.f32 %v900_v4, %v815_v63 }
  0xd8   : > { %v1002_v61 = vadd.f32 %v901_v9, %v814_v36 }
  0xd9   : > { %v1242_v3 = vadd.f32 %v1139_v21, %v1003_v7 }
  0xda   : > { %v1241_v58 = vadd.f32 %v1140_v5, %v1002_v61 }
  0xdb   : > { %1295 = vst.msk [vmem:[%s1549_s17 + $0x190] sm:$0x1] %vm1246_vm4, %v1242_v3 }
  0xdc   : > { %1294 = vst.msk [vmem:[%s1549_s17 + $0x188] sm:$0xff] %vm1243_vm3, %v1241_v58 }
  0xdd PF: > { %s11_s8 = sadd.s32 1, %s1436_s8   ;;  %s2147_s6 = smov %s1432_s7 }
  0xde   : > { %p8_p5 = scmp.ge.s32.totalorder %s11_s8, 6   ;;  %s2148_s7 = smov %s2150_s9 }
  0xe0   :  { %10 = sbr.rel (!%p8_p5) target bundleno = 2 (0x2), region = 54 }

// kernel: discriminator_forward.19
= control target key start
LH: loop header
LB: loop body
LE: loop exit
PB: predicated region body
PF: predicated region fallthrough
CT: control target
= control target key end

     0   :  { %s1172_s1 = inlined_call_operand.vmem [shape: bf16[128,128], index: 1, kind: input, shape index: {}]   ;;  %s1173_s0 = inlined_call_operand.vmem [shape: bf16[256,128], index: 0, kind: input, shape index: {}]   ;;  %s1174_s2 = inlined_call_operand.vmem [shape: f32[1,128], index: 2, kind: input, shape index: {}]   ;;  %s1175_s3 = inlined_call_operand.vmem [shape: f32[256,128], index: 3, kind: input, shape index: {}]   ;;  %s1176_s4 = inlined_call_operand.vmem [shape: f32[256,128], index: 4, kind: output, shape index: {}]  }
   0x1   :  { %v822_v0 = vld [vmem:[%s1172_s1 + $0x38] sm:$0xff]   ;;  %v823_v1 = vld [vmem:[%s1172_s1 + $0x30] sm:$0xff]   ;;  %v824_v2 = vld [vmem:[%s1172_s1 + $0x28] sm:$0xff]  }
   0x2   :  { %758 = vmatprep.subr.bf16.mxu0 %v822_v0  ;;  %806 = vmatprep.subr.bf16.mxu1 %v822_v0  ;;  %v825_v3 = vld [vmem:[%s1172_s1 + $0x20] sm:$0xff]   ;;  %v826_v6 = vld [vmem:[%s1172_s1 + $0x18] sm:$0xff]   ;;  %v827_v7 = vld [vmem:[%s1172_s1 + $0x10] sm:$0xff]  }
   0x3   :  { %759 = vmatpush3.bf16.msra.mxu0 %v822_v0  ;;  %814 = vmatpush3.bf16.msra.mxu1 %v822_v0  ;;  %v830_v4 = vld [vmem:[%s1173_s0] sm:$0xff]   ;;  %v828_v8 = vld [vmem:[%s1172_s1 + $0x8] sm:$0xff]   ;;  %v834_v12 = vld [vmem:[%s1173_s0 + $0x10] sm:$0xff]  }
   0x4   :  { %760 = vmatprep.subr.bf16.mxu0 %v823_v1  ;;  %807 = vmatprep.subr.bf16.mxu1 %v823_v1  ;;  %v831_v5 = vld [vmem:[%s1173_s0 + $0x40] sm:$0xff]   ;;  %v832_v10 = vld [vmem:[%s1173_s0 + $0x8] sm:$0xff]   ;;  %v835_v13 = vld [vmem:[%s1173_s0 + $0x50] sm:$0xff]  }
   0x5   :  { %774 = vmatprep.mubr.bf16.mxu0 %v830_v4  ;;  %790 = vmatprep.mubr.bf16.mxu1 %v831_v5  ;;  %v829_v9 = vld [vmem:[%s1172_s1] sm:$0xff]   ;;  %v833_v11 = vld [vmem:[%s1173_s0 + $0x48] sm:$0xff]   ;;  %v836_v14 = vld [vmem:[%s1173_s0 + $0x18] sm:$0xff]  }
   0x6   :  { %v837_v15 = vld [vmem:[%s1173_s0 + $0x58] sm:$0xff]   ;;  %v838_v16 = vld [vmem:[%s1173_s0 + $0x20] sm:$0xff]   ;;  %v840_v18 = vld [vmem:[%s1173_s0 + $0x28] sm:$0xff]  }
   0x7   :  { %761 = vmatpush3.bf16.msra.mxu0 %v823_v1  ;;  %815 = vmatpush3.bf16.msra.mxu1 %v823_v1  ;;  %v839_v17 = vld [vmem:[%s1173_s0 + $0x60] sm:$0xff]   ;;  %v841_v19 = vld [vmem:[%s1173_s0 + $0x68] sm:$0xff]   ;;  %v842_v20 = vld [vmem:[%s1173_s0 + $0x30] sm:$0xff]  }
   0x8   :  { %762 = vmatprep.subr.bf16.mxu0 %v824_v2  ;;  %808 = vmatprep.subr.bf16.mxu1 %v824_v2  ;;  %v843_v21 = vld [vmem:[%s1173_s0 + $0x70] sm:$0xff]   ;;  %v844_v22 = vld [vmem:[%s1173_s0 + $0x38] sm:$0xff]   ;;  %v946_v24 = vld [vmem:[%s1174_s2] ss:$0 sm:$0xff] }
   0x9   :  { %v845_v23 = vld [vmem:[%s1173_s0 + $0x78] sm:$0xff]   ;;  %v579_v26 = vld [vmem:[%s1175_s3 + $0x10] sm:$0xff]  ;;  %v577_v32 = vld [vmem:[%s1175_s3] sm:$0xff] }
   0xa   :  { %v595_v28 = vld [vmem:[%s1175_s3 + $0x90] sm:$0xff]  ;;  %v593_v34 = vld [vmem:[%s1175_s3 + $0x80] sm:$0xff]  ;;  %v580_v45 = vld [vmem:[%s1175_s3 + $0x18] sm:$0xff] }
   0xb   :  { %763 = vmatpush3.bf16.msra.mxu0 %v824_v2  ;;  %816 = vmatpush3.bf16.msra.mxu1 %v824_v2  ;;  %v596_v46 = vld [vmem:[%s1175_s3 + $0x98] sm:$0xff]  ;;  %v578_v50 = vld [vmem:[%s1175_s3 + $0x8] sm:$0xff]  ;;  %v583_v60 = vld [vmem:[%s1175_s3 + $0x30] sm:$0xff] }
   0xc   :  { %764 = vmatprep.subr.bf16.mxu0 %v825_v3  ;;  %809 = vmatprep.subr.bf16.mxu1 %v825_v3  ;;  %v594_v52 = vld [vmem:[%s1175_s3 + $0x88] sm:$0xff]  ;;  %v599_v62 = vld [vmem:[%s1175_s3 + $0xb0] sm:$0xff] }
   0xf   :  { %765 = vmatpush3.bf16.msra.mxu0 %v825_v3  ;;  %817 = vmatpush3.bf16.msra.mxu1 %v825_v3 }
  0x10   :  { %766 = vmatprep.subr.bf16.mxu0 %v826_v6  ;;  %810 = vmatprep.subr.bf16.mxu1 %v826_v6 }
  0x13   :  { %767 = vmatpush3.bf16.msra.mxu0 %v826_v6  ;;  %818 = vmatpush3.bf16.msra.mxu1 %v826_v6 }
  0x14   :  { %768 = vmatprep.subr.bf16.mxu0 %v827_v7  ;;  %811 = vmatprep.subr.bf16.mxu1 %v827_v7 }
  0x17   :  { %769 = vmatpush3.bf16.msra.mxu0 %v827_v7  ;;  %819 = vmatpush3.bf16.msra.mxu1 %v827_v7 }
  0x18   :  { %770 = vmatprep.subr.bf16.mxu0 %v828_v8  ;;  %812 = vmatprep.subr.bf16.mxu1 %v828_v8 }
  0x1b   :  { %771 = vmatpush3.bf16.msra.mxu0 %v828_v8  ;;  %820 = vmatpush3.bf16.msra.mxu1 %v828_v8 }
  0x1c   :  { %772 = vmatprep.subr.bf16.mxu0 %v829_v9  ;;  %813 = vmatprep.subr.bf16.mxu1 %v829_v9 }
  0x1f   :  { %773 = vmatpush3.bf16.msra.mxu0 %v829_v9  ;;  %821 = vmatpush3.bf16.msra.mxu1 %v829_v9 }
  0x22   :  { %775 = vmatmul.mubr.bf16.vlgmr.msra.gmra.mxu0 %v832_v10  ;;  %791 = vmatmul.mubr.bf16.vlgmr.msra.gmra.mxu1 %v833_v11  ;;  %v581_v11 = vld [vmem:[%s1175_s3 + $0x20] sm:$0xff] }
  0x23   :  { %778 = vmatprep.mubr.bf16.mxu0 %v834_v12  ;;  %794 = vmatprep.mubr.bf16.mxu1 %v835_v13  ;;  %v597_v12 = vld [vmem:[%s1175_s3 + $0xa0] sm:$0xff] }
  0x2a   :  { %779 = vmatmul.mubr.bf16.gmra.mxu0 %v836_v14  ;;  %795 = vmatmul.mubr.bf16.gmra.mxu1 %v837_v15 }
  0x2b   :  { %782 = vmatprep.mubr.bf16.mxu0 %v838_v16  ;;  %798 = vmatprep.mubr.bf16.mxu1 %v839_v17  ;;  %v584_v16 = vld [vmem:[%s1175_s3 + $0x38] sm:$0xff] }
  0x32   :  { %783 = vmatmul.mubr.bf16.gmra.mxu0 %v840_v18  ;;  %799 = vmatmul.mubr.bf16.gmra.mxu1 %v841_v19  ;;  %v600_v18 = vld [vmem:[%s1175_s3 + $0xb8] sm:$0xff] }
  0x33   :  { %786 = vmatprep.mubr.bf16.mxu0 %v842_v20  ;;  %802 = vmatprep.mubr.bf16.mxu1 %v843_v21 }
  0x3a   :  { %787 = vmatmul.mubr.bf16.gmra.mxu0 %v844_v22  ;;  %803 = vmatmul.mubr.bf16.gmra.mxu1 %v845_v23 }
  0xe2   :  { %v776_v25 = vpop.f32.mrf.mxu0  ;;  %v792_v27 = vpop.f32.mrf.mxu1 }
  0xe3   :  { %v547_v29 = vadd.f32 %v776_v25, %v946_v24  ;;  %v563_v30 = vadd.f32 %v792_v27, %v946_v24  ;;  %v582_v27 = vld [vmem:[%s1175_s3 + $0x28] sm:$0xff] }
  0xe4   :  { %v312_v31 = vpop.f32.mrf.mxu0  ;;  %v376_v33 = vpop.f32.mrf.mxu1 }
  0xe5   :  { %v611_v35 = vadd.f32 %v579_v26, %v547_v29  ;;  %v627_v36 = vadd.f32 %v595_v28, %v563_v30  ;;  %v545_v37 = vadd.f32 %v946_v24, %v312_v31  ;;  %v561_v38 = vadd.f32 %v946_v24, %v376_v33  ;;  %v598_v29 = vld [vmem:[%s1175_s3 + $0xa8] sm:$0xff] }
  0xe6   :  { %v777_v39 = vpop.f32.mrf.mxu0  ;;  %v793_v40 = vpop.f32.mrf.mxu1 }
  0xe7   :  { %v643_v41 = vmul.f32 0.70710677, %v611_v35  ;;  %v659_v42 = vmul.f32 0.70710677, %v627_v36  ;;  %v609_v43 = vadd.f32 %v577_v32, %v545_v37  ;;  %v625_v44 = vadd.f32 %v593_v34, %v561_v38 }
  0xe8   :  { %v548_v47 = vadd.f32 %v777_v39, %v946_v24  ;;  %v564_v48 = vadd.f32 %v793_v40, %v946_v24  ;;  %v315_v49 = vpop.f32.mrf.mxu0  ;;  %v379_v51 = vpop.f32.mrf.mxu1 }
  0xe9   :  { %675 = vst [vmem:[%s1176_s4 + $0x10] sm:$0xff] %v643_v41  ;;  %691 = vst [vmem:[%s1176_s4 + $0x90] sm:$0xff] %v659_v42  ;;  %v641_v53 = vmul.f32 0.70710677, %v609_v43  ;;  %v657_v54 = vmul.f32 0.70710677, %v625_v44  ;;  %v546_v55 = vadd.f32 %v946_v24, %v315_v49  ;;  %v562_v56 = vadd.f32 %v946_v24, %v379_v51 }
  0xea   :  { %v612_v57 = vadd.f32 %v580_v45, %v548_v47  ;;  %v628_v58 = vadd.f32 %v596_v46, %v564_v48  ;;  %v780_v59 = vpop.f32.mrf.mxu0  ;;  %v796_v61 = vpop.f32.mrf.mxu1  ;;  %v587_v42 = vld [vmem:[%s1175_s3 + $0x50] sm:$0xff]  ;;  %v585_v47 = vld [vmem:[%s1175_s3 + $0x40] sm:$0xff] }
  0xeb   :  { %673 = vst [vmem:[%s1176_s4] sm:$0xff] %v641_v53  ;;  %689 = vst [vmem:[%s1176_s4 + $0x80] sm:$0xff] %v657_v54  ;;  %v610_v63 = vadd.f32 %v578_v50, %v546_v55  ;;  %v626_v0 = vadd.f32 %v594_v52, %v562_v56  ;;  %v551_v1 = vadd.f32 %v780_v59, %v946_v24  ;;  %v603_v43 = vld [vmem:[%s1175_s3 + $0xd0] sm:$0xff]  ;;  %v601_v49 = vld [vmem:[%s1175_s3 + $0xc0] sm:$0xff] }
  0xec   :  { %v567_v2 = vadd.f32 %v796_v61, %v946_v24  ;;  %v644_v3 = vmul.f32 0.70710677, %v612_v57  ;;  %v660_v4 = vmul.f32 0.70710677, %v628_v58  ;;  %v328_v5 = vpop.f32.mrf.mxu0  ;;  %v392_v6 = vpop.f32.mrf.mxu1  ;;  %v588_v57 = vld [vmem:[%s1175_s3 + $0x58] sm:$0xff] }
  0xed   :  { %v642_v7 = vmul.f32 0.70710677, %v610_v63  ;;  %v658_v8 = vmul.f32 0.70710677, %v626_v0  ;;  %v615_v9 = vadd.f32 %v583_v60, %v551_v1  ;;  %v549_v13 = vadd.f32 %v946_v24, %v328_v5  ;;  %v604_v59 = vld [vmem:[%s1175_s3 + $0xd8] sm:$0xff] }
  0xee   :  { %v631_v10 = vadd.f32 %v599_v62, %v567_v2  ;;  %676 = vst [vmem:[%s1176_s4 + $0x18] sm:$0xff] %v644_v3  ;;  %692 = vst [vmem:[%s1176_s4 + $0x98] sm:$0xff] %v660_v4  ;;  %v565_v14 = vadd.f32 %v946_v24, %v392_v6  ;;  %v781_v15 = vpop.f32.mrf.mxu0  ;;  %v797_v17 = vpop.f32.mrf.mxu1 }
  0xef   :  { %674 = vst [vmem:[%s1176_s4 + $0x8] sm:$0xff] %v642_v7  ;;  %690 = vst [vmem:[%s1176_s4 + $0x88] sm:$0xff] %v658_v8  ;;  %v647_v19 = vmul.f32 0.70710677, %v615_v9  ;;  %v552_v21 = vadd.f32 %v781_v15, %v946_v24  ;;  %v568_v22 = vadd.f32 %v797_v17, %v946_v24  ;;  %v613_v23 = vadd.f32 %v581_v11, %v549_v13  ;;  %v586_v8 = vld [vmem:[%s1175_s3 + $0x48] sm:$0xff]  ;;  %v591_v13 = vld [vmem:[%s1175_s3 + $0x70] sm:$0xff] }
  0xf0   :  { %v663_v20 = vmul.f32 0.70710677, %v631_v10  ;;  %v629_v25 = vadd.f32 %v597_v12, %v565_v14  ;;  %v331_v26 = vpop.f32.mrf.mxu0  ;;  %v395_v28 = vpop.f32.mrf.mxu1  ;;  %v602_v9 = vld [vmem:[%s1175_s3 + $0xc8] sm:$0xff]  ;;  %v607_v15 = vld [vmem:[%s1175_s3 + $0xf0] sm:$0xff] }
  0xf1   :  { %679 = vst [vmem:[%s1176_s4 + $0x30] sm:$0xff] %v647_v19  ;;  %v616_v30 = vadd.f32 %v584_v16, %v552_v21  ;;  %v632_v31 = vadd.f32 %v600_v18, %v568_v22  ;;  %v550_v32 = vadd.f32 %v946_v24, %v331_v26  ;;  %v566_v33 = vadd.f32 %v946_v24, %v395_v28  ;;  %v605_v26 = vld [vmem:[%s1175_s3 + $0xe0] sm:$0xff] }
  0xf2   :  { %695 = vst [vmem:[%s1176_s4 + $0xb0] sm:$0xff] %v663_v20  ;;  %v645_v34 = vmul.f32 0.70710677, %v613_v23  ;;  %v661_v35 = vmul.f32 0.70710677, %v629_v25  ;;  %v784_v36 = vpop.f32.mrf.mxu0  ;;  %v800_v37 = vpop.f32.mrf.mxu1  ;;  %v589_v23 = vld [vmem:[%s1175_s3 + $0x60] sm:$0xff] }
  0xf3   :  { %v648_v38 = vmul.f32 0.70710677, %v616_v30  ;;  %v664_v39 = vmul.f32 0.70710677, %v632_v31  ;;  %v614_v40 = vadd.f32 %v582_v27, %v550_v32  ;;  %v630_v41 = vadd.f32 %v598_v29, %v566_v33 }
  0xf4   :  { %677 = vst [vmem:[%s1176_s4 + $0x20] sm:$0xff] %v645_v34  ;;  %693 = vst [vmem:[%s1176_s4 + $0xa0] sm:$0xff] %v661_v35  ;;  %v555_v44 = vadd.f32 %v784_v36, %v946_v24  ;;  %v571_v45 = vadd.f32 %v800_v37, %v946_v24  ;;  %v344_v46 = vpop.f32.mrf.mxu0  ;;  %v408_v48 = vpop.f32.mrf.mxu1 }
  0xf5   :  { %680 = vst [vmem:[%s1176_s4 + $0x38] sm:$0xff] %v648_v38  ;;  %696 = vst [vmem:[%s1176_s4 + $0xb8] sm:$0xff] %v664_v39  ;;  %v646_v50 = vmul.f32 0.70710677, %v614_v40  ;;  %v662_v51 = vmul.f32 0.70710677, %v630_v41  ;;  %v553_v52 = vadd.f32 %v946_v24, %v344_v46  ;;  %v569_v53 = vadd.f32 %v946_v24, %v408_v48 }
  0xf6   :  { %v619_v54 = vadd.f32 %v587_v42, %v555_v44  ;;  %v635_v55 = vadd.f32 %v603_v43, %v571_v45  ;;  %v785_v56 = vpop.f32.mrf.mxu0  ;;  %v801_v58 = vpop.f32.mrf.mxu1  ;;  %v592_v39 = vld [vmem:[%s1175_s3 + $0x78] sm:$0xff]  ;;  %v590_v44 = vld [vmem:[%s1175_s3 + $0x68] sm:$0xff] }
  0xf7   :  { %678 = vst [vmem:[%s1176_s4 + $0x28] sm:$0xff] %v646_v50  ;;  %694 = vst [vmem:[%s1176_s4 + $0xa8] sm:$0xff] %v662_v51  ;;  %v617_v60 = vadd.f32 %v585_v47, %v553_v52  ;;  %v633_v61 = vadd.f32 %v601_v49, %v569_v53  ;;  %v556_v62 = vadd.f32 %v785_v56, %v946_v24  ;;  %v608_v40 = vld [vmem:[%s1175_s3 + $0xf8] sm:$0xff]  ;;  %v606_v46 = vld [vmem:[%s1175_s3 + $0xe8] sm:$0xff] }
  0xf8   :  { %v572_v63 = vadd.f32 %v801_v58, %v946_v24  ;;  %v651_v0 = vmul.f32 0.70710677, %v619_v54  ;;  %v667_v1 = vmul.f32 0.70710677, %v635_v55  ;;  %v347_v2 = vpop.f32.mrf.mxu0  ;;  %v411_v3 = vpop.f32.mrf.mxu1 }
  0xf9   :  { %v649_v4 = vmul.f32 0.70710677, %v617_v60  ;;  %v665_v5 = vmul.f32 0.70710677, %v633_v61  ;;  %v620_v6 = vadd.f32 %v588_v57, %v556_v62  ;;  %v554_v10 = vadd.f32 %v946_v24, %v347_v2 }
  0xfa   :  { %v636_v7 = vadd.f32 %v604_v59, %v572_v63  ;;  %683 = vst [vmem:[%s1176_s4 + $0x50] sm:$0xff] %v651_v0  ;;  %699 = vst [vmem:[%s1176_s4 + $0xd0] sm:$0xff] %v667_v1  ;;  %v570_v11 = vadd.f32 %v946_v24, %v411_v3  ;;  %v788_v12 = vpop.f32.mrf.mxu0  ;;  %v804_v14 = vpop.f32.mrf.mxu1 }
  0xfb   :  { %681 = vst [vmem:[%s1176_s4 + $0x40] sm:$0xff] %v649_v4  ;;  %697 = vst [vmem:[%s1176_s4 + $0xc0] sm:$0xff] %v665_v5  ;;  %v652_v16 = vmul.f32 0.70710677, %v620_v6  ;;  %v559_v18 = vadd.f32 %v788_v12, %v946_v24  ;;  %v575_v19 = vadd.f32 %v804_v14, %v946_v24  ;;  %v618_v20 = vadd.f32 %v586_v8, %v554_v10 }
  0xfc   :  { %v668_v17 = vmul.f32 0.70710677, %v636_v7  ;;  %v634_v21 = vadd.f32 %v602_v9, %v570_v11  ;;  %v360_v22 = vpop.f32.mrf.mxu0  ;;  %v424_v25 = vpop.f32.mrf.mxu1 }
  0xfd   :  { %684 = vst [vmem:[%s1176_s4 + $0x58] sm:$0xff] %v652_v16  ;;  %v623_v27 = vadd.f32 %v591_v13, %v559_v18  ;;  %v639_v28 = vadd.f32 %v607_v15, %v575_v19  ;;  %v557_v29 = vadd.f32 %v946_v24, %v360_v22  ;;  %v573_v30 = vadd.f32 %v946_v24, %v424_v25 }
  0xfe   :  { %700 = vst [vmem:[%s1176_s4 + $0xd8] sm:$0xff] %v668_v17  ;;  %v650_v31 = vmul.f32 0.70710677, %v618_v20  ;;  %v666_v32 = vmul.f32 0.70710677, %v634_v21  ;;  %v789_v33 = vpop.f32.mrf.mxu0  ;;  %v805_v34 = vpop.f32.mrf.mxu1 }
  0xff   :  { %v655_v35 = vmul.f32 0.70710677, %v623_v27  ;;  %v671_v36 = vmul.f32 0.70710677, %v639_v28  ;;  %v621_v37 = vadd.f32 %v589_v23, %v557_v29  ;;  %v637_v38 = vadd.f32 %v605_v26, %v573_v30 }
 0x100   :  { %682 = vst [vmem:[%s1176_s4 + $0x48] sm:$0xff] %v650_v31  ;;  %698 = vst [vmem:[%s1176_s4 + $0xc8] sm:$0xff] %v666_v32  ;;  %v560_v41 = vadd.f32 %v789_v33, %v946_v24  ;;  %v576_v42 = vadd.f32 %v805_v34, %v946_v24  ;;  %v363_v43 = vpop.f32.mrf.mxu0  ;;  %v427_v45 = vpop.f32.mrf.mxu1 }
 0x101   :  { %687 = vst [vmem:[%s1176_s4 + $0x70] sm:$0xff] %v655_v35  ;;  %703 = vst [vmem:[%s1176_s4 + $0xf0] sm:$0xff] %v671_v36  ;;  %v653_v47 = vmul.f32 0.70710677, %v621_v37  ;;  %v669_v48 = vmul.f32 0.70710677, %v637_v38  ;;  %v558_v49 = vadd.f32 %v946_v24, %v363_v43  ;;  %v574_v50 = vadd.f32 %v946_v24, %v427_v45 }
 0x102   :  { %v624_v51 = vadd.f32 %v592_v39, %v560_v41  ;;  %v640_v52 = vadd.f32 %v608_v40, %v576_v42 }
 0x103   :  { %685 = vst [vmem:[%s1176_s4 + $0x60] sm:$0xff] %v653_v47  ;;  %701 = vst [vmem:[%s1176_s4 + $0xe0] sm:$0xff] %v669_v48  ;;  %v622_v53 = vadd.f32 %v590_v44, %v558_v49  ;;  %v638_v54 = vadd.f32 %v606_v46, %v574_v50 }
 0x104   :  { %v656_v55 = vmul.f32 0.70710677, %v624_v51  ;;  %v672_v56 = vmul.f32 0.70710677, %v640_v52 }
 0x105   :  { %v654_v57 = vmul.f32 0.70710677, %v622_v53  ;;  %v670_v58 = vmul.f32 0.70710677, %v638_v54 }
 0x106   :  { %688 = vst [vmem:[%s1176_s4 + $0x78] sm:$0xff] %v656_v55  ;;  %704 = vst [vmem:[%s1176_s4 + $0xf8] sm:$0xff] %v672_v56 }
 0x107   :  { %686 = vst [vmem:[%s1176_s4 + $0x68] sm:$0xff] %v654_v57  ;;  %702 = vst [vmem:[%s1176_s4 + $0xe8] sm:$0xff] %v670_v58 }

// kernel: discriminator_forward.23
= control target key start
LH: loop header
LB: loop body
LE: loop exit
PB: predicated region body
PF: predicated region fallthrough
CT: control target
= control target key end

     0   :  { %s555_s6 = smov 0   ;;  %s557_s7 = smov 0   ;;  %s684_s0 = inlined_call_operand.vmem [shape: f32[4,10,10,32], index: 0, kind: input, shape index: {}]   ;;  %s685_s1 = inlined_call_operand.vmem [shape: f32[4,7,7,32], index: 1, kind: output, shape index: {}]  }
   0x1   :  { %s559_s8 = smov 0  }
   0x2 LB: > { %s23_s9 = sadd.s32 1, %s539_s7  ;;  %p490_p0 = scmp.ge.s32.totalorder %s543_s8, 1  ;;  %s543_s8 = sphi %s559_s8, %s11_s8   ;;  %s539_s7 = sphi %s557_s7, %s687_s7   ;;  %s535_s6 = sphi %s555_s6, %s686_s6  }
   0x3   : > { %p25_p1 = scmp.ge.s32.totalorder %s23_s9, 4  ;;  %p106_p2 = scmp.lt.s32.totalorder %s543_s8, 5 }
   0x5   : > { %s689_s9 = smov (%p25_p1, %s23_s9), 0  ;;  %p107_p3 = pnand %p490_p0, %p106_p2 }
   0x6   : > { %p132_p4 = scmp.lt.s32.totalorder (!%p107_p3), %s535_s6, 3 }
   0x7   : > { %110 = sbr.rel (%p107_p3) target bundleno = 70 (0x46), region = 24 }
   0xc   : > { %s691_s6 = smov (!%p132_p4, %s535_s6), 3  ;;  %vm302_vm0 = vcmask 1045504   ;;  %vm359_vm1 = vcmask 1044480   ;;  %vm395_vm2 = vcmask 260096  }
   0xd   : > { %s495_s10 = smul.u32 160, %s691_s6 }
   0xe   : > { %s496_s14 = smul.u32 56, %s691_s6 }
   0xf   : > { %s579_s13 = scalar_lea.vmem %s684_s0, %s495_s10 }
  0x10   : > { %v148_v0 = vld [vmem:[%s579_s13] sm:$0xff]  ;;  %v149_v1 = vld [vmem:[%s579_s13 + $0x8] sm:$0x3]  ;;  %v150_v2 = vld [vmem:[%s579_s13 + $0x10] sm:$0xff]  ;;  %s623_s17 = scalar_lea.vmem %s685_s1, %s496_s14 }
  0x11   : > { %v151_v3 = vld [vmem:[%s579_s13 + $0x18] sm:$0x3]  ;;  %v152_v4 = vld [vmem:[%s579_s13 + $0x20] sm:$0xff]  ;;  %v153_v5 = vld [vmem:[%s579_s13 + $0x28] sm:$0x3]  ;;  %v168_v6 = vmul.f32 0.125, %v148_v0 }
  0x12   : > { %v154_v7 = vld [vmem:[%s579_s13 + $0x30] sm:$0xff]  ;;  %v155_v8 = vld [vmem:[%s579_s13 + $0x38] sm:$0x3]  ;;  %v169_v9 = vmul.f32 0.125, %v149_v1  ;;  %v182_v10 = vmul.f32 0.375, %v150_v2  ;;  %v183_v11 = vmul.f32 0.375, %v151_v3 }
  0x13   : > { %v589_v12 = vmul.f32 0.125, %v154_v7  ;;  %v591_v13 = vmul.f32 0.125, %v155_v8  ;;  %v184_v14 = vmul.f32 0.375, %v152_v4  ;;  %v185_v15 = vmul.f32 0.375, %v153_v5  ;;  %v156_v16 = vld [vmem:[%s579_s13 + $0x40] sm:$0xff]  ;;  %v595_v17 = vld [vmem:[%s579_s13 + $0x50] sm:$0xff] }
  0x14   : > { %v196_v18 = vadd.f32 %v182_v10, %v168_v6  ;;  %v197_v19 = vadd.f32 %v183_v11, %v169_v9  ;;  %v157_v20 = vld [vmem:[%s579_s13 + $0x48] sm:$0x3]  ;;  %v170_v21 = vmul.f32 0.125, %v150_v2  ;;  %v171_v22 = vmul.f32 0.125, %v151_v3  ;;  %v599_v23 = vld [vmem:[%s579_s13 + $0x58] sm:$0x3] }
  0x15   : > { %v601_v24 = vmul.f32 0.125, %v156_v16  ;;  %v603_v25 = vmul.f32 0.125, %v157_v20  ;;  %v186_v26 = vmul.f32 0.375, %v154_v7  ;;  %v187_v27 = vmul.f32 0.375, %v155_v8 }
  0x16   : > { %v212_v28 = vadd.f32 %v196_v18, %v184_v14  ;;  %v213_v29 = vadd.f32 %v197_v19, %v185_v15  ;;  %v198_v30 = vadd.f32 %v184_v14, %v170_v21  ;;  %v199_v31 = vadd.f32 %v185_v15, %v171_v22  ;;  %v160_v14 = vld [vmem:[%s579_s13 + $0x60] sm:$0xff]  ;;  %v161_v15 = vld [vmem:[%s579_s13 + $0x68] sm:$0x3] }
  0x17   : > { %v172_v32 = vmul.f32 0.125, %v152_v4  ;;  %v173_v33 = vmul.f32 0.125, %v153_v5  ;;  %v606_v34 = vmul.f32 0.125, %v595_v17  ;;  %v609_v35 = vmul.f32 0.125, %v599_v23 }
  0x18   : > { %v232_v36 = vadd.f32 %v212_v28, %v589_v12  ;;  %v233_v37 = vadd.f32 %v213_v29, %v591_v13  ;;  %v214_v38 = vadd.f32 %v198_v30, %v186_v26  ;;  %v215_v39 = vadd.f32 %v199_v31, %v187_v27 }
  0x19   : > { %v188_v40 = vmul.f32 0.375, %v156_v16  ;;  %v189_v41 = vmul.f32 0.375, %v157_v20  ;;  %v200_v42 = vadd.f32 %v186_v26, %v172_v32  ;;  %v201_v43 = vadd.f32 %v187_v27, %v173_v33 }
  0x1a   : > { %v246_v44 = vmul.f32 0.125, %v232_v36  ;;  %v253_v45 = vmul.f32 0.375, %v232_v36  ;;  %v288_v46 = vmul.f32 0.375, %v233_v37  ;;  %v338_v47 = vmul.f32 0.125, %v233_v37 }
  0x1b   : > { %v234_v48 = vadd.f32 %v214_v38, %v601_v24  ;;  %v235_v49 = vadd.f32 %v215_v39, %v603_v25  ;;  %v216_v50 = vadd.f32 %v200_v42, %v188_v40  ;;  %v217_v51 = vadd.f32 %v201_v43, %v189_v41 }
  0x1c   : > { %v267_v52 = vrot.slane %v253_v45, 1  ;;  %v303_v53 = vrot.slane %v253_v45, 2  ;;  %v304_v54 = vrot.slane %v288_v46, 2  ;;  %v360_v55 = vrot.slane %v246_v44, 3  ;;  %v163_v46 = vld [vmem:[%s579_s13 + $0x78] sm:$0x3] }
  0x1d   : > { %v361_v56 = vrot.slane %v338_v47, 3  ;;  %v247_v57 = vmul.f32 0.125, %v234_v48  ;;  %v254_v58 = vmul.f32 0.375, %v234_v48  ;;  %v289_v59 = vmul.f32 0.375, %v235_v49 }
  0x1e   : > { %v281_v60 = vadd.f32 %v267_v52, %v246_v44  ;;  %v305_v61 = vsel %vm302_vm0, %v303_v53, %v304_v54  ;;  %v339_v62 = vmul.f32 0.125, %v235_v49  ;;  %v236_v63 = vadd.f32 %v216_v50, %v606_v34  ;;  %v162_v44 = vld [vmem:[%s579_s13 + $0x70] sm:$0xff] }
  0x1f   : > { %v362_v0 = vsel %vm359_vm1, %v360_v55, %v361_v56  ;;  %v268_v1 = vrot.slane %v254_v58, 1  ;;  %v306_v2 = vrot.slane %v254_v58, 2  ;;  %v307_v3 = vrot.slane %v289_v59, 2  ;;  %v164_v55 = vld [vmem:[%s579_s13 + $0x80] sm:$0xff] }
  0x20   : > { %v331_v4 = vadd.f32 %v305_v61, %v281_v60  ;;  %v363_v5 = vrot.slane %v247_v57, 3  ;;  %v364_v6 = vrot.slane %v339_v62, 3  ;;  %v237_v7 = vadd.f32 %v217_v51, %v609_v35 }
  0x21   : > { %v282_v8 = vadd.f32 %v268_v1, %v247_v57  ;;  %v308_v9 = vsel %vm302_vm0, %v306_v2, %v307_v3  ;;  %v248_v10 = vmul.f32 0.125, %v236_v63  ;;  %v255_v11 = vmul.f32 0.375, %v236_v63 }
  0x22   : > { %v388_v16 = vadd.f32 %v362_v0, %v331_v4  ;;  %v365_v18 = vsel %vm359_vm1, %v363_v5, %v364_v6  ;;  %v290_v19 = vmul.f32 0.375, %v237_v7  ;;  %v340_v20 = vmul.f32 0.125, %v237_v7 }
  0x23   : > { %v332_v21 = vadd.f32 %v308_v9, %v282_v8  ;;  %v269_v22 = vrot.slane %v255_v11, 1  ;;  %v309_v26 = vrot.slane %v255_v11, 2  ;;  %v366_v27 = vrot.slane %v248_v10, 3 }
  0x24   : > { %396 = vst.msk [vmem:[%s623_s17] sm:$0x7f] %vm395_vm2, %v388_v16  ;;  %v310_v28 = vrot.slane %v290_v19, 2  ;;  %v367_v29 = vrot.slane %v340_v20, 3  ;;  %v631_v30 = vmul.f32 0.125, %v160_v14  ;;  %v633_v31 = vmul.f32 0.125, %v161_v15 }
  0x25   : > { %v389_v32 = vadd.f32 %v365_v18, %v332_v21  ;;  %v283_v33 = vadd.f32 %v269_v22, %v248_v10  ;;  %v190_v36 = vmul.f32 0.375, %v595_v17  ;;  %v191_v37 = vmul.f32 0.375, %v599_v23  ;;  %v165_v19 = vld [vmem:[%s579_s13 + $0x88] sm:$0x3] }
  0x26   : > { %v311_v38 = vsel %vm302_vm0, %v309_v26, %v310_v28  ;;  %v368_v39 = vsel %vm359_vm1, %v366_v27, %v367_v29  ;;  %v202_v42 = vadd.f32 %v188_v40, %v589_v12  ;;  %v203_v43 = vadd.f32 %v189_v41, %v591_v13  ;;  %v166_v29 = vld [vmem:[%s579_s13 + $0x90] sm:$0xff] }
  0x27   : > { %397 = vst.msk [vmem:[%s623_s17 + $0x8] sm:$0x7f] %vm395_vm2, %v389_v32  ;;  %v333_v45 = vadd.f32 %v311_v38, %v283_v33  ;;  %v192_v47 = vmul.f32 0.375, %v160_v14  ;;  %v193_v48 = vmul.f32 0.375, %v161_v15  ;;  %v204_v17 = vadd.f32 %v190_v36, %v601_v24 }
  0x28   : > { %v218_v23 = vadd.f32 %v202_v42, %v190_v36  ;;  %v219_v49 = vadd.f32 %v203_v43, %v191_v37  ;;  %v205_v50 = vadd.f32 %v191_v37, %v603_v25  ;;  %v226_v51 = vmul.f32 0.125, %v162_v44 }
  0x29   : > { %v390_v52 = vadd.f32 %v368_v39, %v333_v45  ;;  %v220_v12 = vadd.f32 %v204_v17, %v192_v47  ;;  %v227_v40 = vmul.f32 0.125, %v163_v46  ;;  %v194_v13 = vmul.f32 0.375, %v162_v44  ;;  %v167_v45 = vld [vmem:[%s579_s13 + $0x98] sm:$0x3] }
  0x2a   : > { %v238_v41 = vadd.f32 %v218_v23, %v631_v30  ;;  %v239_v53 = vadd.f32 %v219_v49, %v633_v31  ;;  %v221_v54 = vadd.f32 %v205_v50, %v193_v48  ;;  %v195_v56 = vmul.f32 0.375, %v163_v46 }
  0x2b   : > { %398 = vst.msk [vmem:[%s623_s17 + $0x10] sm:$0x7f] %vm395_vm2, %v390_v52  ;;  %v240_v57 = vadd.f32 %v226_v51, %v220_v12  ;;  %v206_v24 = vadd.f32 %v192_v47, %v606_v34  ;;  %v207_v58 = vadd.f32 %v193_v48, %v609_v35  ;;  %v228_v25 = vmul.f32 0.125, %v164_v55 }
  0x2c   : > { %v249_v59 = vmul.f32 0.125, %v238_v41  ;;  %v256_v60 = vmul.f32 0.375, %v238_v41  ;;  %v291_v61 = vmul.f32 0.375, %v239_v53  ;;  %v341_v62 = vmul.f32 0.125, %v239_v53 }
  0x2d   : > { %v241_v63 = vadd.f32 %v227_v40, %v221_v54  ;;  %v250_v0 = vmul.f32 0.125, %v240_v57  ;;  %v257_v1 = vmul.f32 0.375, %v240_v57  ;;  %v222_v2 = vadd.f32 %v206_v24, %v194_v13 }
  0x2e   : > { %v270_v3 = vrot.slane %v256_v60, 1  ;;  %v312_v4 = vrot.slane %v256_v60, 2  ;;  %v313_v5 = vrot.slane %v291_v61, 2  ;;  %v369_v6 = vrot.slane %v249_v59, 3 }
  0x2f   : > { %v370_v7 = vrot.slane %v341_v62, 3  ;;  %v271_v8 = vrot.slane %v257_v1, 1  ;;  %v292_v9 = vmul.f32 0.375, %v241_v63  ;;  %v315_v34 = vrot.slane %v257_v1, 2 }
  0x30   : > { %v284_v35 = vadd.f32 %v270_v3, %v249_v59  ;;  %v314_v10 = vsel %vm302_vm0, %v312_v4, %v313_v5  ;;  %v342_v11 = vmul.f32 0.125, %v241_v63  ;;  %v372_v14 = vrot.slane %v250_v0, 3 }
  0x31   : > { %v371_v15 = vsel %vm359_vm1, %v369_v6, %v370_v7  ;;  %v285_v16 = vadd.f32 %v271_v8, %v250_v0  ;;  %v316_v18 = vrot.slane %v292_v9, 2  ;;  %v223_v20 = vadd.f32 %v207_v58, %v195_v56 }
  0x32   : > { %v334_v21 = vadd.f32 %v314_v10, %v284_v35  ;;  %v373_v22 = vrot.slane %v342_v11, 3  ;;  %v229_v26 = vmul.f32 0.125, %v165_v19  ;;  %v242_v27 = vadd.f32 %v228_v25, %v222_v2 }
  0x33   : > { %v317_v28 = vsel %vm302_vm0, %v315_v34, %v316_v18  ;;  %v208_v32 = vadd.f32 %v194_v13, %v631_v30  ;;  %v209_v33 = vadd.f32 %v195_v56, %v633_v31  ;;  %v210_v36 = vmul.f32 0.375, %v164_v55 }
  0x34   : > { %v391_v37 = vadd.f32 %v371_v15, %v334_v21  ;;  %v335_v38 = vadd.f32 %v317_v28, %v285_v16  ;;  %v374_v39 = vsel %vm359_vm1, %v372_v14, %v373_v22  ;;  %v243_v42 = vadd.f32 %v229_v26, %v223_v20 }
  0x35   : > { %v251_v43 = vmul.f32 0.125, %v242_v27  ;;  %v258_v44 = vmul.f32 0.375, %v242_v27  ;;  %v211_v46 = vmul.f32 0.375, %v165_v19  ;;  %v224_v47 = vadd.f32 %v210_v36, %v208_v32 }
  0x36   : > { %399 = vst.msk [vmem:[%s623_s17 + $0x18] sm:$0x7f] %vm395_vm2, %v391_v37  ;;  %v392_v48 = vadd.f32 %v374_v39, %v335_v38  ;;  %v293_v17 = vmul.f32 0.375, %v243_v42  ;;  %v343_v23 = vmul.f32 0.125, %v243_v42  ;;  %v230_v30 = vmul.f32 0.125, %v166_v29 }
  0x37   : > { %v272_v49 = vrot.slane %v258_v44, 1  ;;  %v318_v31 = vrot.slane %v258_v44, 2  ;;  %v375_v50 = vrot.slane %v251_v43, 3  ;;  %v225_v51 = vadd.f32 %v211_v46, %v209_v33 }
  0x38   : > { %400 = vst.msk [vmem:[%s623_s17 + $0x20] sm:$0x7f] %vm395_vm2, %v392_v48  ;;  %v319_v52 = vrot.slane %v293_v17, 2  ;;  %v376_v12 = vrot.slane %v343_v23, 3  ;;  %v231_v40 = vmul.f32 0.125, %v167_v45  ;;  %v244_v13 = vadd.f32 %v230_v30, %v224_v47 }
  0x39   : > { %v286_v41 = vadd.f32 %v272_v49, %v251_v43 }
  0x3a   : > { %v320_v53 = vsel %vm302_vm0, %v318_v31, %v319_v52  ;;  %v377_v54 = vsel %vm359_vm1, %v375_v50, %v376_v12  ;;  %v245_v55 = vadd.f32 %v231_v40, %v225_v51  ;;  %v252_v56 = vmul.f32 0.125, %v244_v13 }
  0x3b   : > { %v336_v57 = vadd.f32 %v320_v53, %v286_v41  ;;  %v259_v24 = vmul.f32 0.375, %v244_v13 }
  0x3c   : > { %v294_v58 = vmul.f32 0.375, %v245_v55  ;;  %v344_v25 = vmul.f32 0.125, %v245_v55  ;;  %v378_v59 = vrot.slane %v252_v56, 3 }
  0x3d   : > { %v393_v60 = vadd.f32 %v377_v54, %v336_v57  ;;  %v273_v61 = vrot.slane %v259_v24, 1  ;;  %v321_v62 = vrot.slane %v259_v24, 2 }
  0x3e   : > { %v322_v63 = vrot.slane %v294_v58, 2  ;;  %v379_v0 = vrot.slane %v344_v25, 3 }
  0x3f   : > { %401 = vst.msk [vmem:[%s623_s17 + $0x28] sm:$0x7f] %vm395_vm2, %v393_v60  ;;  %v287_v1 = vadd.f32 %v273_v61, %v252_v56 }
  0x40   : > { %v323_v2 = vsel %vm302_vm0, %v321_v62, %v322_v63  ;;  %v380_v3 = vsel %vm359_vm1, %v378_v59, %v379_v0 }
  0x41   : > { %v337_v4 = vadd.f32 %v323_v2, %v287_v1 }
  0x43   : > { %v394_v5 = vadd.f32 %v380_v3, %v337_v4 }
  0x45   : > { %402 = vst.msk [vmem:[%s623_s17 + $0x30] sm:$0x7f] %vm395_vm2, %v394_v5 }
  0x46 PF: > { %s11_s8 = sadd.s32 1, %s543_s8   ;;  %s686_s6 = smov %s539_s7 }
  0x47   : > { %p8_p5 = scmp.ge.s32.totalorder %s11_s8, 6   ;;  %s687_s7 = smov %s689_s9 }
  0x49   :  { %10 = sbr.rel (!%p8_p5) target bundleno = 2 (0x2), region = 54 }

// kernel: discriminator_forward.17
= control target key start
LH: loop header
LB: loop body
LE: loop exit
PB: predicated region body
PF: predicated region fallthrough
CT: control target
= control target key end

     0   :  { %s2003_s1 = inlined_call_operand.vmem [shape: bf16[384,128], index: 1, kind: input, shape index: {}]   ;;  %s2004_s0 = inlined_call_operand.vmem [shape: bf16[256,384], index: 0, kind: input, shape index: {}]   ;;  %s2005_s2 = inlined_call_operand.vmem [shape: f32[1,128], index: 2, kind: input, shape index: {}]   ;;  %s2006_s3 = inlined_call_operand.vmem [shape: f32[256,128], index: 3, kind: output, shape index: {}]  }
   0x1   :  { %v1492_v0 = vld [vmem:[%s2003_s1 + $0x78] sm:$0xff]   ;;  %v1494_v2 = vld [vmem:[%s2003_s1 + $0x70] sm:$0xff]   ;;  %v1496_v4 = vld [vmem:[%s2003_s1 + $0x68] sm:$0xff]  }
   0x2   :  { %v1493_v1 = vld [vmem:[%s2003_s1 + $0x38] sm:$0xff]   ;;  %1292 = vmatprep.subr.bf16.mxu0 %v1492_v0  ;;  %1476 = vmatprep.subr.bf16.mxu1 %v1492_v0  ;;  %v1495_v3 = vld [vmem:[%s2003_s1 + $0x30] sm:$0xff]   ;;  %v1497_v5 = vld [vmem:[%s2003_s1 + $0x28] sm:$0xff]  }
   0x3   :  { %1293 = vmatpush3.bf16.msra.mxu0 %v1493_v1  ;;  %1484 = vmatpush3.bf16.msra.mxu1 %v1493_v1  ;;  %v1498_v6 = vld [vmem:[%s2003_s1 + $0x60] sm:$0xff]   ;;  %v1500_v8 = vld [vmem:[%s2003_s1 + $0x58] sm:$0xff]   ;;  %v1502_v10 = vld [vmem:[%s2003_s1 + $0x50] sm:$0xff]  }
   0x4   :  { %1294 = vmatprep.subr.bf16.mxu0 %v1494_v2  ;;  %1477 = vmatprep.subr.bf16.mxu1 %v1494_v2  ;;  %v1499_v7 = vld [vmem:[%s2003_s1 + $0x20] sm:$0xff]   ;;  %v1501_v9 = vld [vmem:[%s2003_s1 + $0x18] sm:$0xff]   ;;  %v1503_v13 = vld [vmem:[%s2003_s1 + $0x10] sm:$0xff]  }
   0x5   :  { %v1510_v11 = vld [vmem:[%s2004_s0 + $0x4] ss:$12 sps:$4 sm:$0xff]   ;;  %v1504_v14 = vld [vmem:[%s2003_s1 + $0x48] sm:$0xff]   ;;  %v1514_v18 = vld [vmem:[%s2003_s1 + $0xb8] sm:$0xff]  }
   0x6   :  { %v1513_v12 = vld [vmem:[%s2004_s0 + $0x124] ss:$12 sps:$4 sm:$0xff]   ;;  %627 = vmatprep.mubr.bf16.mxu0 %v1510_v11  ;;  %v1505_v15 = vld [vmem:[%s2003_s1 + $0x8] sm:$0xff]   ;;  %v1524_v28 = vld [vmem:[%s2004_s0 + $0x34] ss:$12 sps:$4 sm:$0xff]  }
   0x7   :  { %1295 = vmatpush3.bf16.msra.mxu0 %v1495_v3  ;;  %1485 = vmatpush3.bf16.msra.mxu1 %v1495_v3  ;;  %v1506_v16 = vld [vmem:[%s2003_s1 + $0x40] sm:$0xff]   ;;  %v1516_v21 = vld [vmem:[%s2004_s0 + $0x1c] ss:$12 sps:$4 sm:$0xff]   ;;  %v1515_v22 = vld [vmem:[%s2003_s1 + $0xb0] sm:$0xff]  }
   0x8   :  { %1296 = vmatprep.subr.bf16.mxu0 %v1496_v4  ;;  %1478 = vmatprep.subr.bf16.mxu1 %v1496_v4  ;;  %v1507_v17 = vld [vmem:[%s2003_s1] sm:$0xff]   ;;  %v1518_v23 = vld [vmem:[%s2004_s0 + $0x13c] ss:$12 sps:$4 sm:$0xff]   ;;  %v1531_v33 = vld [vmem:[%s2003_s1 + $0x90] sm:$0xff]  }
   0x9   :  { %723 = vmatprep.mubr.bf16.mxu1 %v1513_v12  ;;  %v1508_v19 = vld [vmem:[%s2004_s0] ss:$12 sps:$4 sm:$0xff]   ;;  %v1520_v24 = vld [vmem:[%s2004_s0 + $0x18] ss:$12 sps:$4 sm:$0xff]   ;;  %v1528_v31 = vld [vmem:[%s2004_s0 + $0x30] ss:$12 sps:$4 sm:$0xff]  }
   0xa   :  { %v1511_v20 = vld [vmem:[%s2004_s0 + $0x120] ss:$12 sps:$4 sm:$0xff]   ;;  %v1521_v26 = vld [vmem:[%s2004_s0 + $0x138] ss:$12 sps:$4 sm:$0xff]   ;;  %v1529_v32 = vld [vmem:[%s2004_s0 + $0x150] ss:$12 sps:$4 sm:$0xff]  }
   0xb   :  { %1297 = vmatpush3.bf16.msra.mxu0 %v1497_v5  ;;  %1486 = vmatpush3.bf16.msra.mxu1 %v1497_v5  ;;  %v1522_v25 = vld [vmem:[%s2003_s1 + $0xa8] sm:$0xff]   ;;  %v1523_v27 = vld [vmem:[%s2003_s1 + $0xa0] sm:$0xff]   ;;  %v1530_v30 = vld [vmem:[%s2003_s1 + $0x98] sm:$0xff]  }
   0xc   :  { %1298 = vmatprep.subr.bf16.mxu0 %v1498_v6  ;;  %1479 = vmatprep.subr.bf16.mxu1 %v1498_v6  ;;  %v1526_v29 = vld [vmem:[%s2004_s0 + $0x154] ss:$12 sps:$4 sm:$0xff]   ;;  %v1532_v34 = vld [vmem:[%s2004_s0 + $0x4c] ss:$12 sps:$4 sm:$0xff]   ;;  %v1540_v39 = vld [vmem:[%s2004_s0 + $0x64] ss:$12 sps:$4 sm:$0xff]  }
   0xd   :  { %v1534_v35 = vld [vmem:[%s2004_s0 + $0x16c] ss:$12 sps:$4 sm:$0xff]   ;;  %v1536_v37 = vld [vmem:[%s2004_s0 + $0x48] ss:$12 sps:$4 sm:$0xff]   ;;  %v1539_v40 = vld [vmem:[%s2003_s1 + $0x80] sm:$0xff]  }
   0xe   :  { %v1538_v36 = vld [vmem:[%s2003_s1 + $0x88] sm:$0xff]   ;;  %v1547_v45 = vld [vmem:[%s2004_s0 + $0x38] ss:$12 sps:$4 sm:$0xff]   ;;  %v1549_v47 = vld [vmem:[%s2004_s0 + $0x50] ss:$12 sps:$4 sm:$0xff]  }
   0xf   :  { %1299 = vmatpush3.bf16.msra.mxu0 %v1499_v7  ;;  %1487 = vmatpush3.bf16.msra.mxu1 %v1499_v7  ;;  %v1537_v38 = vld [vmem:[%s2004_s0 + $0x168] ss:$12 sps:$4 sm:$0xff]   ;;  %v1543_v42 = vld [vmem:[%s2004_s0 + $0x60] ss:$12 sps:$4 sm:$0xff]   ;;  %v1548_v46 = vld [vmem:[%s2004_s0 + $0x78] ss:$12 sps:$4 sm:$0xff]  }
  0x10   :  { %1300 = vmatprep.subr.bf16.mxu0 %v1500_v8  ;;  %1480 = vmatprep.subr.bf16.mxu1 %v1500_v8  ;;  %v1542_v41 = vld [vmem:[%s2004_s0 + $0x8] ss:$12 sps:$4 sm:$0xff]   ;;  %v1544_v43 = vld [vmem:[%s2004_s0 + $0x20] ss:$12 sps:$4 sm:$0xff]   ;;  %v1553_v50 = vld [vmem:[%s2004_s0 + $0x90] ss:$12 sps:$4 sm:$0xff]  }
  0x11   :  { %v1545_v44 = vld [vmem:[%s2004_s0 + $0x7c] ss:$12 sps:$4 sm:$0xff]   ;;  %v1550_v48 = vld [vmem:[%s2004_s0 + $0x94] ss:$12 sps:$4 sm:$0xff]   ;;  %v1555_v52 = vld [vmem:[%s2004_s0 + $0xac] ss:$12 sps:$4 sm:$0xff]  }
  0x12   :  { %v1552_v49 = vld [vmem:[%s2004_s0 + $0x68] ss:$12 sps:$4 sm:$0xff]   ;;  %v1554_v51 = vld [vmem:[%s2004_s0 + $0x80] ss:$12 sps:$4 sm:$0xff]   ;;  %v1557_v53 = vld [vmem:[%s2004_s0 + $0x98] ss:$12 sps:$4 sm:$0xff]  }
  0x13   :  { %1301 = vmatpush3.bf16.msra.mxu0 %v1501_v9  ;;  %1488 = vmatpush3.bf16.msra.mxu1 %v1501_v9  ;;  %v1558_v54 = vld [vmem:[%s2004_s0 + $0xa8] ss:$12 sps:$4 sm:$0xff]   ;;  %v1559_v55 = vld [vmem:[%s2004_s0 + $0xb0] ss:$12 sps:$4 sm:$0xff]   ;;  %v1563_v58 = vld [vmem:[%s2004_s0 + $0xc0] ss:$12 sps:$4 sm:$0xff]  }
  0x14   :  { %1302 = vmatprep.subr.bf16.mxu0 %v1502_v10  ;;  %1481 = vmatprep.subr.bf16.mxu1 %v1502_v10  ;;  %v1560_v56 = vld [vmem:[%s2004_s0 + $0xc4] ss:$12 sps:$4 sm:$0xff]   ;;  %v1562_v57 = vld [vmem:[%s2004_s0 + $0xc8] ss:$12 sps:$4 sm:$0xff]   ;;  %v1564_v59 = vld [vmem:[%s2004_s0 + $0xe0] ss:$12 sps:$4 sm:$0xff]  }
  0x15   :  { %v1565_v60 = vld [vmem:[%s2004_s0 + $0xdc] ss:$12 sps:$4 sm:$0xff]   ;;  %v1567_v61 = vld [vmem:[%s2004_s0 + $0xf8] ss:$12 sps:$4 sm:$0xff]   ;;  %v1570_v0 = vld [vmem:[%s2004_s0 + $0xf4] ss:$12 sps:$4 sm:$0xff]  }
  0x16   :  { %v1568_v62 = vld [vmem:[%s2004_s0 + $0xd8] ss:$12 sps:$4 sm:$0xff]   ;;  %v1569_v63 = vld [vmem:[%s2004_s0 + $0x110] ss:$12 sps:$4 sm:$0xff]   ;;  %v1572_v1 = vld [vmem:[%s2004_s0 + $0x128] ss:$12 sps:$4 sm:$0xff]  }
  0x17   :  { %1303 = vmatpush3.bf16.msra.mxu0 %v1503_v13  ;;  %1489 = vmatpush3.bf16.msra.mxu1 %v1503_v13  ;;  %v1573_v2 = vld [vmem:[%s2004_s0 + $0xf0] ss:$12 sps:$4 sm:$0xff]   ;;  %v1574_v3 = vld [vmem:[%s2004_s0 + $0x140] ss:$12 sps:$4 sm:$0xff]   ;;  %v1577_v5 = vld [vmem:[%s2004_s0 + $0x158] ss:$12 sps:$4 sm:$0xff]  }
  0x18   :  { %1304 = vmatprep.subr.bf16.mxu0 %v1504_v14  ;;  %1482 = vmatprep.subr.bf16.mxu1 %v1504_v14  ;;  %v1575_v4 = vld [vmem:[%s2004_s0 + $0x10c] ss:$12 sps:$4 sm:$0xff]   ;;  %v1578_v6 = vld [vmem:[%s2004_s0 + $0x108] ss:$12 sps:$4 sm:$0xff]   ;;  %v1579_v7 = vld [vmem:[%s2004_s0 + $0x170] ss:$12 sps:$4 sm:$0xff]  }
  0x1b   :  { %1305 = vmatpush3.bf16.msra.mxu0 %v1505_v15  ;;  %1490 = vmatpush3.bf16.msra.mxu1 %v1505_v15 }
  0x1c   :  { %1306 = vmatprep.subr.bf16.mxu0 %v1506_v16  ;;  %1483 = vmatprep.subr.bf16.mxu1 %v1506_v16 }
  0x1f   :  { %1307 = vmatpush3.bf16.msra.mxu0 %v1507_v17  ;;  %1491 = vmatpush3.bf16.msra.mxu1 %v1507_v17 }
  0x20   :  { %1428 = vmatprep.subr.bf16.mxu1 %v1514_v18 }
  0x22   :  { %628 = vmatmul.mubr.bf16.vlgmr.msra.gmra.mxu0 %v1508_v19  ;;  %724 = vmatmul.mubr.bf16.vlgmr.msra.gmra.mxu1 %v1511_v20 }
  0x23   :  { %1429 = vmatpush3.bf16.msra.mxu1 %v1514_v18  ;;  %635 = vmatprep.mubr.bf16.mxu0 %v1516_v21 }
  0x24   :  { %1430 = vmatprep.subr.bf16.mxu1 %v1515_v22  ;;  %731 = vmatprep.mubr.bf16.mxu1 %v1518_v23 }
  0x27   :  { %1431 = vmatpush3.bf16.msra.mxu1 %v1515_v22 }
  0x28   :  { %1432 = vmatprep.subr.bf16.mxu1 %v1522_v25 }
  0x2a   :  { %636 = vmatmul.mubr.bf16.gmra.mxu0 %v1520_v24  ;;  %732 = vmatmul.mubr.bf16.gmra.mxu1 %v1521_v26 }
  0x2b   :  { %1433 = vmatpush3.bf16.msra.mxu1 %v1522_v25  ;;  %643 = vmatprep.mubr.bf16.mxu0 %v1524_v28 }
  0x2c   :  { %1434 = vmatprep.subr.bf16.mxu1 %v1523_v27  ;;  %739 = vmatprep.mubr.bf16.mxu1 %v1526_v29 }
  0x2f   :  { %1435 = vmatpush3.bf16.msra.mxu1 %v1523_v27 }
  0x30   :  { %1436 = vmatprep.subr.bf16.mxu1 %v1530_v30 }
  0x32   :  { %644 = vmatmul.mubr.bf16.gmra.mxu0 %v1528_v31  ;;  %740 = vmatmul.mubr.bf16.gmra.mxu1 %v1529_v32 }
  0x33   :  { %1437 = vmatpush3.bf16.msra.mxu1 %v1530_v30  ;;  %651 = vmatprep.mubr.bf16.mxu0 %v1532_v34 }
  0x34   :  { %1438 = vmatprep.subr.bf16.mxu1 %v1531_v33  ;;  %747 = vmatprep.mubr.bf16.mxu1 %v1534_v35 }
  0x37   :  { %1439 = vmatpush3.bf16.msra.mxu1 %v1531_v33 }
  0x38   :  { %1440 = vmatprep.subr.bf16.mxu1 %v1538_v36 }
  0x3a   :  { %652 = vmatmul.mubr.bf16.gmra.mxu0 %v1536_v37  ;;  %748 = vmatmul.mubr.bf16.gmra.mxu1 %v1537_v38 }
  0x3b   :  { %1441 = vmatpush3.bf16.msra.mxu1 %v1538_v36  ;;  %659 = vmatprep.mubr.bf16.mxu0 %v1540_v39 }
  0x3c   :  { %1442 = vmatprep.subr.bf16.mxu1 %v1539_v40  ;;  %1444 = vmatprep.mubr.bf16.mxu1 %v1542_v41 }
  0x3f   :  { %1443 = vmatpush3.bf16.msra.mxu1 %v1539_v40 }
  0x42   :  { %660 = vmatmul.mubr.bf16.gmra.mxu0 %v1543_v42  ;;  %1445 = vmatmul.mubr.bf16.vlgmr.msra.gmra.mxu1 %v1544_v43 }
  0x43   :  { %667 = vmatprep.mubr.bf16.mxu0 %v1545_v44  ;;  %1448 = vmatprep.mubr.bf16.mxu1 %v1547_v45 }
  0x4a   :  { %668 = vmatmul.mubr.bf16.gmra.mxu0 %v1548_v46  ;;  %1449 = vmatmul.mubr.bf16.gmra.mxu1 %v1549_v47 }
  0x4b   :  { %675 = vmatprep.mubr.bf16.mxu0 %v1550_v48  ;;  %1452 = vmatprep.mubr.bf16.mxu1 %v1552_v49  ;;  %v1845_v49 = vld [vmem:[%s2005_s2] ss:$0 sm:$0xff] }
  0x52   :  { %676 = vmatmul.mubr.bf16.gmra.mxu0 %v1553_v50  ;;  %1453 = vmatmul.mubr.bf16.gmra.mxu1 %v1554_v51 }
  0x53   :  { %683 = vmatprep.mubr.bf16.mxu0 %v1555_v52  ;;  %1456 = vmatprep.mubr.bf16.mxu1 %v1557_v53 }
  0x5a   :  { %684 = vmatmul.mubr.bf16.gmra.mxu0 %v1558_v54  ;;  %1457 = vmatmul.mubr.bf16.gmra.mxu1 %v1559_v55 }
  0x5b   :  { %691 = vmatprep.mubr.bf16.mxu0 %v1560_v56  ;;  %1460 = vmatprep.mubr.bf16.mxu1 %v1562_v57 }
  0x62   :  { %692 = vmatmul.mubr.bf16.gmra.mxu0 %v1563_v58  ;;  %1461 = vmatmul.mubr.bf16.gmra.mxu1 %v1564_v59 }
  0x63   :  { %699 = vmatprep.mubr.bf16.mxu0 %v1565_v60  ;;  %1464 = vmatprep.mubr.bf16.mxu1 %v1567_v61 }
  0x6a   :  { %700 = vmatmul.mubr.bf16.gmra.mxu0 %v1568_v62  ;;  %1465 = vmatmul.mubr.bf16.gmra.mxu1 %v1569_v63 }
  0x6b   :  { %707 = vmatprep.mubr.bf16.mxu0 %v1570_v0  ;;  %1468 = vmatprep.mubr.bf16.mxu1 %v1572_v1 }
  0x72   :  { %708 = vmatmul.mubr.bf16.gmra.mxu0 %v1573_v2  ;;  %1469 = vmatmul.mubr.bf16.gmra.mxu1 %v1574_v3 }
  0x73   :  { %715 = vmatprep.mubr.bf16.mxu0 %v1575_v4  ;;  %1472 = vmatprep.mubr.bf16.mxu1 %v1577_v5 }
  0x7a   :  { %716 = vmatmul.mubr.bf16.gmra.mxu0 %v1578_v6  ;;  %1473 = vmatmul.mubr.bf16.gmra.mxu1 %v1579_v7 }
  0xe2   :  { %v1308_v8 = vpop.f32.mrf.mxu0  ;;  %v1380_v9 = vpop.f32.mrf.mxu1 }
  0xe4   :  { %v1309_v10 = vpop.f32.mrf.mxu0  ;;  %v1381_v11 = vpop.f32.mrf.mxu1 }
  0xe5   :  { %v1816_v12 = vadd.f32 %v1381_v11, %v1380_v9  ;;  %v1310_v50 = vadd.f32 %v1309_v10, %v1308_v8 }
  0xe6   :  { %v1311_v13 = vpop.f32.mrf.mxu0  ;;  %v1383_v14 = vpop.f32.mrf.mxu1 }
  0xe8   :  { %v1312_v15 = vpop.f32.mrf.mxu0  ;;  %v1384_v16 = vpop.f32.mrf.mxu1 }
  0xe9   :  { %v1818_v17 = vadd.f32 %v1384_v16, %v1383_v14  ;;  %v1313_v62 = vadd.f32 %v1312_v15, %v1311_v13 }
  0xea   :  { %v1314_v18 = vpop.f32.mrf.mxu0  ;;  %v1386_v19 = vpop.f32.mrf.mxu1 }
  0xec   :  { %v1315_v20 = vpop.f32.mrf.mxu0  ;;  %v1387_v21 = vpop.f32.mrf.mxu1 }
  0xed   :  { %v1820_v22 = vadd.f32 %v1387_v21, %v1386_v19  ;;  %v1316_v46 = vadd.f32 %v1315_v20, %v1314_v18 }
  0xee   :  { %v1317_v23 = vpop.f32.mrf.mxu0  ;;  %v1389_v24 = vpop.f32.mrf.mxu1 }
  0xf0   :  { %v1318_v25 = vpop.f32.mrf.mxu0  ;;  %v1390_v26 = vpop.f32.mrf.mxu1 }
  0xf1   :  { %v1822_v27 = vadd.f32 %v1390_v26, %v1389_v24  ;;  %v1319_v54 = vadd.f32 %v1318_v25, %v1317_v23 }
  0xf2   :  { %v1320_v28 = vpop.f32.mrf.mxu0  ;;  %v1392_v29 = vpop.f32.mrf.mxu1 }
  0xf4   :  { %v1321_v30 = vpop.f32.mrf.mxu0  ;;  %v1393_v31 = vpop.f32.mrf.mxu1 }
  0xf5   :  { %v1824_v32 = vadd.f32 %v1393_v31, %v1392_v29  ;;  %v1322_v5 = vadd.f32 %v1321_v30, %v1320_v28 }
  0xf6   :  { %v1826_v33 = vpop.f32.mrf.mxu0  ;;  %v1395_v34 = vpop.f32.mrf.mxu1 }
  0xf8   :  { %v1828_v35 = vpop.f32.mrf.mxu0  ;;  %v1396_v36 = vpop.f32.mrf.mxu1 }
  0xf9   :  { %v1830_v37 = vadd.f32 %v1396_v36, %v1395_v34  ;;  %v1325_v34 = vadd.f32 %v1828_v35, %v1826_v33 }
  0xfa   :  { %v1326_v38 = vpop.f32.mrf.mxu0  ;;  %v1832_v39 = vpop.f32.mrf.mxu1 }
  0xfc   :  { %v1327_v40 = vpop.f32.mrf.mxu0  ;;  %v1834_v41 = vpop.f32.mrf.mxu1 }
  0xfd   :  { %v1328_v63 = vadd.f32 %v1327_v40, %v1326_v38 }
  0xfe   :  { %v1329_v42 = vpop.f32.mrf.mxu0  ;;  %v1836_v43 = vpop.f32.mrf.mxu1 }
 0x100   :  { %v1330_v44 = vpop.f32.mrf.mxu0  ;;  %v1838_v45 = vpop.f32.mrf.mxu1 }
 0x101   :  { %v1331_v19 = vadd.f32 %v1330_v44, %v1329_v42 }
 0x102   :  { %v1840_v47 = vpop.f32.mrf.mxu0  ;;  %v1446_v48 = vpop.f32.mrf.mxu1 }
 0x103   :  { %v799_v51 = vadd.f32 %v1446_v48, %v1316_v46 }
 0x104   :  { %v1847_v52 = vpop.f32.mrf.mxu0  ;;  %v790_v53 = vpop.f32.mrf.mxu1 }
 0x105   :  { %v1025_v55 = vadd.f32 %v1845_v49, %v799_v51  ;;  %v791_v56 = vadd.f32 %v1310_v50, %v790_v53  ;;  %v1334_v33 = vadd.f32 %v1847_v52, %v1840_v47 }
 0x106   :  { %v1850_v57 = vpop.f32.mrf.mxu0  ;;  %v1447_v58 = vpop.f32.mrf.mxu1 }
 0x107   :  { %vm1057_vm0 = vcmp.ge.f32.partialorder %v1025_v55, 0.0  ;;  %v1089_v59 = vmul.f32 0.2, %v1025_v55  ;;  %v1023_v60 = vadd.f32 %v1845_v49, %v791_v56  ;;  %v802_v61 = vadd.f32 %v1447_v58, %v1319_v54 }
 0x108   :  { %v1853_v0 = vpop.f32.mrf.mxu0  ;;  %v793_v1 = vpop.f32.mrf.mxu1 }
 0x109   :  { %v1121_v2 = vsel %vm1057_vm0, %v1025_v55, %v1089_v59  ;;  %vm1055_vm1 = vcmp.ge.f32.partialorder %v1023_v60, 0.0  ;;  %v1087_v3 = vmul.f32 0.2, %v1023_v60  ;;  %v1026_v4 = vadd.f32 %v1845_v49, %v802_v61 }
 0x10a   :  { %v1153_v6 = vmul.f32 1.4142135, %v1121_v2  ;;  %v794_v7 = vadd.f32 %v1313_v62, %v793_v1  ;;  %v1338_v8 = vpop.f32.mrf.mxu0  ;;  %v1450_v9 = vpop.f32.mrf.mxu1 }
 0x10b   :  { %v1119_v10 = vsel %vm1055_vm1, %v1023_v60, %v1087_v3  ;;  %vm1058_vm2 = vcmp.ge.f32.partialorder %v1026_v4, 0.0  ;;  %v1090_v11 = vmul.f32 0.2, %v1026_v4  ;;  %v815_v14 = vadd.f32 %v1450_v9, %v1328_v63 }
 0x10c   :  { %1185 = vst [vmem:[%s2006_s3 + $0x10] sm:$0xff] %v1153_v6  ;;  %v1151_v13 = vmul.f32 1.4142135, %v1119_v10  ;;  %v1024_v15 = vadd.f32 %v1845_v49, %v794_v7  ;;  %v1339_v16 = vpop.f32.mrf.mxu0  ;;  %v806_v18 = vpop.f32.mrf.mxu1 }
 0x10d   :  { %v1122_v20 = vsel %vm1058_vm2, %v1026_v4, %v1090_v11  ;;  %v1029_v21 = vadd.f32 %v1845_v49, %v815_v14  ;;  %v807_v23 = vadd.f32 %v1322_v5, %v806_v18  ;;  %v1340_v38 = vadd.f32 %v1339_v16, %v1338_v8 }
 0x10e   :  { %1183 = vst [vmem:[%s2006_s3] sm:$0xff] %v1151_v13  ;;  %v1154_v24 = vmul.f32 1.4142135, %v1122_v20  ;;  %vm1056_vm3 = vcmp.ge.f32.partialorder %v1024_v15, 0.0  ;;  %v1088_v25 = vmul.f32 0.2, %v1024_v15  ;;  %v1341_v26 = vpop.f32.mrf.mxu0  ;;  %v1451_v28 = vpop.f32.mrf.mxu1  ;;  %v1337_v8 = vadd.f32 %v1853_v0, %v1850_v57 }
 0x10f   :  { %vm1061_vm4 = vcmp.ge.f32.partialorder %v1029_v21, 0.0  ;;  %v1093_v29 = vmul.f32 0.2, %v1029_v21  ;;  %v1027_v30 = vadd.f32 %v1845_v49, %v807_v23  ;;  %v818_v31 = vadd.f32 %v1451_v28, %v1331_v19 }
 0x110   :  { %1186 = vst [vmem:[%s2006_s3 + $0x18] sm:$0xff] %v1154_v24  ;;  %v1120_v36 = vsel %vm1056_vm3, %v1024_v15, %v1088_v25  ;;  %v1342_v40 = vpop.f32.mrf.mxu0  ;;  %v809_v42 = vpop.f32.mrf.mxu1 }
 0x111   :  { %v1152_v44 = vmul.f32 1.4142135, %v1120_v36  ;;  %v1125_v46 = vsel %vm1061_vm4, %v1029_v21, %v1093_v29  ;;  %vm1059_vm5 = vcmp.ge.f32.partialorder %v1027_v30, 0.0  ;;  %v1091_v48 = vmul.f32 0.2, %v1027_v30 }
 0x112   :  { %v1157_v50 = vmul.f32 1.4142135, %v1125_v46  ;;  %v1030_v51 = vadd.f32 %v1845_v49, %v818_v31  ;;  %v810_v53 = vadd.f32 %v1325_v34, %v809_v42  ;;  %v1344_v54 = vpop.f32.mrf.mxu0  ;;  %v1454_v55 = vpop.f32.mrf.mxu1  ;;  %v1343_v1 = vadd.f32 %v1342_v40, %v1341_v26 }
 0x113   :  { %1184 = vst [vmem:[%s2006_s3 + $0x8] sm:$0xff] %v1152_v44  ;;  %v1123_v35 = vsel %vm1059_vm5, %v1027_v30, %v1091_v48  ;;  %v831_v56 = vadd.f32 %v1454_v55, %v1340_v38 }
 0x114   :  { %1189 = vst [vmem:[%s2006_s3 + $0x30] sm:$0xff] %v1157_v50  ;;  %v1155_v58 = vmul.f32 1.4142135, %v1123_v35  ;;  %vm1062_vm6 = vcmp.ge.f32.partialorder %v1030_v51, 0.0  ;;  %v1094_v59 = vmul.f32 0.2, %v1030_v51  ;;  %v1028_v60 = vadd.f32 %v1845_v49, %v810_v53  ;;  %v1345_v61 = vpop.f32.mrf.mxu0  ;;  %v822_v62 = vpop.f32.mrf.mxu1 }
 0x115   :  { %v1033_v63 = vadd.f32 %v1845_v49, %v831_v56  ;;  %v823_v47 = vadd.f32 %v1334_v33, %v822_v62  ;;  %v1346_v57 = vadd.f32 %v1345_v61, %v1344_v54 }
 0x116   :  { %1187 = vst [vmem:[%s2006_s3 + $0x20] sm:$0xff] %v1155_v58  ;;  %v1126_v52 = vsel %vm1062_vm6, %v1030_v51, %v1094_v59  ;;  %vm1060_vm7 = vcmp.ge.f32.partialorder %v1028_v60, 0.0  ;;  %v1092_v2 = vmul.f32 0.2, %v1028_v60  ;;  %v1347_v3 = vpop.f32.mrf.mxu0  ;;  %v1455_v4 = vpop.f32.mrf.mxu1 }
 0x117   :  { %v1158_v5 = vmul.f32 1.4142135, %v1126_v52  ;;  %vm1065_vm8 = vcmp.ge.f32.partialorder %v1033_v63, 0.0  ;;  %v1097_v6 = vmul.f32 0.2, %v1033_v63  ;;  %v1031_v7 = vadd.f32 %v1845_v49, %v823_v47 }
 0x118   :  { %v1124_v9 = vsel %vm1060_vm7, %v1028_v60, %v1092_v2  ;;  %v834_v10 = vadd.f32 %v1455_v4, %v1343_v1  ;;  %v1348_v11 = vpop.f32.mrf.mxu0  ;;  %v825_v14 = vpop.f32.mrf.mxu1 }
 0x119   :  { %1190 = vst [vmem:[%s2006_s3 + $0x38] sm:$0xff] %v1158_v5  ;;  %v1156_v13 = vmul.f32 1.4142135, %v1124_v9  ;;  %v1129_v15 = vsel %vm1065_vm8, %v1033_v63, %v1097_v6  ;;  %vm1063_vm9 = vcmp.ge.f32.partialorder %v1031_v7, 0.0  ;;  %v1095_v16 = vmul.f32 0.2, %v1031_v7 }
 0x11a   :  { %v1161_v18 = vmul.f32 1.4142135, %v1129_v15  ;;  %v1034_v19 = vadd.f32 %v1845_v49, %v834_v10  ;;  %v826_v20 = vadd.f32 %v1337_v8, %v825_v14  ;;  %v1350_v21 = vpop.f32.mrf.mxu0  ;;  %v1458_v23 = vpop.f32.mrf.mxu1  ;;  %v1349_v48 = vadd.f32 %v1348_v11, %v1347_v3 }
 0x11b   :  { %1188 = vst [vmem:[%s2006_s3 + $0x28] sm:$0xff] %v1156_v13  ;;  %v1127_v0 = vsel %vm1063_vm9, %v1031_v7, %v1095_v16 }
 0x11c   :  { %1193 = vst [vmem:[%s2006_s3 + $0x50] sm:$0xff] %v1161_v18  ;;  %v1159_v24 = vmul.f32 1.4142135, %v1127_v0  ;;  %vm1066_vm10 = vcmp.ge.f32.partialorder %v1034_v19, 0.0  ;;  %v1098_v25 = vmul.f32 0.2, %v1034_v19  ;;  %v1032_v26 = vadd.f32 %v1845_v49, %v826_v20  ;;  %v1351_v28 = vpop.f32.mrf.mxu0  ;;  %v838_v29 = vpop.f32.mrf.mxu1 }
 0x11d   :  { %v1352_v30 = vadd.f32 %v1351_v28, %v1350_v21  ;;  %v839_v31 = vadd.f32 %v1346_v57, %v838_v29 }
 0x11e   :  { %1191 = vst [vmem:[%s2006_s3 + $0x40] sm:$0xff] %v1159_v24  ;;  %v1130_v34 = vsel %vm1066_vm10, %v1034_v19, %v1098_v25  ;;  %vm1064_vm11 = vcmp.ge.f32.partialorder %v1032_v26, 0.0  ;;  %v1096_v36 = vmul.f32 0.2, %v1032_v26  ;;  %v1353_v38 = vpop.f32.mrf.mxu0  ;;  %v1459_v40 = vpop.f32.mrf.mxu1 }
 0x11f   :  { %v1162_v42 = vmul.f32 1.4142135, %v1130_v34  ;;  %v847_v44 = vadd.f32 %v1458_v23, %v1352_v30  ;;  %v1035_v46 = vadd.f32 %v1845_v49, %v839_v31 }
 0x120   :  { %v1128_v50 = vsel %vm1064_vm11, %v1032_v26, %v1096_v36  ;;  %v1354_v51 = vpop.f32.mrf.mxu0  ;;  %v841_v53 = vpop.f32.mrf.mxu1 }
 0x121   :  { %1194 = vst [vmem:[%s2006_s3 + $0x58] sm:$0xff] %v1162_v42  ;;  %v1160_v54 = vmul.f32 1.4142135, %v1128_v50  ;;  %v1037_v55 = vadd.f32 %v1845_v49, %v847_v44  ;;  %vm1067_vm12 = vcmp.ge.f32.partialorder %v1035_v46, 0.0  ;;  %v1099_v33 = vmul.f32 0.2, %v1035_v46 }
 0x122   :  { %v1355_v35 = vadd.f32 %v1354_v51, %v1353_v38  ;;  %v842_v56 = vadd.f32 %v1349_v48, %v841_v53  ;;  %v1356_v58 = vpop.f32.mrf.mxu0  ;;  %v1462_v59 = vpop.f32.mrf.mxu1 }
 0x123   :  { %1192 = vst [vmem:[%s2006_s3 + $0x48] sm:$0xff] %v1160_v54  ;;  %vm1069_vm13 = vcmp.ge.f32.partialorder %v1037_v55, 0.0  ;;  %v1101_v60 = vmul.f32 0.2, %v1037_v55  ;;  %v1131_v61 = vsel %vm1067_vm12, %v1035_v46, %v1099_v33 }
 0x124   :  { %v1163_v62 = vmul.f32 1.4142135, %v1131_v61  ;;  %v850_v63 = vadd.f32 %v1459_v40, %v1355_v35  ;;  %v1036_v47 = vadd.f32 %v1845_v49, %v842_v56  ;;  %v1357_v52 = vpop.f32.mrf.mxu0  ;;  %v854_v1 = vpop.f32.mrf.mxu1 }
 0x125   :  { %v1133_v2 = vsel %vm1069_vm13, %v1037_v55, %v1101_v60  ;;  %v1358_v3 = vadd.f32 %v1357_v52, %v1356_v58 }
 0x126   :  { %v1165_v4 = vmul.f32 1.4142135, %v1133_v2  ;;  %1195 = vst [vmem:[%s2006_s3 + $0x60] sm:$0xff] %v1163_v62  ;;  %v1038_v5 = vadd.f32 %v1845_v49, %v850_v63  ;;  %vm1068_vm14 = vcmp.ge.f32.partialorder %v1036_v47, 0.0  ;;  %v1100_v6 = vmul.f32 0.2, %v1036_v47  ;;  %v1359_v7 = vpop.f32.mrf.mxu0  ;;  %v1463_v8 = vpop.f32.mrf.mxu1 }
 0x127   :  { %v855_v9 = vadd.f32 %v1358_v3, %v854_v1  ;;  %v1400_v2 = vadd.f32 %v1834_v41, %v1832_v39 }
 0x128   :  { %1197 = vst [vmem:[%s2006_s3 + $0x70] sm:$0xff] %v1165_v4  ;;  %vm1070_vm15 = vcmp.ge.f32.partialorder %v1038_v5, 0.0  ;;  %v1102_v10 = vmul.f32 0.2, %v1038_v5  ;;  %v1132_v11 = vsel %vm1068_vm14, %v1036_v47, %v1100_v6  ;;  %v1360_v14 = vpop.f32.mrf.mxu0  ;;  %v857_v13 = vpop.f32.mrf.mxu1 }
 0x129   :  { %v1164_v15 = vmul.f32 1.4142135, %v1132_v11  ;;  %v1039_v16 = vadd.f32 %v1845_v49, %v855_v9  ;;  %v1361_v18 = vadd.f32 %v1360_v14, %v1359_v7 }
 0x12a   :  { %v1134_v19 = vsel %vm1070_vm15, %v1038_v5, %v1102_v10  ;;  %v1362_v20 = vpop.f32.mrf.mxu0  ;;  %v1918_v21 = vpop.f32.mrf.mxu1 }
 0x12b   :  { %v1166_v23 = vmul.f32 1.4142135, %v1134_v19  ;;  %1196 = vst [vmem:[%s2006_s3 + $0x68] sm:$0xff] %v1164_v15  ;;  %vm1071_vm0 = vcmp.ge.f32.partialorder %v1039_v16, 0.0  ;;  %v1103_v57 = vmul.f32 0.2, %v1039_v16  ;;  %v858_v0 = vadd.f32 %v1361_v18, %v857_v13 }
 0x12c   :  { %v1363_v24 = vpop.f32.mrf.mxu0  ;;  %v870_v25 = vpop.f32.mrf.mxu1  ;;  %v1403_v19 = vadd.f32 %v1838_v45, %v1836_v43 }
 0x12d   :  { %1198 = vst [vmem:[%s2006_s3 + $0x78] sm:$0xff] %v1166_v23  ;;  %v1135_v26 = vsel %vm1071_vm0, %v1039_v16, %v1103_v57  ;;  %v1040_v28 = vadd.f32 %v1845_v49, %v858_v0  ;;  %v1364_v29 = vadd.f32 %v1363_v24, %v1362_v20 }
 0x12e   :  { %v1167_v30 = vmul.f32 1.4142135, %v1135_v26  ;;  %v1365_v31 = vpop.f32.mrf.mxu0  ;;  %v1927_v34 = vpop.f32.mrf.mxu1 }
 0x12f   :  { %vm1072_vm1 = vcmp.ge.f32.partialorder %v1040_v28, 0.0  ;;  %v1104_v36 = vmul.f32 0.2, %v1040_v28  ;;  %v863_v38 = vadd.f32 %v1462_v59, %v1364_v29 }
 0x130   :  { %1199 = vst [vmem:[%s2006_s3 + $0x80] sm:$0xff] %v1167_v30  ;;  %v1366_v40 = vpop.f32.mrf.mxu0  ;;  %v873_v42 = vpop.f32.mrf.mxu1 }
 0x131   :  { %v1136_v44 = vsel %vm1072_vm1, %v1040_v28, %v1104_v36  ;;  %v1041_v46 = vadd.f32 %v1845_v49, %v863_v38  ;;  %v1367_v48 = vadd.f32 %v1366_v40, %v1365_v31 }
 0x132   :  { %v1168_v50 = vmul.f32 1.4142135, %v1136_v44  ;;  %v1368_v51 = vpop.f32.mrf.mxu0  ;;  %v1470_v53 = vpop.f32.mrf.mxu1 }
 0x133   :  { %vm1073_vm2 = vcmp.ge.f32.partialorder %v1041_v46, 0.0  ;;  %v1105_v54 = vmul.f32 0.2, %v1041_v46  ;;  %v866_v55 = vadd.f32 %v1463_v8, %v1367_v48  ;;  %v895_v33 = vadd.f32 %v1470_v53, %v1820_v22 }
 0x134   :  { %1200 = vst [vmem:[%s2006_s3 + $0x88] sm:$0xff] %v1168_v50  ;;  %v1369_v35 = vpop.f32.mrf.mxu0  ;;  %v886_v56 = vpop.f32.mrf.mxu1 }
 0x135   :  { %v1137_v58 = vsel %vm1073_vm2, %v1041_v46, %v1105_v54  ;;  %v1042_v59 = vadd.f32 %v1845_v49, %v866_v55  ;;  %v1049_v60 = vadd.f32 %v1845_v49, %v895_v33  ;;  %v1370_v61 = vadd.f32 %v1369_v35, %v1368_v51 }
 0x136   :  { %v1169_v62 = vmul.f32 1.4142135, %v1137_v58  ;;  %v887_v63 = vadd.f32 %v1816_v12, %v886_v56  ;;  %v1371_v47 = vpop.f32.mrf.mxu0  ;;  %v1471_v52 = vpop.f32.mrf.mxu1 }
 0x137   :  { %vm1074_vm3 = vcmp.ge.f32.partialorder %v1042_v59, 0.0  ;;  %v1106_v1 = vmul.f32 0.2, %v1042_v59  ;;  %vm1081_vm4 = vcmp.ge.f32.partialorder %v1049_v60, 0.0  ;;  %v1113_v22 = vmul.f32 0.2, %v1049_v60 }
 0x138   :  { %1201 = vst [vmem:[%s2006_s3 + $0x90] sm:$0xff] %v1169_v62  ;;  %v871_v3 = vadd.f32 %v1370_v61, %v870_v25  ;;  %v1047_v4 = vadd.f32 %v1845_v49, %v887_v63  ;;  %v898_v5 = vadd.f32 %v1471_v52, %v1822_v27  ;;  %v1372_v6 = vpop.f32.mrf.mxu0  ;;  %v889_v12 = vpop.f32.mrf.mxu1 }
 0x139   :  { %v1138_v7 = vsel %vm1074_vm3, %v1042_v59, %v1106_v1  ;;  %v1145_v8 = vsel %vm1081_vm4, %v1049_v60, %v1113_v22  ;;  %v1373_v9 = vadd.f32 %v1372_v6, %v1371_v47  ;;  %v890_v10 = vadd.f32 %v1818_v17, %v889_v12 }
 0x13a   :  { %v1170_v11 = vmul.f32 1.4142135, %v1138_v7  ;;  %v1177_v14 = vmul.f32 1.4142135, %v1145_v8  ;;  %v1043_v39 = vadd.f32 %v1845_v49, %v871_v3  ;;  %vm1079_vm5 = vcmp.ge.f32.partialorder %v1047_v4, 0.0  ;;  %v1374_v41 = vpop.f32.mrf.mxu0  ;;  %v1474_v13 = vpop.f32.mrf.mxu1 }
 0x13b   :  { %v1111_v15 = vmul.f32 0.2, %v1047_v4  ;;  %v1050_v16 = vadd.f32 %v1845_v49, %v898_v5  ;;  %v874_v18 = vadd.f32 %v1373_v9, %v873_v42  ;;  %v1048_v27 = vadd.f32 %v1845_v49, %v890_v10 }
 0x13c   :  { %1202 = vst [vmem:[%s2006_s3 + $0x98] sm:$0xff] %v1170_v11  ;;  %1209 = vst [vmem:[%s2006_s3 + $0xd0] sm:$0xff] %v1177_v14  ;;  %vm1075_vm6 = vcmp.ge.f32.partialorder %v1043_v39, 0.0  ;;  %v1107_v17 = vmul.f32 0.2, %v1043_v39  ;;  %v911_v20 = vadd.f32 %v1474_v13, %v1400_v2  ;;  %v1375_v23 = vpop.f32.mrf.mxu0  ;;  %v902_v57 = vpop.f32.mrf.mxu1 }
 0x13d   :  { %v1143_v0 = vsel %vm1079_vm5, %v1047_v4, %v1111_v15  ;;  %vm1082_vm7 = vcmp.ge.f32.partialorder %v1050_v16, 0.0  ;;  %v1114_v24 = vmul.f32 0.2, %v1050_v16  ;;  %v1044_v25 = vadd.f32 %v1845_v49, %v874_v18 }
 0x13e   :  { %v1139_v26 = vsel %vm1075_vm6, %v1043_v39, %v1107_v17  ;;  %v1175_v43 = vmul.f32 1.4142135, %v1143_v0  ;;  %vm1080_vm8 = vcmp.ge.f32.partialorder %v1048_v27, 0.0  ;;  %v1112_v45 = vmul.f32 0.2, %v1048_v27  ;;  %v1377_v28 = vpop.f32.mrf.mxu0  ;;  %v1475_v29 = vpop.f32.mrf.mxu1 }
 0x13f   :  { %v1171_v30 = vmul.f32 1.4142135, %v1139_v26  ;;  %v1146_v31 = vsel %vm1082_vm7, %v1050_v16, %v1114_v24  ;;  %vm1076_vm9 = vcmp.ge.f32.partialorder %v1044_v25, 0.0  ;;  %v1108_v36 = vmul.f32 0.2, %v1044_v25 }
 0x140   :  { %1207 = vst [vmem:[%s2006_s3 + $0xc0] sm:$0xff] %v1175_v43  ;;  %v1178_v38 = vmul.f32 1.4142135, %v1146_v31  ;;  %v1144_v40 = vsel %vm1080_vm8, %v1048_v27, %v1112_v45  ;;  %v1053_v42 = vadd.f32 %v1845_v49, %v911_v20  ;;  %v1376_v44 = vadd.f32 %v1375_v23, %v1374_v41  ;;  %v1378_v46 = vpop.f32.mrf.mxu0  ;;  %v905_v48 = vpop.f32.mrf.mxu1 }
 0x141   :  { %1203 = vst [vmem:[%s2006_s3 + $0xa0] sm:$0xff] %v1171_v30  ;;  %v1140_v50 = vsel %vm1076_vm9, %v1044_v25, %v1108_v36  ;;  %v1176_v51 = vmul.f32 1.4142135, %v1144_v40  ;;  %v903_v53 = vadd.f32 %v1824_v32, %v902_v57  ;;  %v914_v54 = vadd.f32 %v1475_v29, %v1403_v19 }
 0x142   :  { %1210 = vst [vmem:[%s2006_s3 + $0xd8] sm:$0xff] %v1178_v38  ;;  %v1172_v55 = vmul.f32 1.4142135, %v1140_v50  ;;  %vm1085_vm10 = vcmp.ge.f32.partialorder %v1053_v42, 0.0  ;;  %v1117_v33 = vmul.f32 0.2, %v1053_v42  ;;  %v879_v35 = vadd.f32 %v1918_v21, %v1376_v44 }
 0x143   :  { %1208 = vst [vmem:[%s2006_s3 + $0xc8] sm:$0xff] %v1176_v51  ;;  %v1051_v56 = vadd.f32 %v1845_v49, %v903_v53  ;;  %v1054_v58 = vadd.f32 %v1845_v49, %v914_v54  ;;  %v1379_v59 = vadd.f32 %v1378_v46, %v1377_v28  ;;  %v906_v32 = vadd.f32 %v1830_v37, %v905_v48 }
 0x144   :  { %1204 = vst [vmem:[%s2006_s3 + $0xa8] sm:$0xff] %v1172_v55  ;;  %v1149_v60 = vsel %vm1085_vm10, %v1053_v42, %v1117_v33  ;;  %v1045_v61 = vadd.f32 %v1845_v49, %v879_v35 }
 0x145   :  { %v1181_v62 = vmul.f32 1.4142135, %v1149_v60  ;;  %vm1083_vm11 = vcmp.ge.f32.partialorder %v1051_v56, 0.0  ;;  %v1115_v21 = vmul.f32 0.2, %v1051_v56  ;;  %vm1086_vm12 = vcmp.ge.f32.partialorder %v1054_v58, 0.0 }
 0x146   :  { %vm1077_vm13 = vcmp.ge.f32.partialorder %v1045_v61, 0.0  ;;  %v1109_v63 = vmul.f32 0.2, %v1045_v61  ;;  %v1118_v47 = vmul.f32 0.2, %v1054_v58  ;;  %v882_v52 = vadd.f32 %v1927_v34, %v1379_v59 }
 0x147   :  { %1213 = vst [vmem:[%s2006_s3 + $0xf0] sm:$0xff] %v1181_v62  ;;  %v1147_v37 = vsel %vm1083_vm11, %v1051_v56, %v1115_v21  ;;  %v1052_v1 = vadd.f32 %v1845_v49, %v906_v32 }
 0x148   :  { %v1141_v22 = vsel %vm1077_vm13, %v1045_v61, %v1109_v63  ;;  %v1179_v2 = vmul.f32 1.4142135, %v1147_v37  ;;  %v1150_v3 = vsel %vm1086_vm12, %v1054_v58, %v1118_v47  ;;  %v1046_v4 = vadd.f32 %v1845_v49, %v882_v52 }
 0x149   :  { %v1173_v5 = vmul.f32 1.4142135, %v1141_v22  ;;  %v1182_v6 = vmul.f32 1.4142135, %v1150_v3  ;;  %vm1084_vm14 = vcmp.ge.f32.partialorder %v1052_v1, 0.0 }
 0x14a   :  { %1211 = vst [vmem:[%s2006_s3 + $0xe0] sm:$0xff] %v1179_v2  ;;  %vm1078_vm15 = vcmp.ge.f32.partialorder %v1046_v4, 0.0  ;;  %v1110_v34 = vmul.f32 0.2, %v1046_v4  ;;  %v1116_v12 = vmul.f32 0.2, %v1052_v1 }
 0x14b   :  { %1205 = vst [vmem:[%s2006_s3 + $0xb0] sm:$0xff] %v1173_v5  ;;  %1214 = vst [vmem:[%s2006_s3 + $0xf8] sm:$0xff] %v1182_v6 }
 0x14c   :  { %v1142_v7 = vsel %vm1078_vm15, %v1046_v4, %v1110_v34  ;;  %v1148_v49 = vsel %vm1084_vm14, %v1052_v1, %v1116_v12 }
 0x14d   :  { %v1174_v8 = vmul.f32 1.4142135, %v1142_v7  ;;  %v1180_v9 = vmul.f32 1.4142135, %v1148_v49 }
 0x14f   :  { %1206 = vst [vmem:[%s2006_s3 + $0xb8] sm:$0xff] %v1174_v8  ;;  %1212 = vst [vmem:[%s2006_s3 + $0xe8] sm:$0xff] %v1180_v9 }

// kernel: discriminator_forward.21
= control target key start
LH: loop header
LB: loop body
LE: loop exit
PB: predicated region body
PF: predicated region fallthrough
CT: control target
= control target key end

     0   :  { %s706_s6 = smov 0   ;;  %s708_s7 = smov 0   ;;  %s906_s0 = inlined_call_operand.vmem [shape: f32[4,12,12,32], index: 0, kind: input, shape index: {}]   ;;  %s907_s1 = inlined_call_operand.vmem [shape: f32[4,9,9,32], index: 1, kind: output, shape index: {}]  }
   0x1   :  { %s710_s8 = smov 0  }
   0x2 LB: > { %s23_s9 = sadd.s32 1, %s690_s7  ;;  %p641_p0 = scmp.ge.s32.totalorder %s694_s8, 1  ;;  %s694_s8 = sphi %s710_s8, %s11_s8   ;;  %s690_s7 = sphi %s708_s7, %s909_s7   ;;  %s686_s6 = sphi %s706_s6, %s908_s6  }
   0x3   : > { %p25_p1 = scmp.ge.s32.totalorder %s23_s9, 4  ;;  %p106_p2 = scmp.lt.s32.totalorder %s694_s8, 5 }
   0x5   : > { %s911_s9 = smov (%p25_p1, %s23_s9), 0  ;;  %p107_p3 = pnand %p641_p0, %p106_p2 }
   0x6   : > { %p132_p4 = scmp.lt.s32.totalorder (!%p107_p3), %s686_s6, 3 }
   0x7   : > { %110 = sbr.rel (%p107_p3) target bundleno = 94 (0x5e), region = 24 }
   0xc   : > { %s913_s6 = smov (!%p132_p4, %s686_s6), 3  ;;  %vm324_vm0 = vcmask 1046528   ;;  %vm388_vm1 = vcmask 1045504   ;;  %vm470_vm2 = vcmask 1044480   ;;  %vm536_vm3 = vcmask 253952  }
   0xd   : > { %s646_s10 = smul.u32 192, %s913_s6  ;;  %vm534_vm4 = vcmask 261120  }
   0xe   : > { %s647_s14 = smul.u32 144, %s913_s6 }
   0xf   : > { %s730_s13 = scalar_lea.vmem %s906_s0, %s646_s10 }
  0x10   : > { %v148_v0 = vld [vmem:[%s730_s13] sm:$0xff]  ;;  %v149_v1 = vld [vmem:[%s730_s13 + $0x8] sm:$0xf]  ;;  %v150_v2 = vld [vmem:[%s730_s13 + $0x10] sm:$0xff]  ;;  %s780_s17 = scalar_lea.vmem %s907_s1, %s647_s14 }
  0x11   : > { %v151_v3 = vld [vmem:[%s730_s13 + $0x18] sm:$0xf]  ;;  %v152_v4 = vld [vmem:[%s730_s13 + $0x20] sm:$0xff]  ;;  %v153_v5 = vld [vmem:[%s730_s13 + $0x28] sm:$0xf]  ;;  %v172_v6 = vmul.f32 0.125, %v148_v0 }
  0x12   : > { %v154_v7 = vld [vmem:[%s730_s13 + $0x30] sm:$0xff]  ;;  %v155_v8 = vld [vmem:[%s730_s13 + $0x38] sm:$0xf]  ;;  %v173_v9 = vmul.f32 0.125, %v149_v1  ;;  %v190_v10 = vmul.f32 0.375, %v150_v2  ;;  %v191_v11 = vmul.f32 0.375, %v151_v3 }
  0x13   : > { %v740_v12 = vmul.f32 0.125, %v154_v7  ;;  %v742_v13 = vmul.f32 0.125, %v155_v8  ;;  %v192_v14 = vmul.f32 0.375, %v152_v4  ;;  %v193_v15 = vmul.f32 0.375, %v153_v5  ;;  %v156_v16 = vld [vmem:[%s730_s13 + $0x40] sm:$0xff]  ;;  %v746_v17 = vld [vmem:[%s730_s13 + $0x50] sm:$0xff] }
  0x14   : > { %v208_v18 = vadd.f32 %v190_v10, %v172_v6  ;;  %v209_v19 = vadd.f32 %v191_v11, %v173_v9  ;;  %v157_v20 = vld [vmem:[%s730_s13 + $0x48] sm:$0xf]  ;;  %v174_v21 = vmul.f32 0.125, %v150_v2  ;;  %v175_v22 = vmul.f32 0.125, %v151_v3  ;;  %v750_v23 = vld [vmem:[%s730_s13 + $0x58] sm:$0xf] }
  0x15   : > { %v752_v24 = vmul.f32 0.125, %v156_v16  ;;  %v754_v25 = vmul.f32 0.125, %v157_v20  ;;  %v194_v26 = vmul.f32 0.375, %v154_v7  ;;  %v195_v27 = vmul.f32 0.375, %v155_v8 }
  0x16   : > { %v228_v28 = vadd.f32 %v208_v18, %v192_v14  ;;  %v229_v29 = vadd.f32 %v209_v19, %v193_v15  ;;  %v210_v30 = vadd.f32 %v192_v14, %v174_v21  ;;  %v211_v31 = vadd.f32 %v193_v15, %v175_v22  ;;  %v161_v19 = vld [vmem:[%s730_s13 + $0x68] sm:$0xf] }
  0x17   : > { %v176_v32 = vmul.f32 0.125, %v152_v4  ;;  %v177_v33 = vmul.f32 0.125, %v153_v5  ;;  %v757_v34 = vmul.f32 0.125, %v746_v17  ;;  %v760_v35 = vmul.f32 0.125, %v750_v23  ;;  %v160_v4 = vld [vmem:[%s730_s13 + $0x60] sm:$0xff] }
  0x18   : > { %v252_v36 = vadd.f32 %v228_v28, %v740_v12  ;;  %v253_v37 = vadd.f32 %v229_v29, %v742_v13  ;;  %v230_v38 = vadd.f32 %v210_v30, %v194_v26  ;;  %v231_v39 = vadd.f32 %v211_v31, %v195_v27 }
  0x19   : > { %v764_v40 = vmul.f32 0.375, %v156_v16  ;;  %v766_v41 = vmul.f32 0.375, %v157_v20  ;;  %v212_v42 = vadd.f32 %v194_v26, %v176_v32  ;;  %v213_v43 = vadd.f32 %v195_v27, %v177_v33 }
  0x1a   : > { %v270_v44 = vmul.f32 0.125, %v252_v36  ;;  %v271_v45 = vmul.f32 0.125, %v253_v37  ;;  %v288_v46 = vmul.f32 0.375, %v252_v36  ;;  %v289_v47 = vmul.f32 0.375, %v253_v37 }
  0x1b   : > { %v254_v48 = vadd.f32 %v230_v38, %v752_v24  ;;  %v255_v49 = vadd.f32 %v231_v39, %v754_v25  ;;  %v232_v50 = vadd.f32 %v212_v42, %v764_v40  ;;  %v233_v51 = vadd.f32 %v213_v43, %v766_v41 }
  0x1c   : > { %v325_v52 = vrot.slane %v288_v46, 1  ;;  %v326_v53 = vrot.slane %v289_v47, 1  ;;  %v389_v54 = vrot.slane %v288_v46, 2  ;;  %v390_v55 = vrot.slane %v289_v47, 2 }
  0x1d   : > { %v471_v56 = vrot.slane %v270_v44, 3  ;;  %v472_v57 = vrot.slane %v271_v45, 3  ;;  %v272_v58 = vmul.f32 0.125, %v254_v48  ;;  %v273_v59 = vmul.f32 0.125, %v255_v49 }
  0x1e   : > { %v327_v60 = vsel %vm324_vm0, %v325_v52, %v326_v53  ;;  %v391_v61 = vsel %vm388_vm1, %v389_v54, %v390_v55  ;;  %v371_v62 = vadd.f32 %v326_v53, %v271_v45  ;;  %v290_v63 = vmul.f32 0.375, %v254_v48  ;;  %v162_v48 = vld [vmem:[%s730_s13 + $0x70] sm:$0xff]  ;;  %v163_v52 = vld [vmem:[%s730_s13 + $0x78] sm:$0xf] }
  0x1f   : > { %v370_v0 = vadd.f32 %v327_v60, %v270_v44  ;;  %v473_v1 = vsel %vm470_vm2, %v471_v56, %v472_v57  ;;  %v291_v2 = vmul.f32 0.375, %v255_v49  ;;  %v474_v3 = vrot.slane %v272_v58, 3 }
  0x20   : > { %v435_v5 = vadd.f32 %v390_v55, %v371_v62  ;;  %v328_v6 = vrot.slane %v290_v63, 1  ;;  %v392_v7 = vrot.slane %v290_v63, 2  ;;  %v475_v8 = vrot.slane %v273_v59, 3 }
  0x21   : > { %v434_v9 = vadd.f32 %v391_v61, %v370_v0  ;;  %v329_v10 = vrot.slane %v291_v2, 1  ;;  %v393_v11 = vrot.slane %v291_v2, 2  ;;  %v256_v14 = vadd.f32 %v232_v50, %v757_v34 }
  0x22   : > { %v517_v15 = vadd.f32 %v472_v57, %v435_v5  ;;  %v476_v16 = vsel %vm470_vm2, %v474_v3, %v475_v8  ;;  %v257_v18 = vadd.f32 %v233_v51, %v760_v35  ;;  %v786_v20 = vmul.f32 0.125, %v160_v4 }
  0x23   : > { %v516_v21 = vadd.f32 %v473_v1, %v434_v9  ;;  %v330_v22 = vsel %vm324_vm0, %v328_v6, %v329_v10  ;;  %v394_v26 = vsel %vm388_vm1, %v392_v7, %v393_v11  ;;  %v373_v27 = vadd.f32 %v329_v10, %v273_v59 }
  0x24   : > { %537 = vst.msk [vmem:[%s780_s17 + $0x8] sm:$0x1] %vm536_vm3, %v517_v15  ;;  %v372_v28 = vadd.f32 %v330_v22, %v272_v58  ;;  %v274_v29 = vmul.f32 0.125, %v256_v14  ;;  %v275_v30 = vmul.f32 0.125, %v257_v18  ;;  %v292_v31 = vmul.f32 0.375, %v256_v14 }
  0x25   : > { %535 = vst.msk [vmem:[%s780_s17] sm:$0xff] %vm534_vm4, %v516_v21  ;;  %v437_v32 = vadd.f32 %v393_v11, %v373_v27  ;;  %v293_v33 = vmul.f32 0.375, %v257_v18  ;;  %v794_v36 = vmul.f32 0.125, %v161_v19  ;;  %v198_v37 = vmul.f32 0.375, %v746_v17 }
  0x26   : > { %v436_v38 = vadd.f32 %v394_v26, %v372_v28  ;;  %v331_v39 = vrot.slane %v292_v31, 1  ;;  %v395_v42 = vrot.slane %v292_v31, 2  ;;  %v477_v43 = vrot.slane %v274_v29, 3 }
  0x27   : > { %v519_v44 = vadd.f32 %v475_v8, %v437_v32  ;;  %v332_v45 = vrot.slane %v293_v33, 1  ;;  %v396_v46 = vrot.slane %v293_v33, 2  ;;  %v478_v47 = vrot.slane %v275_v30, 3 }
  0x28   : > { %v518_v49 = vadd.f32 %v476_v16, %v436_v38  ;;  %v199_v50 = vmul.f32 0.375, %v750_v23  ;;  %v214_v51 = vadd.f32 %v764_v40, %v740_v12  ;;  %v215_v17 = vadd.f32 %v766_v41, %v742_v13  ;;  %v814_v12 = vld [vmem:[%s730_s13 + $0x80] sm:$0xff]  ;;  %v817_v13 = vld [vmem:[%s730_s13 + $0x88] sm:$0xf] }
  0x29   : > { %539 = vst.msk [vmem:[%s780_s17 + $0x18] sm:$0x1] %vm536_vm3, %v519_v44  ;;  %v333_v53 = vsel %vm324_vm0, %v331_v39, %v332_v45  ;;  %v397_v54 = vsel %vm388_vm1, %v395_v42, %v396_v46  ;;  %v479_v55 = vsel %vm470_vm2, %v477_v43, %v478_v47  ;;  %v375_v56 = vadd.f32 %v332_v45, %v275_v30 }
  0x2a   : > { %538 = vst.msk [vmem:[%s780_s17 + $0x10] sm:$0xff] %vm534_vm4, %v518_v49  ;;  %v374_v57 = vadd.f32 %v333_v53, %v274_v29  ;;  %v234_v23 = vadd.f32 %v214_v51, %v198_v37  ;;  %v235_v58 = vadd.f32 %v215_v17, %v199_v50  ;;  %v811_v59 = vmul.f32 0.125, %v162_v48 }
  0x2b   : > { %v439_v40 = vadd.f32 %v396_v46, %v375_v56  ;;  %v819_v41 = vmul.f32 0.125, %v163_v52  ;;  %v200_v60 = vmul.f32 0.375, %v160_v4  ;;  %v201_v61 = vmul.f32 0.375, %v161_v19 }
  0x2c   : > { %v438_v62 = vadd.f32 %v397_v54, %v374_v57  ;;  %v258_v63 = vadd.f32 %v234_v23, %v786_v20  ;;  %v259_v0 = vadd.f32 %v235_v58, %v794_v36  ;;  %v216_v1 = vadd.f32 %v198_v37, %v752_v24 }
  0x2d   : > { %v521_v2 = vadd.f32 %v478_v47, %v439_v40  ;;  %v217_v3 = vadd.f32 %v199_v50, %v754_v25  ;;  %v826_v5 = vmul.f32 0.125, %v814_v12  ;;  %v829_v6 = vmul.f32 0.125, %v817_v13 }
  0x2e   : > { %v520_v7 = vadd.f32 %v479_v55, %v438_v62  ;;  %v276_v4 = vmul.f32 0.125, %v258_v63  ;;  %v277_v8 = vmul.f32 0.125, %v259_v0  ;;  %v294_v9 = vmul.f32 0.375, %v258_v63 }
  0x2f   : > { %541 = vst.msk [vmem:[%s780_s17 + $0x28] sm:$0x1] %vm536_vm3, %v521_v2  ;;  %v295_v10 = vmul.f32 0.375, %v259_v0  ;;  %v236_v11 = vadd.f32 %v216_v1, %v200_v60  ;;  %v237_v14 = vadd.f32 %v217_v3, %v201_v61  ;;  %v202_v15 = vmul.f32 0.375, %v162_v48 }
  0x30   : > { %540 = vst.msk [vmem:[%s780_s17 + $0x20] sm:$0xff] %vm534_vm4, %v520_v7  ;;  %v334_v24 = vrot.slane %v294_v9, 1  ;;  %v398_v25 = vrot.slane %v294_v9, 2  ;;  %v480_v16 = vrot.slane %v276_v4, 3  ;;  %v481_v18 = vrot.slane %v277_v8, 3 }
  0x31   : > { %v335_v19 = vrot.slane %v295_v10, 1  ;;  %v399_v21 = vrot.slane %v295_v10, 2  ;;  %v260_v22 = vadd.f32 %v236_v11, %v811_v59  ;;  %v261_v26 = vadd.f32 %v237_v14, %v819_v41 }
  0x32   : > { %v482_v27 = vsel %vm470_vm2, %v480_v16, %v481_v18  ;;  %v203_v28 = vmul.f32 0.375, %v163_v52  ;;  %v218_v29 = vadd.f32 %v200_v60, %v757_v34  ;;  %v219_v30 = vadd.f32 %v201_v61, %v760_v35 }
  0x33   : > { %v336_v31 = vsel %vm324_vm0, %v334_v24, %v335_v19  ;;  %v400_v32 = vsel %vm388_vm1, %v398_v25, %v399_v21  ;;  %v377_v33 = vadd.f32 %v335_v19, %v277_v8  ;;  %v278_v37 = vmul.f32 0.125, %v260_v22  ;;  %v166_v24 = vld [vmem:[%s730_s13 + $0x90] sm:$0xff] }
  0x34   : > { %v376_v38 = vadd.f32 %v336_v31, %v276_v4  ;;  %v279_v39 = vmul.f32 0.125, %v261_v26  ;;  %v296_v42 = vmul.f32 0.375, %v260_v22  ;;  %v297_v43 = vmul.f32 0.375, %v261_v26 }
  0x35   : > { %v441_v44 = vadd.f32 %v399_v21, %v377_v33  ;;  %v483_v45 = vrot.slane %v278_v37, 3  ;;  %v238_v46 = vadd.f32 %v218_v29, %v202_v15  ;;  %v239_v47 = vadd.f32 %v219_v30, %v203_v28  ;;  %v168_v33 = vld [vmem:[%s730_s13 + $0xa0] sm:$0xff] }
  0x36   : > { %v440_v48 = vadd.f32 %v400_v32, %v376_v38  ;;  %v337_v49 = vrot.slane %v296_v42, 1  ;;  %v338_v34 = vrot.slane %v297_v43, 1  ;;  %v401_v35 = vrot.slane %v296_v42, 2 }
  0x37   : > { %v523_v50 = vadd.f32 %v481_v18, %v441_v44  ;;  %v402_v51 = vrot.slane %v297_v43, 2  ;;  %v484_v17 = vrot.slane %v279_v39, 3  ;;  %v262_v52 = vadd.f32 %v238_v46, %v826_v5  ;;  %v169_v46 = vld [vmem:[%s730_s13 + $0xa8] sm:$0xf] }
  0x38   : > { %v522_v53 = vadd.f32 %v482_v27, %v440_v48  ;;  %v339_v54 = vsel %vm324_vm0, %v337_v49, %v338_v34  ;;  %v379_v55 = vadd.f32 %v338_v34, %v279_v39  ;;  %v263_v56 = vadd.f32 %v239_v47, %v829_v6 }
  0x39   : > { %543 = vst.msk [vmem:[%s780_s17 + $0x38] sm:$0x1] %vm536_vm3, %v523_v50  ;;  %v378_v57 = vadd.f32 %v339_v54, %v278_v37  ;;  %v403_v23 = vsel %vm388_vm1, %v401_v35, %v402_v51  ;;  %v485_v58 = vsel %vm470_vm2, %v483_v45, %v484_v17  ;;  %v280_v40 = vmul.f32 0.125, %v262_v52 }
  0x3a   : > { %542 = vst.msk [vmem:[%s780_s17 + $0x30] sm:$0xff] %vm534_vm4, %v522_v53  ;;  %v443_v60 = vadd.f32 %v402_v51, %v379_v55  ;;  %v281_v61 = vmul.f32 0.125, %v263_v56  ;;  %v298_v62 = vmul.f32 0.375, %v262_v52  ;;  %v299_v63 = vmul.f32 0.375, %v263_v56 }
  0x3b   : > { %v442_v0 = vadd.f32 %v403_v23, %v378_v57  ;;  %v486_v1 = vrot.slane %v280_v40, 3  ;;  %v204_v2 = vmul.f32 0.375, %v814_v12  ;;  %v205_v3 = vmul.f32 0.375, %v817_v13  ;;  %v167_v12 = vld [vmem:[%s730_s13 + $0x98] sm:$0xf] }
  0x3c   : > { %v525_v7 = vadd.f32 %v484_v17, %v443_v60  ;;  %v340_v4 = vrot.slane %v298_v62, 1  ;;  %v341_v8 = vrot.slane %v299_v63, 1  ;;  %v404_v9 = vrot.slane %v298_v62, 2 }
  0x3d   : > { %v524_v10 = vadd.f32 %v485_v58, %v442_v0  ;;  %v405_v11 = vrot.slane %v299_v63, 2  ;;  %v487_v14 = vrot.slane %v281_v61, 3  ;;  %v220_v25 = vadd.f32 %v202_v15, %v786_v20 }
  0x3e   : > { %545 = vst.msk [vmem:[%s780_s17 + $0x48] sm:$0x1] %vm536_vm3, %v525_v7  ;;  %v342_v16 = vsel %vm324_vm0, %v340_v4, %v341_v8  ;;  %v381_v18 = vadd.f32 %v341_v8, %v281_v61  ;;  %v221_v13 = vadd.f32 %v203_v28, %v794_v36  ;;  %v246_v19 = vmul.f32 0.125, %v166_v24 }
  0x3f   : > { %544 = vst.msk [vmem:[%s780_s17 + $0x40] sm:$0xff] %vm534_vm4, %v524_v10  ;;  %v380_v21 = vadd.f32 %v342_v16, %v280_v40  ;;  %v406_v22 = vsel %vm388_vm1, %v404_v9, %v405_v11  ;;  %v488_v26 = vsel %vm470_vm2, %v486_v1, %v487_v14  ;;  %v240_v27 = vadd.f32 %v220_v25, %v204_v2 }
  0x40   : > { %v445_v29 = vadd.f32 %v405_v11, %v381_v18  ;;  %v241_v20 = vadd.f32 %v221_v13, %v205_v3  ;;  %v247_v15 = vmul.f32 0.125, %v167_v12  ;;  %v206_v30 = vmul.f32 0.375, %v166_v24  ;;  %v171_v11 = vld [vmem:[%s730_s13 + $0xb8] sm:$0xf] }
  0x41   : > { %v444_v31 = vadd.f32 %v406_v22, %v380_v21  ;;  %v264_v32 = vadd.f32 %v246_v19, %v240_v27  ;;  %v207_v37 = vmul.f32 0.375, %v167_v12  ;;  %v222_v36 = vadd.f32 %v204_v2, %v811_v59  ;;  %v170_v2 = vld [vmem:[%s730_s13 + $0xb0] sm:$0xff] }
  0x42   : > { %v527_v28 = vadd.f32 %v487_v14, %v445_v29  ;;  %v265_v38 = vadd.f32 %v247_v15, %v241_v20  ;;  %v223_v39 = vadd.f32 %v205_v3, %v819_v41  ;;  %v248_v42 = vmul.f32 0.125, %v168_v33 }
  0x43   : > { %v526_v43 = vadd.f32 %v488_v26, %v444_v31  ;;  %v282_v44 = vmul.f32 0.125, %v264_v32  ;;  %v300_v45 = vmul.f32 0.375, %v264_v32  ;;  %v242_v47 = vadd.f32 %v222_v36, %v206_v30 }
  0x44   : > { %547 = vst.msk [vmem:[%s780_s17 + $0x58] sm:$0x1] %vm536_vm3, %v527_v28  ;;  %v283_v48 = vmul.f32 0.125, %v265_v38  ;;  %v301_v49 = vmul.f32 0.375, %v265_v38  ;;  %v243_v34 = vadd.f32 %v223_v39, %v207_v37  ;;  %v249_v35 = vmul.f32 0.125, %v169_v46 }
  0x45   : > { %546 = vst.msk [vmem:[%s780_s17 + $0x50] sm:$0xff] %vm534_vm4, %v526_v43  ;;  %v343_v50 = vrot.slane %v300_v45, 1  ;;  %v407_v59 = vrot.slane %v300_v45, 2  ;;  %v489_v51 = vrot.slane %v282_v44, 3  ;;  %v266_v17 = vadd.f32 %v248_v42, %v242_v47 }
  0x46   : > { %v344_v52 = vrot.slane %v301_v49, 1  ;;  %v408_v41 = vrot.slane %v301_v49, 2  ;;  %v490_v53 = vrot.slane %v283_v48, 3  ;;  %v267_v54 = vadd.f32 %v249_v35, %v243_v34 }
  0x47   : > { %v284_v55 = vmul.f32 0.125, %v266_v17  ;;  %v302_v56 = vmul.f32 0.375, %v266_v17  ;;  %v224_v57 = vadd.f32 %v206_v30, %v826_v5  ;;  %v225_v23 = vadd.f32 %v207_v37, %v829_v6 }
  0x48   : > { %v345_v58 = vsel %vm324_vm0, %v343_v50, %v344_v52  ;;  %v409_v40 = vsel %vm388_vm1, %v407_v59, %v408_v41  ;;  %v491_v60 = vsel %vm470_vm2, %v489_v51, %v490_v53  ;;  %v383_v61 = vadd.f32 %v344_v52, %v283_v48 }
  0x49   : > { %v382_v62 = vadd.f32 %v345_v58, %v282_v44  ;;  %v285_v63 = vmul.f32 0.125, %v267_v54  ;;  %v303_v0 = vmul.f32 0.375, %v267_v54  ;;  %v346_v1 = vrot.slane %v302_v56, 1 }
  0x4a   : > { %v447_v3 = vadd.f32 %v408_v41, %v383_v61  ;;  %v410_v7 = vrot.slane %v302_v56, 2  ;;  %v492_v4 = vrot.slane %v284_v55, 3  ;;  %v226_v5 = vmul.f32 0.375, %v168_v33 }
  0x4b   : > { %v446_v8 = vadd.f32 %v409_v40, %v382_v62  ;;  %v347_v6 = vrot.slane %v303_v0, 1  ;;  %v411_v9 = vrot.slane %v303_v0, 2  ;;  %v493_v10 = vrot.slane %v285_v63, 3 }
  0x4c   : > { %v529_v14 = vadd.f32 %v490_v53, %v447_v3  ;;  %v227_v24 = vmul.f32 0.375, %v169_v46  ;;  %v244_v25 = vadd.f32 %v226_v5, %v224_v57  ;;  %v250_v16 = vmul.f32 0.125, %v170_v2 }
  0x4d   : > { %v528_v18 = vadd.f32 %v491_v60, %v446_v8  ;;  %v348_v12 = vsel %vm324_vm0, %v346_v1, %v347_v6  ;;  %v412_v13 = vsel %vm388_vm1, %v410_v7, %v411_v9  ;;  %v385_v21 = vadd.f32 %v347_v6, %v285_v63 }
  0x4e   : > { %549 = vst.msk [vmem:[%s780_s17 + $0x68] sm:$0x1] %vm536_vm3, %v529_v14  ;;  %v384_v19 = vadd.f32 %v348_v12, %v284_v55  ;;  %v245_v22 = vadd.f32 %v227_v24, %v225_v23  ;;  %v251_v26 = vmul.f32 0.125, %v171_v11  ;;  %v494_v27 = vsel %vm470_vm2, %v492_v4, %v493_v10 }
  0x4f   : > { %548 = vst.msk [vmem:[%s780_s17 + $0x60] sm:$0xff] %vm534_vm4, %v528_v18  ;;  %v268_v29 = vadd.f32 %v250_v16, %v244_v25  ;;  %v449_v15 = vadd.f32 %v411_v9, %v385_v21 }
  0x50   : > { %v448_v20 = vadd.f32 %v412_v13, %v384_v19  ;;  %v269_v30 = vadd.f32 %v251_v26, %v245_v22 }
  0x51   : > { %v286_v31 = vmul.f32 0.125, %v268_v29  ;;  %v304_v32 = vmul.f32 0.375, %v268_v29  ;;  %v531_v37 = vadd.f32 %v493_v10, %v449_v15 }
  0x52   : > { %v530_v33 = vadd.f32 %v494_v27, %v448_v20  ;;  %v287_v36 = vmul.f32 0.125, %v269_v30  ;;  %v305_v28 = vmul.f32 0.375, %v269_v30 }
  0x53   : > { %v349_v38 = vrot.slane %v304_v32, 1  ;;  %v413_v39 = vrot.slane %v304_v32, 2  ;;  %551 = vst.msk [vmem:[%s780_s17 + $0x78] sm:$0x1] %vm536_vm3, %v531_v37  ;;  %v495_v44 = vrot.slane %v286_v31, 3 }
  0x54   : > { %550 = vst.msk [vmem:[%s780_s17 + $0x70] sm:$0xff] %vm534_vm4, %v530_v33  ;;  %v350_v42 = vrot.slane %v305_v28, 1  ;;  %v414_v43 = vrot.slane %v305_v28, 2  ;;  %v496_v45 = vrot.slane %v287_v36, 3 }
  0x56   : > { %v351_v46 = vsel %vm324_vm0, %v349_v38, %v350_v42  ;;  %v415_v47 = vsel %vm388_vm1, %v413_v39, %v414_v43  ;;  %v387_v48 = vadd.f32 %v350_v42, %v287_v36  ;;  %v497_v34 = vsel %vm470_vm2, %v495_v44, %v496_v45 }
  0x57   : > { %v386_v49 = vadd.f32 %v351_v46, %v286_v31 }
  0x58   : > { %v451_v35 = vadd.f32 %v414_v43, %v387_v48 }
  0x59   : > { %v450_v50 = vadd.f32 %v415_v47, %v386_v49 }
  0x5a   : > { %v533_v59 = vadd.f32 %v496_v45, %v451_v35 }
  0x5b   : > { %v532_v51 = vadd.f32 %v497_v34, %v450_v50 }
  0x5c   : > { %553 = vst.msk [vmem:[%s780_s17 + $0x88] sm:$0x1] %vm536_vm3, %v533_v59 }
  0x5d   : > { %552 = vst.msk [vmem:[%s780_s17 + $0x80] sm:$0xff] %vm534_vm4, %v532_v51 }
  0x5e PF: > { %s11_s8 = sadd.s32 1, %s694_s8   ;;  %s908_s6 = smov %s690_s7 }
  0x5f   : > { %p8_p5 = scmp.ge.s32.totalorder %s11_s8, 6   ;;  %s909_s7 = smov %s911_s9 }
  0x61   :  { %10 = sbr.rel (!%p8_p5) target bundleno = 2 (0x2), region = 54 }

// kernel: discriminator_forward.24
= control target key start
LH: loop header
LB: loop body
LE: loop exit
PB: predicated region body
PF: predicated region fallthrough
CT: control target
= control target key end

     0   :  { %s466_s1 = inlined_call_operand.vmem [shape: bf16[128,128], index: 1, kind: input, shape index: {}]   ;;  %s467_s0 = inlined_call_operand.vmem [shape: bf16[64,128], index: 0, kind: input, shape index: {}]   ;;  %s468_s2 = inlined_call_operand.vmem [shape: f32[1,128], index: 2, kind: input, shape index: {}]   ;;  %s469_s3 = inlined_call_operand.vmem [shape: f32[64,128], index: 3, kind: input, shape index: {}]   ;;  %s470_s4 = inlined_call_operand.vmem [shape: f32[64,128], index: 4, kind: output, shape index: {}]  }
   0x1   :  { %v342_v0 = vld [vmem:[%s466_s1 + $0x38] sm:$0xff]   ;;  %v343_v1 = vld [vmem:[%s466_s1 + $0x30] sm:$0xff]   ;;  %v344_v2 = vld [vmem:[%s466_s1 + $0x28] sm:$0xff]  }
   0x2   :  { %302 = vmatprep.subr.bf16.mxu0 %v342_v0  ;;  %326 = vmatprep.subr.bf16.mxu1 %v342_v0  ;;  %v345_v3 = vld [vmem:[%s466_s1 + $0x20] sm:$0xff]   ;;  %v351_v5 = vld [vmem:[%s467_s0 + $0x10] sm:$0xff]   ;;  %v346_v6 = vld [vmem:[%s466_s1 + $0x18] sm:$0xff]  }
   0x3   :  { %303 = vmatpush3.bf16.msra.mxu0 %v342_v0  ;;  %334 = vmatpush3.bf16.msra.mxu1 %v342_v0  ;;  %v350_v4 = vld [vmem:[%s467_s0] sm:$0xff]   ;;  %v347_v7 = vld [vmem:[%s466_s1 + $0x10] sm:$0xff]   ;;  %v348_v8 = vld [vmem:[%s466_s1 + $0x8] sm:$0xff]  }
   0x4   :  { %304 = vmatprep.subr.bf16.mxu0 %v343_v1  ;;  %327 = vmatprep.subr.bf16.mxu1 %v343_v1  ;;  %v349_v9 = vld [vmem:[%s466_s1] sm:$0xff]   ;;  %v352_v10 = vld [vmem:[%s467_s0 + $0x8] sm:$0xff]   ;;  %v353_v11 = vld [vmem:[%s467_s0 + $0x18] sm:$0xff]  }
   0x5   :  { %318 = vmatprep.mubr.bf16.mxu0 %v350_v4  ;;  %322 = vmatprep.mubr.bf16.mxu1 %v351_v5  ;;  %v289_v12 = vld [vmem:[%s468_s2] ss:$0 sm:$0xff]  ;;  %v243_v14 = vld [vmem:[%s469_s3 + $0x10] sm:$0xff]  ;;  %v244_v33 = vld [vmem:[%s469_s3 + $0x18] sm:$0xff] }
   0x6   :  { %v247_v16 = vld [vmem:[%s469_s3 + $0x30] sm:$0xff]  ;;  %v241_v20 = vld [vmem:[%s469_s3] sm:$0xff]  ;;  %v248_v34 = vld [vmem:[%s469_s3 + $0x38] sm:$0xff] }
   0x7   :  { %305 = vmatpush3.bf16.msra.mxu0 %v343_v1  ;;  %335 = vmatpush3.bf16.msra.mxu1 %v343_v1  ;;  %v245_v22 = vld [vmem:[%s469_s3 + $0x20] sm:$0xff]  ;;  %v242_v38 = vld [vmem:[%s469_s3 + $0x8] sm:$0xff] }
   0x8   :  { %306 = vmatprep.subr.bf16.mxu0 %v344_v2  ;;  %328 = vmatprep.subr.bf16.mxu1 %v344_v2  ;;  %v246_v40 = vld [vmem:[%s469_s3 + $0x28] sm:$0xff] }
   0xb   :  { %307 = vmatpush3.bf16.msra.mxu0 %v344_v2  ;;  %336 = vmatpush3.bf16.msra.mxu1 %v344_v2 }
   0xc   :  { %308 = vmatprep.subr.bf16.mxu0 %v345_v3  ;;  %329 = vmatprep.subr.bf16.mxu1 %v345_v3 }
   0xf   :  { %309 = vmatpush3.bf16.msra.mxu0 %v345_v3  ;;  %337 = vmatpush3.bf16.msra.mxu1 %v345_v3 }
  0x10   :  { %310 = vmatprep.subr.bf16.mxu0 %v346_v6  ;;  %330 = vmatprep.subr.bf16.mxu1 %v346_v6 }
  0x13   :  { %311 = vmatpush3.bf16.msra.mxu0 %v346_v6  ;;  %338 = vmatpush3.bf16.msra.mxu1 %v346_v6 }
  0x14   :  { %312 = vmatprep.subr.bf16.mxu0 %v347_v7  ;;  %331 = vmatprep.subr.bf16.mxu1 %v347_v7 }
  0x17   :  { %313 = vmatpush3.bf16.msra.mxu0 %v347_v7  ;;  %339 = vmatpush3.bf16.msra.mxu1 %v347_v7 }
  0x18   :  { %314 = vmatprep.subr.bf16.mxu0 %v348_v8  ;;  %332 = vmatprep.subr.bf16.mxu1 %v348_v8 }
  0x1b   :  { %315 = vmatpush3.bf16.msra.mxu0 %v348_v8  ;;  %340 = vmatpush3.bf16.msra.mxu1 %v348_v8 }
  0x1c   :  { %316 = vmatprep.subr.bf16.mxu0 %v349_v9  ;;  %333 = vmatprep.subr.bf16.mxu1 %v349_v9 }
  0x1f   :  { %317 = vmatpush3.bf16.msra.mxu0 %v349_v9  ;;  %341 = vmatpush3.bf16.msra.mxu1 %v349_v9 }
  0x22   :  { %319 = vmatmul.mubr.bf16.vlgmr.msra.gmra.mxu0 %v352_v10  ;;  %323 = vmatmul.mubr.bf16.vlgmr.msra.gmra.mxu1 %v353_v11 }
  0xe2   :  { %v320_v13 = vpop.f32.mrf.mxu0  ;;  %v324_v15 = vpop.f32.mrf.mxu1 }
  0xe3   :  { %v235_v17 = vadd.f32 %v320_v13, %v289_v12  ;;  %v239_v18 = vadd.f32 %v324_v15, %v289_v12 }
  0xe4   :  { %v168_v19 = vpop.f32.mrf.mxu0  ;;  %v184_v21 = vpop.f32.mrf.mxu1 }
  0xe5   :  { %v251_v23 = vadd.f32 %v243_v14, %v235_v17  ;;  %v255_v24 = vadd.f32 %v247_v16, %v239_v18  ;;  %v233_v25 = vadd.f32 %v289_v12, %v168_v19  ;;  %v237_v26 = vadd.f32 %v289_v12, %v184_v21 }
  0xe6   :  { %v321_v27 = vpop.f32.mrf.mxu0  ;;  %v325_v28 = vpop.f32.mrf.mxu1 }
  0xe7   :  { %v259_v29 = vmul.f32 0.70710677, %v251_v23  ;;  %v263_v30 = vmul.f32 0.70710677, %v255_v24  ;;  %v249_v31 = vadd.f32 %v241_v20, %v233_v25  ;;  %v253_v32 = vadd.f32 %v245_v22, %v237_v26 }
  0xe8   :  { %v236_v35 = vadd.f32 %v321_v27, %v289_v12  ;;  %v240_v36 = vadd.f32 %v325_v28, %v289_v12  ;;  %v171_v37 = vpop.f32.mrf.mxu0  ;;  %v187_v39 = vpop.f32.mrf.mxu1 }
  0xe9   :  { %267 = vst [vmem:[%s470_s4 + $0x10] sm:$0xff] %v259_v29  ;;  %271 = vst [vmem:[%s470_s4 + $0x30] sm:$0xff] %v263_v30  ;;  %v257_v41 = vmul.f32 0.70710677, %v249_v31  ;;  %v261_v42 = vmul.f32 0.70710677, %v253_v32  ;;  %v234_v43 = vadd.f32 %v289_v12, %v171_v37  ;;  %v238_v44 = vadd.f32 %v289_v12, %v187_v39 }
  0xea   :  { %v252_v45 = vadd.f32 %v244_v33, %v236_v35  ;;  %v256_v46 = vadd.f32 %v248_v34, %v240_v36 }
  0xeb   :  { %265 = vst [vmem:[%s470_s4] sm:$0xff] %v257_v41  ;;  %269 = vst [vmem:[%s470_s4 + $0x20] sm:$0xff] %v261_v42  ;;  %v250_v47 = vadd.f32 %v242_v38, %v234_v43  ;;  %v254_v48 = vadd.f32 %v246_v40, %v238_v44 }
  0xec   :  { %v260_v49 = vmul.f32 0.70710677, %v252_v45  ;;  %v264_v50 = vmul.f32 0.70710677, %v256_v46 }
  0xed   :  { %v258_v51 = vmul.f32 0.70710677, %v250_v47  ;;  %v262_v52 = vmul.f32 0.70710677, %v254_v48 }
  0xee   :  { %268 = vst [vmem:[%s470_s4 + $0x18] sm:$0xff] %v260_v49  ;;  %272 = vst [vmem:[%s470_s4 + $0x38] sm:$0xff] %v264_v50 }
  0xef   :  { %266 = vst [vmem:[%s470_s4 + $0x8] sm:$0xff] %v258_v51  ;;  %270 = vst [vmem:[%s470_s4 + $0x28] sm:$0xff] %v262_v52 }

// kernel: discriminator_forward.22
= control target key start
LH: loop header
LB: loop body
LE: loop exit
PB: predicated region body
PF: predicated region fallthrough
CT: control target
= control target key end

     0   :  { %s841_s1 = inlined_call_operand.vmem [shape: bf16[384,128], index: 1, kind: input, shape index: {}]   ;;  %s842_s0 = inlined_call_operand.vmem [shape: bf16[64,384], index: 0, kind: input, shape index: {}]   ;;  %s843_s2 = inlined_call_operand.vmem [shape: f32[1,128], index: 2, kind: input, shape index: {}]   ;;  %s844_s3 = inlined_call_operand.vmem [shape: f32[64,128], index: 3, kind: output, shape index: {}]  }
   0x1   :  { %v636_v0 = vld [vmem:[%s841_s1 + $0x78] sm:$0xff]   ;;  %v639_v3 = vld [vmem:[%s841_s1 + $0x70] sm:$0xff]   ;;  %v642_v6 = vld [vmem:[%s841_s1 + $0x68] sm:$0xff]  }
   0x2   :  { %v637_v1 = vld [vmem:[%s841_s1 + $0x38] sm:$0xff]   ;;  %560 = vmatprep.subr.bf16.mxu0 %v636_v0  ;;  %v640_v4 = vld [vmem:[%s841_s1 + $0x30] sm:$0xff]   ;;  %v643_v7 = vld [vmem:[%s841_s1 + $0x28] sm:$0xff]  }
   0x3   :  { %v638_v2 = vld [vmem:[%s841_s1 + $0xb8] sm:$0xff]   ;;  %561 = vmatpush3.bf16.msra.mxu0 %v637_v1  ;;  %v641_v5 = vld [vmem:[%s841_s1 + $0xb0] sm:$0xff]   ;;  %v644_v8 = vld [vmem:[%s841_s1 + $0xa8] sm:$0xff]  }
   0x4   :  { %612 = vmatprep.subr.bf16.mxu1 %v638_v2  ;;  %562 = vmatprep.subr.bf16.mxu0 %v639_v3  ;;  %v645_v9 = vld [vmem:[%s841_s1 + $0x60] sm:$0xff]   ;;  %v648_v12 = vld [vmem:[%s841_s1 + $0x58] sm:$0xff]   ;;  %v651_v15 = vld [vmem:[%s841_s1 + $0x50] sm:$0xff]  }
   0x5   :  { %613 = vmatpush3.bf16.msra.mxu1 %v638_v2  ;;  %v646_v10 = vld [vmem:[%s841_s1 + $0x20] sm:$0xff]   ;;  %v650_v13 = vld [vmem:[%s841_s1 + $0x98] sm:$0xff]   ;;  %v653_v16 = vld [vmem:[%s841_s1 + $0x90] sm:$0xff]  }
   0x6   :  { %614 = vmatprep.subr.bf16.mxu1 %v641_v5  ;;  %v647_v11 = vld [vmem:[%s841_s1 + $0xa0] sm:$0xff]   ;;  %v649_v14 = vld [vmem:[%s841_s1 + $0x18] sm:$0xff]   ;;  %v652_v17 = vld [vmem:[%s841_s1 + $0x10] sm:$0xff]  }
   0x7   :  { %563 = vmatpush3.bf16.msra.mxu0 %v640_v4  ;;  %v654_v18 = vld [vmem:[%s841_s1 + $0x48] sm:$0xff]   ;;  %v657_v21 = vld [vmem:[%s841_s1 + $0x40] sm:$0xff]   ;;  %v672_v32 = vld [vmem:[%s842_s0 + $0x50] ss:$12 sps:$4 sm:$0xff]  }
   0x8   :  { %564 = vmatprep.subr.bf16.mxu0 %v642_v6  ;;  %v655_v19 = vld [vmem:[%s841_s1 + $0x8] sm:$0xff]   ;;  %v659_v22 = vld [vmem:[%s841_s1 + $0x80] sm:$0xff]   ;;  %v670_v33 = vld [vmem:[%s842_s0 + $0x30] ss:$12 sps:$4 sm:$0xff]  }
   0x9   :  { %615 = vmatpush3.bf16.msra.mxu1 %v641_v5  ;;  %v656_v20 = vld [vmem:[%s841_s1 + $0x88] sm:$0xff]   ;;  %v662_v23 = vld [vmem:[%s842_s0 + $0x4] ss:$12 sps:$4 sm:$0xff]   ;;  %v668_v31 = vld [vmem:[%s842_s0 + $0x34] ss:$12 sps:$4 sm:$0xff]  }
   0xa   :  { %616 = vmatprep.subr.bf16.mxu1 %v644_v8  ;;  %v663_v24 = vld [vmem:[%s842_s0 + $0x8] ss:$12 sps:$4 sm:$0xff]   ;;  %v658_v25 = vld [vmem:[%s841_s1] sm:$0xff]   ;;  %339 = vmatprep.mubr.bf16.mxu0 %v662_v23  ;;  %v673_v34 = vld [vmem:[%s842_s0 + $0x4c] ss:$12 sps:$4 sm:$0xff]  }
   0xb   :  { %565 = vmatpush3.bf16.msra.mxu0 %v643_v7  ;;  %628 = vmatprep.mubr.bf16.mxu1 %v663_v24  ;;  %v660_v26 = vld [vmem:[%s842_s0] ss:$12 sps:$4 sm:$0xff]   ;;  %v665_v27 = vld [vmem:[%s842_s0 + $0x1c] ss:$12 sps:$4 sm:$0xff]   ;;  %v671_v29 = vld [vmem:[%s842_s0 + $0x38] ss:$12 sps:$4 sm:$0xff]  }
   0xc   :  { %566 = vmatprep.subr.bf16.mxu0 %v645_v9  ;;  %v664_v28 = vld [vmem:[%s842_s0 + $0x20] ss:$12 sps:$4 sm:$0xff]   ;;  %v667_v30 = vld [vmem:[%s842_s0 + $0x18] ss:$12 sps:$4 sm:$0xff]   ;;  %v675_v35 = vld [vmem:[%s842_s0 + $0x48] ss:$12 sps:$4 sm:$0xff]  }
   0xd   :  { %617 = vmatpush3.bf16.msra.mxu1 %v644_v8  ;;  %v807_v42 = vld [vmem:[%s843_s2] ss:$0 sm:$0xff] }
   0xe   :  { %618 = vmatprep.subr.bf16.mxu1 %v647_v11 }
   0xf   :  { %567 = vmatpush3.bf16.msra.mxu0 %v646_v10 }
  0x10   :  { %568 = vmatprep.subr.bf16.mxu0 %v648_v12 }
  0x11   :  { %619 = vmatpush3.bf16.msra.mxu1 %v647_v11 }
  0x12   :  { %620 = vmatprep.subr.bf16.mxu1 %v650_v13 }
  0x13   :  { %569 = vmatpush3.bf16.msra.mxu0 %v649_v14 }
  0x14   :  { %570 = vmatprep.subr.bf16.mxu0 %v651_v15 }
  0x15   :  { %621 = vmatpush3.bf16.msra.mxu1 %v650_v13 }
  0x16   :  { %622 = vmatprep.subr.bf16.mxu1 %v653_v16 }
  0x17   :  { %571 = vmatpush3.bf16.msra.mxu0 %v652_v17 }
  0x18   :  { %572 = vmatprep.subr.bf16.mxu0 %v654_v18 }
  0x19   :  { %623 = vmatpush3.bf16.msra.mxu1 %v653_v16 }
  0x1a   :  { %624 = vmatprep.subr.bf16.mxu1 %v656_v20 }
  0x1b   :  { %573 = vmatpush3.bf16.msra.mxu0 %v655_v19 }
  0x1c   :  { %574 = vmatprep.subr.bf16.mxu0 %v657_v21 }
  0x1d   :  { %625 = vmatpush3.bf16.msra.mxu1 %v656_v20 }
  0x1e   :  { %626 = vmatprep.subr.bf16.mxu1 %v659_v22 }
  0x1f   :  { %575 = vmatpush3.bf16.msra.mxu0 %v658_v25 }
  0x21   :  { %627 = vmatpush3.bf16.msra.mxu1 %v659_v22 }
  0x22   :  { %340 = vmatmul.mubr.bf16.vlgmr.msra.gmra.mxu0 %v660_v26 }
  0x23   :  { %347 = vmatprep.mubr.bf16.mxu0 %v665_v27 }
  0x24   :  { %629 = vmatmul.mubr.bf16.vlgmr.msra.gmra.mxu1 %v664_v28 }
  0x25   :  { %632 = vmatprep.mubr.bf16.mxu1 %v671_v29 }
  0x2a   :  { %348 = vmatmul.mubr.bf16.gmra.mxu0 %v667_v30 }
  0x2b   :  { %355 = vmatprep.mubr.bf16.mxu0 %v668_v31 }
  0x2c   :  { %633 = vmatmul.mubr.bf16.gmra.mxu1 %v672_v32 }
  0x32   :  { %356 = vmatmul.mubr.bf16.gmra.mxu0 %v670_v33 }
  0x33   :  { %363 = vmatprep.mubr.bf16.mxu0 %v673_v34 }
  0x3a   :  { %364 = vmatmul.mubr.bf16.gmra.mxu0 %v675_v35 }
  0xe2   :  { %v576_v36 = vpop.f32.mrf.mxu0 }
  0xe4   :  { %v577_v37 = vpop.f32.mrf.mxu0  ;;  %v630_v38 = vpop.f32.mrf.mxu1 }
  0xe5   :  { %v578_v39 = vadd.f32 %v577_v37, %v576_v36 }
  0xe6   :  { %v579_v40 = vpop.f32.mrf.mxu0  ;;  %v406_v41 = vpop.f32.mrf.mxu1 }
  0xe7   :  { %v407_v43 = vadd.f32 %v578_v39, %v406_v41 }
  0xe8   :  { %v580_v44 = vpop.f32.mrf.mxu0  ;;  %v631_v45 = vpop.f32.mrf.mxu1 }
  0xe9   :  { %v471_v46 = vadd.f32 %v807_v42, %v407_v43  ;;  %v581_v47 = vadd.f32 %v580_v44, %v579_v40 }
  0xea   :  { %v582_v48 = vpop.f32.mrf.mxu0  ;;  %v409_v49 = vpop.f32.mrf.mxu1 }
  0xeb   :  { %vm479_vm0 = vcmp.ge.f32.partialorder %v471_v46, 0.0  ;;  %v487_v50 = vmul.f32 0.2, %v471_v46  ;;  %v410_v51 = vadd.f32 %v581_v47, %v409_v49 }
  0xec   :  { %v583_v52 = vpop.f32.mrf.mxu0  ;;  %v634_v53 = vpop.f32.mrf.mxu1 }
  0xed   :  { %v495_v54 = vsel %vm479_vm0, %v471_v46, %v487_v50  ;;  %v472_v55 = vadd.f32 %v807_v42, %v410_v51  ;;  %v584_v56 = vadd.f32 %v583_v52, %v582_v48 }
  0xee   :  { %v503_v57 = vmul.f32 1.4142135, %v495_v54  ;;  %v585_v58 = vpop.f32.mrf.mxu0  ;;  %v422_v62 = vpop.f32.mrf.mxu1 }
  0xef   :  { %vm480_vm1 = vcmp.ge.f32.partialorder %v472_v55, 0.0  ;;  %v488_v59 = vmul.f32 0.2, %v472_v55  ;;  %v415_v60 = vadd.f32 %v630_v38, %v584_v56 }
  0xf0   :  { %511 = vst [vmem:[%s844_s3] sm:$0xff] %v503_v57  ;;  %v586_v61 = vpop.f32.mrf.mxu0  ;;  %v635_v7 = vpop.f32.mrf.mxu1 }
  0xf1   :  { %v496_v63 = vsel %vm480_vm1, %v472_v55, %v488_v59  ;;  %v473_v0 = vadd.f32 %v807_v42, %v415_v60  ;;  %v587_v1 = vadd.f32 %v586_v61, %v585_v58 }
  0xf2   :  { %v504_v2 = vmul.f32 1.4142135, %v496_v63  ;;  %v588_v3 = vpop.f32.mrf.mxu0  ;;  %v425_v16 = vpop.f32.mrf.mxu1 }
  0xf3   :  { %vm481_vm2 = vcmp.ge.f32.partialorder %v473_v0, 0.0  ;;  %v489_v4 = vmul.f32 0.2, %v473_v0  ;;  %v418_v5 = vadd.f32 %v631_v45, %v587_v1 }
  0xf4   :  { %512 = vst [vmem:[%s844_s3 + $0x8] sm:$0xff] %v504_v2  ;;  %v589_v6 = vpop.f32.mrf.mxu0 }
  0xf5   :  { %v497_v8 = vsel %vm481_vm2, %v473_v0, %v489_v4  ;;  %v474_v9 = vadd.f32 %v807_v42, %v418_v5  ;;  %v590_v10 = vadd.f32 %v589_v6, %v588_v3 }
  0xf6   :  { %v505_v11 = vmul.f32 1.4142135, %v497_v8  ;;  %v591_v12 = vpop.f32.mrf.mxu0 }
  0xf7   :  { %vm482_vm3 = vcmp.ge.f32.partialorder %v474_v9, 0.0  ;;  %v490_v13 = vmul.f32 0.2, %v474_v9  ;;  %v423_v14 = vadd.f32 %v590_v10, %v422_v62 }
  0xf8   :  { %513 = vst [vmem:[%s844_s3 + $0x10] sm:$0xff] %v505_v11  ;;  %v592_v15 = vpop.f32.mrf.mxu0 }
  0xf9   :  { %v498_v17 = vsel %vm482_vm3, %v474_v9, %v490_v13  ;;  %v475_v18 = vadd.f32 %v807_v42, %v423_v14  ;;  %v593_v19 = vadd.f32 %v592_v15, %v591_v12 }
  0xfa   :  { %v506_v20 = vmul.f32 1.4142135, %v498_v17  ;;  %v594_v21 = vpop.f32.mrf.mxu0 }
  0xfb   :  { %vm483_vm4 = vcmp.ge.f32.partialorder %v475_v18, 0.0  ;;  %v491_v22 = vmul.f32 0.2, %v475_v18  ;;  %v426_v23 = vadd.f32 %v593_v19, %v425_v16 }
  0xfc   :  { %514 = vst [vmem:[%s844_s3 + $0x18] sm:$0xff] %v506_v20  ;;  %v595_v24 = vpop.f32.mrf.mxu0 }
  0xfd   :  { %v499_v25 = vsel %vm483_vm4, %v475_v18, %v491_v22  ;;  %v476_v26 = vadd.f32 %v807_v42, %v426_v23  ;;  %v596_v27 = vadd.f32 %v595_v24, %v594_v21 }
  0xfe   :  { %v507_v28 = vmul.f32 1.4142135, %v499_v25  ;;  %v597_v29 = vpop.f32.mrf.mxu0 }
  0xff   :  { %vm484_vm5 = vcmp.ge.f32.partialorder %v476_v26, 0.0  ;;  %v492_v30 = vmul.f32 0.2, %v476_v26  ;;  %v431_v31 = vadd.f32 %v634_v53, %v596_v27 }
 0x100   :  { %515 = vst [vmem:[%s844_s3 + $0x20] sm:$0xff] %v507_v28  ;;  %v598_v32 = vpop.f32.mrf.mxu0 }
 0x101   :  { %v500_v33 = vsel %vm484_vm5, %v476_v26, %v492_v30  ;;  %v477_v34 = vadd.f32 %v807_v42, %v431_v31  ;;  %v599_v35 = vadd.f32 %v598_v32, %v597_v29 }
 0x102   :  { %v508_v36 = vmul.f32 1.4142135, %v500_v33 }
 0x103   :  { %vm485_vm6 = vcmp.ge.f32.partialorder %v477_v34, 0.0  ;;  %v493_v37 = vmul.f32 0.2, %v477_v34  ;;  %v434_v38 = vadd.f32 %v635_v7, %v599_v35 }
 0x104   :  { %516 = vst [vmem:[%s844_s3 + $0x28] sm:$0xff] %v508_v36 }
 0x105   :  { %v501_v39 = vsel %vm485_vm6, %v477_v34, %v493_v37  ;;  %v478_v40 = vadd.f32 %v807_v42, %v434_v38 }
 0x106   :  { %v509_v41 = vmul.f32 1.4142135, %v501_v39 }
 0x107   :  { %vm486_vm7 = vcmp.ge.f32.partialorder %v478_v40, 0.0  ;;  %v494_v43 = vmul.f32 0.2, %v478_v40 }
 0x108   :  { %517 = vst [vmem:[%s844_s3 + $0x30] sm:$0xff] %v509_v41 }
 0x109   :  { %v502_v44 = vsel %vm486_vm7, %v478_v40, %v494_v43 }
 0x10a   :  { %v510_v45 = vmul.f32 1.4142135, %v502_v44 }
 0x10c   :  { %518 = vst [vmem:[%s844_s3 + $0x38] sm:$0xff] %v510_v45 }

// kernel: discriminator_forward.27
= control target key start
LH: loop header
LB: loop body
LE: loop exit
PB: predicated region body
PF: predicated region fallthrough
CT: control target
= control target key end

     0   :  { %v210_v0 = vmov 0.0   ;;  %vm211_vm0 = vmmov 0   ;;  %s268_s1 = inlined_call_operand.vmem [shape: bf16[128,128], index: 1, kind: input, shape index: {}]   ;;  %s269_s0 = inlined_call_operand.vmem [shape: bf16[16,128], index: 0, kind: input, shape index: {}]   ;;  %s270_s2 = inlined_call_operand.vmem [shape: f32[1,128], index: 2, kind: input, shape index: {}]   ;;  %s271_s3 = inlined_call_operand.vmem [shape: f32[16,128], index: 3, kind: output, shape index: {}]  }
   0x1   :  { %179 = vmatprep.subr.bf16.mxu0 %v210_v0  ;;  %v201_v1 = vld [vmem:[%s268_s1 + $0x38] sm:$0xff]   ;;  %195 = vmatprep.mubr.msk.bf16.mxu0 %vm211_vm0, %v210_v0  ;;  %v202_v2 = vld [vmem:[%s268_s1 + $0x30] sm:$0xff]   ;;  %v203_v3 = vld [vmem:[%s268_s1 + $0x28] sm:$0xff]  }
   0x2   :  { %180 = vmatpush3.bf16.msra.mxu0 %v201_v1  ;;  %v204_v4 = vld [vmem:[%s268_s1 + $0x20] sm:$0xff]   ;;  %v205_v5 = vld [vmem:[%s268_s1 + $0x18] sm:$0xff]   ;;  %v206_v6 = vld [vmem:[%s268_s1 + $0x10] sm:$0xff]  }
   0x3   :  { %181 = vmatprep.subr.bf16.mxu0 %v210_v0  ;;  %v207_v7 = vld [vmem:[%s268_s1 + $0x8] sm:$0xff]   ;;  %v208_v8 = vld [vmem:[%s268_s1] sm:$0xff]  }
   0x4   :  { %v209_v9 = vld [vmem:[%s269_s0] sm:$0xff]  }
   0x5   :  { %v169_v10 = vld [vmem:[%s270_s2] ss:$0 sm:$0xff] }
   0x6   :  { %182 = vmatpush3.bf16.msra.mxu0 %v202_v2 }
   0x7   :  { %183 = vmatprep.subr.bf16.mxu0 %v210_v0 }
   0xa   :  { %184 = vmatpush3.bf16.msra.mxu0 %v203_v3 }
   0xb   :  { %185 = vmatprep.subr.bf16.mxu0 %v210_v0 }
   0xe   :  { %186 = vmatpush3.bf16.msra.mxu0 %v204_v4 }
   0xf   :  { %187 = vmatprep.subr.bf16.mxu0 %v210_v0 }
  0x12   :  { %188 = vmatpush3.bf16.msra.mxu0 %v205_v5 }
  0x13   :  { %189 = vmatprep.subr.bf16.mxu0 %v210_v0 }
  0x16   :  { %190 = vmatpush3.bf16.msra.mxu0 %v206_v6 }
  0x17   :  { %191 = vmatprep.subr.bf16.mxu0 %v210_v0 }
  0x1a   :  { %192 = vmatpush3.bf16.msra.mxu0 %v207_v7 }
  0x1b   :  { %193 = vmatprep.subr.bf16.mxu0 %v210_v0 }
  0x1e   :  { %194 = vmatpush3.bf16.msra.mxu0 %v208_v8 }
  0x21   :  { %196 = vmatmul.mubr.bf16.vlgmr.msra.gmra.mxu0 %v209_v9 }
  0xe1   :  { %v129_v11 = vpop.f32.mrf.mxu0 }
  0xe2   :  { %v152_v12 = vadd.f32 %v169_v10, %v129_v11 }
  0xe3   :  { %v197_v13 = vpop.f32.mrf.mxu0 }
  0xe4   :  { %154 = vst [vmem:[%s271_s3] sm:$0xff] %v152_v12 }
  0xe5   :  { %v132_v14 = vpop.f32.mrf.mxu0 }
  0xe6   :  { %v153_v15 = vadd.f32 %v169_v10, %v132_v14 }
  0xe7   :  { %v198_v16 = vpop.f32.mrf.mxu0 }
  0xe8   :  { %155 = vst [vmem:[%s271_s3 + $0x8] sm:$0xff] %v153_v15 }

// kernel: discriminator_forward.26
= control target key start
LH: loop header
LB: loop body
LE: loop exit
PB: predicated region body
PF: predicated region fallthrough
CT: control target
= control target key end

     0   :  { %s673_s1 = inlined_call_operand.vmem [shape: bf16[512,128], index: 1, kind: input, shape index: {}]   ;;  %s674_s0 = inlined_call_operand.vmem [shape: bf16[16,512], index: 0, kind: input, shape index: {}]   ;;  %s675_s2 = inlined_call_operand.vmem [shape: f32[1,128], index: 2, kind: input, shape index: {}]   ;;  %s676_s3 = inlined_call_operand.vmem [shape: f32[16,128], index: 3, kind: output, shape index: {}]  }
   0x1   :  { %v498_v0 = vld [vmem:[%s673_s1 + $0x78] sm:$0xff]   ;;  %v502_v4 = vld [vmem:[%s673_s1 + $0x70] sm:$0xff]   ;;  %v506_v8 = vld [vmem:[%s673_s1 + $0x68] sm:$0xff]  }
   0x2   :  { %v499_v1 = vld [vmem:[%s673_s1 + $0xf8] sm:$0xff]   ;;  %454 = vmatprep.subr.bf16.mxu0 %v498_v0  ;;  %v503_v5 = vld [vmem:[%s673_s1 + $0xf0] sm:$0xff]   ;;  %v507_v9 = vld [vmem:[%s673_s1 + $0xe8] sm:$0xff]  }
   0x3   :  { %v500_v2 = vld [vmem:[%s673_s1 + $0x38] sm:$0xff]   ;;  %476 = vmatprep.subr.bf16.mxu1 %v499_v1  ;;  %v504_v6 = vld [vmem:[%s673_s1 + $0x30] sm:$0xff]   ;;  %v508_v10 = vld [vmem:[%s673_s1 + $0x28] sm:$0xff]  }
   0x4   :  { %v501_v3 = vld [vmem:[%s673_s1 + $0xb8] sm:$0xff]   ;;  %455 = vmatpush3.bf16.msra.mxu0 %v500_v2  ;;  %v505_v7 = vld [vmem:[%s673_s1 + $0xb0] sm:$0xff]   ;;  %v509_v11 = vld [vmem:[%s673_s1 + $0xa8] sm:$0xff]  }
   0x5   :  { %477 = vmatpush3.bf16.msra.mxu1 %v501_v3  ;;  %456 = vmatprep.subr.bf16.mxu0 %v502_v4  ;;  %v510_v12 = vld [vmem:[%s673_s1 + $0x60] sm:$0xff]   ;;  %v514_v16 = vld [vmem:[%s673_s1 + $0x58] sm:$0xff]   ;;  %v518_v20 = vld [vmem:[%s673_s1 + $0x50] sm:$0xff]  }
   0x6   :  { %478 = vmatprep.subr.bf16.mxu1 %v503_v5  ;;  %v511_v13 = vld [vmem:[%s673_s1 + $0xe0] sm:$0xff]   ;;  %v515_v17 = vld [vmem:[%s673_s1 + $0xd8] sm:$0xff]   ;;  %v519_v21 = vld [vmem:[%s673_s1 + $0xd0] sm:$0xff]  }
   0x7   :  { %v512_v14 = vld [vmem:[%s673_s1 + $0x20] sm:$0xff]   ;;  %v516_v18 = vld [vmem:[%s673_s1 + $0x18] sm:$0xff]   ;;  %v520_v22 = vld [vmem:[%s673_s1 + $0x10] sm:$0xff]  }
   0x8   :  { %457 = vmatpush3.bf16.msra.mxu0 %v504_v6  ;;  %v513_v15 = vld [vmem:[%s673_s1 + $0xa0] sm:$0xff]   ;;  %v517_v19 = vld [vmem:[%s673_s1 + $0x98] sm:$0xff]   ;;  %v521_v23 = vld [vmem:[%s673_s1 + $0x90] sm:$0xff]  }
   0x9   :  { %479 = vmatpush3.bf16.msra.mxu1 %v505_v7  ;;  %458 = vmatprep.subr.bf16.mxu0 %v506_v8  ;;  %v522_v24 = vld [vmem:[%s673_s1 + $0x48] sm:$0xff]   ;;  %v526_v28 = vld [vmem:[%s673_s1 + $0x40] sm:$0xff]  }
   0xa   :  { %480 = vmatprep.subr.bf16.mxu1 %v507_v9  ;;  %v523_v25 = vld [vmem:[%s673_s1 + $0xc8] sm:$0xff]   ;;  %v527_v29 = vld [vmem:[%s673_s1 + $0xc0] sm:$0xff]  }
   0xb   :  { %v524_v26 = vld [vmem:[%s673_s1 + $0x8] sm:$0xff]   ;;  %v528_v30 = vld [vmem:[%s673_s1] sm:$0xff]  }
   0xc   :  { %459 = vmatpush3.bf16.msra.mxu0 %v508_v10  ;;  %v525_v27 = vld [vmem:[%s673_s1 + $0x88] sm:$0xff]   ;;  %v529_v31 = vld [vmem:[%s673_s1 + $0x80] sm:$0xff]  }
   0xd   :  { %481 = vmatpush3.bf16.msra.mxu1 %v509_v11  ;;  %460 = vmatprep.subr.bf16.mxu0 %v510_v12  ;;  %v530_v32 = vld [vmem:[%s674_s0] ss:$16 sps:$4 sm:$0xff]   ;;  %v532_v33 = vld [vmem:[%s674_s0 + $0x4] ss:$16 sps:$4 sm:$0xff]   ;;  %v533_v34 = vld [vmem:[%s674_s0 + $0x8] ss:$16 sps:$4 sm:$0xff]  }
   0xe   :  { %482 = vmatprep.subr.bf16.mxu1 %v511_v13  ;;  %v535_v35 = vld [vmem:[%s674_s0 + $0xc] ss:$16 sps:$4 sm:$0xff]   ;;  %335 = vmatprep.mubr.bf16.mxu0 %v532_v33  ;;  %v453_v43 = vld [vmem:[%s675_s2] ss:$0 sm:$0xff] }
   0xf   :  { %376 = vmatprep.mubr.bf16.mxu1 %v535_v35 }
  0x10   :  { %461 = vmatpush3.bf16.msra.mxu0 %v512_v14 }
  0x11   :  { %483 = vmatpush3.bf16.msra.mxu1 %v513_v15  ;;  %462 = vmatprep.subr.bf16.mxu0 %v514_v16 }
  0x12   :  { %484 = vmatprep.subr.bf16.mxu1 %v515_v17 }
  0x14   :  { %463 = vmatpush3.bf16.msra.mxu0 %v516_v18 }
  0x15   :  { %485 = vmatpush3.bf16.msra.mxu1 %v517_v19  ;;  %464 = vmatprep.subr.bf16.mxu0 %v518_v20 }
  0x16   :  { %486 = vmatprep.subr.bf16.mxu1 %v519_v21 }
  0x18   :  { %465 = vmatpush3.bf16.msra.mxu0 %v520_v22 }
  0x19   :  { %487 = vmatpush3.bf16.msra.mxu1 %v521_v23  ;;  %466 = vmatprep.subr.bf16.mxu0 %v522_v24 }
  0x1a   :  { %488 = vmatprep.subr.bf16.mxu1 %v523_v25 }
  0x1c   :  { %467 = vmatpush3.bf16.msra.mxu0 %v524_v26 }
  0x1d   :  { %489 = vmatpush3.bf16.msra.mxu1 %v525_v27  ;;  %468 = vmatprep.subr.bf16.mxu0 %v526_v28 }
  0x1e   :  { %490 = vmatprep.subr.bf16.mxu1 %v527_v29 }
  0x20   :  { %469 = vmatpush3.bf16.msra.mxu0 %v528_v30 }
  0x21   :  { %491 = vmatpush3.bf16.msra.mxu1 %v529_v31 }
  0x23   :  { %336 = vmatmul.mubr.bf16.vlgmr.msra.gmra.mxu0 %v530_v32 }
  0x24   :  { %377 = vmatmul.mubr.bf16.vlgmr.msra.gmra.mxu1 %v533_v34 }
  0xe3   :  { %v470_v36 = vpop.f32.mrf.mxu0 }
  0xe4   :  { %v492_v37 = vpop.f32.mrf.mxu1 }
  0xe5   :  { %v471_v38 = vpop.f32.mrf.mxu0 }
  0xe6   :  { %v472_v39 = vadd.f32 %v471_v38, %v470_v36  ;;  %v493_v40 = vpop.f32.mrf.mxu1 }
  0xe7   :  { %v494_v41 = vadd.f32 %v493_v40, %v492_v37  ;;  %v473_v42 = vpop.f32.mrf.mxu0 }
  0xe8   :  { %v495_v44 = vpop.f32.mrf.mxu1 }
  0xe9   :  { %v379_v45 = vadd.f32 %v494_v41, %v472_v39  ;;  %v474_v46 = vpop.f32.mrf.mxu0 }
  0xea   :  { %v475_v47 = vadd.f32 %v474_v46, %v473_v42  ;;  %v496_v48 = vpop.f32.mrf.mxu1 }
  0xeb   :  { %v401_v49 = vadd.f32 %v453_v43, %v379_v45  ;;  %v497_v50 = vadd.f32 %v496_v48, %v495_v44 }
  0xed   :  { %vm403_vm0 = vcmp.ge.f32.partialorder %v401_v49, 0.0  ;;  %v405_v51 = vmul.f32 0.2, %v401_v49  ;;  %v382_v52 = vadd.f32 %v497_v50, %v475_v47 }
  0xef   :  { %v407_v53 = vsel %vm403_vm0, %v401_v49, %v405_v51  ;;  %v402_v54 = vadd.f32 %v453_v43, %v382_v52 }
  0xf0   :  { %v409_v55 = vmul.f32 1.4142135, %v407_v53 }
  0xf1   :  { %vm404_vm1 = vcmp.ge.f32.partialorder %v402_v54, 0.0  ;;  %v406_v56 = vmul.f32 0.2, %v402_v54 }
  0xf2   :  { %411 = vst [vmem:[%s676_s3] sm:$0xff] %v409_v55 }
  0xf3   :  { %v408_v57 = vsel %vm404_vm1, %v402_v54, %v406_v56 }
  0xf4   :  { %v410_v58 = vmul.f32 1.4142135, %v408_v57 }
  0xf6   :  { %412 = vst [vmem:[%s676_s3 + $0x8] sm:$0xff] %v410_v58 }

</bundles_post_ra>
